<compile_context>
chip_gen: v5e
topology: v5e:2x2
jax: 0.10.0
libtpu: 0.0.40
codegen_flags: <defaults>
</compile_context>

<pallas_src>
import math
import functools

import jax
import jax.numpy as jnp
from jax.experimental import pallas as pl
from jax.experimental.pallas import tpu as pltpu

EPS = 1e-5
LANE = 128


def _round_up(x, m):
    return ((x + m - 1) // m) * m


# ----------------------------------------------------------------------------
# In-kernel helpers
# ----------------------------------------------------------------------------
def _mish(y):
    # mish(y) = y * tanh(softplus(y)) using a single exp + approx reciprocal:
    #   tanh(ln(1+e)) = ((1+e)^2 - 1) / ((1+e)^2 + 1)
    # exponent clamped: for y > 20, tanh(softplus(y)) == 1 to f32 precision,
    # and (1+e^20)^2 ~ 2.4e17 stays finite in f32 (fixes the old log(1+exp)
    # overflow fragility).
    e = jnp.exp(jnp.minimum(y, 20.0))
    n = (1.0 + e) * (1.0 + e)
    t = (n - 1.0) * pl.reciprocal(n + 1.0, approx=True)
    return y * t


# ----------------------------------------------------------------------------
# Pallas kernels
# ----------------------------------------------------------------------------
def _matmul_bn_act_kernel(a_ref, w_ref, scale_ref, shift_ref, o_ref, *, act):
    # acc = A @ W on the MXU (bf16 operands, f32 accumulate)
    acc = jnp.dot(a_ref[...], w_ref[...], preferred_element_type=jnp.float32)
    # fused conv-bias + BatchNorm (inference):  y = acc*scale + shift   (f32)
    y = acc * scale_ref[...] + shift_ref[...]
    if act == "mish":
        y = _mish(y)
    o_ref[...] = y.astype(o_ref.dtype)


def _matmul_bn_mish_pool_kernel(a_ref, w_ref, scale_ref, shift_ref, o_ref, *,
                                batch, spatial):
    # Final branch conv + (conv BN ∘ branch BN folded into scale/shift) + Mish
    # + global average pool over the spatial positions of each batch element.
    acc = jnp.dot(a_ref[...], w_ref[...], preferred_element_type=jnp.float32)
    y = _mish(acc * scale_ref[...] + shift_ref[...])
    for b in range(batch):                     # static, unrolled (batch is tiny)
        o_ref[b:b + 1, :] = jnp.mean(y[b * spatial:(b + 1) * spatial, :],
                                     axis=0, keepdims=True)


def _matmul_bias_kernel(a_ref, w_ref, bias_ref, o_ref):
    acc = jnp.dot(a_ref[...], w_ref[...], preferred_element_type=jnp.float32)
    o_ref[...] = acc + bias_ref[...]


# ----------------------------------------------------------------------------
# Kernel wrappers
# ----------------------------------------------------------------------------
def _pick_row_tile(M):
    if M <= 512:
        return M
    for cand in (512, 256, 128, 64, 32, 16, 8):
        if M % cand == 0:
            return cand
    return M


def matmul_bn_act(a, w, scale, shift, act="none", out_dtype=jnp.bfloat16):
    """out = act((a @ w) * scale + shift).

    a: (M, K), w: (K, N), scale/shift: (N,). N is zero-padded to a multiple of
    128 (lane-dense stores); result is sliced back to (M, N).
    """
    M, K = a.shape
    K2, N = w.shape
    assert K == K2
    Np = _round_up(N, LANE)
    if Np != N:
        w = jnp.pad(w, ((0, 0), (0, Np - N)))
        scale = jnp.pad(scale, (0, Np - N))
        shift = jnp.pad(shift, (0, Np - N))

    tm = _pick_row_tile(M)
    grid = (M // tm,)
    kernel = functools.partial(_matmul_bn_act_kernel, act=act)
    cost = pl.CostEstimate(
        flops=2 * M * K * Np,
        transcendentals=(2 * M * Np) if act == "mish" else 0,
        bytes_accessed=M * K * 2 + K * Np * 2 + 2 * Np * 4
        + M * Np * jnp.dtype(out_dtype).itemsize,
    )
    out = pl.pallas_call(
        kernel,
        out_shape=jax.ShapeDtypeStruct((M, Np), out_dtype),
        grid=grid,
        in_specs=[
            pl.BlockSpec((tm, K), lambda i: (i, 0)),
            pl.BlockSpec((K, Np), lambda i: (0, 0)),
            pl.BlockSpec((1, Np), lambda i: (0, 0)),
            pl.BlockSpec((1, Np), lambda i: (0, 0)),
        ],
        out_specs=pl.BlockSpec((tm, Np), lambda i: (i, 0)),
        compiler_params=pltpu.CompilerParams(dimension_semantics=("parallel",)),
        cost_estimate=cost,
    )(
        a.astype(jnp.bfloat16),
        w.astype(jnp.bfloat16),
        scale.reshape(1, Np).astype(jnp.float32),
        shift.reshape(1, Np).astype(jnp.float32),
    )
    return out[:, :N]


def linear_bias(a, w_t, bias):
    """out = a @ w_t.T + bias.  a: (M, K) f32, w_t: (N, K) torch layout."""
    M, K = a.shape
    N = w_t.shape[0]
    Np = _round_up(N, LANE)
    wm = w_t.T
    if Np != N:
        wm = jnp.pad(wm, ((0, 0), (0, Np - N)))
        bias = jnp.pad(bias, (0, Np - N))
    out = pl.pallas_call(
        _matmul_bias_kernel,
        out_shape=jax.ShapeDtypeStruct((M, Np), jnp.float32),
        grid=(1,),
        in_specs=[
            pl.BlockSpec((M, K), lambda i: (0, 0)),
            pl.BlockSpec((K, Np), lambda i: (0, 0)),
            pl.BlockSpec((1, Np), lambda i: (0, 0)),
        ],
        out_specs=pl.BlockSpec((M, Np), lambda i: (0, 0)),
        compiler_params=pltpu.CompilerParams(dimension_semantics=("arbitrary",)),
    )(a.astype(jnp.float32), wm.astype(jnp.float32),
      bias.reshape(1, Np).astype(jnp.float32))
    return out[:, :N]


# ----------------------------------------------------------------------------
# Conv3d helpers (channels-last)
# ----------------------------------------------------------------------------
def _gather_patches_cl(x, ksize, padding):
    """x: (B, D, H, W, C) channels-last -> (B*Do*Ho*Wo, kd*kh*kw*C).

    Feature order is (kd, kh, kw, C): taps concatenated along the lane axis.
    """
    kd, kh, kw = ksize
    pd, ph, pw = padding
    xp = jnp.pad(x, ((0, 0), (pd, pd), (ph, ph), (pw, pw), (0, 0)))
    B, Dp, Hp, Wp, C = xp.shape
    Do, Ho, Wo = Dp - kd + 1, Hp - kh + 1, Wp - kw + 1
    taps = []
    for i in range(kd):
        for j in range(kh):
            for k in range(kw):
                taps.append(xp[:, i:i + Do, j:j + Ho, k:k + Wo, :])
    patches = taps[0] if len(taps) == 1 else jnp.concatenate(taps, axis=-1)
    patches = patches.reshape(B * Do * Ho * Wo, kd * kh * kw * C)
    return patches, (Do, Ho, Wo)


def _weight_matrix_cl(w):
    """w: (Cout, Cin, kd, kh, kw) -> (kd*kh*kw*Cin, Cout) (matches patch order)."""
    Cout = w.shape[0]
    return jnp.transpose(w, (2, 3, 4, 1, 0)).reshape(-1, Cout)


def conv3d_bn_act(x_cl, p, ksize, padding, act):
    """Conv3d(stride 1) + BatchNorm3d(inference) + optional Mish, channels-last."""
    B = x_cl.shape[0]
    patches, (Do, Ho, Wo) = _gather_patches_cl(x_cl, ksize, padding)
    Cout = p["w"].shape[0]
    wm = _weight_matrix_cl(p["w"])
    scale = p["gamma"] / jnp.sqrt(p["var"] + EPS)
    shift = p["beta"] + (p["b"] - p["mean"]) * scale
    out = matmul_bn_act(patches, wm, scale, shift, act=act)
    return out.reshape(B, Do, Ho, Wo, Cout)


def conv_bn_bn_mish_pool(x_cl, conv_p, bn_p, ksize):
    """Fused: final branch Conv3d + its BN + (identity attention) + branch BN +
    Mish + AdaptiveAvgPool3d(1).  Returns (B, Cout) f32."""
    B = x_cl.shape[0]
    patches, (Do, Ho, Wo) = _gather_patches_cl(x_cl, ksize, (0, 0, 0))
    S = Do * Ho * Wo
    M = B * S
    Cout = conv_p["w"].shape[0]
    wm = _weight_matrix_cl(conv_p["w"])
    K = wm.shape[0]
    # fold conv bias + conv BN + branch BN into one affine (scale, shift)
    s1 = conv_p["gamma"] / jnp.sqrt(conv_p["var"] + EPS)
    t1 = conv_p["beta"] + (conv_p["b"] - conv_p["mean"]) * s1
    s2 = bn_p["gamma"] / jnp.sqrt(bn_p["var"] + EPS)
    t2 = bn_p["beta"] - bn_p["mean"] * s2
    scale = s1 * s2
    shift = t1 * s2 + t2

    Np = _round_up(Cout, LANE)
    if Np != Cout:
        wm = jnp.pad(wm, ((0, 0), (0, Np - Cout)))
        scale = jnp.pad(scale, (0, Np - Cout))
        shift = jnp.pad(shift, (0, Np - Cout))

    kernel = functools.partial(_matmul_bn_mish_pool_kernel, batch=B, spatial=S)
    cost = pl.CostEstimate(
        flops=2 * M * K * Np,
        transcendentals=2 * M * Np,
        bytes_accessed=M * K * 2 + K * Np * 2 + 2 * Np * 4 + B * Np * 4,
    )
    out = pl.pallas_call(
        kernel,
        out_shape=jax.ShapeDtypeStruct((B, Np), jnp.float32),
        grid=(1,),
        in_specs=[
            pl.BlockSpec((M, K), lambda i: (0, 0)),
            pl.BlockSpec((K, Np), lambda i: (0, 0)),
            pl.BlockSpec((1, Np), lambda i: (0, 0)),
            pl.BlockSpec((1, Np), lambda i: (0, 0)),
        ],
        out_specs=pl.BlockSpec((B, Np), lambda i: (0, 0)),
        compiler_params=pltpu.CompilerParams(dimension_semantics=("arbitrary",)),
        cost_estimate=cost,
    )(patches.astype(jnp.bfloat16), wm.astype(jnp.bfloat16),
      scale.reshape(1, Np).astype(jnp.float32),
      shift.reshape(1, Np).astype(jnp.float32))
    return out[:, :Cout]


# ----------------------------------------------------------------------------
# Parameter initialization (deterministic, synthetic)
# ----------------------------------------------------------------------------
def make_conv_bn(key, cin, cout, ksize):
    kd, kh, kw = ksize
    k1, k2, k3, k4, k5, k6 = jax.random.split(key, 6)
    fan_in = cin * kd * kh * kw
    return dict(
        w=jax.random.normal(k1, (cout, cin, kd, kh, kw), jnp.float32) / math.sqrt(fan_in),
        b=0.01 * jax.random.normal(k2, (cout,), jnp.float32),
        gamma=1.0 + 0.1 * jax.random.normal(k3, (cout,), jnp.float32),
        beta=0.05 * jax.random.normal(k4, (cout,), jnp.float32),
        mean=0.05 * jax.random.normal(k5, (cout,), jnp.float32),
        var=1.0 + 0.1 * jnp.abs(jax.random.normal(k6, (cout,), jnp.float32)),
    )


def make_bn(key, c):
    k3, k4, k5, k6 = jax.random.split(key, 4)
    return dict(
        gamma=1.0 + 0.1 * jax.random.normal(k3, (c,), jnp.float32),
        beta=0.05 * jax.random.normal(k4, (c,), jnp.float32),
        mean=0.05 * jax.random.normal(k5, (c,), jnp.float32),
        var=1.0 + 0.1 * jnp.abs(jax.random.normal(k6, (c,), jnp.float32)),
    )


def init_params(key, band, classes):
    out_depth = int(math.ceil(band / 4))
    pad_d = int(math.ceil(band / 4) * 4)
    keys = jax.random.split(key, 20)
    P = {}
    P["conv_feature"] = make_conv_bn(keys[0], 1, 24, (1, 1, 7))
    P["stem_conv1"] = make_conv_bn(keys[1], pad_d // 4, out_depth, (3, 3, 1))
    P["stem_conv2"] = make_conv_bn(keys[2], 24, 24, (3, 3, 1))
    P["conv11"] = make_conv_bn(keys[3], 24, 12, (1, 1, 7))
    P["conv12"] = make_conv_bn(keys[4], 36, 12, (1, 1, 7))
    P["conv13"] = make_conv_bn(keys[5], 48, 12, (1, 1, 7))
    P["conv14"] = make_conv_bn(keys[6], 60, 60, (1, 1, out_depth))
    P["conv21"] = make_conv_bn(keys[7], 24, 12, (5, 1, 1))
    P["conv22"] = make_conv_bn(keys[8], 36, 12, (5, 1, 1))
    P["conv23"] = make_conv_bn(keys[9], 48, 12, (5, 1, 1))
    P["conv24"] = make_conv_bn(keys[10], 60, 60, (1, 1, out_depth))
    P["conv31"] = make_conv_bn(keys[11], 24, 12, (1, 5, 1))
    P["conv32"] = make_conv_bn(keys[12], 36, 12, (1, 5, 1))
    P["conv33"] = make_conv_bn(keys[13], 48, 12, (1, 5, 1))
    P["conv34"] = make_conv_bn(keys[14], 60, 60, (1, 1, out_depth))
    P["bn_spectral"] = make_bn(keys[15], 60)
    P["bn_spatial_x"] = make_bn(keys[16], 60)
    P["bn_spatial_y"] = make_bn(keys[17], 60)
    P["fc_w"] = jax.random.normal(keys[18], (classes, 180), jnp.float32) / math.sqrt(180)
    P["fc_b"] = 0.01 * jax.random.normal(keys[19], (classes,), jnp.float32)
    return P


# ----------------------------------------------------------------------------
# Forward pass (mirrors MBSFC_l.forward / SFC_back.forward), channels-last
# ----------------------------------------------------------------------------
def sfc_back_forward(x_cl, P, band):
    # x_cl: (b, w, h, d, 24)  (== PyTorch (b, 24, w, h, d) channels-last)
    b, w, h, d, c = x_cl.shape
    pad_d = int(math.ceil(band / 4) * 4)
    if pad_d > d:
        pad = jnp.full((b, w, h, pad_d - d, c), 1e-8, x_cl.dtype)
        x_cl = jnp.concatenate([x_cl, pad], axis=3)
    q = pad_d // 4
    xt = jnp.swapaxes(x_cl, 3, 4)                    # (b, w, h, 24, pad_d)
    # pixel-unshuffle of the depth quarters into a 2x-upsampled spatial grid
    xx = jnp.zeros((b, 2 * w, 2 * h, c, q), x_cl.dtype)
    xx = xx.at[:, 0::2, 0::2].set(xt[..., 0 * q:1 * q])
    xx = xx.at[:, 1::2, 0::2].set(xt[..., 1 * q:2 * q])
    xx = xx.at[:, 0::2, 1::2].set(xt[..., 2 * q:3 * q])
    xx = xx.at[:, 1::2, 1::2].set(xt[..., 3 * q:4 * q])
    # conv1: spatial (2w, 2h, 24), channels q -> out_depth
    xx = conv3d_bn_act(xx, P["stem_conv1"], (3, 3, 1), (1, 1, 0), "mish")
    # reinterpret: spatial (2w, 2h, out_depth), channels 24
    xx = jnp.swapaxes(xx, 3, 4)                      # (b, 2w, 2h, out_depth, 24)
    x = conv3d_bn_act(xx, P["stem_conv2"], (3, 3, 1), (1, 1, 0), "mish")
    return x                                         # (b, 2w, 2h, out_depth, 24)


def mbsfc_forward(x, P, band):
    out_depth = int(math.ceil(band / 4))
    # NCDHW (B, 1, w, h, band) -> channels-last (B, w, h, band, 1)
    x = jnp.transpose(x, (0, 2, 3, 4, 1))
    x = conv3d_bn_act(x, P["conv_feature"], (1, 1, 7), (0, 0, 3), "mish")
    x = sfc_back_forward(x, P, band)                 # (B, 2w, 2h, out_depth, 24)

    # TODO(synk): Spectral_Module / Spatial_X_Module / Spatial_Y_Module sources
    # were not provided; attention is treated as identity, so torch.mul is a
    # no-op (and Dropout is identity in eval).

    # --- spectral dense branch (1,1,7) convs, channels concatenated on lanes ---
    x11 = conv3d_bn_act(x, P["conv11"], (1, 1, 7), (0, 0, 3), "mish")
    x12 = conv3d_bn_act(jnp.concatenate([x, x11], -1), P["conv12"], (1, 1, 7), (0, 0, 3), "mish")
    x13 = conv3d_bn_act(jnp.concatenate([x, x11, x12], -1), P["conv13"], (1, 1, 7), (0, 0, 3), "mish")
    p1 = conv_bn_bn_mish_pool(jnp.concatenate([x, x11, x12, x13], -1),
                              P["conv14"], P["bn_spectral"], (1, 1, out_depth))

    # --- spatial-x dense branch (5,1,1) convs ---
    x21 = conv3d_bn_act(x, P["conv21"], (5, 1, 1), (2, 0, 0), "mish")
    x22 = conv3d_bn_act(jnp.concatenate([x, x21], -1), P["conv22"], (5, 1, 1), (2, 0, 0), "mish")
    x23 = conv3d_bn_act(jnp.concatenate([x, x21, x22], -1), P["conv23"], (5, 1, 1), (2, 0, 0), "mish")
    p2 = conv_bn_bn_mish_pool(jnp.concatenate([x, x21, x22, x23], -1),
                              P["conv24"], P["bn_spatial_x"], (1, 1, out_depth))

    # --- spatial-y dense branch (1,5,1) convs ---
    x31 = conv3d_bn_act(x, P["conv31"], (1, 5, 1), (0, 2, 0), "mish")
    x32 = conv3d_bn_act(jnp.concatenate([x, x31], -1), P["conv32"], (1, 5, 1), (0, 2, 0), "mish")
    x33 = conv3d_bn_act(jnp.concatenate([x, x31, x32], -1), P["conv33"], (1, 5, 1), (0, 2, 0), "mish")
    p3 = conv_bn_bn_mish_pool(jnp.concatenate([x, x31, x32, x33], -1),
                              P["conv34"], P["bn_spatial_y"], (1, 1, out_depth))

    x_pre = jnp.concatenate([p1, p2, p3], axis=1)    # (B, 180) f32
    out = linear_bias(x_pre, P["fc_w"], P["fc_b"])   # (B, classes)
    return out


# ----------------------------------------------------------------------------
if __name__ == "__main__":
    band, classes = 8, 5
    B, W, H = 2, 4, 4

    key = jax.random.PRNGKey(0)
    kx, kp = jax.random.split(key)
    # Input matches PyTorch: (batch, 1, w, h, band) NCDHW
    x = jax.random.normal(kx, (B, 1, W, H, band), jnp.float32)
    params = init_params(kp, band, classes)

    fwd = jax.jit(functools.partial(mbsfc_forward, band=band))
    out = fwd(x, params)
    out = jax.block_until_ready(out)
    assert out.shape == (B, classes), out.shape
    assert bool(jnp.all(jnp.isfinite(out)))
    print("KERNEL_OK")
</pallas_src>

<mosaic_0001>
module attributes {stable_mosaic.version = 11 : i64} {
  func.func @_matmul_bn_act_kernel(%arg0: i32, %arg1: memref<256x7xbf16, #tpu.memory_space<vmem>>, %arg2: memref<7x128xbf16, #tpu.memory_space<vmem>>, %arg3: memref<1x128xf32, #tpu.memory_space<vmem>>, %arg4: memref<1x128xf32, #tpu.memory_space<vmem>>, %arg5: memref<256x128xbf16, #tpu.memory_space<vmem>>) attributes {dimension_semantics = [#tpu.dimension_semantics<parallel>], iteration_bounds = array<i64: 1>, scalar_prefetch = 0 : i64, scratch_operands = 0 : i64, tpu.core_type = #tpu.core_type<tc>, window_params = [{transform_indices = @transform_0, window_bounds = array<i64: 256, 7>}, {pipeline_mode = #tpu.pipeline_mode<synchronous>, transform_indices = @transform_1, window_bounds = array<i64: 7, 128>}, {pipeline_mode = #tpu.pipeline_mode<synchronous>, transform_indices = @transform_2, window_bounds = array<i64: 1, 128>}, {pipeline_mode = #tpu.pipeline_mode<synchronous>, transform_indices = @transform_3, window_bounds = array<i64: 1, 128>}, {transform_indices = @transform_4, window_bounds = array<i64: 256, 128>}]} {
    %c0 = arith.constant 0 : index
    %c0_0 = arith.constant 0 : index
    %0 = vector.load %arg1[%c0, %c0_0] : memref<256x7xbf16, #tpu.memory_space<vmem>>, vector<256x7xbf16>
    %c0_1 = arith.constant 0 : index
    %c0_2 = arith.constant 0 : index
    %1 = vector.load %arg2[%c0_1, %c0_2] : memref<7x128xbf16, #tpu.memory_space<vmem>>, vector<7x128xbf16>
    %cst = arith.constant dense<0.000000e+00> : vector<256x128xf32>
    %2 = tpu.matmul %0, %1, %cst {dimension_numbers = #tpu.dot_dimension_numbers<[1], [0], [0], [1], [0, 0, 1, 1], [], []>} : vector<256x7xbf16>, vector<7x128xbf16>, vector<256x128xf32> -> vector<256x128xf32>
    %c0_3 = arith.constant 0 : index
    %c0_4 = arith.constant 0 : index
    %3 = vector.load %arg3[%c0_3, %c0_4] : memref<1x128xf32, #tpu.memory_space<vmem>>, vector<1x128xf32>
    %4 = vector.broadcast %3 : vector<1x128xf32> to vector<256x128xf32>
    %5 = arith.mulf %2, %4 : vector<256x128xf32>
    %c0_5 = arith.constant 0 : index
    %c0_6 = arith.constant 0 : index
    %6 = vector.load %arg4[%c0_5, %c0_6] : memref<1x128xf32, #tpu.memory_space<vmem>>, vector<1x128xf32>
    %7 = vector.broadcast %6 : vector<1x128xf32> to vector<256x128xf32>
    %8 = arith.addf %5, %7 : vector<256x128xf32>
    %cst_7 = arith.constant 2.000000e+01 : f32
    %9 = vector.broadcast %cst_7 : f32 to vector<256x128xf32>
    %10 = arith.minimumf %8, %9 : vector<256x128xf32>
    %11 = math.exp %10 : vector<256x128xf32>
    %cst_8 = arith.constant 1.000000e+00 : f32
    %12 = vector.broadcast %cst_8 : f32 to vector<256x128xf32>
    %13 = arith.addf %12, %11 : vector<256x128xf32>
    %cst_9 = arith.constant 1.000000e+00 : f32
    %14 = vector.broadcast %cst_9 : f32 to vector<256x128xf32>
    %15 = arith.addf %14, %11 : vector<256x128xf32>
    %16 = arith.mulf %13, %15 : vector<256x128xf32>
    %cst_10 = arith.constant 1.000000e+00 : f32
    %17 = vector.broadcast %cst_10 : f32 to vector<256x128xf32>
    %18 = arith.subf %16, %17 : vector<256x128xf32>
    %cst_11 = arith.constant 1.000000e+00 : f32
    %19 = vector.broadcast %cst_11 : f32 to vector<256x128xf32>
    %20 = arith.addf %16, %19 : vector<256x128xf32>
    %21 = tpu.reciprocal %20 {approx = true} : vector<256x128xf32> -> vector<256x128xf32>
    %22 = arith.mulf %18, %21 : vector<256x128xf32>
    %23 = arith.mulf %8, %22 : vector<256x128xf32>
    %24 = arith.truncf %23 : vector<256x128xf32> to vector<256x128xbf16>
    %c0_12 = arith.constant 0 : index
    %c0_13 = arith.constant 0 : index
    %25 = vector.load %arg5[%c0_12, %c0_13] : memref<256x128xbf16, #tpu.memory_space<vmem>>, vector<256x128xbf16>
    tpu.vector_store %arg5[%c0_12, %c0_13], %24 {strides = array<i32>} : memref<256x128xbf16, #tpu.memory_space<vmem>>, vector<256x128xbf16>,
    return
  }
  func.func @transform_0(%arg0: i32) -> (i32, i32) {
    %c0_i32 = arith.constant 0 : i32
    %c0_i32_0 = arith.constant 0 : i32
    return %arg0, %c0_i32 : i32, i32
  }
  func.func @transform_1(%arg0: i32) -> (i32, i32) {
    %c0_i32 = arith.constant 0 : i32
    %c0_i32_0 = arith.constant 0 : i32
    %c0_i32_1 = arith.constant 0 : i32
    return %c0_i32, %c0_i32_0 : i32, i32
  }
  func.func @transform_2(%arg0: i32) -> (i32, i32) {
    %c0_i32 = arith.constant 0 : i32
    %c0_i32_0 = arith.constant 0 : i32
    %c0_i32_1 = arith.constant 0 : i32
    return %c0_i32, %c0_i32_0 : i32, i32
  }
  func.func @transform_3(%arg0: i32) -> (i32, i32) {
    %c0_i32 = arith.constant 0 : i32
    %c0_i32_0 = arith.constant 0 : i32
    %c0_i32_1 = arith.constant 0 : i32
    return %c0_i32, %c0_i32_0 : i32, i32
  }
  func.func @transform_4(%arg0: i32) -> (i32, i32) {
    %c0_i32 = arith.constant 0 : i32
    %c0_i32_0 = arith.constant 0 : i32
    return %arg0, %c0_i32 : i32, i32
  }
}

module attributes {stable_mosaic.version = 11 : i64} {
  func.func @_matmul_bn_act_kernel(%arg0: i32, %arg1: memref<512x18xbf16, #tpu.memory_space<vmem>>, %arg2: memref<18x128xbf16, #tpu.memory_space<vmem>>, %arg3: memref<1x128xf32, #tpu.memory_space<vmem>>, %arg4: memref<1x128xf32, #tpu.memory_space<vmem>>, %arg5: memref<512x128xbf16, #tpu.memory_space<vmem>>) attributes {dimension_semantics = [#tpu.dimension_semantics<parallel>], iteration_bounds = array<i64: 6>, scalar_prefetch = 0 : i64, scratch_operands = 0 : i64, tpu.core_type = #tpu.core_type<tc>, window_params = [{transform_indices = @transform_0, window_bounds = array<i64: 512, 18>}, {pipeline_mode = #tpu.pipeline_mode<synchronous>, transform_indices = @transform_1, window_bounds = array<i64: 18, 128>}, {pipeline_mode = #tpu.pipeline_mode<synchronous>, transform_indices = @transform_2, window_bounds = array<i64: 1, 128>}, {pipeline_mode = #tpu.pipeline_mode<synchronous>, transform_indices = @transform_3, window_bounds = array<i64: 1, 128>}, {transform_indices = @transform_4, window_bounds = array<i64: 512, 128>}]} {
    %c0 = arith.constant 0 : index
    %c0_0 = arith.constant 0 : index
    %0 = vector.load %arg1[%c0, %c0_0] : memref<512x18xbf16, #tpu.memory_space<vmem>>, vector<512x18xbf16>
    %c0_1 = arith.constant 0 : index
    %c0_2 = arith.constant 0 : index
    %1 = vector.load %arg2[%c0_1, %c0_2] : memref<18x128xbf16, #tpu.memory_space<vmem>>, vector<18x128xbf16>
    %cst = arith.constant dense<0.000000e+00> : vector<512x128xf32>
    %2 = tpu.matmul %0, %1, %cst {dimension_numbers = #tpu.dot_dimension_numbers<[1], [0], [0], [1], [0, 0, 1, 1], [], []>} : vector<512x18xbf16>, vector<18x128xbf16>, vector<512x128xf32> -> vector<512x128xf32>
    %c0_3 = arith.constant 0 : index
    %c0_4 = arith.constant 0 : index
    %3 = vector.load %arg3[%c0_3, %c0_4] : memref<1x128xf32, #tpu.memory_space<vmem>>, vector<1x128xf32>
    %4 = vector.broadcast %3 : vector<1x128xf32> to vector<512x128xf32>
    %5 = arith.mulf %2, %4 : vector<512x128xf32>
    %c0_5 = arith.constant 0 : index
    %c0_6 = arith.constant 0 : index
    %6 = vector.load %arg4[%c0_5, %c0_6] : memref<1x128xf32, #tpu.memory_space<vmem>>, vector<1x128xf32>
    %7 = vector.broadcast %6 : vector<1x128xf32> to vector<512x128xf32>
    %8 = arith.addf %5, %7 : vector<512x128xf32>
    %cst_7 = arith.constant 2.000000e+01 : f32
    %9 = vector.broadcast %cst_7 : f32 to vector<512x128xf32>
    %10 = arith.minimumf %8, %9 : vector<512x128xf32>
    %11 = math.exp %10 : vector<512x128xf32>
    %cst_8 = arith.constant 1.000000e+00 : f32
    %12 = vector.broadcast %cst_8 : f32 to vector<512x128xf32>
    %13 = arith.addf %12, %11 : vector<512x128xf32>
    %cst_9 = arith.constant 1.000000e+00 : f32
    %14 = vector.broadcast %cst_9 : f32 to vector<512x128xf32>
    %15 = arith.addf %14, %11 : vector<512x128xf32>
    %16 = arith.mulf %13, %15 : vector<512x128xf32>
    %cst_10 = arith.constant 1.000000e+00 : f32
    %17 = vector.broadcast %cst_10 : f32 to vector<512x128xf32>
    %18 = arith.subf %16, %17 : vector<512x128xf32>
    %cst_11 = arith.constant 1.000000e+00 : f32
    %19 = vector.broadcast %cst_11 : f32 to vector<512x128xf32>
    %20 = arith.addf %16, %19 : vector<512x128xf32>
    %21 = tpu.reciprocal %20 {approx = true} : vector<512x128xf32> -> vector<512x128xf32>
    %22 = arith.mulf %18, %21 : vector<512x128xf32>
    %23 = arith.mulf %8, %22 : vector<512x128xf32>
    %24 = arith.truncf %23 : vector<512x128xf32> to vector<512x128xbf16>
    %c0_12 = arith.constant 0 : index
    %c0_13 = arith.constant 0 : index
    %25 = vector.load %arg5[%c0_12, %c0_13] : memref<512x128xbf16, #tpu.memory_space<vmem>>, vector<512x128xbf16>
    tpu.vector_store %arg5[%c0_12, %c0_13], %24 {strides = array<i32>} : memref<512x128xbf16, #tpu.memory_space<vmem>>, vector<512x128xbf16>,
    return
  }
  func.func @transform_0(%arg0: i32) -> (i32, i32) {
    %c0_i32 = arith.constant 0 : i32
    %c0_i32_0 = arith.constant 0 : i32
    return %arg0, %c0_i32 : i32, i32
  }
  func.func @transform_1(%arg0: i32) -> (i32, i32) {
    %c0_i32 = arith.constant 0 : i32
    %c0_i32_0 = arith.constant 0 : i32
    %c0_i32_1 = arith.constant 0 : i32
    return %c0_i32, %c0_i32_0 : i32, i32
  }
  func.func @transform_2(%arg0: i32) -> (i32, i32) {
    %c0_i32 = arith.constant 0 : i32
    %c0_i32_0 = arith.constant 0 : i32
    %c0_i32_1 = arith.constant 0 : i32
    return %c0_i32, %c0_i32_0 : i32, i32
  }
  func.func @transform_3(%arg0: i32) -> (i32, i32) {
    %c0_i32 = arith.constant 0 : i32
    %c0_i32_0 = arith.constant 0 : i32
    %c0_i32_1 = arith.constant 0 : i32
    return %c0_i32, %c0_i32_0 : i32, i32
  }
  func.func @transform_4(%arg0: i32) -> (i32, i32) {
    %c0_i32 = arith.constant 0 : i32
    %c0_i32_0 = arith.constant 0 : i32
    return %arg0, %c0_i32 : i32, i32
  }
}

module attributes {stable_mosaic.version = 11 : i64} {
  func.func @_matmul_bn_act_kernel(%arg0: i32, %arg1: memref<256x216xbf16, #tpu.memory_space<vmem>>, %arg2: memref<216x128xbf16, #tpu.memory_space<vmem>>, %arg3: memref<1x128xf32, #tpu.memory_space<vmem>>, %arg4: memref<1x128xf32, #tpu.memory_space<vmem>>, %arg5: memref<256x128xbf16, #tpu.memory_space<vmem>>) attributes {dimension_semantics = [#tpu.dimension_semantics<parallel>], iteration_bounds = array<i64: 1>, scalar_prefetch = 0 : i64, scratch_operands = 0 : i64, tpu.core_type = #tpu.core_type<tc>, window_params = [{transform_indices = @transform_0, window_bounds = array<i64: 256, 216>}, {pipeline_mode = #tpu.pipeline_mode<synchronous>, transform_indices = @transform_1, window_bounds = array<i64: 216, 128>}, {pipeline_mode = #tpu.pipeline_mode<synchronous>, transform_indices = @transform_2, window_bounds = array<i64: 1, 128>}, {pipeline_mode = #tpu.pipeline_mode<synchronous>, transform_indices = @transform_3, window_bounds = array<i64: 1, 128>}, {transform_indices = @transform_4, window_bounds = array<i64: 256, 128>}]} {
    %c0 = arith.constant 0 : index
    %c0_0 = arith.constant 0 : index
    %0 = vector.load %arg1[%c0, %c0_0] : memref<256x216xbf16, #tpu.memory_space<vmem>>, vector<256x216xbf16>
    %c0_1 = arith.constant 0 : index
    %c0_2 = arith.constant 0 : index
    %1 = vector.load %arg2[%c0_1, %c0_2] : memref<216x128xbf16, #tpu.memory_space<vmem>>, vector<216x128xbf16>
    %cst = arith.constant dense<0.000000e+00> : vector<256x128xf32>
    %2 = tpu.matmul %0, %1, %cst {dimension_numbers = #tpu.dot_dimension_numbers<[1], [0], [0], [1], [0, 0, 1, 1], [], []>} : vector<256x216xbf16>, vector<216x128xbf16>, vector<256x128xf32> -> vector<256x128xf32>
    %c0_3 = arith.constant 0 : index
    %c0_4 = arith.constant 0 : index
    %3 = vector.load %arg3[%c0_3, %c0_4] : memref<1x128xf32, #tpu.memory_space<vmem>>, vector<1x128xf32>
    %4 = vector.broadcast %3 : vector<1x128xf32> to vector<256x128xf32>
    %5 = arith.mulf %2, %4 : vector<256x128xf32>
    %c0_5 = arith.constant 0 : index
    %c0_6 = arith.constant 0 : index
    %6 = vector.load %arg4[%c0_5, %c0_6] : memref<1x128xf32, #tpu.memory_space<vmem>>, vector<1x128xf32>
    %7 = vector.broadcast %6 : vector<1x128xf32> to vector<256x128xf32>
    %8 = arith.addf %5, %7 : vector<256x128xf32>
    %cst_7 = arith.constant 2.000000e+01 : f32
    %9 = vector.broadcast %cst_7 : f32 to vector<256x128xf32>
    %10 = arith.minimumf %8, %9 : vector<256x128xf32>
    %11 = math.exp %10 : vector<256x128xf32>
    %cst_8 = arith.constant 1.000000e+00 : f32
    %12 = vector.broadcast %cst_8 : f32 to vector<256x128xf32>
    %13 = arith.addf %12, %11 : vector<256x128xf32>
    %cst_9 = arith.constant 1.000000e+00 : f32
    %14 = vector.broadcast %cst_9 : f32 to vector<256x128xf32>
    %15 = arith.addf %14, %11 : vector<256x128xf32>
    %16 = arith.mulf %13, %15 : vector<256x128xf32>
    %cst_10 = arith.constant 1.000000e+00 : f32
    %17 = vector.broadcast %cst_10 : f32 to vector<256x128xf32>
    %18 = arith.subf %16, %17 : vector<256x128xf32>
    %cst_11 = arith.constant 1.000000e+00 : f32
    %19 = vector.broadcast %cst_11 : f32 to vector<256x128xf32>
    %20 = arith.addf %16, %19 : vector<256x128xf32>
    %21 = tpu.reciprocal %20 {approx = true} : vector<256x128xf32> -> vector<256x128xf32>
    %22 = arith.mulf %18, %21 : vector<256x128xf32>
    %23 = arith.mulf %8, %22 : vector<256x128xf32>
    %24 = arith.truncf %23 : vector<256x128xf32> to vector<256x128xbf16>
    %c0_12 = arith.constant 0 : index
    %c0_13 = arith.constant 0 : index
    %25 = vector.load %arg5[%c0_12, %c0_13] : memref<256x128xbf16, #tpu.memory_space<vmem>>, vector<256x128xbf16>
    tpu.vector_store %arg5[%c0_12, %c0_13], %24 {strides = array<i32>} : memref<256x128xbf16, #tpu.memory_space<vmem>>, vector<256x128xbf16>,
    return
  }
  func.func @transform_0(%arg0: i32) -> (i32, i32) {
    %c0_i32 = arith.constant 0 : i32
    %c0_i32_0 = arith.constant 0 : i32
    return %arg0, %c0_i32 : i32, i32
  }
  func.func @transform_1(%arg0: i32) -> (i32, i32) {
    %c0_i32 = arith.constant 0 : i32
    %c0_i32_0 = arith.constant 0 : i32
    %c0_i32_1 = arith.constant 0 : i32
    return %c0_i32, %c0_i32_0 : i32, i32
  }
  func.func @transform_2(%arg0: i32) -> (i32, i32) {
    %c0_i32 = arith.constant 0 : i32
    %c0_i32_0 = arith.constant 0 : i32
    %c0_i32_1 = arith.constant 0 : i32
    return %c0_i32, %c0_i32_0 : i32, i32
  }
  func.func @transform_3(%arg0: i32) -> (i32, i32) {
    %c0_i32 = arith.constant 0 : i32
    %c0_i32_0 = arith.constant 0 : i32
    %c0_i32_1 = arith.constant 0 : i32
    return %c0_i32, %c0_i32_0 : i32, i32
  }
  func.func @transform_4(%arg0: i32) -> (i32, i32) {
    %c0_i32 = arith.constant 0 : i32
    %c0_i32_0 = arith.constant 0 : i32
    return %arg0, %c0_i32 : i32, i32
  }
}

module attributes {stable_mosaic.version = 11 : i64} {
  func.func @_matmul_bn_act_kernel(%arg0: i32, %arg1: memref<256x120xbf16, #tpu.memory_space<vmem>>, %arg2: memref<120x128xbf16, #tpu.memory_space<vmem>>, %arg3: memref<1x128xf32, #tpu.memory_space<vmem>>, %arg4: memref<1x128xf32, #tpu.memory_space<vmem>>, %arg5: memref<256x128xbf16, #tpu.memory_space<vmem>>) attributes {dimension_semantics = [#tpu.dimension_semantics<parallel>], iteration_bounds = array<i64: 1>, scalar_prefetch = 0 : i64, scratch_operands = 0 : i64, tpu.core_type = #tpu.core_type<tc>, window_params = [{transform_indices = @transform_0, window_bounds = array<i64: 256, 120>}, {pipeline_mode = #tpu.pipeline_mode<synchronous>, transform_indices = @transform_1, window_bounds = array<i64: 120, 128>}, {pipeline_mode = #tpu.pipeline_mode<synchronous>, transform_indices = @transform_2, window_bounds = array<i64: 1, 128>}, {pipeline_mode = #tpu.pipeline_mode<synchronous>, transform_indices = @transform_3, window_bounds = array<i64: 1, 128>}, {transform_indices = @transform_4, window_bounds = array<i64: 256, 128>}]} {
    %c0 = arith.constant 0 : index
    %c0_0 = arith.constant 0 : index
    %0 = vector.load %arg1[%c0, %c0_0] : memref<256x120xbf16, #tpu.memory_space<vmem>>, vector<256x120xbf16>
    %c0_1 = arith.constant 0 : index
    %c0_2 = arith.constant 0 : index
    %1 = vector.load %arg2[%c0_1, %c0_2] : memref<120x128xbf16, #tpu.memory_space<vmem>>, vector<120x128xbf16>
    %cst = arith.constant dense<0.000000e+00> : vector<256x128xf32>
    %2 = tpu.matmul %0, %1, %cst {dimension_numbers = #tpu.dot_dimension_numbers<[1], [0], [0], [1], [0, 0, 1, 1], [], []>} : vector<256x120xbf16>, vector<120x128xbf16>, vector<256x128xf32> -> vector<256x128xf32>
    %c0_3 = arith.constant 0 : index
    %c0_4 = arith.constant 0 : index
    %3 = vector.load %arg3[%c0_3, %c0_4] : memref<1x128xf32, #tpu.memory_space<vmem>>, vector<1x128xf32>
    %4 = vector.broadcast %3 : vector<1x128xf32> to vector<256x128xf32>
    %5 = arith.mulf %2, %4 : vector<256x128xf32>
    %c0_5 = arith.constant 0 : index
    %c0_6 = arith.constant 0 : index
    %6 = vector.load %arg4[%c0_5, %c0_6] : memref<1x128xf32, #tpu.memory_space<vmem>>, vector<1x128xf32>
    %7 = vector.broadcast %6 : vector<1x128xf32> to vector<256x128xf32>
    %8 = arith.addf %5, %7 : vector<256x128xf32>
    %cst_7 = arith.constant 2.000000e+01 : f32
    %9 = vector.broadcast %cst_7 : f32 to vector<256x128xf32>
    %10 = arith.minimumf %8, %9 : vector<256x128xf32>
    %11 = math.exp %10 : vector<256x128xf32>
    %cst_8 = arith.constant 1.000000e+00 : f32
    %12 = vector.broadcast %cst_8 : f32 to vector<256x128xf32>
    %13 = arith.addf %12, %11 : vector<256x128xf32>
    %cst_9 = arith.constant 1.000000e+00 : f32
    %14 = vector.broadcast %cst_9 : f32 to vector<256x128xf32>
    %15 = arith.addf %14, %11 : vector<256x128xf32>
    %16 = arith.mulf %13, %15 : vector<256x128xf32>
    %cst_10 = arith.constant 1.000000e+00 : f32
    %17 = vector.broadcast %cst_10 : f32 to vector<256x128xf32>
    %18 = arith.subf %16, %17 : vector<256x128xf32>
    %cst_11 = arith.constant 1.000000e+00 : f32
    %19 = vector.broadcast %cst_11 : f32 to vector<256x128xf32>
    %20 = arith.addf %16, %19 : vector<256x128xf32>
    %21 = tpu.reciprocal %20 {approx = true} : vector<256x128xf32> -> vector<256x128xf32>
    %22 = arith.mulf %18, %21 : vector<256x128xf32>
    %23 = arith.mulf %8, %22 : vector<256x128xf32>
    %24 = arith.truncf %23 : vector<256x128xf32> to vector<256x128xbf16>
    %c0_12 = arith.constant 0 : index
    %c0_13 = arith.constant 0 : index
    %25 = vector.load %arg5[%c0_12, %c0_13] : memref<256x128xbf16, #tpu.memory_space<vmem>>, vector<256x128xbf16>
    tpu.vector_store %arg5[%c0_12, %c0_13], %24 {strides = array<i32>} : memref<256x128xbf16, #tpu.memory_space<vmem>>, vector<256x128xbf16>,
    return
  }
  func.func @transform_0(%arg0: i32) -> (i32, i32) {
    %c0_i32 = arith.constant 0 : i32
    %c0_i32_0 = arith.constant 0 : i32
    return %arg0, %c0_i32 : i32, i32
  }
  func.func @transform_1(%arg0: i32) -> (i32, i32) {
    %c0_i32 = arith.constant 0 : i32
    %c0_i32_0 = arith.constant 0 : i32
    %c0_i32_1 = arith.constant 0 : i32
    return %c0_i32, %c0_i32_0 : i32, i32
  }
  func.func @transform_2(%arg0: i32) -> (i32, i32) {
    %c0_i32 = arith.constant 0 : i32
    %c0_i32_0 = arith.constant 0 : i32
    %c0_i32_1 = arith.constant 0 : i32
    return %c0_i32, %c0_i32_0 : i32, i32
  }
  func.func @transform_3(%arg0: i32) -> (i32, i32) {
    %c0_i32 = arith.constant 0 : i32
    %c0_i32_0 = arith.constant 0 : i32
    %c0_i32_1 = arith.constant 0 : i32
    return %c0_i32, %c0_i32_0 : i32, i32
  }
  func.func @transform_4(%arg0: i32) -> (i32, i32) {
    %c0_i32 = arith.constant 0 : i32
    %c0_i32_0 = arith.constant 0 : i32
    return %arg0, %c0_i32 : i32, i32
  }
}

module attributes {stable_mosaic.version = 11 : i64} {
  func.func @_matmul_bn_act_kernel(%arg0: i32, %arg1: memref<256x168xbf16, #tpu.memory_space<vmem>>, %arg2: memref<168x128xbf16, #tpu.memory_space<vmem>>, %arg3: memref<1x128xf32, #tpu.memory_space<vmem>>, %arg4: memref<1x128xf32, #tpu.memory_space<vmem>>, %arg5: memref<256x128xbf16, #tpu.memory_space<vmem>>) attributes {dimension_semantics = [#tpu.dimension_semantics<parallel>], iteration_bounds = array<i64: 1>, scalar_prefetch = 0 : i64, scratch_operands = 0 : i64, tpu.core_type = #tpu.core_type<tc>, window_params = [{transform_indices = @transform_0, window_bounds = array<i64: 256, 168>}, {pipeline_mode = #tpu.pipeline_mode<synchronous>, transform_indices = @transform_1, window_bounds = array<i64: 168, 128>}, {pipeline_mode = #tpu.pipeline_mode<synchronous>, transform_indices = @transform_2, window_bounds = array<i64: 1, 128>}, {pipeline_mode = #tpu.pipeline_mode<synchronous>, transform_indices = @transform_3, window_bounds = array<i64: 1, 128>}, {transform_indices = @transform_4, window_bounds = array<i64: 256, 128>}]} {
    %c0 = arith.constant 0 : index
    %c0_0 = arith.constant 0 : index
    %0 = vector.load %arg1[%c0, %c0_0] : memref<256x168xbf16, #tpu.memory_space<vmem>>, vector<256x168xbf16>
    %c0_1 = arith.constant 0 : index
    %c0_2 = arith.constant 0 : index
    %1 = vector.load %arg2[%c0_1, %c0_2] : memref<168x128xbf16, #tpu.memory_space<vmem>>, vector<168x128xbf16>
    %cst = arith.constant dense<0.000000e+00> : vector<256x128xf32>
    %2 = tpu.matmul %0, %1, %cst {dimension_numbers = #tpu.dot_dimension_numbers<[1], [0], [0], [1], [0, 0, 1, 1], [], []>} : vector<256x168xbf16>, vector<168x128xbf16>, vector<256x128xf32> -> vector<256x128xf32>
    %c0_3 = arith.constant 0 : index
    %c0_4 = arith.constant 0 : index
    %3 = vector.load %arg3[%c0_3, %c0_4] : memref<1x128xf32, #tpu.memory_space<vmem>>, vector<1x128xf32>
    %4 = vector.broadcast %3 : vector<1x128xf32> to vector<256x128xf32>
    %5 = arith.mulf %2, %4 : vector<256x128xf32>
    %c0_5 = arith.constant 0 : index
    %c0_6 = arith.constant 0 : index
    %6 = vector.load %arg4[%c0_5, %c0_6] : memref<1x128xf32, #tpu.memory_space<vmem>>, vector<1x128xf32>
    %7 = vector.broadcast %6 : vector<1x128xf32> to vector<256x128xf32>
    %8 = arith.addf %5, %7 : vector<256x128xf32>
    %cst_7 = arith.constant 2.000000e+01 : f32
    %9 = vector.broadcast %cst_7 : f32 to vector<256x128xf32>
    %10 = arith.minimumf %8, %9 : vector<256x128xf32>
    %11 = math.exp %10 : vector<256x128xf32>
    %cst_8 = arith.constant 1.000000e+00 : f32
    %12 = vector.broadcast %cst_8 : f32 to vector<256x128xf32>
    %13 = arith.addf %12, %11 : vector<256x128xf32>
    %cst_9 = arith.constant 1.000000e+00 : f32
    %14 = vector.broadcast %cst_9 : f32 to vector<256x128xf32>
    %15 = arith.addf %14, %11 : vector<256x128xf32>
    %16 = arith.mulf %13, %15 : vector<256x128xf32>
    %cst_10 = arith.constant 1.000000e+00 : f32
    %17 = vector.broadcast %cst_10 : f32 to vector<256x128xf32>
    %18 = arith.subf %16, %17 : vector<256x128xf32>
    %cst_11 = arith.constant 1.000000e+00 : f32
    %19 = vector.broadcast %cst_11 : f32 to vector<256x128xf32>
    %20 = arith.addf %16, %19 : vector<256x128xf32>
    %21 = tpu.reciprocal %20 {approx = true} : vector<256x128xf32> -> vector<256x128xf32>
    %22 = arith.mulf %18, %21 : vector<256x128xf32>
    %23 = arith.mulf %8, %22 : vector<256x128xf32>
    %24 = arith.truncf %23 : vector<256x128xf32> to vector<256x128xbf16>
    %c0_12 = arith.constant 0 : index
    %c0_13 = arith.constant 0 : index
    %25 = vector.load %arg5[%c0_12, %c0_13] : memref<256x128xbf16, #tpu.memory_space<vmem>>, vector<256x128xbf16>
    tpu.vector_store %arg5[%c0_12, %c0_13], %24 {strides = array<i32>} : memref<256x128xbf16, #tpu.memory_space<vmem>>, vector<256x128xbf16>,
    return
  }
  func.func @transform_0(%arg0: i32) -> (i32, i32) {
    %c0_i32 = arith.constant 0 : i32
    %c0_i32_0 = arith.constant 0 : i32
    return %arg0, %c0_i32 : i32, i32
  }
  func.func @transform_1(%arg0: i32) -> (i32, i32) {
    %c0_i32 = arith.constant 0 : i32
    %c0_i32_0 = arith.constant 0 : i32
    %c0_i32_1 = arith.constant 0 : i32
    return %c0_i32, %c0_i32_0 : i32, i32
  }
  func.func @transform_2(%arg0: i32) -> (i32, i32) {
    %c0_i32 = arith.constant 0 : i32
    %c0_i32_0 = arith.constant 0 : i32
    %c0_i32_1 = arith.constant 0 : i32
    return %c0_i32, %c0_i32_0 : i32, i32
  }
  func.func @transform_3(%arg0: i32) -> (i32, i32) {
    %c0_i32 = arith.constant 0 : i32
    %c0_i32_0 = arith.constant 0 : i32
    %c0_i32_1 = arith.constant 0 : i32
    return %c0_i32, %c0_i32_0 : i32, i32
  }
  func.func @transform_4(%arg0: i32) -> (i32, i32) {
    %c0_i32 = arith.constant 0 : i32
    %c0_i32_0 = arith.constant 0 : i32
    return %arg0, %c0_i32 : i32, i32
  }
}

module attributes {stable_mosaic.version = 11 : i64} {
  func.func @_matmul_bn_act_kernel(%arg0: i32, %arg1: memref<256x180xbf16, #tpu.memory_space<vmem>>, %arg2: memref<180x128xbf16, #tpu.memory_space<vmem>>, %arg3: memref<1x128xf32, #tpu.memory_space<vmem>>, %arg4: memref<1x128xf32, #tpu.memory_space<vmem>>, %arg5: memref<256x128xbf16, #tpu.memory_space<vmem>>) attributes {dimension_semantics = [#tpu.dimension_semantics<parallel>], iteration_bounds = array<i64: 1>, scalar_prefetch = 0 : i64, scratch_operands = 0 : i64, tpu.core_type = #tpu.core_type<tc>, window_params = [{transform_indices = @transform_0, window_bounds = array<i64: 256, 180>}, {pipeline_mode = #tpu.pipeline_mode<synchronous>, transform_indices = @transform_1, window_bounds = array<i64: 180, 128>}, {pipeline_mode = #tpu.pipeline_mode<synchronous>, transform_indices = @transform_2, window_bounds = array<i64: 1, 128>}, {pipeline_mode = #tpu.pipeline_mode<synchronous>, transform_indices = @transform_3, window_bounds = array<i64: 1, 128>}, {transform_indices = @transform_4, window_bounds = array<i64: 256, 128>}]} {
    %c0 = arith.constant 0 : index
    %c0_0 = arith.constant 0 : index
    %0 = vector.load %arg1[%c0, %c0_0] : memref<256x180xbf16, #tpu.memory_space<vmem>>, vector<256x180xbf16>
    %c0_1 = arith.constant 0 : index
    %c0_2 = arith.constant 0 : index
    %1 = vector.load %arg2[%c0_1, %c0_2] : memref<180x128xbf16, #tpu.memory_space<vmem>>, vector<180x128xbf16>
    %cst = arith.constant dense<0.000000e+00> : vector<256x128xf32>
    %2 = tpu.matmul %0, %1, %cst {dimension_numbers = #tpu.dot_dimension_numbers<[1], [0], [0], [1], [0, 0, 1, 1], [], []>} : vector<256x180xbf16>, vector<180x128xbf16>, vector<256x128xf32> -> vector<256x128xf32>
    %c0_3 = arith.constant 0 : index
    %c0_4 = arith.constant 0 : index
    %3 = vector.load %arg3[%c0_3, %c0_4] : memref<1x128xf32, #tpu.memory_space<vmem>>, vector<1x128xf32>
    %4 = vector.broadcast %3 : vector<1x128xf32> to vector<256x128xf32>
    %5 = arith.mulf %2, %4 : vector<256x128xf32>
    %c0_5 = arith.constant 0 : index
    %c0_6 = arith.constant 0 : index
    %6 = vector.load %arg4[%c0_5, %c0_6] : memref<1x128xf32, #tpu.memory_space<vmem>>, vector<1x128xf32>
    %7 = vector.broadcast %6 : vector<1x128xf32> to vector<256x128xf32>
    %8 = arith.addf %5, %7 : vector<256x128xf32>
    %cst_7 = arith.constant 2.000000e+01 : f32
    %9 = vector.broadcast %cst_7 : f32 to vector<256x128xf32>
    %10 = arith.minimumf %8, %9 : vector<256x128xf32>
    %11 = math.exp %10 : vector<256x128xf32>
    %cst_8 = arith.constant 1.000000e+00 : f32
    %12 = vector.broadcast %cst_8 : f32 to vector<256x128xf32>
    %13 = arith.addf %12, %11 : vector<256x128xf32>
    %cst_9 = arith.constant 1.000000e+00 : f32
    %14 = vector.broadcast %cst_9 : f32 to vector<256x128xf32>
    %15 = arith.addf %14, %11 : vector<256x128xf32>
    %16 = arith.mulf %13, %15 : vector<256x128xf32>
    %cst_10 = arith.constant 1.000000e+00 : f32
    %17 = vector.broadcast %cst_10 : f32 to vector<256x128xf32>
    %18 = arith.subf %16, %17 : vector<256x128xf32>
    %cst_11 = arith.constant 1.000000e+00 : f32
    %19 = vector.broadcast %cst_11 : f32 to vector<256x128xf32>
    %20 = arith.addf %16, %19 : vector<256x128xf32>
    %21 = tpu.reciprocal %20 {approx = true} : vector<256x128xf32> -> vector<256x128xf32>
    %22 = arith.mulf %18, %21 : vector<256x128xf32>
    %23 = arith.mulf %8, %22 : vector<256x128xf32>
    %24 = arith.truncf %23 : vector<256x128xf32> to vector<256x128xbf16>
    %c0_12 = arith.constant 0 : index
    %c0_13 = arith.constant 0 : index
    %25 = vector.load %arg5[%c0_12, %c0_13] : memref<256x128xbf16, #tpu.memory_space<vmem>>, vector<256x128xbf16>
    tpu.vector_store %arg5[%c0_12, %c0_13], %24 {strides = array<i32>} : memref<256x128xbf16, #tpu.memory_space<vmem>>, vector<256x128xbf16>,
    return
  }
  func.func @transform_0(%arg0: i32) -> (i32, i32) {
    %c0_i32 = arith.constant 0 : i32
    %c0_i32_0 = arith.constant 0 : i32
    return %arg0, %c0_i32 : i32, i32
  }
  func.func @transform_1(%arg0: i32) -> (i32, i32) {
    %c0_i32 = arith.constant 0 : i32
    %c0_i32_0 = arith.constant 0 : i32
    %c0_i32_1 = arith.constant 0 : i32
    return %c0_i32, %c0_i32_0 : i32, i32
  }
  func.func @transform_2(%arg0: i32) -> (i32, i32) {
    %c0_i32 = arith.constant 0 : i32
    %c0_i32_0 = arith.constant 0 : i32
    %c0_i32_1 = arith.constant 0 : i32
    return %c0_i32, %c0_i32_0 : i32, i32
  }
  func.func @transform_3(%arg0: i32) -> (i32, i32) {
    %c0_i32 = arith.constant 0 : i32
    %c0_i32_0 = arith.constant 0 : i32
    %c0_i32_1 = arith.constant 0 : i32
    return %c0_i32, %c0_i32_0 : i32, i32
  }
  func.func @transform_4(%arg0: i32) -> (i32, i32) {
    %c0_i32 = arith.constant 0 : i32
    %c0_i32_0 = arith.constant 0 : i32
    return %arg0, %c0_i32 : i32, i32
  }
}

module attributes {stable_mosaic.version = 11 : i64} {
  func.func @_matmul_bn_act_kernel(%arg0: i32, %arg1: memref<256x252xbf16, #tpu.memory_space<vmem>>, %arg2: memref<252x128xbf16, #tpu.memory_space<vmem>>, %arg3: memref<1x128xf32, #tpu.memory_space<vmem>>, %arg4: memref<1x128xf32, #tpu.memory_space<vmem>>, %arg5: memref<256x128xbf16, #tpu.memory_space<vmem>>) attributes {dimension_semantics = [#tpu.dimension_semantics<parallel>], iteration_bounds = array<i64: 1>, scalar_prefetch = 0 : i64, scratch_operands = 0 : i64, tpu.core_type = #tpu.core_type<tc>, window_params = [{transform_indices = @transform_0, window_bounds = array<i64: 256, 252>}, {pipeline_mode = #tpu.pipeline_mode<synchronous>, transform_indices = @transform_1, window_bounds = array<i64: 252, 128>}, {pipeline_mode = #tpu.pipeline_mode<synchronous>, transform_indices = @transform_2, window_bounds = array<i64: 1, 128>}, {pipeline_mode = #tpu.pipeline_mode<synchronous>, transform_indices = @transform_3, window_bounds = array<i64: 1, 128>}, {transform_indices = @transform_4, window_bounds = array<i64: 256, 128>}]} {
    %c0 = arith.constant 0 : index
    %c0_0 = arith.constant 0 : index
    %0 = vector.load %arg1[%c0, %c0_0] : memref<256x252xbf16, #tpu.memory_space<vmem>>, vector<256x252xbf16>
    %c0_1 = arith.constant 0 : index
    %c0_2 = arith.constant 0 : index
    %1 = vector.load %arg2[%c0_1, %c0_2] : memref<252x128xbf16, #tpu.memory_space<vmem>>, vector<252x128xbf16>
    %cst = arith.constant dense<0.000000e+00> : vector<256x128xf32>
    %2 = tpu.matmul %0, %1, %cst {dimension_numbers = #tpu.dot_dimension_numbers<[1], [0], [0], [1], [0, 0, 1, 1], [], []>} : vector<256x252xbf16>, vector<252x128xbf16>, vector<256x128xf32> -> vector<256x128xf32>
    %c0_3 = arith.constant 0 : index
    %c0_4 = arith.constant 0 : index
    %3 = vector.load %arg3[%c0_3, %c0_4] : memref<1x128xf32, #tpu.memory_space<vmem>>, vector<1x128xf32>
    %4 = vector.broadcast %3 : vector<1x128xf32> to vector<256x128xf32>
    %5 = arith.mulf %2, %4 : vector<256x128xf32>
    %c0_5 = arith.constant 0 : index
    %c0_6 = arith.constant 0 : index
    %6 = vector.load %arg4[%c0_5, %c0_6] : memref<1x128xf32, #tpu.memory_space<vmem>>, vector<1x128xf32>
    %7 = vector.broadcast %6 : vector<1x128xf32> to vector<256x128xf32>
    %8 = arith.addf %5, %7 : vector<256x128xf32>
    %cst_7 = arith.constant 2.000000e+01 : f32
    %9 = vector.broadcast %cst_7 : f32 to vector<256x128xf32>
    %10 = arith.minimumf %8, %9 : vector<256x128xf32>
    %11 = math.exp %10 : vector<256x128xf32>
    %cst_8 = arith.constant 1.000000e+00 : f32
    %12 = vector.broadcast %cst_8 : f32 to vector<256x128xf32>
    %13 = arith.addf %12, %11 : vector<256x128xf32>
    %cst_9 = arith.constant 1.000000e+00 : f32
    %14 = vector.broadcast %cst_9 : f32 to vector<256x128xf32>
    %15 = arith.addf %14, %11 : vector<256x128xf32>
    %16 = arith.mulf %13, %15 : vector<256x128xf32>
    %cst_10 = arith.constant 1.000000e+00 : f32
    %17 = vector.broadcast %cst_10 : f32 to vector<256x128xf32>
    %18 = arith.subf %16, %17 : vector<256x128xf32>
    %cst_11 = arith.constant 1.000000e+00 : f32
    %19 = vector.broadcast %cst_11 : f32 to vector<256x128xf32>
    %20 = arith.addf %16, %19 : vector<256x128xf32>
    %21 = tpu.reciprocal %20 {approx = true} : vector<256x128xf32> -> vector<256x128xf32>
    %22 = arith.mulf %18, %21 : vector<256x128xf32>
    %23 = arith.mulf %8, %22 : vector<256x128xf32>
    %24 = arith.truncf %23 : vector<256x128xf32> to vector<256x128xbf16>
    %c0_12 = arith.constant 0 : index
    %c0_13 = arith.constant 0 : index
    %25 = vector.load %arg5[%c0_12, %c0_13] : memref<256x128xbf16, #tpu.memory_space<vmem>>, vector<256x128xbf16>
    tpu.vector_store %arg5[%c0_12, %c0_13], %24 {strides = array<i32>} : memref<256x128xbf16, #tpu.memory_space<vmem>>, vector<256x128xbf16>,
    return
  }
  func.func @transform_0(%arg0: i32) -> (i32, i32) {
    %c0_i32 = arith.constant 0 : i32
    %c0_i32_0 = arith.constant 0 : i32
    return %arg0, %c0_i32 : i32, i32
  }
  func.func @transform_1(%arg0: i32) -> (i32, i32) {
    %c0_i32 = arith.constant 0 : i32
    %c0_i32_0 = arith.constant 0 : i32
    %c0_i32_1 = arith.constant 0 : i32
    return %c0_i32, %c0_i32_0 : i32, i32
  }
  func.func @transform_2(%arg0: i32) -> (i32, i32) {
    %c0_i32 = arith.constant 0 : i32
    %c0_i32_0 = arith.constant 0 : i32
    %c0_i32_1 = arith.constant 0 : i32
    return %c0_i32, %c0_i32_0 : i32, i32
  }
  func.func @transform_3(%arg0: i32) -> (i32, i32) {
    %c0_i32 = arith.constant 0 : i32
    %c0_i32_0 = arith.constant 0 : i32
    %c0_i32_1 = arith.constant 0 : i32
    return %c0_i32, %c0_i32_0 : i32, i32
  }
  func.func @transform_4(%arg0: i32) -> (i32, i32) {
    %c0_i32 = arith.constant 0 : i32
    %c0_i32_0 = arith.constant 0 : i32
    return %arg0, %c0_i32 : i32, i32
  }
}

module attributes {stable_mosaic.version = 11 : i64} {
  func.func @_matmul_bn_act_kernel(%arg0: i32, %arg1: memref<256x240xbf16, #tpu.memory_space<vmem>>, %arg2: memref<240x128xbf16, #tpu.memory_space<vmem>>, %arg3: memref<1x128xf32, #tpu.memory_space<vmem>>, %arg4: memref<1x128xf32, #tpu.memory_space<vmem>>, %arg5: memref<256x128xbf16, #tpu.memory_space<vmem>>) attributes {dimension_semantics = [#tpu.dimension_semantics<parallel>], iteration_bounds = array<i64: 1>, scalar_prefetch = 0 : i64, scratch_operands = 0 : i64, tpu.core_type = #tpu.core_type<tc>, window_params = [{transform_indices = @transform_0, window_bounds = array<i64: 256, 240>}, {pipeline_mode = #tpu.pipeline_mode<synchronous>, transform_indices = @transform_1, window_bounds = array<i64: 240, 128>}, {pipeline_mode = #tpu.pipeline_mode<synchronous>, transform_indices = @transform_2, window_bounds = array<i64: 1, 128>}, {pipeline_mode = #tpu.pipeline_mode<synchronous>, transform_indices = @transform_3, window_bounds = array<i64: 1, 128>}, {transform_indices = @transform_4, window_bounds = array<i64: 256, 128>}]} {
    %c0 = arith.constant 0 : index
    %c0_0 = arith.constant 0 : index
    %0 = vector.load %arg1[%c0, %c0_0] : memref<256x240xbf16, #tpu.memory_space<vmem>>, vector<256x240xbf16>
    %c0_1 = arith.constant 0 : index
    %c0_2 = arith.constant 0 : index
    %1 = vector.load %arg2[%c0_1, %c0_2] : memref<240x128xbf16, #tpu.memory_space<vmem>>, vector<240x128xbf16>
    %cst = arith.constant dense<0.000000e+00> : vector<256x128xf32>
    %2 = tpu.matmul %0, %1, %cst {dimension_numbers = #tpu.dot_dimension_numbers<[1], [0], [0], [1], [0, 0, 1, 1], [], []>} : vector<256x240xbf16>, vector<240x128xbf16>, vector<256x128xf32> -> vector<256x128xf32>
    %c0_3 = arith.constant 0 : index
    %c0_4 = arith.constant 0 : index
    %3 = vector.load %arg3[%c0_3, %c0_4] : memref<1x128xf32, #tpu.memory_space<vmem>>, vector<1x128xf32>
    %4 = vector.broadcast %3 : vector<1x128xf32> to vector<256x128xf32>
    %5 = arith.mulf %2, %4 : vector<256x128xf32>
    %c0_5 = arith.constant 0 : index
    %c0_6 = arith.constant 0 : index
    %6 = vector.load %arg4[%c0_5, %c0_6] : memref<1x128xf32, #tpu.memory_space<vmem>>, vector<1x128xf32>
    %7 = vector.broadcast %6 : vector<1x128xf32> to vector<256x128xf32>
    %8 = arith.addf %5, %7 : vector<256x128xf32>
    %cst_7 = arith.constant 2.000000e+01 : f32
    %9 = vector.broadcast %cst_7 : f32 to vector<256x128xf32>
    %10 = arith.minimumf %8, %9 : vector<256x128xf32>
    %11 = math.exp %10 : vector<256x128xf32>
    %cst_8 = arith.constant 1.000000e+00 : f32
    %12 = vector.broadcast %cst_8 : f32 to vector<256x128xf32>
    %13 = arith.addf %12, %11 : vector<256x128xf32>
    %cst_9 = arith.constant 1.000000e+00 : f32
    %14 = vector.broadcast %cst_9 : f32 to vector<256x128xf32>
    %15 = arith.addf %14, %11 : vector<256x128xf32>
    %16 = arith.mulf %13, %15 : vector<256x128xf32>
    %cst_10 = arith.constant 1.000000e+00 : f32
    %17 = vector.broadcast %cst_10 : f32 to vector<256x128xf32>
    %18 = arith.subf %16, %17 : vector<256x128xf32>
    %cst_11 = arith.constant 1.000000e+00 : f32
    %19 = vector.broadcast %cst_11 : f32 to vector<256x128xf32>
    %20 = arith.addf %16, %19 : vector<256x128xf32>
    %21 = tpu.reciprocal %20 {approx = true} : vector<256x128xf32> -> vector<256x128xf32>
    %22 = arith.mulf %18, %21 : vector<256x128xf32>
    %23 = arith.mulf %8, %22 : vector<256x128xf32>
    %24 = arith.truncf %23 : vector<256x128xf32> to vector<256x128xbf16>
    %c0_12 = arith.constant 0 : index
    %c0_13 = arith.constant 0 : index
    %25 = vector.load %arg5[%c0_12, %c0_13] : memref<256x128xbf16, #tpu.memory_space<vmem>>, vector<256x128xbf16>
    tpu.vector_store %arg5[%c0_12, %c0_13], %24 {strides = array<i32>} : memref<256x128xbf16, #tpu.memory_space<vmem>>, vector<256x128xbf16>,
    return
  }
  func.func @transform_0(%arg0: i32) -> (i32, i32) {
    %c0_i32 = arith.constant 0 : i32
    %c0_i32_0 = arith.constant 0 : i32
    return %arg0, %c0_i32 : i32, i32
  }
  func.func @transform_1(%arg0: i32) -> (i32, i32) {
    %c0_i32 = arith.constant 0 : i32
    %c0_i32_0 = arith.constant 0 : i32
    %c0_i32_1 = arith.constant 0 : i32
    return %c0_i32, %c0_i32_0 : i32, i32
  }
  func.func @transform_2(%arg0: i32) -> (i32, i32) {
    %c0_i32 = arith.constant 0 : i32
    %c0_i32_0 = arith.constant 0 : i32
    %c0_i32_1 = arith.constant 0 : i32
    return %c0_i32, %c0_i32_0 : i32, i32
  }
  func.func @transform_3(%arg0: i32) -> (i32, i32) {
    %c0_i32 = arith.constant 0 : i32
    %c0_i32_0 = arith.constant 0 : i32
    %c0_i32_1 = arith.constant 0 : i32
    return %c0_i32, %c0_i32_0 : i32, i32
  }
  func.func @transform_4(%arg0: i32) -> (i32, i32) {
    %c0_i32 = arith.constant 0 : i32
    %c0_i32_0 = arith.constant 0 : i32
    return %arg0, %c0_i32 : i32, i32
  }
}

module attributes {stable_mosaic.version = 11 : i64} {
  func.func @_matmul_bn_act_kernel(%arg0: i32, %arg1: memref<256x336xbf16, #tpu.memory_space<vmem>>, %arg2: memref<336x128xbf16, #tpu.memory_space<vmem>>, %arg3: memref<1x128xf32, #tpu.memory_space<vmem>>, %arg4: memref<1x128xf32, #tpu.memory_space<vmem>>, %arg5: memref<256x128xbf16, #tpu.memory_space<vmem>>) attributes {dimension_semantics = [#tpu.dimension_semantics<parallel>], iteration_bounds = array<i64: 1>, scalar_prefetch = 0 : i64, scratch_operands = 0 : i64, tpu.core_type = #tpu.core_type<tc>, window_params = [{transform_indices = @transform_0, window_bounds = array<i64: 256, 336>}, {pipeline_mode = #tpu.pipeline_mode<synchronous>, transform_indices = @transform_1, window_bounds = array<i64: 336, 128>}, {pipeline_mode = #tpu.pipeline_mode<synchronous>, transform_indices = @transform_2, window_bounds = array<i64: 1, 128>}, {pipeline_mode = #tpu.pipeline_mode<synchronous>, transform_indices = @transform_3, window_bounds = array<i64: 1, 128>}, {transform_indices = @transform_4, window_bounds = array<i64: 256, 128>}]} {
    %c0 = arith.constant 0 : index
    %c0_0 = arith.constant 0 : index
    %0 = vector.load %arg1[%c0, %c0_0] : memref<256x336xbf16, #tpu.memory_space<vmem>>, vector<256x336xbf16>
    %c0_1 = arith.constant 0 : index
    %c0_2 = arith.constant 0 : index
    %1 = vector.load %arg2[%c0_1, %c0_2] : memref<336x128xbf16, #tpu.memory_space<vmem>>, vector<336x128xbf16>
    %cst = arith.constant dense<0.000000e+00> : vector<256x128xf32>
    %2 = tpu.matmul %0, %1, %cst {dimension_numbers = #tpu.dot_dimension_numbers<[1], [0], [0], [1], [0, 0, 1, 1], [], []>} : vector<256x336xbf16>, vector<336x128xbf16>, vector<256x128xf32> -> vector<256x128xf32>
    %c0_3 = arith.constant 0 : index
    %c0_4 = arith.constant 0 : index
    %3 = vector.load %arg3[%c0_3, %c0_4] : memref<1x128xf32, #tpu.memory_space<vmem>>, vector<1x128xf32>
    %4 = vector.broadcast %3 : vector<1x128xf32> to vector<256x128xf32>
    %5 = arith.mulf %2, %4 : vector<256x128xf32>
    %c0_5 = arith.constant 0 : index
    %c0_6 = arith.constant 0 : index
    %6 = vector.load %arg4[%c0_5, %c0_6] : memref<1x128xf32, #tpu.memory_space<vmem>>, vector<1x128xf32>
    %7 = vector.broadcast %6 : vector<1x128xf32> to vector<256x128xf32>
    %8 = arith.addf %5, %7 : vector<256x128xf32>
    %cst_7 = arith.constant 2.000000e+01 : f32
    %9 = vector.broadcast %cst_7 : f32 to vector<256x128xf32>
    %10 = arith.minimumf %8, %9 : vector<256x128xf32>
    %11 = math.exp %10 : vector<256x128xf32>
    %cst_8 = arith.constant 1.000000e+00 : f32
    %12 = vector.broadcast %cst_8 : f32 to vector<256x128xf32>
    %13 = arith.addf %12, %11 : vector<256x128xf32>
    %cst_9 = arith.constant 1.000000e+00 : f32
    %14 = vector.broadcast %cst_9 : f32 to vector<256x128xf32>
    %15 = arith.addf %14, %11 : vector<256x128xf32>
    %16 = arith.mulf %13, %15 : vector<256x128xf32>
    %cst_10 = arith.constant 1.000000e+00 : f32
    %17 = vector.broadcast %cst_10 : f32 to vector<256x128xf32>
    %18 = arith.subf %16, %17 : vector<256x128xf32>
    %cst_11 = arith.constant 1.000000e+00 : f32
    %19 = vector.broadcast %cst_11 : f32 to vector<256x128xf32>
    %20 = arith.addf %16, %19 : vector<256x128xf32>
    %21 = tpu.reciprocal %20 {approx = true} : vector<256x128xf32> -> vector<256x128xf32>
    %22 = arith.mulf %18, %21 : vector<256x128xf32>
    %23 = arith.mulf %8, %22 : vector<256x128xf32>
    %24 = arith.truncf %23 : vector<256x128xf32> to vector<256x128xbf16>
    %c0_12 = arith.constant 0 : index
    %c0_13 = arith.constant 0 : index
    %25 = vector.load %arg5[%c0_12, %c0_13] : memref<256x128xbf16, #tpu.memory_space<vmem>>, vector<256x128xbf16>
    tpu.vector_store %arg5[%c0_12, %c0_13], %24 {strides = array<i32>} : memref<256x128xbf16, #tpu.memory_space<vmem>>, vector<256x128xbf16>,
    return
  }
  func.func @transform_0(%arg0: i32) -> (i32, i32) {
    %c0_i32 = arith.constant 0 : i32
    %c0_i32_0 = arith.constant 0 : i32
    return %arg0, %c0_i32 : i32, i32
  }
  func.func @transform_1(%arg0: i32) -> (i32, i32) {
    %c0_i32 = arith.constant 0 : i32
    %c0_i32_0 = arith.constant 0 : i32
    %c0_i32_1 = arith.constant 0 : i32
    return %c0_i32, %c0_i32_0 : i32, i32
  }
  func.func @transform_2(%arg0: i32) -> (i32, i32) {
    %c0_i32 = arith.constant 0 : i32
    %c0_i32_0 = arith.constant 0 : i32
    %c0_i32_1 = arith.constant 0 : i32
    return %c0_i32, %c0_i32_0 : i32, i32
  }
  func.func @transform_3(%arg0: i32) -> (i32, i32) {
    %c0_i32 = arith.constant 0 : i32
    %c0_i32_0 = arith.constant 0 : i32
    %c0_i32_1 = arith.constant 0 : i32
    return %c0_i32, %c0_i32_0 : i32, i32
  }
  func.func @transform_4(%arg0: i32) -> (i32, i32) {
    %c0_i32 = arith.constant 0 : i32
    %c0_i32_0 = arith.constant 0 : i32
    return %arg0, %c0_i32 : i32, i32
  }
}

module attributes {stable_mosaic.version = 11 : i64} {
  func.func @_matmul_bn_mish_pool_kernel(%arg0: i32, %arg1: memref<128x120xbf16, #tpu.memory_space<vmem>>, %arg2: memref<120x128xbf16, #tpu.memory_space<vmem>>, %arg3: memref<1x128xf32, #tpu.memory_space<vmem>>, %arg4: memref<1x128xf32, #tpu.memory_space<vmem>>, %arg5: memref<2x128xf32, #tpu.memory_space<vmem>>) attributes {dimension_semantics = [#tpu.dimension_semantics<arbitrary>], iteration_bounds = array<i64: 1>, scalar_prefetch = 0 : i64, scratch_operands = 0 : i64, tpu.core_type = #tpu.core_type<tc>, window_params = [{pipeline_mode = #tpu.pipeline_mode<synchronous>, transform_indices = @transform_0, window_bounds = array<i64: 128, 120>}, {pipeline_mode = #tpu.pipeline_mode<synchronous>, transform_indices = @transform_1, window_bounds = array<i64: 120, 128>}, {pipeline_mode = #tpu.pipeline_mode<synchronous>, transform_indices = @transform_2, window_bounds = array<i64: 1, 128>}, {pipeline_mode = #tpu.pipeline_mode<synchronous>, transform_indices = @transform_3, window_bounds = array<i64: 1, 128>}, {pipeline_mode = #tpu.pipeline_mode<synchronous>, transform_indices = @transform_4, window_bounds = array<i64: 2, 128>}]} {
    %c0 = arith.constant 0 : index
    %c0_0 = arith.constant 0 : index
    %0 = vector.load %arg1[%c0, %c0_0] : memref<128x120xbf16, #tpu.memory_space<vmem>>, vector<128x120xbf16>
    %c0_1 = arith.constant 0 : index
    %c0_2 = arith.constant 0 : index
    %1 = vector.load %arg2[%c0_1, %c0_2] : memref<120x128xbf16, #tpu.memory_space<vmem>>, vector<120x128xbf16>
    %cst = arith.constant dense<0.000000e+00> : vector<128x128xf32>
    %2 = tpu.matmul %0, %1, %cst {dimension_numbers = #tpu.dot_dimension_numbers<[1], [0], [0], [1], [0, 0, 1, 1], [], []>} : vector<128x120xbf16>, vector<120x128xbf16>, vector<128x128xf32> -> vector<128x128xf32>
    %c0_3 = arith.constant 0 : index
    %c0_4 = arith.constant 0 : index
    %3 = vector.load %arg3[%c0_3, %c0_4] : memref<1x128xf32, #tpu.memory_space<vmem>>, vector<1x128xf32>
    %4 = vector.broadcast %3 : vector<1x128xf32> to vector<128x128xf32>
    %5 = arith.mulf %2, %4 : vector<128x128xf32>
    %c0_5 = arith.constant 0 : index
    %c0_6 = arith.constant 0 : index
    %6 = vector.load %arg4[%c0_5, %c0_6] : memref<1x128xf32, #tpu.memory_space<vmem>>, vector<1x128xf32>
    %7 = vector.broadcast %6 : vector<1x128xf32> to vector<128x128xf32>
    %8 = arith.addf %5, %7 : vector<128x128xf32>
    %cst_7 = arith.constant 2.000000e+01 : f32
    %9 = vector.broadcast %cst_7 : f32 to vector<128x128xf32>
    %10 = arith.minimumf %8, %9 : vector<128x128xf32>
    %11 = math.exp %10 : vector<128x128xf32>
    %cst_8 = arith.constant 1.000000e+00 : f32
    %12 = vector.broadcast %cst_8 : f32 to vector<128x128xf32>
    %13 = arith.addf %12, %11 : vector<128x128xf32>
    %cst_9 = arith.constant 1.000000e+00 : f32
    %14 = vector.broadcast %cst_9 : f32 to vector<128x128xf32>
    %15 = arith.addf %14, %11 : vector<128x128xf32>
    %16 = arith.mulf %13, %15 : vector<128x128xf32>
    %cst_10 = arith.constant 1.000000e+00 : f32
    %17 = vector.broadcast %cst_10 : f32 to vector<128x128xf32>
    %18 = arith.subf %16, %17 : vector<128x128xf32>
    %cst_11 = arith.constant 1.000000e+00 : f32
    %19 = vector.broadcast %cst_11 : f32 to vector<128x128xf32>
    %20 = arith.addf %16, %19 : vector<128x128xf32>
    %21 = tpu.reciprocal %20 {approx = true} : vector<128x128xf32> -> vector<128x128xf32>
    %22 = arith.mulf %18, %21 : vector<128x128xf32>
    %23 = arith.mulf %8, %22 : vector<128x128xf32>
    %24 = vector.extract_strided_slice %23 {offsets = [0, 0], sizes = [64, 128], strides = [1, 1]} : vector<128x128xf32> to vector<64x128xf32>
    %cst_12 = arith.constant dense<0.000000e+00> : vector<128xf32>
    %25 = vector.multi_reduction <add>, %24, %cst_12 [0] : vector<64x128xf32> to vector<128xf32>
    %26 = vector.shape_cast %25 : vector<128xf32> to vector<1x128xf32>
    %cst_13 = arith.constant 6.400000e+01 : f32
    %27 = vector.broadcast %cst_13 : f32 to vector<1x128xf32>
    %28 = arith.divf %26, %27 : vector<1x128xf32>
    %c0_14 = arith.constant 0 : index
    %c0_15 = arith.constant 0 : index
    %29 = vector.load %arg5[%c0_14, %c0_15] : memref<2x128xf32, #tpu.memory_space<vmem>>, vector<1x128xf32>
    tpu.vector_store %arg5[%c0_14, %c0_15], %28 {strides = array<i32>} : memref<2x128xf32, #tpu.memory_space<vmem>>, vector<1x128xf32>,
    %30 = vector.extract_strided_slice %23 {offsets = [64, 0], sizes = [64, 128], strides = [1, 1]} : vector<128x128xf32> to vector<64x128xf32>
    %cst_16 = arith.constant dense<0.000000e+00> : vector<128xf32>
    %31 = vector.multi_reduction <add>, %30, %cst_16 [0] : vector<64x128xf32> to vector<128xf32>
    %32 = vector.shape_cast %31 : vector<128xf32> to vector<1x128xf32>
    %cst_17 = arith.constant 6.400000e+01 : f32
    %33 = vector.broadcast %cst_17 : f32 to vector<1x128xf32>
    %34 = arith.divf %32, %33 : vector<1x128xf32>
    %c1 = arith.constant 1 : index
    %c0_18 = arith.constant 0 : index
    %35 = vector.load %arg5[%c1, %c0_18] : memref<2x128xf32, #tpu.memory_space<vmem>>, vector<1x128xf32>
    tpu.vector_store %arg5[%c1, %c0_18], %34 {strides = array<i32>} : memref<2x128xf32, #tpu.memory_space<vmem>>, vector<1x128xf32>,
    return
  }
  func.func @transform_0(%arg0: i32) -> (i32, i32) {
    %c0_i32 = arith.constant 0 : i32
    %c0_i32_0 = arith.constant 0 : i32
    %c0_i32_1 = arith.constant 0 : i32
    return %c0_i32, %c0_i32_0 : i32, i32
  }
  func.func @transform_1(%arg0: i32) -> (i32, i32) {
    %c0_i32 = arith.constant 0 : i32
    %c0_i32_0 = arith.constant 0 : i32
    %c0_i32_1 = arith.constant 0 : i32
    return %c0_i32, %c0_i32_0 : i32, i32
  }
  func.func @transform_2(%arg0: i32) -> (i32, i32) {
    %c0_i32 = arith.constant 0 : i32
    %c0_i32_0 = arith.constant 0 : i32
    %c0_i32_1 = arith.constant 0 : i32
    return %c0_i32, %c0_i32_0 : i32, i32
  }
  func.func @transform_3(%arg0: i32) -> (i32, i32) {
    %c0_i32 = arith.constant 0 : i32
    %c0_i32_0 = arith.constant 0 : i32
    %c0_i32_1 = arith.constant 0 : i32
    return %c0_i32, %c0_i32_0 : i32, i32
  }
  func.func @transform_4(%arg0: i32) -> (i32, i32) {
    %c0_i32 = arith.constant 0 : i32
    %c0_i32_0 = arith.constant 0 : i32
    %c0_i32_1 = arith.constant 0 : i32
    return %c0_i32, %c0_i32_0 : i32, i32
  }
}

module attributes {stable_mosaic.version = 11 : i64} {
  func.func @_matmul_bias_kernel(%arg0: i32, %arg1: memref<2x180xf32, #tpu.memory_space<vmem>>, %arg2: memref<180x128xf32, #tpu.memory_space<vmem>>, %arg3: memref<1x128xf32, #tpu.memory_space<vmem>>, %arg4: memref<2x128xf32, #tpu.memory_space<vmem>>) attributes {dimension_semantics = [#tpu.dimension_semantics<arbitrary>], iteration_bounds = array<i64: 1>, scalar_prefetch = 0 : i64, scratch_operands = 0 : i64, tpu.core_type = #tpu.core_type<tc>, window_params = [{pipeline_mode = #tpu.pipeline_mode<synchronous>, transform_indices = @transform_0, window_bounds = array<i64: 2, 180>}, {pipeline_mode = #tpu.pipeline_mode<synchronous>, transform_indices = @transform_1, window_bounds = array<i64: 180, 128>}, {pipeline_mode = #tpu.pipeline_mode<synchronous>, transform_indices = @transform_2, window_bounds = array<i64: 1, 128>}, {pipeline_mode = #tpu.pipeline_mode<synchronous>, transform_indices = @transform_3, window_bounds = array<i64: 2, 128>}]} {
    %c0 = arith.constant 0 : index
    %c0_0 = arith.constant 0 : index
    %0 = vector.load %arg1[%c0, %c0_0] : memref<2x180xf32, #tpu.memory_space<vmem>>, vector<2x180xf32>
    %c0_1 = arith.constant 0 : index
    %c0_2 = arith.constant 0 : index
    %1 = vector.load %arg2[%c0_1, %c0_2] : memref<180x128xf32, #tpu.memory_space<vmem>>, vector<180x128xf32>
    %cst = arith.constant dense<0.000000e+00> : vector<2x128xf32>
    %2 = tpu.matmul %0, %1, %cst {dimension_numbers = #tpu.dot_dimension_numbers<[1], [0], [0], [1], [0, 0, 1, 1], [], []>} : vector<2x180xf32>, vector<180x128xf32>, vector<2x128xf32> -> vector<2x128xf32>
    %c0_3 = arith.constant 0 : index
    %c0_4 = arith.constant 0 : index
    %3 = vector.load %arg3[%c0_3, %c0_4] : memref<1x128xf32, #tpu.memory_space<vmem>>, vector<1x128xf32>
    %4 = vector.broadcast %3 : vector<1x128xf32> to vector<2x128xf32>
    %5 = arith.addf %2, %4 : vector<2x128xf32>
    %c0_5 = arith.constant 0 : index
    %c0_6 = arith.constant 0 : index
    %6 = vector.load %arg4[%c0_5, %c0_6] : memref<2x128xf32, #tpu.memory_space<vmem>>, vector<2x128xf32>
    tpu.vector_store %arg4[%c0_5, %c0_6], %5 {strides = array<i32>} : memref<2x128xf32, #tpu.memory_space<vmem>>, vector<2x128xf32>,
    return
  }
  func.func @transform_0(%arg0: i32) -> (i32, i32) {
    %c0_i32 = arith.constant 0 : i32
    %c0_i32_0 = arith.constant 0 : i32
    %c0_i32_1 = arith.constant 0 : i32
    return %c0_i32, %c0_i32_0 : i32, i32
  }
  func.func @transform_1(%arg0: i32) -> (i32, i32) {
    %c0_i32 = arith.constant 0 : i32
    %c0_i32_0 = arith.constant 0 : i32
    %c0_i32_1 = arith.constant 0 : i32
    return %c0_i32, %c0_i32_0 : i32, i32
  }
  func.func @transform_2(%arg0: i32) -> (i32, i32) {
    %c0_i32 = arith.constant 0 : i32
    %c0_i32_0 = arith.constant 0 : i32
    %c0_i32_1 = arith.constant 0 : i32
    return %c0_i32, %c0_i32_0 : i32, i32
  }
  func.func @transform_3(%arg0: i32) -> (i32, i32) {
    %c0_i32 = arith.constant 0 : i32
    %c0_i32_0 = arith.constant 0 : i32
    %c0_i32_1 = arith.constant 0 : i32
    return %c0_i32, %c0_i32_0 : i32, i32
  }
}

</mosaic_0001>

<bundles_post_ra>
// kernel: mbsfc_forward.16
= control target key start
LH: loop header
LB: loop body
LE: loop exit
PB: predicated region body
PF: predicated region fallthrough
CT: control target
= control target key end

     0   :  { %vm180_vm0 = vcmask 1042432   ;;  %vm181_vm1 = vcmask 1043456   ;;  %v1093_v1 = vmov 65535   ;;  %vm131_vm2 = vcmask 56320   ;;  %s1446_s1 = inlined_call_operand.vmem [shape: bf16[7,128], index: 1, kind: input, shape index: {}]   ;;  %s1447_s0 = inlined_call_operand.vmem [shape: bf16[256,7], index: 0, kind: input, shape index: {}]   ;;  %s1448_s2 = inlined_call_operand.vmem [shape: f32[1,128], index: 2, kind: input, shape index: {}]   ;;  %s1449_s3 = inlined_call_operand.vmem [shape: f32[1,128], index: 3, kind: input, shape index: {}]   ;;  %s1450_s4 = inlined_call_operand.vmem [shape: bf16[256,128], index: 4, kind: output, shape index: {}]  }
   0x1   :  { %v50_v0 = vld [vmem:[%s1446_s1] sm:$0xf]  ;;  %v182_v2 = vsel %vm180_vm0, 4294967295, %v1093_v1  ;;  %v849_v9 = vld [vmem:[%s1447_s0 + $0x8] sm:$0xff]  ;;  %v850_v13 = vld [vmem:[%s1447_s0 + $0x10] sm:$0xff] }
   0x2   :  { %v183_v3 = vsel %vm181_vm1, %v182_v2, 0  ;;  %v848_v5 = vld [vmem:[%s1447_s0] sm:$0xff]  ;;  %v853_v10 = vld [vmem:[%s1447_s0 + $0x28] sm:$0xff]  ;;  %v854_v14 = vld [vmem:[%s1447_s0 + $0x30] sm:$0xff] }
   0x3   :  { %v185_v4 = vand.u32 %v183_v3, %v50_v0  ;;  %v852_v6 = vld [vmem:[%s1447_s0 + $0x20] sm:$0xff]  ;;  %v857_v11 = vld [vmem:[%s1447_s0 + $0x48] sm:$0xff]  ;;  %v858_v15 = vld [vmem:[%s1447_s0 + $0x50] sm:$0xff] }
   0x4   :  { %v856_v7 = vld [vmem:[%s1447_s0 + $0x40] sm:$0xff]  ;;  %v861_v12 = vld [vmem:[%s1447_s0 + $0x68] sm:$0xff]  ;;  %v862_v16 = vld [vmem:[%s1447_s0 + $0x70] sm:$0xff] }
   0x5   :  { %194 = vmatpush.bf16.msra.mxu0 %v185_v4  ;;  %959 = vmatpush.bf16.msra.mxu1 %v185_v4  ;;  %v860_v8 = vld [vmem:[%s1447_s0 + $0x60] sm:$0xff]  ;;  %v851_v17 = vld [vmem:[%s1447_s0 + $0x18] sm:$0xff] }
   0x6   :  { %960 = vmatpush.bf16.msra.mxu2 %v185_v4  ;;  %961 = vmatpush.bf16.msra.mxu3 %v185_v4  ;;  %v855_v18 = vld [vmem:[%s1447_s0 + $0x38] sm:$0xff]  ;;  %v1189_v21 = vld [vmem:[%s1448_s2] ss:$0 sm:$0xff] }
   0x7   :  { %v859_v19 = vld [vmem:[%s1447_s0 + $0x58] sm:$0xff]  ;;  %v1194_v22 = vld [vmem:[%s1449_s3] ss:$0 sm:$0xff] }
   0x8   :  { %800 = vmatmul.msk.bf16.vlgmr.msra.gmra.mxu0 %vm131_vm2, %v848_v5  ;;  %804 = vmatmul.msk.bf16.vlgmr.msra.gmra.mxu1 %vm131_vm2, %v852_v6  ;;  %v863_v20 = vld [vmem:[%s1447_s0 + $0x78] sm:$0xff] }
   0x9   :  { %808 = vmatmul.msk.bf16.vlgmr.msra.gmra.mxu2 %vm131_vm2, %v856_v7  ;;  %812 = vmatmul.msk.bf16.vlgmr.msra.gmra.mxu3 %vm131_vm2, %v860_v8 }
  0x18   :  { %801 = vmatmul.msk.bf16.gmra.mxu0 %vm131_vm2, %v849_v9  ;;  %805 = vmatmul.msk.bf16.gmra.mxu1 %vm131_vm2, %v853_v10 }
  0x19   :  { %809 = vmatmul.msk.bf16.gmra.mxu2 %vm131_vm2, %v857_v11  ;;  %813 = vmatmul.msk.bf16.gmra.mxu3 %vm131_vm2, %v861_v12 }
  0x28   :  { %802 = vmatmul.msk.bf16.gmra.mxu0 %vm131_vm2, %v850_v13  ;;  %806 = vmatmul.msk.bf16.gmra.mxu1 %vm131_vm2, %v854_v14 }
  0x29   :  { %810 = vmatmul.msk.bf16.gmra.mxu2 %vm131_vm2, %v858_v15  ;;  %814 = vmatmul.msk.bf16.gmra.mxu3 %vm131_vm2, %v862_v16 }
  0x38   :  { %803 = vmatmul.msk.bf16.gmra.mxu0 %vm131_vm2, %v851_v17  ;;  %807 = vmatmul.msk.bf16.gmra.mxu1 %vm131_vm2, %v855_v18 }
  0x39   :  { %811 = vmatmul.msk.bf16.gmra.mxu2 %vm131_vm2, %v859_v19  ;;  %815 = vmatmul.msk.bf16.gmra.mxu3 %vm131_vm2, %v863_v20 }
  0x85   :  { %v196_v23 = vpop.f32.mrf.mxu0  ;;  %v216_v24 = vpop.f32.mrf.mxu1 }
  0x86   :  { %v280_v25 = vmul.f32 %v1189_v21, %v196_v23  ;;  %v288_v26 = vmul.f32 %v1189_v21, %v216_v24 }
  0x88   :  { %v1199_v27 = vadd.f32 %v1194_v22, %v280_v25  ;;  %v1202_v28 = vadd.f32 %v1194_v22, %v288_v26 }
  0x8a   :  { %v348_v29 = vmin.f32 %v1199_v27, 20.0  ;;  %v356_v30 = vmin.f32 %v1202_v28, 20.0 }
  0x8c   :  { %v380_v31 = vmul.f32 1.442695, %v348_v29  ;;  %v396_v32 = vmul.f32 1.442695, %v356_v30  ;;  %v236_v33 = vpop.f32.mrf.mxu2  ;;  %v256_v34 = vpop.f32.mrf.mxu3 }
  0x8d   :  { %v296_v35 = vmul.f32 %v1189_v21, %v236_v33  ;;  %v304_v36 = vmul.f32 %v1189_v21, %v256_v34  ;;  %v198_v37 = vpop.f32.mrf.mxu0  ;;  %v218_v38 = vpop.f32.mrf.mxu1 }
  0x8e   :  { %965 = vpow2.f32 %v380_v31  ;;  %v281_v39 = vmul.f32 %v1189_v21, %v198_v37  ;;  %v289_v40 = vmul.f32 %v1189_v21, %v218_v38 }
  0x8f   :  { %967 = vpow2.f32 %v396_v32  ;;  %v1211_v41 = vadd.f32 %v1194_v22, %v296_v35  ;;  %v1214_v42 = vadd.f32 %v1194_v22, %v304_v36 }
  0x90   :  { %v1217_v43 = vadd.f32 %v1194_v22, %v281_v39  ;;  %v1220_v44 = vadd.f32 %v1194_v22, %v289_v40 }
  0x91   :  { %v364_v45 = vmin.f32 %v1211_v41, 20.0  ;;  %v372_v46 = vmin.f32 %v1214_v42, 20.0 }
  0x92   :  { %v349_v47 = vmin.f32 %v1217_v43, 20.0  ;;  %v357_v48 = vmin.f32 %v1220_v44, 20.0 }
  0x93   :  { %v412_v49 = vmul.f32 1.442695, %v364_v45  ;;  %v428_v50 = vmul.f32 1.442695, %v372_v46 }
  0x94   :  { %v966_v51 = vpop.eup %965  ;;  %v382_v52 = vmul.f32 1.442695, %v349_v47  ;;  %v398_v53 = vmul.f32 1.442695, %v357_v48  ;;  %v238_v54 = vpop.f32.mrf.mxu2 }
  0x95   :  { %v258_v55 = vpop.f32.mrf.mxu3  ;;  %v968_v56 = vpop.eup %967  ;;  %v444_v57 = vadd.f32 1.0, %v966_v51  ;;  %969 = vpow2.f32 %v412_v49  ;;  %v297_v58 = vmul.f32 %v1189_v21, %v238_v54 }
  0x96   :  { %v305_v59 = vmul.f32 %v1189_v21, %v258_v55  ;;  %v201_v60 = vpop.f32.mrf.mxu0  ;;  %v221_v61 = vpop.f32.mrf.mxu1  ;;  %v452_v62 = vadd.f32 1.0, %v968_v56  ;;  %971 = vpow2.f32 %v428_v50 }
  0x97   :  { %v282_v63 = vmul.f32 %v1189_v21, %v201_v60  ;;  %v290_v0 = vmul.f32 %v1189_v21, %v221_v61  ;;  %v476_v1 = vmul.f32 %v444_v57, %v444_v57  ;;  %973 = vpow2.f32 %v382_v52 }
  0x98   :  { %v1231_v2 = vadd.f32 %v1194_v22, %v297_v58  ;;  %v1234_v3 = vadd.f32 %v1194_v22, %v305_v59  ;;  %v484_v4 = vmul.f32 %v452_v62, %v452_v62  ;;  %975 = vpow2.f32 %v398_v53 }
  0x99   :  { %v1237_v5 = vadd.f32 %v1194_v22, %v282_v63  ;;  %v1240_v6 = vadd.f32 %v1194_v22, %v290_v0  ;;  %v540_v7 = vadd.f32 1.0, %v476_v1  ;;  %v816_v29 = vadd.f32 -1.0, %v476_v1 }
  0x9a   :  { %v365_v8 = vmin.f32 %v1231_v2, 20.0  ;;  %v373_v9 = vmin.f32 %v1234_v3, 20.0  ;;  %v548_v10 = vadd.f32 1.0, %v484_v4  ;;  %v824_v37 = vadd.f32 -1.0, %v484_v4 }
  0x9b   :  { %v350_v11 = vmin.f32 %v1237_v5, 20.0  ;;  %v358_v12 = vmin.f32 %v1240_v6, 20.0  ;;  %v970_v13 = vpop.eup %969  ;;  %977 = vrcp.f32 %v540_v7 }
  0x9c   :  { %v414_v14 = vmul.f32 1.442695, %v365_v8  ;;  %v430_v15 = vmul.f32 1.442695, %v373_v9  ;;  %v972_v16 = vpop.eup %971  ;;  %979 = vrcp.f32 %v548_v10  ;;  %v460_v17 = vadd.f32 1.0, %v970_v13  ;;  %v241_v20 = vpop.f32.mrf.mxu2 }
  0x9d   :  { %v384_v18 = vmul.f32 1.442695, %v350_v11  ;;  %v400_v19 = vmul.f32 1.442695, %v358_v12  ;;  %v974_v23 = vpop.eup %973  ;;  %v468_v24 = vadd.f32 1.0, %v972_v16  ;;  %v298_v25 = vmul.f32 %v1189_v21, %v241_v20  ;;  %v261_v32 = vpop.f32.mrf.mxu3 }
  0x9e   :  { %981 = vpow2.f32 %v414_v14  ;;  %v976_v26 = vpop.eup %975  ;;  %v492_v30 = vmul.f32 %v460_v17, %v460_v17  ;;  %v445_v31 = vadd.f32 1.0, %v974_v23  ;;  %v203_v36 = vpop.f32.mrf.mxu0  ;;  %v306_v48 = vmul.f32 %v1189_v21, %v261_v32 }
  0x9f   :  { %983 = vpow2.f32 %v430_v15  ;;  %v500_v33 = vmul.f32 %v468_v24, %v468_v24  ;;  %v453_v34 = vadd.f32 1.0, %v976_v26  ;;  %v1248_v35 = vadd.f32 %v1194_v22, %v298_v25  ;;  %v223_v12 = vpop.f32.mrf.mxu1 }
  0xa0   :  { %985 = vpow2.f32 %v384_v18  ;;  %v556_v38 = vadd.f32 1.0, %v492_v30  ;;  %v477_v39 = vmul.f32 %v445_v31, %v445_v31  ;;  %v283_v51 = vmul.f32 %v1189_v21, %v203_v36 }
  0xa1   :  { %987 = vpow2.f32 %v400_v19  ;;  %v978_v40 = vpop.eup %977  ;;  %v564_v45 = vadd.f32 1.0, %v500_v33  ;;  %v485_v46 = vmul.f32 %v453_v34, %v453_v34  ;;  %v366_v47 = vmin.f32 %v1248_v35, 20.0 }
  0xa2   :  { %v980_v49 = vpop.eup %979  ;;  %989 = vrcp.f32 %v556_v38  ;;  %v541_v50 = vadd.f32 1.0, %v477_v39  ;;  %v604_v53 = vmul.f32 %v978_v40, %v816_v29  ;;  %v832_v54 = vadd.f32 -1.0, %v492_v30 }
  0xa3   :  { %991 = vrcp.f32 %v564_v45  ;;  %v549_v55 = vadd.f32 1.0, %v485_v46  ;;  %v612_v57 = vmul.f32 %v980_v49, %v824_v37  ;;  %v416_v59 = vmul.f32 1.442695, %v366_v47 }
  0xa4   :  { %v982_v52 = vpop.eup %981  ;;  %993 = vrcp.f32 %v541_v50  ;;  %v840_v61 = vadd.f32 -1.0, %v500_v33  ;;  %v1254_v63 = vadd.f32 %v1194_v22, %v306_v48  ;;  %v1257_v7 = vadd.f32 %v1194_v22, %v283_v51 }
  0xa5   :  { %v984_v56 = vpop.eup %983  ;;  %v461_v58 = vadd.f32 1.0, %v982_v52  ;;  %995 = vrcp.f32 %v549_v55  ;;  %v817_v8 = vadd.f32 -1.0, %v477_v39  ;;  %v825_v9 = vadd.f32 -1.0, %v485_v46  ;;  %v263_v34 = vpop.f32.mrf.mxu3 }
  0xa6   :  { %v986_v60 = vpop.eup %985  ;;  %v469_v62 = vadd.f32 1.0, %v984_v56  ;;  %997 = vpow2.f32 %v416_v59  ;;  %v636_v14 = vmul.f32 %v604_v53, %v1199_v27  ;;  %v644_v15 = vmul.f32 %v612_v57, %v1202_v28  ;;  %v243_v28 = vpop.f32.mrf.mxu2 }
  0xa7   :  { %v988_v0 = vpop.eup %987  ;;  %v493_v1 = vmul.f32 %v461_v58, %v461_v58  ;;  %v446_v4 = vadd.f32 1.0, %v986_v60  ;;  %v374_v23 = vmin.f32 %v1254_v63, 20.0  ;;  %v351_v24 = vmin.f32 %v1257_v7, 20.0  ;;  %v206_v48 = vpop.f32.mrf.mxu0 }
  0xa8   :  { %v501_v10 = vmul.f32 %v469_v62, %v469_v62  ;;  %v454_v11 = vadd.f32 1.0, %v988_v0  ;;  %v990_v13 = vpop.eup %989  ;;  %v291_v30 = vmul.f32 %v1189_v21, %v223_v12  ;;  %v299_v51 = vmul.f32 %v1189_v21, %v243_v28 }
  0xa9   :  { %v557_v16 = vadd.f32 1.0, %v493_v1  ;;  %v478_v17 = vmul.f32 %v446_v4, %v446_v4  ;;  %v992_v18 = vpop.eup %991  ;;  %v833_v26 = vadd.f32 -1.0, %v493_v1  ;;  %v620_v32 = vmul.f32 %v990_v13, %v832_v54 }
  0xaa   :  { %v565_v19 = vadd.f32 1.0, %v501_v10  ;;  %v486_v20 = vmul.f32 %v454_v11, %v454_v11  ;;  %v994_v25 = vpop.eup %993  ;;  %v841_v33 = vadd.f32 -1.0, %v501_v10  ;;  %v628_v37 = vmul.f32 %v992_v18, %v840_v61 }
  0xab   :  { %999 = vrcp.f32 %v557_v16  ;;  %v542_v29 = vadd.f32 1.0, %v478_v17  ;;  %v996_v31 = vpop.eup %995  ;;  %v605_v27 = vmul.f32 %v994_v25, %v817_v8  ;;  %v432_v46 = vmul.f32 1.442695, %v374_v23  ;;  %v226_v8 = vpop.f32.mrf.mxu1 }
  0xac   :  { %1001 = vrcp.f32 %v565_v19  ;;  %v998_v36 = vpop.eup %997  ;;  %v613_v38 = vmul.f32 %v996_v31, %v825_v9  ;;  %v550_v39 = vadd.f32 1.0, %v486_v20  ;;  %v386_v47 = vmul.f32 1.442695, %v351_v24 }
  0xad   :  { %1003 = vrcp.f32 %v542_v29  ;;  %v637_v40 = vmul.f32 %v605_v27, %v1217_v43  ;;  %v462_v45 = vadd.f32 1.0, %v998_v36  ;;  %v1267_v50 = vadd.f32 %v1194_v22, %v291_v30 }
  0xae   :  { %v645_v49 = vmul.f32 %v613_v38, %v1220_v44  ;;  %1005 = vrcp.f32 %v550_v39  ;;  %v818_v53 = vadd.f32 -1.0, %v478_v17  ;;  %v307_v54 = vmul.f32 %v1189_v21, %v263_v34  ;;  %v246_v25 = vpop.f32.mrf.mxu2 }
  0xaf   :  { %v867_v52 = vpack.c.bf16 %v637_v40, %v636_v14  ;;  %1007 = vpow2.f32 %v432_v46  ;;  %v359_v43 = vmin.f32 %v1267_v50, 20.0  ;;  %v1273_v57 = vadd.f32 %v1194_v22, %v299_v51 }
  0xb0   :  { %v887_v56 = vpack.c.bf16 %v645_v49, %v644_v15  ;;  %1009 = vpow2.f32 %v386_v47  ;;  %v652_v58 = vmul.f32 %v620_v32, %v1211_v41  ;;  %v494_v60 = vmul.f32 %v462_v45, %v462_v45  ;;  %v208_v32 = vpop.f32.mrf.mxu0 }
  0xb1   :  { %v1000_v55 = vpop.eup %999  ;;  %868 = vst [vmem:[%s1450_s4] sm:$0xff] %v867_v52   ;;  %v1280_v61 = vadd.f32 %v1194_v22, %v307_v54  ;;  %v402_v1 = vmul.f32 1.442695, %v359_v43  ;;  %v367_v4 = vmin.f32 %v1273_v57, 20.0  ;;  %v284_v41 = vmul.f32 %v1189_v21, %v206_v48 }
  0xb2   :  { %v1002_v44 = vpop.eup %1001  ;;  %v621_v59 = vmul.f32 %v1000_v55, %v833_v26  ;;  %947 = vst [vmem:[%s1450_s4 + $0x20] sm:$0xff] %v887_v56   ;;  %v660_v9 = vmul.f32 %v628_v37, %v1214_v42  ;;  %v826_v11 = vadd.f32 -1.0, %v486_v20  ;;  %v558_v23 = vadd.f32 1.0, %v494_v60  ;;  %v266_v42 = vpop.f32.mrf.mxu3 }
  0xb3   :  { %v1004_v62 = vpop.eup %1003  ;;  %v629_v0 = vmul.f32 %v1002_v44, %v841_v33  ;;  %v375_v12 = vmin.f32 %v1280_v61, 20.0  ;;  %1011 = vpow2.f32 %v402_v1  ;;  %v418_v15 = vmul.f32 1.442695, %v367_v4  ;;  %v228_v55 = vpop.f32.mrf.mxu1 }
  0xb4   :  { %v653_v10 = vmul.f32 %v621_v59, %v1231_v2  ;;  %v1006_v13 = vpop.eup %1005  ;;  %v1292_v16 = vadd.f32 %v1194_v22, %v284_v41  ;;  %v606_v19 = vmul.f32 %v1004_v62, %v818_v53  ;;  %v292_v31 = vmul.f32 %v1189_v21, %v226_v8 }
  0xb5   :  { %v661_v14 = vmul.f32 %v629_v0, %v1234_v3  ;;  %v1008_v17 = vpop.eup %1007  ;;  %v434_v24 = vmul.f32 1.442695, %v375_v12  ;;  %1013 = vpow2.f32 %v418_v15  ;;  %v614_v3 = vmul.f32 %v1006_v13, %v826_v11 }
  0xb6   :  { %v907_v18 = vpack.c.bf16 %v653_v10, %v652_v58  ;;  %v1010_v26 = vpop.eup %1009  ;;  %v470_v20 = vadd.f32 1.0, %v1008_v17  ;;  %v352_v29 = vmin.f32 %v1292_v16, 20.0  ;;  %v300_v28 = vmul.f32 %v1189_v21, %v246_v25 }
  0xb7   :  { %v927_v2 = vpack.c.bf16 %v661_v14, %v660_v9  ;;  %v447_v30 = vadd.f32 1.0, %v1010_v26  ;;  %1015 = vpow2.f32 %v434_v24  ;;  %v308_v34 = vmul.f32 %v1189_v21, %v266_v42  ;;  %v248_v14 = vpop.f32.mrf.mxu2 }
  0xb8   :  { %951 = vst [vmem:[%s1450_s4 + $0x40] sm:$0xff] %v907_v18   ;;  %v502_v27 = vmul.f32 %v470_v20, %v470_v20  ;;  %v388_v33 = vmul.f32 1.442695, %v352_v29  ;;  %1017 = vrcp.f32 %v558_v23  ;;  %v1305_v37 = vadd.f32 %v1194_v22, %v292_v31  ;;  %v211_v29 = vpop.f32.mrf.mxu0 }
  0xb9   :  { %955 = vst [vmem:[%s1450_s4 + $0x60] sm:$0xff] %v927_v2   ;;  %v479_v36 = vmul.f32 %v447_v30, %v447_v30  ;;  %v1012_v38 = vpop.eup %1011  ;;  %v834_v39 = vadd.f32 -1.0, %v494_v60  ;;  %v285_v40 = vmul.f32 %v1189_v21, %v208_v32  ;;  %v1309_v45 = vmul.f32 %v606_v19, %v1237_v5 }
  0xba   :  { %1019 = vpow2.f32 %v388_v33  ;;  %v455_v47 = vadd.f32 1.0, %v1012_v38  ;;  %v360_v48 = vmin.f32 %v1305_v37, 20.0  ;;  %v1313_v51 = vmul.f32 %v614_v3, %v1240_v6  ;;  %v268_v15 = vpop.f32.mrf.mxu3 }
  0xbb   :  { %v543_v46 = vadd.f32 1.0, %v479_v36  ;;  %v1014_v49 = vpop.eup %1013  ;;  %v566_v52 = vadd.f32 1.0, %v502_v27  ;;  %v1316_v53 = vadd.f32 %v1194_v22, %v300_v28  ;;  %v1319_v54 = vadd.f32 %v1194_v22, %v308_v34 }
  0xbc   :  { %v487_v5 = vmul.f32 %v455_v47, %v455_v47  ;;  %v463_v43 = vadd.f32 1.0, %v1014_v49  ;;  %v404_v44 = vmul.f32 1.442695, %v360_v48  ;;  %v1324_v6 = vadd.f32 %v1194_v22, %v285_v40 }
  0xbd   :  { %v1016_v56 = vpop.eup %1015  ;;  %1021 = vrcp.f32 %v543_v46  ;;  %v368_v59 = vmin.f32 %v1316_v53, 20.0  ;;  %v376_v60 = vmin.f32 %v1319_v54, 20.0  ;;  %v293_v4 = vmul.f32 %v1189_v21, %v228_v55 }
  0xbe   :  { %v471_v58 = vadd.f32 1.0, %v1016_v56  ;;  %v1018_v62 = vpop.eup %1017  ;;  %v551_v0 = vadd.f32 1.0, %v487_v5  ;;  %v495_v1 = vmul.f32 %v463_v43, %v463_v43  ;;  %1023 = vpow2.f32 %v404_v44 }
  0xbf   :  { %1025 = vrcp.f32 %v566_v52  ;;  %v420_v9 = vmul.f32 1.442695, %v368_v59  ;;  %v353_v10 = vmin.f32 %v1324_v6, 20.0  ;;  %v436_v13 = vmul.f32 1.442695, %v376_v60 }
  0xc0   :  { %v1020_v41 = vpop.eup %1019  ;;  %v503_v8 = vmul.f32 %v471_v58, %v471_v58  ;;  %1027 = vrcp.f32 %v551_v0  ;;  %v559_v11 = vadd.f32 1.0, %v495_v1  ;;  %v819_v17 = vadd.f32 -1.0, %v479_v36 }
  0xc1   :  { %v448_v12 = vadd.f32 1.0, %v1020_v41  ;;  %1029 = vpow2.f32 %v420_v9  ;;  %v390_v19 = vmul.f32 1.442695, %v353_v10  ;;  %v622_v24 = vmul.f32 %v1018_v62, %v834_v39 }
  0xc2   :  { %v567_v18 = vadd.f32 1.0, %v503_v8  ;;  %1031 = vrcp.f32 %v559_v11  ;;  %v1329_v42 = vadd.f32 %v1194_v22, %v293_v4  ;;  %v301_v2 = vmul.f32 %v1189_v21, %v248_v14 }
  0xc3   :  { %v1022_v23 = vpop.eup %1021  ;;  %v480_v25 = vmul.f32 %v448_v12, %v448_v12  ;;  %v309_v20 = vmul.f32 %v1189_v21, %v268_v15  ;;  %v842_v30 = vadd.f32 -1.0, %v502_v27  ;;  %v827_v31 = vadd.f32 -1.0, %v487_v5 }
  0xc4   :  { %v607_v26 = vmul.f32 %v1022_v23, %v819_v17  ;;  %1033 = vrcp.f32 %v567_v18  ;;  %v1024_v3 = vpop.eup %1023  ;;  %v361_v36 = vmin.f32 %v1329_v42, 20.0  ;;  %v835_v39 = vadd.f32 -1.0, %v495_v1  ;;  %v251_v23 = vpop.f32.mrf.mxu2 }
  0xc5   :  { %v544_v32 = vadd.f32 1.0, %v480_v25  ;;  %1035 = vpow2.f32 %v436_v13  ;;  %v1026_v33 = vpop.eup %1025  ;;  %v456_v34 = vadd.f32 1.0, %v1024_v3  ;;  %v1336_v40 = vadd.f32 %v1194_v22, %v301_v2 }
  0xc6   :  { %v639_v28 = vmul.f32 %v607_v26, %v1257_v7  ;;  %1037 = vpow2.f32 %v390_v19  ;;  %v1028_v38 = vpop.eup %1027  ;;  %v1339_v46 = vadd.f32 %v1194_v22, %v309_v20  ;;  %v286_v27 = vmul.f32 %v1189_v21, %v211_v29  ;;  %v213_v29 = vpop.f32.mrf.mxu0 }
  0xc7   :  { %v1030_v47 = vpop.eup %1029  ;;  %v615_v49 = vmul.f32 %v1028_v38, %v827_v31  ;;  %v1343_v52 = vmul.f32 %v456_v34, %v456_v34  ;;  %v406_v7 = vmul.f32 1.442695, %v361_v36  ;;  %v654_v56 = vmul.f32 %v622_v24, %v1248_v35 }
  0xc8   :  { %v872_v48 = vpack.c.bf16 %v639_v28, %v1309_v45  ;;  %v1032_v55 = vpop.eup %1031  ;;  %v630_v5 = vmul.f32 %v1026_v33, %v842_v30  ;;  %v843_v43 = vadd.f32 -1.0, %v503_v8  ;;  %v369_v44 = vmin.f32 %v1336_v40, 20.0 }
  0xc9   :  { %v647_v59 = vmul.f32 %v615_v49, %v1267_v50  ;;  %v623_v60 = vmul.f32 %v1032_v55, %v835_v39  ;;  %1039 = vrcp.f32 %v544_v32  ;;  %v464_v45 = vadd.f32 1.0, %v1030_v47 }
  0xca   :  { %v1034_v58 = vpop.eup %1033  ;;  %944 = vst [vmem:[%s1450_s4 + $0x8] sm:$0xff] %v872_v48   ;;  %1041 = vpow2.f32 %v406_v7  ;;  %v422_v1 = vmul.f32 1.442695, %v369_v44  ;;  %v377_v35 = vmin.f32 %v1339_v46, 20.0  ;;  %v552_v9 = vadd.f32 1.0, %v1343_v52 }
  0xcb   :  { %v1036_v62 = vpop.eup %1035  ;;  %v631_v0 = vmul.f32 %v1034_v58, %v843_v43  ;;  %v892_v41 = vpack.c.bf16 %v647_v59, %v1313_v51  ;;  %v655_v8 = vmul.f32 %v623_v60, %v1273_v57  ;;  %v1356_v10 = vadd.f32 %v1194_v22, %v286_v27  ;;  %v231_v51 = vpop.f32.mrf.mxu1 }
  0xcc   :  { %v1038_v4 = vpop.eup %1037  ;;  %v662_v50 = vmul.f32 %v630_v5, %v1254_v63  ;;  %v472_v12 = vadd.f32 1.0, %v1036_v62  ;;  %v496_v15 = vmul.f32 %v464_v45, %v464_v45  ;;  %1043 = vpow2.f32 %v422_v1 }
  0xcd   :  { %v663_v11 = vmul.f32 %v631_v0, %v1280_v61  ;;  %v449_v13 = vadd.f32 1.0, %v1038_v4  ;;  %948 = vst [vmem:[%s1450_s4 + $0x28] sm:$0xff] %v892_v41   ;;  %v912_v14 = vpack.c.bf16 %v655_v8, %v654_v56  ;;  %v820_v17 = vadd.f32 -1.0, %v480_v25  ;;  %v271_v61 = vpop.f32.mrf.mxu3 }
  0xce   :  { %v438_v19 = vmul.f32 1.442695, %v377_v35  ;;  %1045 = vrcp.f32 %v552_v9  ;;  %v354_v63 = vmin.f32 %v1356_v10, 20.0  ;;  %v504_v2 = vmul.f32 %v472_v12, %v472_v12 }
  0xcf   :  { %v932_v57 = vpack.c.bf16 %v663_v11, %v662_v50  ;;  %v481_v18 = vmul.f32 %v449_v13, %v449_v13  ;;  %v1040_v24 = vpop.eup %1039  ;;  %952 = vst [vmem:[%s1450_s4 + $0x48] sm:$0xff] %v912_v14   ;;  %v294_v25 = vmul.f32 %v1189_v21, %v231_v51  ;;  %v560_v3 = vadd.f32 1.0, %v496_v15  ;;  %v253_v13 = vpop.f32.mrf.mxu2 }
  0xd0   :  { %v1042_v26 = vpop.eup %1041  ;;  %1047 = vpow2.f32 %v438_v19  ;;  %v392_v31 = vmul.f32 1.442695, %v354_v63  ;;  %v302_v32 = vmul.f32 %v1189_v21, %v251_v23  ;;  %v608_v33 = vmul.f32 %v1040_v24, %v820_v17 }
  0xd1   :  { %956 = vst [vmem:[%s1450_s4 + $0x68] sm:$0xff] %v932_v57   ;;  %v545_v20 = vadd.f32 1.0, %v481_v18  ;;  %v457_v30 = vadd.f32 1.0, %v1042_v26  ;;  %v1373_v28 = vadd.f32 %v1194_v22, %v294_v25  ;;  %v310_v34 = vmul.f32 %v1189_v21, %v271_v61 }
  0xd2   :  { %v1044_v36 = vpop.eup %1043  ;;  %v1377_v39 = vadd.f32 %v1194_v22, %v302_v32  ;;  %v287_v27 = vmul.f32 %v1189_v21, %v213_v29  ;;  %v568_v47 = vadd.f32 1.0, %v504_v2  ;;  %v828_v56 = vadd.f32 -1.0, %v1343_v52 }
  0xd3   :  { %1049 = vrcp.f32 %v545_v20  ;;  %v489_v38 = vmul.f32 %v457_v30, %v457_v30  ;;  %v465_v48 = vadd.f32 1.0, %v1044_v36  ;;  %v362_v49 = vmin.f32 %v1373_v28, 20.0  ;;  %v233_v12 = vpop.f32.mrf.mxu1 }
  0xd4   :  { %1051 = vpow2.f32 %v392_v31  ;;  %v1382_v7 = vadd.f32 %v1194_v22, %v310_v34  ;;  %v1046_v55 = vpop.eup %1045  ;;  %v370_v43 = vmin.f32 %v1377_v39, 20.0  ;;  %v1388_v45 = vadd.f32 %v1194_v22, %v287_v27 }
  0xd5   :  { %1053 = vrcp.f32 %v560_v3  ;;  %v553_v5 = vadd.f32 1.0, %v489_v38  ;;  %v497_v58 = vmul.f32 %v465_v48, %v465_v48  ;;  %v408_v59 = vmul.f32 1.442695, %v362_v49  ;;  %v273_v17 = vpop.f32.mrf.mxu3 }
  0xd6   :  { %v1048_v44 = vpop.eup %1047  ;;  %v378_v60 = vmin.f32 %v1382_v7, 20.0  ;;  %v821_v62 = vadd.f32 -1.0, %v481_v18  ;;  %v424_v1 = vmul.f32 1.442695, %v370_v43  ;;  %v640_v4 = vmul.f32 %v608_v33, %v1292_v16 }
  0xd7   :  { %1055 = vrcp.f32 %v553_v5  ;;  %v473_v0 = vadd.f32 1.0, %v1048_v44  ;;  %v836_v52 = vadd.f32 -1.0, %v496_v15  ;;  %v561_v41 = vadd.f32 1.0, %v497_v58 }
  0xd8   :  { %1057 = vrcp.f32 %v568_v47  ;;  %v440_v11 = vmul.f32 1.442695, %v378_v60  ;;  %v616_v14 = vmul.f32 %v1046_v55, %v828_v56  ;;  %v355_v57 = vmin.f32 %v1388_v45, 20.0 }
  0xd9   :  { %v1050_v35 = vpop.eup %1049  ;;  %v505_v50 = vmul.f32 %v473_v0, %v473_v0  ;;  %1059 = vpow2.f32 %v408_v59  ;;  %v829_v16 = vadd.f32 -1.0, %v489_v38  ;;  %v295_v24 = vmul.f32 %v1189_v21, %v233_v12 }
  0xda   :  { %v1052_v8 = vpop.eup %1051  ;;  %v609_v9 = vmul.f32 %v1050_v35, %v821_v62  ;;  %1061 = vrcp.f32 %v561_v41  ;;  %v394_v23 = vmul.f32 1.442695, %v355_v57  ;;  %v303_v63 = vmul.f32 %v1189_v21, %v253_v13 }
  0xdb   :  { %v450_v51 = vadd.f32 1.0, %v1052_v8  ;;  %v1054_v18 = vpop.eup %1053  ;;  %v569_v15 = vadd.f32 1.0, %v505_v50  ;;  %1063 = vpow2.f32 %v424_v1  ;;  %v844_v26 = vadd.f32 -1.0, %v504_v2 }
  0xdc   :  { %v641_v19 = vmul.f32 %v609_v9, %v1324_v6  ;;  %1065 = vpow2.f32 %v440_v11  ;;  %v311_v25 = vmul.f32 %v1189_v21, %v273_v17  ;;  %v624_v3 = vmul.f32 %v1054_v18, %v836_v52 }
  0xdd   :  { %v1056_v61 = vpop.eup %1055  ;;  %1067 = vrcp.f32 %v569_v15  ;;  %v482_v31 = vmul.f32 %v450_v51, %v450_v51  ;;  %v837_v32 = vadd.f32 -1.0, %v497_v58  ;;  %v1400_v33 = vadd.f32 %v1194_v22, %v295_v24 }
  0xde   :  { %v877_v20 = vpack.c.bf16 %v641_v19, %v640_v4  ;;  %v1058_v29 = vpop.eup %1057  ;;  %v617_v30 = vmul.f32 %v1056_v61, %v829_v16  ;;  %1069 = vpow2.f32 %v394_v23  ;;  %v1403_v2 = vadd.f32 %v1194_v22, %v303_v63 }
  0xdf   :  { %v1060_v6 = vpop.eup %1059  ;;  %v1406_v34 = vadd.f32 %v1194_v22, %v311_v25  ;;  %v648_v36 = vmul.f32 %v616_v14, %v1305_v37  ;;  %v632_v47 = vmul.f32 %v1058_v29, %v844_v26  ;;  %v363_v49 = vmin.f32 %v1400_v33, 20.0 }
  0xe0   :  { %945 = vst [vmem:[%s1450_s4 + $0x10] sm:$0xff] %v877_v20   ;;  %v1062_v21 = vpop.eup %1061  ;;  %v649_v38 = vmul.f32 %v617_v30, %v1329_v42  ;;  %v371_v55 = vmin.f32 %v1403_v2, 20.0  ;;  %v845_v43 = vadd.f32 -1.0, %v505_v50  ;;  %v546_v44 = vadd.f32 1.0, %v482_v31 }
  0xe1   :  { %v1064_v27 = vpop.eup %1063  ;;  %v625_v48 = vmul.f32 %v1062_v21, %v837_v32  ;;  %v458_v58 = vadd.f32 1.0, %v1060_v6  ;;  %v656_v22 = vmul.f32 %v624_v3, %v1316_v53  ;;  %v410_v37 = vmul.f32 1.442695, %v363_v49 }
  0xe2   :  { %v1066_v56 = vpop.eup %1065  ;;  %v897_v5 = vpack.c.bf16 %v649_v38, %v648_v36  ;;  %v379_v42 = vmin.f32 %v1406_v34, 20.0  ;;  %v664_v1 = vmul.f32 %v632_v47, %v1319_v54  ;;  %v426_v52 = vmul.f32 1.442695, %v371_v55 }
  0xe3   :  { %v1068_v59 = vpop.eup %1067  ;;  %v657_v60 = vmul.f32 %v625_v48, %v1336_v40  ;;  %1071 = vrcp.f32 %v546_v44  ;;  %v490_v53 = vmul.f32 %v458_v58, %v458_v58  ;;  %v466_v8 = vadd.f32 1.0, %v1064_v27 }
  0xe4   :  { %v1070_v62 = vpop.eup %1069  ;;  %949 = vst [vmem:[%s1450_s4 + $0x30] sm:$0xff] %v897_v5   ;;  %v633_v0 = vmul.f32 %v1068_v59, %v845_v43  ;;  %v474_v40 = vadd.f32 1.0, %v1066_v56  ;;  %1073 = vpow2.f32 %v410_v37  ;;  %v442_v50 = vmul.f32 1.442695, %v379_v42 }
  0xe5   :  { %v917_v35 = vpack.c.bf16 %v657_v60, %v656_v22  ;;  %v451_v4 = vadd.f32 1.0, %v1070_v62  ;;  %1075 = vpow2.f32 %v426_v52  ;;  %v498_v54 = vmul.f32 %v466_v8, %v466_v8 }
  0xe6   :  { %v665_v41 = vmul.f32 %v633_v0, %v1339_v46  ;;  %1077 = vpow2.f32 %v442_v50  ;;  %v554_v46 = vadd.f32 1.0, %v490_v53  ;;  %v506_v13 = vmul.f32 %v474_v40, %v474_v40 }
  0xe7   :  { %953 = vst [vmem:[%s1450_s4 + $0x50] sm:$0xff] %v917_v35   ;;  %v483_v9 = vmul.f32 %v451_v4, %v451_v4  ;;  %v822_v51 = vadd.f32 -1.0, %v482_v31  ;;  %v562_v17 = vadd.f32 1.0, %v498_v54  ;;  %v830_v36 = vadd.f32 -1.0, %v490_v53 }
  0xe8   :  { %v937_v11 = vpack.c.bf16 %v665_v41, %v664_v1  ;;  %v570_v16 = vadd.f32 1.0, %v506_v13  ;;  %v838_v55 = vadd.f32 -1.0, %v498_v54  ;;  %v846_v5 = vadd.f32 -1.0, %v506_v13 }
  0xe9   :  { %v547_v12 = vadd.f32 1.0, %v483_v9  ;;  %v1072_v14 = vpop.eup %1071  ;;  %v823_v24 = vadd.f32 -1.0, %v483_v9 }
  0xea   :  { %957 = vst [vmem:[%s1450_s4 + $0x70] sm:$0xff] %v937_v11   ;;  %v1074_v57 = vpop.eup %1073  ;;  %v610_v23 = vmul.f32 %v1072_v14, %v822_v51 }
  0xeb   :  { %1079 = vrcp.f32 %v547_v12  ;;  %v459_v18 = vadd.f32 1.0, %v1074_v57  ;;  %v1076_v19 = vpop.eup %1075 }
  0xec   :  { %1081 = vrcp.f32 %v554_v46  ;;  %v1078_v15 = vpop.eup %1077  ;;  %v467_v61 = vadd.f32 1.0, %v1076_v19  ;;  %v642_v31 = vmul.f32 %v610_v23, %v1356_v10 }
  0xed   :  { %v491_v63 = vmul.f32 %v459_v18, %v459_v18  ;;  %v475_v20 = vadd.f32 1.0, %v1078_v15  ;;  %1083 = vrcp.f32 %v562_v17 }
  0xee   :  { %v499_v3 = vmul.f32 %v467_v61, %v467_v61  ;;  %1085 = vrcp.f32 %v570_v16 }
  0xef   :  { %v555_v29 = vadd.f32 1.0, %v491_v63  ;;  %v507_v30 = vmul.f32 %v475_v20, %v475_v20  ;;  %v831_v56 = vadd.f32 -1.0, %v491_v63 }
  0xf0   :  { %v563_v32 = vadd.f32 1.0, %v499_v3  ;;  %v839_v44 = vadd.f32 -1.0, %v499_v3 }
  0xf1   :  { %v1080_v26 = vpop.eup %1079  ;;  %1087 = vrcp.f32 %v555_v29  ;;  %v571_v38 = vadd.f32 1.0, %v507_v30  ;;  %v847_v22 = vadd.f32 -1.0, %v507_v30 }
  0xf2   :  { %v611_v25 = vmul.f32 %v1080_v26, %v823_v24  ;;  %v1082_v21 = vpop.eup %1081  ;;  %1089 = vrcp.f32 %v563_v32 }
  0xf3   :  { %1091 = vrcp.f32 %v571_v38  ;;  %v1084_v47 = vpop.eup %1083  ;;  %v618_v49 = vmul.f32 %v1082_v21, %v830_v36 }
  0xf4   :  { %v643_v6 = vmul.f32 %v611_v25, %v1388_v45  ;;  %v1086_v48 = vpop.eup %1085  ;;  %v626_v45 = vmul.f32 %v1084_v47, %v838_v55 }
  0xf5   :  { %v634_v59 = vmul.f32 %v1086_v48, %v846_v5  ;;  %v650_v37 = vmul.f32 %v618_v49, %v1373_v28 }
  0xf6   :  { %v882_v27 = vpack.c.bf16 %v643_v6, %v642_v31  ;;  %v658_v1 = vmul.f32 %v626_v45, %v1377_v39 }
  0xf7   :  { %v1088_v10 = vpop.eup %1087  ;;  %v666_v52 = vmul.f32 %v634_v59, %v1382_v7 }
  0xf8   :  { %946 = vst [vmem:[%s1450_s4 + $0x18] sm:$0xff] %v882_v27   ;;  %v619_v43 = vmul.f32 %v1088_v10, %v831_v56  ;;  %v1090_v58 = vpop.eup %1089 }
  0xf9   :  { %v1092_v60 = vpop.eup %1091  ;;  %v627_v62 = vmul.f32 %v1090_v58, %v839_v44 }
  0xfa   :  { %v651_v42 = vmul.f32 %v619_v43, %v1400_v33  ;;  %v635_v0 = vmul.f32 %v1092_v60, %v847_v22 }
  0xfb   :  { %v659_v4 = vmul.f32 %v627_v62, %v1403_v2 }
  0xfc   :  { %v902_v35 = vpack.c.bf16 %v651_v42, %v650_v37  ;;  %v667_v41 = vmul.f32 %v635_v0, %v1406_v34 }
  0xfd   :  { %v922_v53 = vpack.c.bf16 %v659_v4, %v658_v1 }
  0xfe   :  { %950 = vst [vmem:[%s1450_s4 + $0x38] sm:$0xff] %v902_v35   ;;  %v942_v8 = vpack.c.bf16 %v667_v41, %v666_v52 }
  0xff   :  { %954 = vst [vmem:[%s1450_s4 + $0x58] sm:$0xff] %v922_v53  }
 0x100   :  { %958 = vst [vmem:[%s1450_s4 + $0x78] sm:$0xff] %v942_v8  }

// kernel: mbsfc_forward.17
= control target key start
LH: loop header
LB: loop body
LE: loop exit
PB: predicated region body
PF: predicated region fallthrough
CT: control target
= control target key end

     0   :  { %s2438_s15 = smov 0   ;;  %s3010_s0 = inlined_call_operand.vmem [shape: bf16[3072,18], index: 0, kind: input, shape index: {}]   ;;  %s3011_s1 = inlined_call_operand.vmem [shape: bf16[18,128], index: 1, kind: input, shape index: {}]   ;;  %s3012_s2 = inlined_call_operand.vmem [shape: f32[1,128], index: 2, kind: input, shape index: {}]   ;;  %s3013_s3 = inlined_call_operand.vmem [shape: f32[1,128], index: 3, kind: input, shape index: {}]   ;;  %s3014_s4 = inlined_call_operand.vmem [shape: bf16[3072,128], index: 4, kind: output, shape index: {}]  }
   0x1 LB: > { %s1668_s16 = sadd.s32 4294967295, %s2411_s15   ;;  %p1672_p0 = scmp.ge.s32.totalorder %s2411_s15, 1  ;;  %s2411_s15 = sphi %s2438_s15, %s14_s15  }
   0x2   : > { %p163_p1 = scmp.lt.s32.totalorder %s2411_s15, 7 }
   0x4   : > { %p164_p2 = pnand %p1672_p0, %p163_p1 }
   0x5   : > { %s1673_s19 = sshll.u32 (!%p164_p2), %s1668_s16, 6 }
   0x6   : > { %167 = sbr.rel (%p164_p2) target bundleno = 375 (0x177), region = 36  ;;  %p190_p3 = scmp.lt.s32.totalorder (!%p164_p2), %s1673_s19, 383 }
   0xb   : > { %v268_v0 = vld [vmem:[%s3011_s1 + $0x8] sm:$0x1]  ;;  %vm535_vm0 = vcmask 1040384   ;;  %s3016_s19 = smov (!%p190_p3, %s1673_s19), 383  ;;  %v1939_v4 = vld [vmem:[%s3011_s1] sm:$0xff]  ;;  %vm438_vm1 = vcmask 146432  }
   0xc   : > { %v434_v1 = vunpack.c.l.b16 %v268_v0  ;;  %s1674_s20 = sshll.u32 %s3016_s19, 2  ;;  %v2529_v37 = vld [vmem:[%s3012_s2] ss:$0 sm:$0xff] }
   0xd   : > { %s2460_s25 = scalar_lea.vmem %s3010_s0, %s1674_s20  ;;  %v2534_v38 = vld [vmem:[%s3013_s3] ss:$0 sm:$0xff]  ;;  %s2611_s6 = scalar_lea.vmem %s3014_s4, %s1674_s20 }
   0xe   : > { %v436_v2 = vpack.c.b16 %v434_v1, %v434_v1  ;;  %v1907_v5 = vld [vmem:[%s2460_s25] sm:$0xff]  ;;  %v1908_v9 = vld [vmem:[%s2460_s25 + $0x8] sm:$0xff]  ;;  %v1909_v13 = vld [vmem:[%s2460_s25 + $0x10] sm:$0xff] }
   0xf   : > { %v1915_v6 = vld [vmem:[%s2460_s25 + $0x40] sm:$0xff]  ;;  %v1916_v10 = vld [vmem:[%s2460_s25 + $0x48] sm:$0xff]  ;;  %v1917_v14 = vld [vmem:[%s2460_s25 + $0x50] sm:$0xff] }
  0x10   : > { %v537_v3 = vsel %vm535_vm0, %v436_v2, 0  ;;  %v1923_v7 = vld [vmem:[%s2460_s25 + $0x80] sm:$0xff]  ;;  %v1924_v11 = vld [vmem:[%s2460_s25 + $0x88] sm:$0xff]  ;;  %v1925_v15 = vld [vmem:[%s2460_s25 + $0x90] sm:$0xff] }
  0x11   : > { %545 = vmatpush.bf16.msra.mxu0 %v537_v3  ;;  %2131 = vmatpush.bf16.msra.mxu1 %v537_v3  ;;  %v1931_v8 = vld [vmem:[%s2460_s25 + $0xc0] sm:$0xff]  ;;  %v1932_v12 = vld [vmem:[%s2460_s25 + $0xc8] sm:$0xff]  ;;  %v1933_v16 = vld [vmem:[%s2460_s25 + $0xd0] sm:$0xff] }
  0x12   : > { %2132 = vmatpush.bf16.msra.mxu2 %v537_v3  ;;  %2133 = vmatpush.bf16.msra.mxu3 %v537_v3  ;;  %v1910_v17 = vld [vmem:[%s2460_s25 + $0x18] sm:$0xff]  ;;  %v1911_v21 = vld [vmem:[%s2460_s25 + $0x20] sm:$0xff]  ;;  %v1912_v25 = vld [vmem:[%s2460_s25 + $0x28] sm:$0xff] }
  0x13   : > { %v1918_v18 = vld [vmem:[%s2460_s25 + $0x58] sm:$0xff]  ;;  %v1919_v22 = vld [vmem:[%s2460_s25 + $0x60] sm:$0xff]  ;;  %v1920_v26 = vld [vmem:[%s2460_s25 + $0x68] sm:$0xff] }
  0x14   : > { %v1926_v19 = vld [vmem:[%s2460_s25 + $0x98] sm:$0xff]  ;;  %v1927_v23 = vld [vmem:[%s2460_s25 + $0xa0] sm:$0xff]  ;;  %v1928_v27 = vld [vmem:[%s2460_s25 + $0xa8] sm:$0xff] }
  0x15   : > { %546 = vmatpush.bf16.msra.mxu0 %v1939_v4  ;;  %2134 = vmatpush.bf16.msra.mxu1 %v1939_v4  ;;  %v1934_v20 = vld [vmem:[%s2460_s25 + $0xd8] sm:$0xff]  ;;  %v1935_v24 = vld [vmem:[%s2460_s25 + $0xe0] sm:$0xff]  ;;  %v1936_v28 = vld [vmem:[%s2460_s25 + $0xe8] sm:$0xff] }
  0x16   : > { %2135 = vmatpush.bf16.msra.mxu2 %v1939_v4  ;;  %2136 = vmatpush.bf16.msra.mxu3 %v1939_v4  ;;  %v1913_v29 = vld [vmem:[%s2460_s25 + $0x30] sm:$0xff]  ;;  %v1914_v33 = vld [vmem:[%s2460_s25 + $0x38] sm:$0xff] }
  0x17   : > { %v1921_v30 = vld [vmem:[%s2460_s25 + $0x70] sm:$0xff]  ;;  %v1922_v34 = vld [vmem:[%s2460_s25 + $0x78] sm:$0xff] }
  0x18   : > { %1809 = vmatmul.msk.bf16.vlgmr.msra.gmra.mxu0 %vm438_vm1, %v1907_v5  ;;  %1817 = vmatmul.msk.bf16.vlgmr.msra.gmra.mxu1 %vm438_vm1, %v1915_v6  ;;  %v1929_v31 = vld [vmem:[%s2460_s25 + $0xb0] sm:$0xff]  ;;  %v1930_v35 = vld [vmem:[%s2460_s25 + $0xb8] sm:$0xff] }
  0x19   : > { %1825 = vmatmul.msk.bf16.vlgmr.msra.gmra.mxu2 %vm438_vm1, %v1923_v7  ;;  %1833 = vmatmul.msk.bf16.vlgmr.msra.gmra.mxu3 %vm438_vm1, %v1931_v8  ;;  %v1937_v32 = vld [vmem:[%s2460_s25 + $0xf0] sm:$0xff]  ;;  %v1938_v36 = vld [vmem:[%s2460_s25 + $0xf8] sm:$0xff] }
  0x28   : > { %1810 = vmatmul.msk.bf16.gmra.mxu0 %vm438_vm1, %v1908_v9  ;;  %1818 = vmatmul.msk.bf16.gmra.mxu1 %vm438_vm1, %v1916_v10 }
  0x29   : > { %1826 = vmatmul.msk.bf16.gmra.mxu2 %vm438_vm1, %v1924_v11  ;;  %1834 = vmatmul.msk.bf16.gmra.mxu3 %vm438_vm1, %v1932_v12 }
  0x38   : > { %1811 = vmatmul.msk.bf16.gmra.mxu0 %vm438_vm1, %v1909_v13  ;;  %1819 = vmatmul.msk.bf16.gmra.mxu1 %vm438_vm1, %v1917_v14 }
  0x39   : > { %1827 = vmatmul.msk.bf16.gmra.mxu2 %vm438_vm1, %v1925_v15  ;;  %1835 = vmatmul.msk.bf16.gmra.mxu3 %vm438_vm1, %v1933_v16 }
  0x48   : > { %1812 = vmatmul.msk.bf16.gmra.mxu0 %vm438_vm1, %v1910_v17  ;;  %1820 = vmatmul.msk.bf16.gmra.mxu1 %vm438_vm1, %v1918_v18 }
  0x49   : > { %1828 = vmatmul.msk.bf16.gmra.mxu2 %vm438_vm1, %v1926_v19  ;;  %1836 = vmatmul.msk.bf16.gmra.mxu3 %vm438_vm1, %v1934_v20 }
  0x58   : > { %1813 = vmatmul.msk.bf16.gmra.mxu0 %vm438_vm1, %v1911_v21  ;;  %1821 = vmatmul.msk.bf16.gmra.mxu1 %vm438_vm1, %v1919_v22 }
  0x59   : > { %1829 = vmatmul.msk.bf16.gmra.mxu2 %vm438_vm1, %v1927_v23  ;;  %1837 = vmatmul.msk.bf16.gmra.mxu3 %vm438_vm1, %v1935_v24 }
  0x68   : > { %1814 = vmatmul.msk.bf16.gmra.mxu0 %vm438_vm1, %v1912_v25  ;;  %1822 = vmatmul.msk.bf16.gmra.mxu1 %vm438_vm1, %v1920_v26 }
  0x69   : > { %1830 = vmatmul.msk.bf16.gmra.mxu2 %vm438_vm1, %v1928_v27  ;;  %1838 = vmatmul.msk.bf16.gmra.mxu3 %vm438_vm1, %v1936_v28 }
  0x78   : > { %1815 = vmatmul.msk.bf16.gmra.mxu0 %vm438_vm1, %v1913_v29  ;;  %1823 = vmatmul.msk.bf16.gmra.mxu1 %vm438_vm1, %v1921_v30 }
  0x79   : > { %1831 = vmatmul.msk.bf16.gmra.mxu2 %vm438_vm1, %v1929_v31  ;;  %1839 = vmatmul.msk.bf16.gmra.mxu3 %vm438_vm1, %v1937_v32 }
  0x88   : > { %1816 = vmatmul.msk.bf16.gmra.mxu0 %vm438_vm1, %v1914_v33  ;;  %1824 = vmatmul.msk.bf16.gmra.mxu1 %vm438_vm1, %v1922_v34 }
  0x89   : > { %1832 = vmatmul.msk.bf16.gmra.mxu2 %vm438_vm1, %v1930_v35  ;;  %1840 = vmatmul.msk.bf16.gmra.mxu3 %vm438_vm1, %v1938_v36 }
  0x95   : > { %v548_v39 = vpop.f32.mrf.mxu0  ;;  %v588_v40 = vpop.f32.mrf.mxu1 }
  0x96   : > { %v712_v41 = vmul.f32 %v2529_v37, %v548_v39  ;;  %v728_v42 = vmul.f32 %v2529_v37, %v588_v40 }
  0x98   : > { %v2539_v43 = vadd.f32 %v2534_v38, %v712_v41  ;;  %v2542_v44 = vadd.f32 %v2534_v38, %v728_v42 }
  0x9a   : > { %v844_v45 = vmin.f32 %v2539_v43, 20.0  ;;  %v860_v46 = vmin.f32 %v2542_v44, 20.0 }
  0x9c   : > { %v908_v47 = vmul.f32 1.442695, %v844_v45  ;;  %v940_v48 = vmul.f32 1.442695, %v860_v46  ;;  %v628_v49 = vpop.f32.mrf.mxu2  ;;  %v668_v50 = vpop.f32.mrf.mxu3 }
  0x9d   : > { %v744_v51 = vmul.f32 %v2529_v37, %v628_v49  ;;  %v760_v52 = vmul.f32 %v2529_v37, %v668_v50  ;;  %v550_v53 = vpop.f32.mrf.mxu0  ;;  %v590_v54 = vpop.f32.mrf.mxu1 }
  0x9e   : > { %2147 = vpow2.f32 %v908_v47  ;;  %v713_v55 = vmul.f32 %v2529_v37, %v550_v53  ;;  %v729_v56 = vmul.f32 %v2529_v37, %v590_v54 }
  0x9f   : > { %2149 = vpow2.f32 %v940_v48  ;;  %v2551_v57 = vadd.f32 %v2534_v38, %v744_v51  ;;  %v2554_v58 = vadd.f32 %v2534_v38, %v760_v52 }
  0xa0   : > { %v2557_v59 = vadd.f32 %v2534_v38, %v713_v55  ;;  %v2560_v60 = vadd.f32 %v2534_v38, %v729_v56 }
  0xa1   : > { %v876_v61 = vmin.f32 %v2551_v57, 20.0  ;;  %v892_v62 = vmin.f32 %v2554_v58, 20.0 }
  0xa2   : > { %v845_v63 = vmin.f32 %v2557_v59, 20.0  ;;  %v861_v0 = vmin.f32 %v2560_v60, 20.0 }
  0xa3   : > { %v972_v1 = vmul.f32 1.442695, %v876_v61  ;;  %v1004_v2 = vmul.f32 1.442695, %v892_v62 }
  0xa4   : > { %v2148_v3 = vpop.eup %2147  ;;  %v910_v4 = vmul.f32 1.442695, %v845_v63  ;;  %v942_v5 = vmul.f32 1.442695, %v861_v0  ;;  %v630_v6 = vpop.f32.mrf.mxu2 }
  0xa5   : > { %v670_v7 = vpop.f32.mrf.mxu3  ;;  %v2150_v8 = vpop.eup %2149  ;;  %v1036_v9 = vadd.f32 1.0, %v2148_v3  ;;  %2151 = vpow2.f32 %v972_v1  ;;  %v745_v10 = vmul.f32 %v2529_v37, %v630_v6 }
  0xa6   : > { %v761_v11 = vmul.f32 %v2529_v37, %v670_v7  ;;  %v553_v12 = vpop.f32.mrf.mxu0  ;;  %v593_v13 = vpop.f32.mrf.mxu1  ;;  %v1052_v14 = vadd.f32 1.0, %v2150_v8  ;;  %2153 = vpow2.f32 %v1004_v2 }
  0xa7   : > { %v714_v15 = vmul.f32 %v2529_v37, %v553_v12  ;;  %v730_v16 = vmul.f32 %v2529_v37, %v593_v13  ;;  %v1100_v17 = vmul.f32 %v1036_v9, %v1036_v9  ;;  %2155 = vpow2.f32 %v910_v4 }
  0xa8   : > { %v2571_v18 = vadd.f32 %v2534_v38, %v745_v10  ;;  %v2574_v19 = vadd.f32 %v2534_v38, %v761_v11  ;;  %v1116_v20 = vmul.f32 %v1052_v14, %v1052_v14  ;;  %2157 = vpow2.f32 %v942_v5 }
  0xa9   : > { %v2577_v21 = vadd.f32 %v2534_v38, %v714_v15  ;;  %v2580_v22 = vadd.f32 %v2534_v38, %v730_v16  ;;  %v1228_v23 = vadd.f32 1.0, %v1100_v17  ;;  %v1841_v40 = vadd.f32 -1.0, %v1100_v17 }
  0xaa   : > { %v877_v24 = vmin.f32 %v2571_v18, 20.0  ;;  %v893_v25 = vmin.f32 %v2574_v19, 20.0  ;;  %v1244_v26 = vadd.f32 1.0, %v1116_v20  ;;  %v1857_v47 = vadd.f32 -1.0, %v1116_v20 }
  0xab   : > { %v846_v27 = vmin.f32 %v2577_v21, 20.0  ;;  %v862_v28 = vmin.f32 %v2580_v22, 20.0  ;;  %v2152_v29 = vpop.eup %2151  ;;  %2159 = vrcp.f32 %v1228_v23 }
  0xac   : > { %v974_v30 = vmul.f32 1.442695, %v877_v24  ;;  %v1006_v31 = vmul.f32 1.442695, %v893_v25  ;;  %v2154_v32 = vpop.eup %2153  ;;  %2161 = vrcp.f32 %v1244_v26  ;;  %v1068_v33 = vadd.f32 1.0, %v2152_v29  ;;  %v633_v36 = vpop.f32.mrf.mxu2 }
  0xad   : > { %v912_v34 = vmul.f32 1.442695, %v846_v27  ;;  %v944_v35 = vmul.f32 1.442695, %v862_v28  ;;  %v2156_v39 = vpop.eup %2155  ;;  %v1084_v41 = vadd.f32 1.0, %v2154_v32  ;;  %v746_v42 = vmul.f32 %v2529_v37, %v633_v36  ;;  %v673_v45 = vpop.f32.mrf.mxu3 }
  0xae   : > { %2163 = vpow2.f32 %v974_v30  ;;  %v2158_v46 = vpop.eup %2157  ;;  %v1132_v48 = vmul.f32 %v1068_v33, %v1068_v33  ;;  %v1037_v49 = vadd.f32 1.0, %v2156_v39  ;;  %v555_v50 = vpop.f32.mrf.mxu0  ;;  %v762_v56 = vmul.f32 %v2529_v37, %v673_v45 }
  0xaf   : > { %2165 = vpow2.f32 %v1006_v31  ;;  %v1148_v51 = vmul.f32 %v1084_v41, %v1084_v41  ;;  %v1053_v52 = vadd.f32 1.0, %v2158_v46  ;;  %v2588_v53 = vadd.f32 %v2534_v38, %v746_v42  ;;  %v595_v10 = vpop.f32.mrf.mxu1 }
  0xb0   : > { %2167 = vpow2.f32 %v912_v34  ;;  %v1260_v54 = vadd.f32 1.0, %v1132_v48  ;;  %v1101_v55 = vmul.f32 %v1037_v49, %v1037_v49  ;;  %v715_v1 = vmul.f32 %v2529_v37, %v555_v50 }
  0xb1   : > { %2169 = vpow2.f32 %v944_v35  ;;  %v2160_v61 = vpop.eup %2159  ;;  %v1276_v62 = vadd.f32 1.0, %v1148_v51  ;;  %v1117_v63 = vmul.f32 %v1053_v52, %v1053_v52  ;;  %v878_v0 = vmin.f32 %v2588_v53, 20.0 }
  0xb2   : > { %v2162_v2 = vpop.eup %2161  ;;  %v1873_v3 = vadd.f32 -1.0, %v1132_v48  ;;  %2171 = vrcp.f32 %v1260_v54  ;;  %v1889_v4 = vadd.f32 -1.0, %v1148_v51  ;;  %v1229_v5 = vadd.f32 1.0, %v1101_v55 }
  0xb3   : > { %v1356_v7 = vmul.f32 %v2160_v61, %v1841_v40  ;;  %v1372_v8 = vmul.f32 %v2162_v2, %v1857_v47  ;;  %2173 = vrcp.f32 %v1276_v62  ;;  %v1245_v9 = vadd.f32 1.0, %v1117_v63 }
  0xb4   : > { %v2164_v6 = vpop.eup %2163  ;;  %v1842_v12 = vadd.f32 -1.0, %v1101_v55  ;;  %2175 = vrcp.f32 %v1229_v5  ;;  %v976_v14 = vmul.f32 1.442695, %v878_v0  ;;  %v1858_v16 = vadd.f32 -1.0, %v1117_v63  ;;  %v635_v51 = vpop.f32.mrf.mxu2 }
  0xb5   : > { %v2166_v11 = vpop.eup %2165  ;;  %v1069_v13 = vadd.f32 1.0, %v2164_v6  ;;  %2177 = vrcp.f32 %v1245_v9  ;;  %v2594_v20 = vadd.f32 %v2534_v38, %v762_v56  ;;  %v2597_v26 = vadd.f32 %v2534_v38, %v715_v1  ;;  %v675_v52 = vpop.f32.mrf.mxu3 }
  0xb6   : > { %v2168_v15 = vpop.eup %2167  ;;  %v1085_v17 = vadd.f32 1.0, %v2166_v11  ;;  %2179 = vpow2.f32 %v976_v14  ;;  %v1420_v27 = vmul.f32 %v1356_v7, %v2539_v43  ;;  %v1436_v28 = vmul.f32 %v1372_v8, %v2542_v44  ;;  %v558_v2 = vpop.f32.mrf.mxu0 }
  0xb7   : > { %v2170_v23 = vpop.eup %2169  ;;  %v1133_v24 = vmul.f32 %v1069_v13, %v1069_v13  ;;  %v1038_v25 = vadd.f32 1.0, %v2168_v15  ;;  %v894_v34 = vmin.f32 %v2594_v20, 20.0  ;;  %v731_v35 = vmul.f32 %v2529_v37, %v595_v10 }
  0xb8   : > { %v1149_v29 = vmul.f32 %v1085_v17, %v1085_v17  ;;  %v1054_v30 = vadd.f32 1.0, %v2170_v23  ;;  %v2172_v31 = vpop.eup %2171  ;;  %v847_v42 = vmin.f32 %v2597_v26, 20.0  ;;  %v763_v7 = vmul.f32 %v2529_v37, %v675_v52 }
  0xb9   : > { %v1261_v32 = vadd.f32 1.0, %v1133_v24  ;;  %v1102_v33 = vmul.f32 %v1038_v25, %v1038_v25  ;;  %v2174_v36 = vpop.eup %2173  ;;  %v1388_v39 = vmul.f32 %v2172_v31, %v1873_v3  ;;  %v1874_v46 = vadd.f32 -1.0, %v1133_v24  ;;  %v598_v3 = vpop.f32.mrf.mxu1 }
  0xba   : > { %v1277_v40 = vadd.f32 1.0, %v1149_v29  ;;  %v1118_v41 = vmul.f32 %v1054_v30, %v1054_v30  ;;  %v2176_v45 = vpop.eup %2175  ;;  %v1890_v43 = vadd.f32 -1.0, %v1149_v29  ;;  %v1404_v48 = vmul.f32 %v2174_v36, %v1889_v4 }
  0xbb   : > { %2181 = vrcp.f32 %v1261_v32  ;;  %v1230_v44 = vadd.f32 1.0, %v1102_v33  ;;  %v2178_v47 = vpop.eup %2177  ;;  %v1357_v49 = vmul.f32 %v2176_v45, %v1842_v12  ;;  %v1843_v50 = vadd.f32 -1.0, %v1102_v33 }
  0xbc   : > { %2183 = vrcp.f32 %v1277_v40  ;;  %v2180_v54 = vpop.eup %2179  ;;  %v1452_v55 = vmul.f32 %v1388_v39, %v2551_v57  ;;  %v1373_v56 = vmul.f32 %v2178_v47, %v1858_v16  ;;  %v1246_v61 = vadd.f32 1.0, %v1118_v41  ;;  %v638_v40 = vpop.f32.mrf.mxu2 }
  0xbd   : > { %2185 = vrcp.f32 %v1230_v44  ;;  %v1421_v62 = vmul.f32 %v1357_v49, %v2557_v59  ;;  %v1070_v63 = vadd.f32 1.0, %v2180_v54  ;;  %v1008_v0 = vmul.f32 1.442695, %v894_v34 }
  0xbe   : > { %v914_v1 = vmul.f32 1.442695, %v847_v42  ;;  %v1437_v4 = vmul.f32 %v1373_v56, %v2560_v60  ;;  %2187 = vrcp.f32 %v1246_v61  ;;  %v2615_v57 = vadd.f32 %v2534_v38, %v731_v35  ;;  %v560_v47 = vpop.f32.mrf.mxu0 }
  0xbf   : > { %v747_v59 = vmul.f32 %v2529_v37, %v635_v51  ;;  %v1943_v5 = vpack.c.bf16 %v1421_v62, %v1420_v27  ;;  %v1134_v6 = vmul.f32 %v1070_v63, %v1070_v63  ;;  %2189 = vpow2.f32 %v1008_v0 }
  0xc0   : > { %v1983_v9 = vpack.c.bf16 %v1437_v4, %v1436_v28  ;;  %2191 = vpow2.f32 %v914_v1  ;;  %v863_v10 = vmin.f32 %v2615_v57, 20.0  ;;  %v1859_v13 = vadd.f32 -1.0, %v1118_v41 }
  0xc1   : > { %v2182_v8 = vpop.eup %2181  ;;  %v2621_v11 = vadd.f32 %v2534_v38, %v747_v59  ;;  %1944 = vst [vmem:[%s2611_s6] sm:$0xff] %v1943_v5   ;;  %v1262_v14 = vadd.f32 1.0, %v1134_v6  ;;  %v2625_v15 = vadd.f32 %v2534_v38, %v763_v7  ;;  %v716_v25 = vmul.f32 %v2529_v37, %v558_v2 }
  0xc2   : > { %v2184_v60 = vpop.eup %2183  ;;  %v1389_v12 = vmul.f32 %v2182_v8, %v1874_v46  ;;  %2107 = vst [vmem:[%s2611_s6 + $0x40] sm:$0xff] %v1983_v9   ;;  %v946_v23 = vmul.f32 1.442695, %v863_v10  ;;  %v1468_v27 = vmul.f32 %v1404_v48, %v2554_v58  ;;  %v1875_v46 = vadd.f32 -1.0, %v1134_v6  ;;  %v600_v48 = vpop.f32.mrf.mxu1 }
  0xc3   : > { %v2186_v16 = vpop.eup %2185  ;;  %v1405_v17 = vmul.f32 %v2184_v60, %v1890_v43  ;;  %v879_v24 = vmin.f32 %v2621_v11, 20.0  ;;  %2193 = vrcp.f32 %v1262_v14  ;;  %v895_v29 = vmin.f32 %v2625_v15, 20.0 }
  0xc4   : > { %v1453_v28 = vmul.f32 %v1389_v12, %v2571_v18  ;;  %v2188_v30 = vpop.eup %2187  ;;  %2195 = vpow2.f32 %v946_v23  ;;  %v2635_v33 = vadd.f32 %v2534_v38, %v716_v25  ;;  %v1358_v36 = vmul.f32 %v2186_v16, %v1843_v50  ;;  %v678_v18 = vpop.f32.mrf.mxu3 }
  0xc5   : > { %v1469_v31 = vmul.f32 %v1405_v17, %v2574_v19  ;;  %v978_v32 = vmul.f32 1.442695, %v879_v24  ;;  %v2190_v34 = vpop.eup %2189  ;;  %v1374_v39 = vmul.f32 %v2188_v30, %v1859_v13  ;;  %v1010_v58 = vmul.f32 1.442695, %v895_v29 }
  0xc6   : > { %v2023_v35 = vpack.c.bf16 %v1453_v28, %v1452_v55  ;;  %v2192_v41 = vpop.eup %2191  ;;  %v1086_v45 = vadd.f32 1.0, %v2190_v34  ;;  %v848_v19 = vmin.f32 %v2635_v33, 20.0  ;;  %v732_v44 = vmul.f32 %v2529_v37, %v598_v3 }
  0xc7   : > { %v2063_v42 = vpack.c.bf16 %v1469_v31, %v1468_v27  ;;  %2197 = vpow2.f32 %v978_v32  ;;  %v1039_v43 = vadd.f32 1.0, %v2192_v41  ;;  %v748_v51 = vmul.f32 %v2529_v37, %v638_v40 }
  0xc8   : > { %2115 = vst [vmem:[%s2611_s6 + $0x80] sm:$0xff] %v2023_v35   ;;  %2199 = vpow2.f32 %v1010_v58  ;;  %v1150_v49 = vmul.f32 %v1086_v45, %v1086_v45  ;;  %v916_v50 = vmul.f32 1.442695, %v848_v19  ;;  %v764_v52 = vmul.f32 %v2529_v37, %v678_v18  ;;  %v640_v35 = vpop.f32.mrf.mxu2 }
  0xc9   : > { %2123 = vst [vmem:[%s2611_s6 + $0xc0] sm:$0xff] %v2063_v42   ;;  %v2194_v54 = vpop.eup %2193  ;;  %v2644_v55 = vmul.f32 %v1358_v36, %v2577_v21  ;;  %v2647_v56 = vmul.f32 %v1374_v39, %v2580_v22  ;;  %v1103_v61 = vmul.f32 %v1039_v43, %v1039_v43  ;;  %v2650_v62 = vadd.f32 %v2534_v38, %v732_v44  ;;  %v563_v44 = vpop.f32.mrf.mxu0 }
  0xca   : > { %v2196_v63 = vpop.eup %2195  ;;  %v1278_v0 = vadd.f32 1.0, %v1150_v49  ;;  %2201 = vpow2.f32 %v916_v50  ;;  %v717_v1 = vmul.f32 %v2529_v37, %v560_v47  ;;  %v733_v2 = vmul.f32 %v2529_v37, %v600_v48 }
  0xcb   : > { %v1390_v3 = vmul.f32 %v2194_v54, %v1875_v46  ;;  %v1231_v4 = vadd.f32 1.0, %v1103_v61  ;;  %v1055_v59 = vadd.f32 1.0, %v2196_v63  ;;  %v864_v21 = vmin.f32 %v2650_v62, 20.0 }
  0xcc   : > { %v1891_v6 = vadd.f32 -1.0, %v1150_v49  ;;  %2203 = vrcp.f32 %v1278_v0  ;;  %v2656_v22 = vadd.f32 %v2534_v38, %v748_v51  ;;  %v2659_v7 = vadd.f32 %v2534_v38, %v764_v52  ;;  %v680_v36 = vpop.f32.mrf.mxu3 }
  0xcd   : > { %v2198_v5 = vpop.eup %2197  ;;  %2205 = vrcp.f32 %v1231_v4  ;;  %v1119_v9 = vmul.f32 %v1055_v59, %v1055_v59  ;;  %v948_v60 = vmul.f32 1.442695, %v864_v21  ;;  %v2664_v16 = vadd.f32 %v2534_v38, %v717_v1 }
  0xce   : > { %v2200_v8 = vpop.eup %2199  ;;  %v1071_v10 = vadd.f32 1.0, %v2198_v5  ;;  %v880_v13 = vmin.f32 %v2656_v22, 20.0  ;;  %v896_v14 = vmin.f32 %v2659_v7, 20.0  ;;  %v1844_v17 = vadd.f32 -1.0, %v1103_v61 }
  0xcf   : > { %v1087_v12 = vadd.f32 1.0, %v2200_v8  ;;  %v1247_v23 = vadd.f32 1.0, %v1119_v9  ;;  %2207 = vpow2.f32 %v948_v60  ;;  %v2667_v27 = vmul.f32 %v1390_v3, %v2588_v53 }
  0xd0   : > { %v1135_v24 = vmul.f32 %v1071_v10, %v1071_v10  ;;  %v2202_v25 = vpop.eup %2201  ;;  %v980_v29 = vmul.f32 1.442695, %v880_v13  ;;  %v849_v30 = vmin.f32 %v2664_v16, 20.0  ;;  %v1012_v34 = vmul.f32 1.442695, %v896_v14 }
  0xd1   : > { %v1151_v28 = vmul.f32 %v1087_v12, %v1087_v12  ;;  %2209 = vrcp.f32 %v1247_v23  ;;  %v1040_v32 = vadd.f32 1.0, %v2202_v25  ;;  %v1860_v58 = vadd.f32 -1.0, %v1119_v9  ;;  %v603_v25 = vpop.f32.mrf.mxu1 }
  0xd2   : > { %v1263_v31 = vadd.f32 1.0, %v1135_v24  ;;  %v2204_v39 = vpop.eup %2203  ;;  %2211 = vpow2.f32 %v980_v29  ;;  %v918_v18 = vmul.f32 1.442695, %v849_v30  ;;  %v1876_v42 = vadd.f32 -1.0, %v1135_v24 }
  0xd3   : > { %v1279_v40 = vadd.f32 1.0, %v1151_v28  ;;  %v2206_v41 = vpop.eup %2205  ;;  %v1104_v53 = vmul.f32 %v1040_v32, %v1040_v32  ;;  %v2671_v45 = vadd.f32 %v2534_v38, %v733_v2  ;;  %v749_v46 = vmul.f32 %v2529_v37, %v640_v35 }
  0xd4   : > { %2213 = vrcp.f32 %v1263_v31  ;;  %v1359_v19 = vmul.f32 %v2206_v41, %v1844_v17  ;;  %v765_v43 = vmul.f32 %v2529_v37, %v680_v36  ;;  %v1406_v48 = vmul.f32 %v2204_v39, %v1891_v6  ;;  %v643_v41 = vpop.f32.mrf.mxu2 }
  0xd5   : > { %2215 = vrcp.f32 %v1279_v40  ;;  %v2208_v47 = vpop.eup %2207  ;;  %v1892_v49 = vadd.f32 -1.0, %v1151_v28  ;;  %v1232_v50 = vadd.f32 1.0, %v1104_v53  ;;  %v865_v54 = vmin.f32 %v2671_v45, 20.0 }
  0xd6   : > { %2217 = vpow2.f32 %v1012_v34  ;;  %v1423_v51 = vmul.f32 %v1359_v19, %v2597_v26  ;;  %v1056_v52 = vadd.f32 1.0, %v2208_v47  ;;  %v2678_v63 = vadd.f32 %v2534_v38, %v749_v46 }
  0xd7   : > { %2219 = vpow2.f32 %v918_v18  ;;  %v2210_v61 = vpop.eup %2209  ;;  %v2681_v0 = vadd.f32 %v2534_v38, %v765_v43  ;;  %v718_v1 = vmul.f32 %v2529_v37, %v563_v44  ;;  %v950_v59 = vmul.f32 1.442695, %v865_v54  ;;  %v565_v44 = vpop.f32.mrf.mxu0 }
  0xd8   : > { %2221 = vrcp.f32 %v1232_v50  ;;  %v2212_v2 = vpop.eup %2211  ;;  %v1948_v3 = vpack.c.bf16 %v1423_v51, %v2644_v55  ;;  %v1375_v4 = vmul.f32 %v2210_v61, %v1860_v58  ;;  %v1120_v26 = vmul.f32 %v1056_v52, %v1056_v52 }
  0xd9   : > { %v1845_v5 = vadd.f32 -1.0, %v1104_v53  ;;  %v1072_v6 = vadd.f32 1.0, %v2212_v2  ;;  %v881_v8 = vmin.f32 %v2678_v63, 20.0  ;;  %v897_v9 = vmin.f32 %v2681_v0, 20.0 }
  0xda   : > { %v2214_v21 = vpop.eup %2213  ;;  %2100 = vst [vmem:[%s2611_s6 + $0x8] sm:$0xff] %v1948_v3   ;;  %v1439_v60 = vmul.f32 %v1375_v4, %v2615_v57  ;;  %v1248_v13 = vadd.f32 1.0, %v1120_v26  ;;  %v2690_v14 = vadd.f32 %v2534_v38, %v718_v1  ;;  %2223 = vpow2.f32 %v950_v59 }
  0xdb   : > { %v2216_v10 = vpop.eup %2215  ;;  %v1391_v12 = vmul.f32 %v2214_v21, %v1876_v42  ;;  %v1136_v23 = vmul.f32 %v1072_v6, %v1072_v6  ;;  %v982_v24 = vmul.f32 1.442695, %v881_v8  ;;  %v1470_v32 = vmul.f32 %v1406_v48, %v2594_v20 }
  0xdc   : > { %v2218_v55 = vpop.eup %2217  ;;  %v1407_v17 = vmul.f32 %v2216_v10, %v1892_v49  ;;  %v1988_v29 = vpack.c.bf16 %v1439_v60, %v2647_v56  ;;  %2225 = vrcp.f32 %v1248_v13  ;;  %v1014_v18 = vmul.f32 1.442695, %v897_v9 }
  0xdd   : > { %v2220_v28 = vpop.eup %2219  ;;  %v1455_v30 = vmul.f32 %v1391_v12, %v2621_v11  ;;  %v1088_v31 = vadd.f32 1.0, %v2218_v55  ;;  %v1264_v35 = vadd.f32 1.0, %v1136_v23  ;;  %2227 = vpow2.f32 %v982_v24 }
  0xde   : > { %v2222_v57 = vpop.eup %2221  ;;  %v1471_v34 = vmul.f32 %v1407_v17, %v2625_v15  ;;  %v1041_v36 = vadd.f32 1.0, %v2220_v28  ;;  %2108 = vst [vmem:[%s2611_s6 + $0x48] sm:$0xff] %v1988_v29   ;;  %v1861_v42 = vadd.f32 -1.0, %v1120_v26  ;;  %v850_v20 = vmin.f32 %v2690_v14, 20.0  ;;  %v683_v15 = vpop.f32.mrf.mxu3 }
  0xdf   : > { %v2028_v39 = vpack.c.bf16 %v1455_v30, %v2667_v27  ;;  %v1360_v58 = vmul.f32 %v2222_v57, %v1845_v5  ;;  %v1152_v40 = vmul.f32 %v1088_v31, %v1088_v31  ;;  %2229 = vrcp.f32 %v1264_v35  ;;  %v605_v5 = vpop.f32.mrf.mxu1 }
  0xe0   : > { %v2068_v56 = vpack.c.bf16 %v1471_v34, %v1470_v32  ;;  %v1105_v11 = vmul.f32 %v1041_v36, %v1041_v36  ;;  %v2224_v19 = vpop.eup %2223  ;;  %v1877_v46 = vadd.f32 -1.0, %v1136_v23  ;;  %2231 = vpow2.f32 %v1014_v18 }
  0xe1   : > { %2116 = vst [vmem:[%s2611_s6 + $0x88] sm:$0xff] %v2028_v39   ;;  %v1280_v53 = vadd.f32 1.0, %v1152_v40  ;;  %v734_v27 = vmul.f32 %v2529_v37, %v603_v25  ;;  %v1057_v48 = vadd.f32 1.0, %v2224_v19  ;;  %v920_v49 = vmul.f32 1.442695, %v850_v20  ;;  %v645_v39 = vpop.f32.mrf.mxu2 }
  0xe2   : > { %2124 = vst [vmem:[%s2611_s6 + $0xc8] sm:$0xff] %v2068_v56   ;;  %v1233_v43 = vadd.f32 1.0, %v1105_v11  ;;  %v2226_v47 = vpop.eup %2225  ;;  %v750_v50 = vmul.f32 %v2529_v37, %v643_v41  ;;  %v2704_v51 = vmul.f32 %v1360_v58, %v2635_v33  ;;  %v766_v54 = vmul.f32 %v2529_v37, %v683_v15 }
  0xe3   : > { %2233 = vrcp.f32 %v1280_v53  ;;  %v2707_v52 = vadd.f32 %v2534_v38, %v734_v27  ;;  %v2228_v61 = vpop.eup %2227  ;;  %v1121_v1 = vmul.f32 %v1057_v48, %v1057_v48  ;;  %v719_v3 = vmul.f32 %v2529_v37, %v565_v44  ;;  %v568_v27 = vpop.f32.mrf.mxu0 }
  0xe4   : > { %2235 = vrcp.f32 %v1233_v43  ;;  %v2711_v2 = vadd.f32 %v2534_v38, %v750_v50  ;;  %v1376_v26 = vmul.f32 %v2226_v47, %v1861_v42  ;;  %v1073_v59 = vadd.f32 1.0, %v2228_v61 }
  0xe5   : > { %2237 = vpow2.f32 %v920_v49  ;;  %v2230_v4 = vpop.eup %2229  ;;  %v866_v33 = vmin.f32 %v2707_v52, 20.0  ;;  %v2716_v21 = vadd.f32 %v2534_v38, %v766_v54  ;;  %v1893_v8 = vadd.f32 -1.0, %v1152_v40 }
  0xe6   : > { %v1392_v6 = vmul.f32 %v2230_v4, %v1877_v46  ;;  %v1249_v9 = vadd.f32 1.0, %v1121_v1  ;;  %v882_v10 = vmin.f32 %v2711_v2, 20.0  ;;  %v2232_v60 = vpop.eup %2231  ;;  %v1137_v12 = vmul.f32 %v1073_v59, %v1073_v59 }
  0xe7   : > { %v952_v13 = vmul.f32 1.442695, %v866_v33  ;;  %v898_v55 = vmin.f32 %v2716_v21, 20.0  ;;  %v2721_v17 = vadd.f32 %v2534_v38, %v719_v3  ;;  %v1846_v24 = vadd.f32 -1.0, %v1105_v11  ;;  %v685_v11 = vpop.f32.mrf.mxu3  ;;  %v608_v49 = vpop.f32.mrf.mxu1 }
  0xe8   : > { %2239 = vrcp.f32 %v1249_v9  ;;  %v1089_v25 = vadd.f32 1.0, %v2232_v60  ;;  %v984_v28 = vmul.f32 1.442695, %v882_v10  ;;  %v1440_v30 = vmul.f32 %v1376_v26, %v2650_v62 }
  0xe9   : > { %v2234_v23 = vpop.eup %2233  ;;  %v1862_v31 = vadd.f32 -1.0, %v1121_v1  ;;  %v1265_v57 = vadd.f32 1.0, %v1137_v12  ;;  %2241 = vpow2.f32 %v952_v13  ;;  %v1016_v36 = vmul.f32 1.442695, %v898_v55 }
  0xea   : > { %v2236_v29 = vpop.eup %2235  ;;  %v1153_v35 = vmul.f32 %v1089_v25, %v1089_v25  ;;  %2243 = vpow2.f32 %v984_v28  ;;  %v2725_v58 = vmul.f32 %v1392_v6, %v2656_v22  ;;  %v851_v56 = vmin.f32 %v2721_v17, 20.0 }
  0xeb   : > { %v2238_v32 = vpop.eup %2237  ;;  %v1361_v34 = vmul.f32 %v2236_v29, %v1846_v24  ;;  %2245 = vrcp.f32 %v1265_v57  ;;  %v1408_v18 = vmul.f32 %v2234_v23, %v1893_v8  ;;  %v735_v20 = vmul.f32 %v2529_v37, %v605_v5 }
  0xec   : > { %v1042_v40 = vadd.f32 1.0, %v2238_v32  ;;  %v1281_v41 = vadd.f32 1.0, %v1153_v35  ;;  %2247 = vpow2.f32 %v1016_v36  ;;  %v922_v53 = vmul.f32 1.442695, %v851_v56 }
  0xed   : > { %v1425_v62 = vmul.f32 %v1361_v34, %v2664_v16  ;;  %v751_v15 = vmul.f32 %v2529_v37, %v645_v39  ;;  %v1878_v46 = vadd.f32 -1.0, %v1137_v12  ;;  %v767_v43 = vmul.f32 %v2529_v37, %v685_v11 }
  0xee   : > { %v1106_v42 = vmul.f32 %v1042_v40, %v1042_v40  ;;  %v2240_v19 = vpop.eup %2239  ;;  %2249 = vrcp.f32 %v1281_v41  ;;  %v1894_v16 = vadd.f32 -1.0, %v1153_v35  ;;  %v2735_v61 = vadd.f32 %v2534_v38, %v735_v20  ;;  %v648_v41 = vpop.f32.mrf.mxu2 }
  0xef   : > { %v1953_v22 = vpack.c.bf16 %v1425_v62, %v2704_v51  ;;  %v2242_v44 = vpop.eup %2241  ;;  %v1377_v47 = vmul.f32 %v2240_v19, %v1862_v31  ;;  %2251 = vpow2.f32 %v922_v53  ;;  %v2738_v1 = vadd.f32 %v2534_v38, %v751_v15  ;;  %v570_v15 = vpop.f32.mrf.mxu0 }
  0xf0   : > { %v1234_v48 = vadd.f32 1.0, %v1106_v42  ;;  %v2244_v50 = vpop.eup %2243  ;;  %v1058_v54 = vadd.f32 1.0, %v2242_v44  ;;  %v2741_v51 = vadd.f32 %v2534_v38, %v767_v43  ;;  %v720_v59 = vmul.f32 %v2529_v37, %v568_v27 }
  0xf1   : > { %2101 = vst [vmem:[%s2611_s6 + $0x10] sm:$0xff] %v1953_v22   ;;  %v2246_v3 = vpop.eup %2245  ;;  %v1441_v4 = vmul.f32 %v1377_v47, %v2671_v45  ;;  %v1074_v26 = vadd.f32 1.0, %v2244_v50  ;;  %v867_v8 = vmin.f32 %v2735_v61, 20.0  ;;  %v883_v9 = vmin.f32 %v2738_v1, 20.0 }
  0xf2   : > { %2253 = vrcp.f32 %v1234_v48  ;;  %v2248_v33 = vpop.eup %2247  ;;  %v1393_v5 = vmul.f32 %v2246_v3, %v1878_v46  ;;  %v1122_v6 = vmul.f32 %v1058_v54, %v1058_v54  ;;  %v1847_v60 = vadd.f32 -1.0, %v1106_v42  ;;  %v688_v42 = vpop.f32.mrf.mxu3 }
  0xf3   : > { %v1993_v10 = vpack.c.bf16 %v1441_v4, %v1440_v30  ;;  %v1138_v12 = vmul.f32 %v1074_v26, %v1074_v26  ;;  %v1090_v13 = vadd.f32 1.0, %v2248_v33  ;;  %v954_v24 = vmul.f32 1.442695, %v867_v8 }
  0xf4   : > { %v2250_v55 = vpop.eup %2249  ;;  %v1457_v23 = vmul.f32 %v1393_v5, %v2678_v63  ;;  %v1250_v45 = vadd.f32 1.0, %v1122_v6  ;;  %v899_v25 = vmin.f32 %v2741_v51, 20.0  ;;  %v2751_v32 = vadd.f32 %v2534_v38, %v720_v59 }
  0xf5   : > { %v2252_v28 = vpop.eup %2251  ;;  %2109 = vst [vmem:[%s2611_s6 + $0x50] sm:$0xff] %v1993_v10   ;;  %v1409_v29 = vmul.f32 %v2250_v55, %v1894_v16  ;;  %v1266_v31 = vadd.f32 1.0, %v1138_v12  ;;  %v1154_v57 = vmul.f32 %v1090_v13, %v1090_v13  ;;  %v986_v35 = vmul.f32 1.442695, %v883_v9 }
  0xf6   : > { %v2033_v30 = vpack.c.bf16 %v1457_v23, %v2725_v58  ;;  %2255 = vrcp.f32 %v1250_v45  ;;  %v1043_v34 = vadd.f32 1.0, %v2252_v28  ;;  %v1472_v63 = vmul.f32 %v1408_v18, %v2659_v7  ;;  %v610_v7 = vpop.f32.mrf.mxu1 }
  0xf7   : > { %v1473_v39 = vmul.f32 %v1409_v29, %v2681_v0  ;;  %2257 = vrcp.f32 %v1266_v31  ;;  %v1282_v40 = vadd.f32 1.0, %v1154_v57  ;;  %v1863_v56 = vadd.f32 -1.0, %v1122_v6 }
  0xf8   : > { %v2254_v36 = vpop.eup %2253  ;;  %2117 = vst [vmem:[%s2611_s6 + $0x90] sm:$0xff] %v2033_v30   ;;  %v1107_v11 = vmul.f32 %v1043_v34, %v1043_v34  ;;  %2259 = vpow2.f32 %v954_v24  ;;  %v1018_v62 = vmul.f32 1.442695, %v899_v25  ;;  %v852_v58 = vmin.f32 %v2751_v32, 20.0 }
  0xf9   : > { %v2073_v53 = vpack.c.bf16 %v1473_v39, %v1472_v63  ;;  %2261 = vrcp.f32 %v1282_v40  ;;  %v736_v20 = vmul.f32 %v2529_v37, %v608_v49  ;;  %v1362_v18 = vmul.f32 %v2254_v36, %v1847_v60 }
  0xfa   : > { %v1879_v0 = vadd.f32 -1.0, %v1138_v12  ;;  %v1235_v19 = vadd.f32 1.0, %v1107_v11  ;;  %2263 = vpow2.f32 %v986_v35  ;;  %v924_v22 = vmul.f32 1.442695, %v852_v58  ;;  %v573_v58 = vpop.f32.mrf.mxu0 }
  0xfb   : > { %2125 = vst [vmem:[%s2611_s6 + $0xd0] sm:$0xff] %v2073_v53   ;;  %2265 = vpow2.f32 %v1018_v62  ;;  %v2761_v46 = vadd.f32 %v2534_v38, %v736_v20  ;;  %v752_v43 = vmul.f32 %v2529_v37, %v648_v41  ;;  %v768_v44 = vmul.f32 %v2529_v37, %v688_v42  ;;  %v690_v53 = vpop.f32.mrf.mxu3 }
  0xfc   : > { %v2256_v27 = vpop.eup %2255  ;;  %2267 = vrcp.f32 %v1235_v19  ;;  %v721_v47 = vmul.f32 %v2529_v37, %v570_v15  ;;  %v737_v16 = vmul.f32 %v2529_v37, %v610_v7  ;;  %v1895_v49 = vadd.f32 -1.0, %v1154_v57 }
  0xfd   : > { %v2258_v48 = vpop.eup %2257  ;;  %2269 = vpow2.f32 %v924_v22  ;;  %v868_v50 = vmin.f32 %v2761_v46, 20.0  ;;  %v2769_v54 = vadd.f32 %v2534_v38, %v752_v43  ;;  %v1426_v4 = vmul.f32 %v1362_v18, %v2690_v14  ;;  %v2805_v22 = vld [vmem:[%s3013_s3] ss:$0 sm:$0xff] }
  0xfe   : > { %v2260_v3 = vpop.eup %2259  ;;  %v1378_v26 = vmul.f32 %v2256_v27, %v1863_v56  ;;  %v2773_v59 = vadd.f32 %v2534_v38, %v768_v44  ;;  %v2776_v33 = vadd.f32 %v2534_v38, %v721_v47  ;;  %v1394_v37 = vmul.f32 %v2258_v48, %v1879_v0  ;;  %v650_v56 = vpop.f32.mrf.mxu2 }
  0xff   : > { %v2262_v5 = vpop.eup %2261  ;;  %v1059_v6 = vadd.f32 1.0, %v2260_v3  ;;  %v956_v8 = vmul.f32 1.442695, %v868_v50  ;;  %v884_v9 = vmin.f32 %v2769_v54, 20.0  ;;  %v1848_v60 = vadd.f32 -1.0, %v1107_v11  ;;  %v613_v50 = vpop.f32.mrf.mxu1 }
 0x100   : > { %v2264_v10 = vpop.eup %2263  ;;  %v900_v12 = vmin.f32 %v2773_v59, 20.0  ;;  %v853_v13 = vmin.f32 %v2776_v33, 20.0  ;;  %v2782_v14 = vadd.f32 %v2534_v38, %v737_v16  ;;  %v2785_v28 = vmul.f32 %v1378_v26, %v2707_v52 }
 0x101   : > { %v2266_v55 = vpop.eup %2265  ;;  %v1123_v23 = vmul.f32 %v1059_v6, %v1059_v6  ;;  %v1075_v45 = vadd.f32 1.0, %v2264_v10  ;;  %2271 = vpow2.f32 %v956_v8  ;;  %v988_v24 = vmul.f32 1.442695, %v884_v9 }
 0x102   : > { %v2268_v25 = vpop.eup %2267  ;;  %v1410_v29 = vmul.f32 %v2262_v5, %v1895_v49  ;;  %v1091_v31 = vadd.f32 1.0, %v2266_v55  ;;  %v1020_v57 = vmul.f32 1.442695, %v900_v12  ;;  %v2788_v34 = vmul.f32 %v1394_v37, %v2711_v2 }
 0x103   : > { %v2270_v30 = vpop.eup %2269  ;;  %v1363_v35 = vmul.f32 %v2268_v25, %v1848_v60  ;;  %v1251_v36 = vadd.f32 1.0, %v1123_v23  ;;  %v1139_v38 = vmul.f32 %v1075_v45, %v1075_v45  ;;  %2273 = vpow2.f32 %v988_v24 }
 0x104   : > { %v1155_v63 = vmul.f32 %v1091_v31, %v1091_v31  ;;  %v1044_v39 = vadd.f32 1.0, %v2270_v30  ;;  %v869_v40 = vmin.f32 %v2782_v14, 20.0  ;;  %v926_v62 = vmul.f32 1.442695, %v853_v13 }
 0x105   : > { %v1427_v11 = vmul.f32 %v1363_v35, %v2721_v17  ;;  %2275 = vrcp.f32 %v1251_v36  ;;  %v1267_v52 = vadd.f32 1.0, %v1139_v38  ;;  %v2793_v41 = vmul.f32 %v1410_v29, %v2716_v21  ;;  %v2798_v17 = vld [vmem:[%s3012_s2] ss:$0 sm:$0xff] }
 0x106   : > { %v1283_v2 = vadd.f32 1.0, %v1155_v63  ;;  %v1108_v42 = vmul.f32 %v1044_v39, %v1044_v39  ;;  %2277 = vpow2.f32 %v1020_v57  ;;  %v958_v7 = vmul.f32 1.442695, %v869_v40  ;;  %v653_v31 = vpop.f32.mrf.mxu2 }
 0x107   : > { %v2272_v20 = vpop.eup %2271  ;;  %v1958_v15 = vpack.c.bf16 %v1427_v11, %v1426_v4  ;;  %2279 = vrcp.f32 %v1267_v52  ;;  %v753_v18 = vmul.f32 %v2798_v17, %v650_v56  ;;  %v1864_v0 = vadd.f32 -1.0, %v1123_v23 }
 0x108   : > { %2281 = vrcp.f32 %v1283_v2  ;;  %v1236_v21 = vadd.f32 1.0, %v1108_v42  ;;  %v1060_v19 = vadd.f32 1.0, %v2272_v20  ;;  %v769_v27 = vmul.f32 %v2798_v17, %v690_v53 }
 0x109   : > { %2102 = vst [vmem:[%s2611_s6 + $0x18] sm:$0xff] %v1958_v15   ;;  %2283 = vpow2.f32 %v926_v62  ;;  %v2808_v43 = vadd.f32 %v2805_v22, %v753_v18  ;;  %v722_v44 = vmul.f32 %v2798_v17, %v573_v58  ;;  %v2274_v47 = vpop.eup %2273  ;;  %v1880_v16 = vadd.f32 -1.0, %v1139_v38 }
 0x10a   : > { %v1896_v48 = vadd.f32 -1.0, %v1155_v63  ;;  %2285 = vrcp.f32 %v1236_v21  ;;  %v1124_v49 = vmul.f32 %v1060_v19, %v1060_v19  ;;  %v1076_v4 = vadd.f32 1.0, %v2274_v47 }
 0x10b   : > { %v2276_v3 = vpop.eup %2275  ;;  %2287 = vpow2.f32 %v958_v7  ;;  %v885_v26 = vmin.f32 %v2808_v43, 20.0  ;;  %v2814_v5 = vadd.f32 %v2805_v22, %v769_v27  ;;  %v1849_v8 = vadd.f32 -1.0, %v1108_v42  ;;  %v693_v7 = vpop.f32.mrf.mxu3 }
 0x10c   : > { %v2278_v37 = vpop.eup %2277  ;;  %v1379_v6 = vmul.f32 %v2276_v3, %v1864_v0  ;;  %v1252_v9 = vadd.f32 1.0, %v1124_v49  ;;  %v2817_v10 = vadd.f32 %v2805_v22, %v722_v44  ;;  %v1140_v12 = vmul.f32 %v1076_v4, %v1076_v4 }
 0x10d   : > { %v2280_v60 = vpop.eup %2279  ;;  %v1092_v13 = vadd.f32 1.0, %v2278_v37  ;;  %v990_v55 = vmul.f32 1.442695, %v885_v26  ;;  %v738_v23 = vmul.f32 %v2798_v17, %v613_v50  ;;  %v901_v29 = vmin.f32 %v2814_v5, 20.0 }
 0x10e   : > { %v2282_v45 = vpop.eup %2281  ;;  %v1443_v24 = vmul.f32 %v1379_v6, %v2735_v61  ;;  %v1395_v25 = vmul.f32 %v2280_v60, %v1880_v16  ;;  %2289 = vrcp.f32 %v1252_v9  ;;  %v1268_v35 = vadd.f32 1.0, %v1140_v12 }
 0x10f   : > { %v2284_v57 = vpop.eup %2283  ;;  %v1411_v30 = vmul.f32 %v2282_v45, %v1896_v48  ;;  %v1156_v36 = vmul.f32 %v1092_v13, %v1092_v13  ;;  %v854_v38 = vmin.f32 %v2817_v10, 20.0  ;;  %2291 = vpow2.f32 %v990_v55  ;;  %v575_v48 = vpop.f32.mrf.mxu0 }
 0x110   : > { %v2286_v63 = vpop.eup %2285  ;;  %v1998_v39 = vpack.c.bf16 %v1443_v24, %v2785_v28  ;;  %v1459_v40 = vmul.f32 %v1395_v25, %v2738_v1  ;;  %v1045_v56 = vadd.f32 1.0, %v2284_v57  ;;  %2293 = vrcp.f32 %v1268_v35 }
 0x111   : > { %v2288_v61 = vpop.eup %2287  ;;  %v1475_v11 = vmul.f32 %v1411_v30, %v2741_v51  ;;  %v1364_v52 = vmul.f32 %v2286_v63, %v1849_v8  ;;  %v754_v62 = vmul.f32 %v2798_v17, %v653_v31  ;;  %v1284_v42 = vadd.f32 1.0, %v1156_v36 }
 0x112   : > { %2110 = vst [vmem:[%s2611_s6 + $0x58] sm:$0xff] %v1998_v39   ;;  %v2038_v2 = vpack.c.bf16 %v1459_v40, %v2788_v34  ;;  %v1109_v53 = vmul.f32 %v1045_v56, %v1045_v56  ;;  %v1061_v58 = vadd.f32 1.0, %v2288_v61  ;;  %v1865_v1 = vadd.f32 -1.0, %v1124_v49  ;;  %v615_v49 = vpop.f32.mrf.mxu1 }
 0x113   : > { %v2078_v28 = vpack.c.bf16 %v1475_v11, %v2793_v41  ;;  %v1022_v20 = vmul.f32 1.442695, %v901_v29  ;;  %v928_v15 = vmul.f32 1.442695, %v854_v38  ;;  %v1881_v51 = vadd.f32 -1.0, %v1140_v12 }
 0x114   : > { %v2290_v18 = vpop.eup %2289  ;;  %2118 = vst [vmem:[%s2611_s6 + $0x98] sm:$0xff] %v2038_v2   ;;  %2295 = vrcp.f32 %v1284_v42  ;;  %v1237_v0 = vadd.f32 1.0, %v1109_v53  ;;  %v1125_v21 = vmul.f32 %v1061_v58, %v1061_v58  ;;  %v1897_v19 = vadd.f32 -1.0, %v1156_v36 }
 0x115   : > { %2126 = vst [vmem:[%s2611_s6 + $0xd8] sm:$0xff] %v2078_v28   ;;  %2297 = vpow2.f32 %v1022_v20  ;;  %v2833_v34 = vadd.f32 %v2805_v22, %v738_v23  ;;  %v2836_v27 = vadd.f32 %v2805_v22, %v754_v62  ;;  %v2292_v41 = vpop.eup %2291  ;;  %v2839_v44 = vmul.f32 %v1364_v52, %v2751_v32  ;;  %v655_v32 = vpop.f32.mrf.mxu2 }
 0x116   : > { %2299 = vrcp.f32 %v1237_v0  ;;  %v1253_v47 = vadd.f32 1.0, %v1125_v21  ;;  %v770_v16 = vmul.f32 %v2798_v17, %v693_v7  ;;  %v2294_v50 = vpop.eup %2293  ;;  %v1380_v3 = vmul.f32 %v2290_v18, %v1865_v1 }
 0x117   : > { %v1077_v4 = vadd.f32 1.0, %v2292_v41  ;;  %2301 = vpow2.f32 %v928_v15  ;;  %v870_v26 = vmin.f32 %v2833_v34, 20.0  ;;  %v1396_v37 = vmul.f32 %v2294_v50, %v1881_v51 }
 0x118   : > { %2303 = vrcp.f32 %v1253_v47  ;;  %v886_v6 = vmin.f32 %v2836_v27, 20.0  ;;  %v2845_v8 = vadd.f32 %v2805_v22, %v770_v16  ;;  %v723_v12 = vmul.f32 %v2798_v17, %v575_v48  ;;  %v578_v48 = vpop.f32.mrf.mxu0 }
 0x119   : > { %v1141_v9 = vmul.f32 %v1077_v4, %v1077_v4  ;;  %v960_v60 = vmul.f32 1.442695, %v870_v26  ;;  %v739_v13 = vmul.f32 %v2798_v17, %v615_v49  ;;  %v1850_v23 = vadd.f32 -1.0, %v1109_v53 }
 0x11a   : > { %v2296_v55 = vpop.eup %2295  ;;  %v1866_v45 = vadd.f32 -1.0, %v1125_v21  ;;  %v992_v24 = vmul.f32 1.442695, %v886_v6  ;;  %v902_v25 = vmin.f32 %v2845_v8, 20.0  ;;  %v1444_v31 = vmul.f32 %v1380_v3, %v2761_v46 }
 0x11b   : > { %v2298_v29 = vpop.eup %2297  ;;  %v1269_v57 = vadd.f32 1.0, %v1141_v9  ;;  %2305 = vpow2.f32 %v960_v60  ;;  %v755_v30 = vmul.f32 %v2798_v17, %v655_v32  ;;  %v2853_v63 = vadd.f32 %v2805_v22, %v723_v12 }
 0x11c   : > { %v2300_v35 = vpop.eup %2299  ;;  %v1093_v36 = vadd.f32 1.0, %v2298_v29  ;;  %2307 = vpow2.f32 %v992_v24  ;;  %v1024_v38 = vmul.f32 1.442695, %v902_v25  ;;  %v2856_v40 = vmul.f32 %v1396_v37, %v2769_v54  ;;  %v695_v54 = vpop.f32.mrf.mxu3 }
 0x11d   : > { %v2302_v39 = vpop.eup %2301  ;;  %v1365_v56 = vmul.f32 %v2300_v35, %v1850_v23  ;;  %2309 = vrcp.f32 %v1269_v57  ;;  %v2859_v61 = vadd.f32 %v2805_v22, %v739_v13  ;;  %v855_v62 = vmin.f32 %v2853_v63, 20.0  ;;  %v658_v25 = vpop.f32.mrf.mxu2 }
 0x11e   : > { %v2304_v46 = vpop.eup %2303  ;;  %v1157_v11 = vmul.f32 %v1093_v36, %v1093_v36  ;;  %v1046_v52 = vadd.f32 1.0, %v2302_v39  ;;  %2311 = vpow2.f32 %v1024_v38  ;;  %v2865_v58 = vadd.f32 %v2805_v22, %v755_v30 }
 0x11f   : > { %v1429_v2 = vmul.f32 %v1365_v56, %v2776_v33  ;;  %v1381_v42 = vmul.f32 %v2304_v46, %v1866_v45  ;;  %v871_v53 = vmin.f32 %v2859_v61, 20.0  ;;  %v1412_v28 = vmul.f32 %v2296_v55, %v1897_v19 }
 0x120   : > { %v1285_v1 = vadd.f32 1.0, %v1157_v11  ;;  %v1110_v20 = vmul.f32 %v1046_v52, %v1046_v52  ;;  %v930_v15 = vmul.f32 1.442695, %v855_v62  ;;  %v887_v33 = vmin.f32 %v2865_v58, 20.0 }
 0x121   : > { %v2306_v7 = vpop.eup %2305  ;;  %v1963_v18 = vpack.c.bf16 %v1429_v2, %v2839_v44  ;;  %v1445_v51 = vmul.f32 %v1381_v42, %v2782_v14  ;;  %v962_v0 = vmul.f32 1.442695, %v871_v53  ;;  %v1882_v41 = vadd.f32 -1.0, %v1141_v9  ;;  %v618_v9 = vpop.f32.mrf.mxu1 }
 0x122   : > { %v2308_v21 = vpop.eup %2307  ;;  %2313 = vrcp.f32 %v1285_v1  ;;  %v1238_v47 = vadd.f32 1.0, %v1110_v20  ;;  %v1062_v16 = vadd.f32 1.0, %v2306_v7  ;;  %v994_v3 = vmul.f32 1.442695, %v887_v33 }
 0x123   : > { %v2310_v19 = vpop.eup %2309  ;;  %2103 = vst [vmem:[%s2611_s6 + $0x20] sm:$0xff] %v1963_v18   ;;  %v2003_v49 = vpack.c.bf16 %v1445_v51, %v1444_v31  ;;  %v1078_v50 = vadd.f32 1.0, %v2308_v21  ;;  %2315 = vpow2.f32 %v930_v15  ;;  %v771_v26 = vmul.f32 %v2798_v17, %v695_v54 }
 0x124   : > { %v2312_v4 = vpop.eup %2311  ;;  %v1397_v44 = vmul.f32 %v2310_v19, %v1882_v41  ;;  %2317 = vrcp.f32 %v1238_v47  ;;  %v1126_v14 = vmul.f32 %v1062_v16, %v1062_v16  ;;  %v724_v32 = vmul.f32 %v2798_v17, %v578_v48  ;;  %v698_v38 = vpop.f32.mrf.mxu3 }
 0x125   : > { %2111 = vst [vmem:[%s2611_s6 + $0x60] sm:$0xff] %v2003_v49   ;;  %v1142_v37 = vmul.f32 %v1078_v50, %v1078_v50  ;;  %v1094_v6 = vadd.f32 1.0, %v2312_v4  ;;  %2319 = vpow2.f32 %v962_v0  ;;  %v1898_v12 = vadd.f32 -1.0, %v1157_v11  ;;  %v580_v50 = vpop.f32.mrf.mxu0 }
 0x126   : > { %v1461_v60 = vmul.f32 %v1397_v44, %v2808_v43  ;;  %v1254_v13 = vadd.f32 1.0, %v1126_v14  ;;  %2321 = vpow2.f32 %v994_v3  ;;  %v1851_v55 = vadd.f32 -1.0, %v1110_v20 }
 0x127   : > { %v1270_v23 = vadd.f32 1.0, %v1142_v37  ;;  %v1158_v45 = vmul.f32 %v1094_v6, %v1094_v6  ;;  %v2876_v24 = vadd.f32 %v2805_v22, %v771_v26  ;;  %v2880_v57 = vadd.f32 %v2805_v22, %v724_v32  ;;  %v660_v26 = vpop.f32.mrf.mxu2 }
 0x128   : > { %v2314_v29 = vpop.eup %2313  ;;  %v2043_v31 = vpack.c.bf16 %v1461_v60, %v2856_v40  ;;  %2323 = vrcp.f32 %v1254_v13  ;;  %v740_v43 = vmul.f32 %v2798_v17, %v618_v9  ;;  %v1476_v62 = vmul.f32 %v1412_v28, %v2773_v59 }
 0x129   : > { %v2316_v30 = vpop.eup %2315  ;;  %v1413_v35 = vmul.f32 %v2314_v29, %v1898_v12  ;;  %2325 = vrcp.f32 %v1270_v23  ;;  %v1286_v36 = vadd.f32 1.0, %v1158_v45  ;;  %v903_v46 = vmin.f32 %v2876_v24, 20.0  ;;  %v620_v3 = vpop.f32.mrf.mxu1 }
 0x12a   : > { %v2318_v39 = vpop.eup %2317  ;;  %2119 = vst [vmem:[%s2611_s6 + $0xa0] sm:$0xff] %v2043_v31   ;;  %v1047_v56 = vadd.f32 1.0, %v2316_v30  ;;  %v856_v11 = vmin.f32 %v2880_v57, 20.0  ;;  %v2887_v40 = vadd.f32 %v2805_v22, %v740_v43  ;;  %v1867_v53 = vadd.f32 -1.0, %v1126_v14 }
 0x12b   : > { %v2320_v52 = vpop.eup %2319  ;;  %v1477_v2 = vmul.f32 %v1413_v35, %v2814_v5  ;;  %v1366_v42 = vmul.f32 %v2318_v39, %v1851_v55  ;;  %v1026_v15 = vmul.f32 1.442695, %v903_v46  ;;  %2327 = vrcp.f32 %v1286_v36 }
 0x12c   : > { %v2322_v54 = vpop.eup %2321  ;;  %v1111_v1 = vmul.f32 %v1047_v56, %v1047_v56  ;;  %v1063_v20 = vadd.f32 1.0, %v2320_v52  ;;  %v932_v7 = vmul.f32 1.442695, %v856_v11  ;;  %v872_v0 = vmin.f32 %v2887_v40, 20.0  ;;  %v700_v55 = vpop.f32.mrf.mxu3 }
 0x12d   : > { %v2083_v18 = vpack.c.bf16 %v1477_v2, %v1476_v62  ;;  %v1079_v51 = vadd.f32 1.0, %v2322_v54  ;;  %2329 = vpow2.f32 %v1026_v15  ;;  %v756_v59 = vmul.f32 %v2798_v17, %v658_v25 }
 0x12e   : > { %v2324_v33 = vpop.eup %2323  ;;  %v1239_v21 = vadd.f32 1.0, %v1111_v1  ;;  %v1127_v41 = vmul.f32 %v1063_v20, %v1063_v20  ;;  %v1883_v28 = vadd.f32 -1.0, %v1142_v37  ;;  %2331 = vpow2.f32 %v932_v7 }
 0x12f   : > { %v2326_v5 = vpop.eup %2325  ;;  %2127 = vst [vmem:[%s2611_s6 + $0xe0] sm:$0xff] %v2083_v18   ;;  %v1143_v47 = vmul.f32 %v1079_v51, %v1079_v51  ;;  %v964_v16 = vmul.f32 1.442695, %v872_v0  ;;  %v1382_v48 = vmul.f32 %v2324_v33, %v1867_v53  ;;  %v1899_v19 = vadd.f32 -1.0, %v1158_v45 }
 0x130   : > { %2333 = vrcp.f32 %v1239_v21  ;;  %v1255_v49 = vadd.f32 1.0, %v1127_v41  ;;  %v1430_v4 = vmul.f32 %v1366_v42, %v2817_v10  ;;  %v1852_v44 = vadd.f32 -1.0, %v1111_v1 }
 0x131   : > { %v1271_v14 = vadd.f32 1.0, %v1143_v47  ;;  %2335 = vpow2.f32 %v964_v16  ;;  %v1398_v6 = vmul.f32 %v2326_v5, %v1883_v28  ;;  %v1868_v32 = vadd.f32 -1.0, %v1127_v41  ;;  %v2328_v9 = vpop.eup %2327 }
 0x132   : > { %2337 = vrcp.f32 %v1255_v49  ;;  %v2896_v37 = vadd.f32 %v2805_v22, %v756_v59  ;;  %v772_v60 = vmul.f32 %v2798_v17, %v698_v38  ;;  %v725_v12 = vmul.f32 %v2798_v17, %v580_v50  ;;  %v623_v50 = vpop.f32.mrf.mxu1 }
 0x133   : > { %2339 = vrcp.f32 %v1271_v14  ;;  %v741_v13 = vmul.f32 %v2798_v17, %v620_v3  ;;  %v2330_v10 = vpop.eup %2329  ;;  %v1446_v23 = vmul.f32 %v1382_v48, %v2833_v34  ;;  %v1884_v45 = vadd.f32 -1.0, %v1143_v47  ;;  %v583_v47 = vpop.f32.mrf.mxu0 }
 0x134   : > { %v888_v25 = vmin.f32 %v2896_v37, 20.0  ;;  %v757_v29 = vmul.f32 %v2798_v17, %v660_v26  ;;  %v2332_v31 = vpop.eup %2331  ;;  %v1095_v43 = vadd.f32 1.0, %v2330_v10  ;;  %v2905_v30 = vadd.f32 %v2805_v22, %v772_v60  ;;  %v663_v26 = vpop.f32.mrf.mxu2 }
 0x135   : > { %v2908_v35 = vadd.f32 %v2805_v22, %v725_v12  ;;  %v2911_v36 = vadd.f32 %v2805_v22, %v741_v13  ;;  %v1462_v39 = vmul.f32 %v1398_v6, %v2836_v27  ;;  %v1048_v34 = vadd.f32 1.0, %v2332_v31  ;;  %v703_v31 = vpop.f32.mrf.mxu3 }
 0x136   : > { %v2334_v38 = vpop.eup %2333  ;;  %v996_v56 = vmul.f32 1.442695, %v888_v25  ;;  %v773_v46 = vmul.f32 %v2798_v17, %v700_v55  ;;  %v1159_v62 = vmul.f32 %v1095_v43, %v1095_v43  ;;  %v904_v2 = vmin.f32 %v2905_v30, 20.0 }
 0x137   : > { %v2336_v11 = vpop.eup %2335  ;;  %v1367_v52 = vmul.f32 %v2334_v38, %v1852_v44  ;;  %v2917_v42 = vadd.f32 %v2805_v22, %v757_v29  ;;  %v2919_v54 = vmul.f32 %v1048_v34, %v1048_v34  ;;  %v857_v20 = vmin.f32 %v2908_v35, 20.0 }
 0x138   : > { %v2338_v53 = vpop.eup %2337  ;;  %v1064_v1 = vadd.f32 1.0, %v2336_v11  ;;  %2341 = vpow2.f32 %v996_v56  ;;  %v1287_v18 = vadd.f32 1.0, %v1159_v62  ;;  %v873_v51 = vmin.f32 %v2911_v36, 20.0 }
 0x139   : > { %v2340_v27 = vpop.eup %2339  ;;  %v1431_v15 = vmul.f32 %v1367_v52, %v2853_v63  ;;  %v1383_v7 = vmul.f32 %v2338_v53, %v1868_v32  ;;  %v1240_v33 = vadd.f32 1.0, %v2919_v54  ;;  %v2926_v41 = vadd.f32 %v2805_v22, %v773_v46 }
 0x13a   : > { %v1399_v0 = vmul.f32 %v2340_v27, %v1884_v45  ;;  %v1128_v21 = vmul.f32 %v1064_v1, %v1064_v1  ;;  %2343 = vrcp.f32 %v1287_v18  ;;  %v1028_v28 = vmul.f32 1.442695, %v904_v2 }
 0x13b   : > { %v1968_v59 = vpack.c.bf16 %v1431_v15, %v1430_v4  ;;  %v1447_v5 = vmul.f32 %v1383_v7, %v2859_v61  ;;  %v1414_v16 = vmul.f32 %v2328_v9, %v1899_v19  ;;  %v1900_v48 = vadd.f32 -1.0, %v1159_v62  ;;  %v585_v1 = vpop.f32.mrf.mxu0 }
 0x13c   : > { %v1463_v63 = vmul.f32 %v1399_v0, %v2865_v58  ;;  %v1256_v49 = vadd.f32 1.0, %v1128_v21  ;;  %2345 = vpow2.f32 %v1028_v28  ;;  %v934_v44 = vmul.f32 1.442695, %v857_v20 }
 0x13d   : > { %2104 = vst [vmem:[%s2611_s6 + $0x28] sm:$0xff] %v1968_v59   ;;  %v2008_v3 = vpack.c.bf16 %v1447_v5, %v1446_v23  ;;  %v966_v14 = vmul.f32 1.442695, %v873_v51  ;;  %2347 = vrcp.f32 %v1240_v33  ;;  %v889_v61 = vmin.f32 %v2917_v42, 20.0 }
 0x13e   : > { %v2342_v4 = vpop.eup %2341  ;;  %v2048_v6 = vpack.c.bf16 %v1463_v63, %v1462_v39  ;;  %v905_v19 = vmin.f32 %v2926_v41, 20.0  ;;  %2349 = vpow2.f32 %v934_v44  ;;  %v726_v58 = vmul.f32 %v2798_v17, %v583_v47 }
 0x13f   : > { %2112 = vst [vmem:[%s2611_s6 + $0x68] sm:$0xff] %v2008_v3   ;;  %v1080_v32 = vadd.f32 1.0, %v2342_v4  ;;  %v742_v9 = vmul.f32 %v2798_v17, %v623_v50  ;;  %2351 = vpow2.f32 %v966_v14  ;;  %v998_v60 = vmul.f32 1.442695, %v889_v61 }
 0x140   : > { %2120 = vst [vmem:[%s2611_s6 + $0xa8] sm:$0xff] %v2048_v6   ;;  %v1030_v12 = vmul.f32 1.442695, %v905_v19  ;;  %v758_v13 = vmul.f32 %v2798_v17, %v663_v26  ;;  %v2344_v55 = vpop.eup %2343  ;;  %2353 = vrcp.f32 %v1256_v49  ;;  %v2941_v23 = vadd.f32 %v2805_v22, %v726_v58  ;;  %v625_v6 = vpop.f32.mrf.mxu1 }
 0x141   : > { %v2938_v10 = vmul.f32 %v1080_v32, %v1080_v32  ;;  %v2944_v45 = vadd.f32 %v2805_v22, %v742_v9  ;;  %v1415_v25 = vmul.f32 %v2344_v55, %v1900_v48  ;;  %2355 = vpow2.f32 %v998_v60  ;;  %v665_v58 = vpop.f32.mrf.mxu2 }
 0x142   : > { %v2947_v29 = vadd.f32 %v2805_v22, %v758_v13  ;;  %v2346_v43 = vpop.eup %2345  ;;  %v1478_v38 = vmul.f32 %v1414_v16, %v2845_v8  ;;  %2357 = vpow2.f32 %v1030_v12  ;;  %v858_v11 = vmin.f32 %v2941_v23, 20.0 }
 0x143   : > { %v1272_v39 = vadd.f32 1.0, %v2938_v10  ;;  %v2348_v34 = vpop.eup %2347  ;;  %v1479_v56 = vmul.f32 %v1415_v25, %v2876_v24  ;;  %v1096_v46 = vadd.f32 1.0, %v2346_v43  ;;  %v874_v52 = vmin.f32 %v2944_v45, 20.0 }
 0x144   : > { %v2350_v62 = vpop.eup %2349  ;;  %v890_v2 = vmin.f32 %v2947_v29, 20.0  ;;  %v774_v53 = vmul.f32 %v2798_v17, %v703_v31  ;;  %v936_v7 = vmul.f32 1.442695, %v858_v11  ;;  %v1853_v24 = vadd.f32 -1.0, %v2919_v54  ;;  %v705_v11 = vpop.f32.mrf.mxu3 }
 0x145   : > { %v2352_v20 = vpop.eup %2351  ;;  %v2088_v8 = vpack.c.bf16 %v1479_v56, %v1478_v38  ;;  %v1160_v27 = vmul.f32 %v1096_v46, %v1096_v46  ;;  %v1049_v15 = vadd.f32 1.0, %v2350_v62  ;;  %v1869_v51 = vadd.f32 -1.0, %v1128_v21 }
 0x146   : > { %v2354_v18 = vpop.eup %2353  ;;  %v1065_v0 = vadd.f32 1.0, %v2352_v20  ;;  %v968_v33 = vmul.f32 1.442695, %v874_v52  ;;  %2359 = vrcp.f32 %v1272_v39  ;;  %v727_v47 = vmul.f32 %v2798_v17, %v585_v1 }
 0x147   : > { %v2356_v59 = vpop.eup %2355  ;;  %2128 = vst [vmem:[%s2611_s6 + $0xe8] sm:$0xff] %v2088_v8   ;;  %v1288_v5 = vadd.f32 1.0, %v1160_v27  ;;  %v1113_v28 = vmul.f32 %v1049_v15, %v1049_v15  ;;  %2361 = vpow2.f32 %v936_v7  ;;  %v2960_v49 = vadd.f32 %v2805_v22, %v774_v53 }
 0x148   : > { %v2358_v16 = vpop.eup %2357  ;;  %v1129_v63 = vmul.f32 %v1065_v0, %v1065_v0  ;;  %v1081_v48 = vadd.f32 1.0, %v2356_v59  ;;  %2363 = vpow2.f32 %v968_v33  ;;  %v1000_v54 = vmul.f32 1.442695, %v890_v2 }
 0x149   : > { %v1241_v50 = vadd.f32 1.0, %v1113_v28  ;;  %v1097_v3 = vadd.f32 1.0, %v2358_v16  ;;  %2365 = vrcp.f32 %v1288_v5  ;;  %v1368_v14 = vmul.f32 %v2348_v34, %v1853_v24 }
 0x14a   : > { %v1257_v21 = vadd.f32 1.0, %v1129_v63  ;;  %v1145_v44 = vmul.f32 %v1081_v48, %v1081_v48  ;;  %v906_v4 = vmin.f32 %v2960_v49, 20.0  ;;  %v1384_v61 = vmul.f32 %v2354_v18, %v1869_v51 }
 0x14b   : > { %2367 = vrcp.f32 %v1241_v50  ;;  %v1161_v26 = vmul.f32 %v1097_v3, %v1097_v3  ;;  %v2964_v32 = vadd.f32 %v2805_v22, %v727_v47  ;;  %v743_v25 = vmul.f32 %v2798_v17, %v625_v6 }
 0x14c   : > { %2369 = vrcp.f32 %v1257_v21  ;;  %v1273_v19 = vadd.f32 1.0, %v1145_v44  ;;  %v2360_v9 = vpop.eup %2359  ;;  %v1032_v12 = vmul.f32 1.442695, %v906_v4  ;;  %v1885_v43 = vadd.f32 -1.0, %v2938_v10 }
 0x14d   : > { %v1289_v60 = vadd.f32 1.0, %v1161_v26  ;;  %2371 = vpow2.f32 %v1000_v54  ;;  %v2362_v13 = vpop.eup %2361  ;;  %v859_v55 = vmin.f32 %v2964_v32, 20.0  ;;  %v759_v38 = vmul.f32 %v2798_v17, %v665_v58 }
 0x14e   : > { %2373 = vrcp.f32 %v1273_v19  ;;  %v2364_v31 = vpop.eup %2363  ;;  %v1432_v34 = vmul.f32 %v1368_v14, %v2880_v57  ;;  %v1448_v56 = vmul.f32 %v1384_v61, %v2887_v40  ;;  %v1854_v46 = vadd.f32 -1.0, %v1113_v28 }
 0x14f   : > { %2375 = vrcp.f32 %v1289_v60  ;;  %v2366_v39 = vpop.eup %2365  ;;  %v1400_v62 = vmul.f32 %v2360_v9, %v1885_v43  ;;  %v1870_v2 = vadd.f32 -1.0, %v1129_v63  ;;  %v2973_v53 = vadd.f32 %v2805_v22, %v743_v25 }
 0x150   : > { %2377 = vpow2.f32 %v1032_v12  ;;  %v2976_v1 = vadd.f32 %v2805_v22, %v759_v38  ;;  %v1901_v20 = vadd.f32 -1.0, %v1160_v27  ;;  %v1886_v15 = vadd.f32 -1.0, %v1145_v44 }
 0x151   : > { %v2368_v52 = vpop.eup %2367  ;;  %v938_v7 = vmul.f32 1.442695, %v859_v55  ;;  %v1902_v40 = vadd.f32 -1.0, %v1161_v26  ;;  %v1050_v24 = vadd.f32 1.0, %v2362_v13  ;;  %v775_v51 = vmul.f32 %v2798_v17, %v705_v11 }
 0x152   : > { %v2370_v10 = vpop.eup %2369  ;;  %v1369_v8 = vmul.f32 %v2368_v52, %v1854_v46  ;;  %v1416_v33 = vmul.f32 %v2366_v39, %v1901_v20  ;;  %v875_v5 = vmin.f32 %v2973_v53, 20.0  ;;  %v891_v28 = vmin.f32 %v2976_v1, 20.0 }
 0x153   : > { %v2372_v57 = vpop.eup %2371  ;;  %v1385_v18 = vmul.f32 %v2370_v10, %v1870_v2  ;;  %v1464_v27 = vmul.f32 %v1400_v62, %v2896_v37  ;;  %v1066_v48 = vadd.f32 1.0, %v2364_v31  ;;  %2379 = vpow2.f32 %v938_v7 }
 0x154   : > { %v2374_v0 = vpop.eup %2373  ;;  %v1433_v59 = vmul.f32 %v1369_v8, %v2908_v35  ;;  %v1082_v54 = vadd.f32 1.0, %v2372_v57  ;;  %v1114_v44 = vmul.f32 %v1050_v24, %v1050_v24  ;;  %v970_v14 = vmul.f32 1.442695, %v875_v5 }
 0x155   : > { %v2376_v47 = vpop.eup %2375  ;;  %v1449_v16 = vmul.f32 %v1385_v18, %v2911_v36  ;;  %v1401_v63 = vmul.f32 %v2374_v0, %v1886_v15  ;;  %v1480_v26 = vmul.f32 %v1416_v33, %v2905_v30  ;;  %v1002_v36 = vmul.f32 1.442695, %v891_v28 }
 0x156   : > { %v2378_v50 = vpop.eup %2377  ;;  %v1973_v3 = vpack.c.bf16 %v1433_v59, %v1432_v34  ;;  %v1417_v17 = vmul.f32 %v2376_v47, %v1902_v40  ;;  %v2989_v4 = vadd.f32 %v2805_v22, %v775_v51  ;;  %v1130_v61 = vmul.f32 %v1066_v48, %v1066_v48 }
 0x157   : > { %v2013_v21 = vpack.c.bf16 %v1449_v16, %v1448_v56  ;;  %v1465_v35 = vmul.f32 %v1401_v63, %v2917_v42  ;;  %v1098_v19 = vadd.f32 1.0, %v2378_v50  ;;  %2381 = vpow2.f32 %v970_v14 }
 0x158   : > { %2105 = vst [vmem:[%s2611_s6 + $0x30] sm:$0xff] %v1973_v3   ;;  %v1481_v37 = vmul.f32 %v1417_v17, %v2926_v41  ;;  %v1146_v42 = vmul.f32 %v1082_v54, %v1082_v54  ;;  %2383 = vpow2.f32 %v1002_v36  ;;  %v907_v9 = vmin.f32 %v2989_v4, 20.0 }
 0x159   : > { %2113 = vst [vmem:[%s2611_s6 + $0x70] sm:$0xff] %v2013_v21   ;;  %v2053_v6 = vpack.c.bf16 %v1465_v35, %v1464_v27  ;;  %v1242_v30 = vadd.f32 1.0, %v1114_v44  ;;  %v2380_v60 = vpop.eup %2379  ;;  %v1258_v41 = vadd.f32 1.0, %v1130_v61  ;;  %v1162_v13 = vmul.f32 %v1098_v19, %v1098_v19 }
 0x15a   : > { %v2093_v58 = vpack.c.bf16 %v1481_v37, %v1480_v26  ;;  %v1034_v12 = vmul.f32 1.442695, %v907_v9  ;;  %v1051_v55 = vadd.f32 1.0, %v2380_v60  ;;  %v1274_v22 = vadd.f32 1.0, %v1146_v42 }
 0x15b   : > { %2121 = vst [vmem:[%s2611_s6 + $0xb0] sm:$0xff] %v2053_v6   ;;  %v1290_v39 = vadd.f32 1.0, %v1162_v13  ;;  %v1855_v62 = vadd.f32 -1.0, %v1114_v44  ;;  %v1871_v7 = vadd.f32 -1.0, %v1130_v61  ;;  %v1887_v33 = vadd.f32 -1.0, %v1146_v42 }
 0x15c   : > { %2129 = vst [vmem:[%s2611_s6 + $0xf0] sm:$0xff] %v2093_v58   ;;  %2385 = vpow2.f32 %v1034_v12  ;;  %v1115_v31 = vmul.f32 %v1051_v55, %v1051_v55  ;;  %v1903_v54 = vadd.f32 -1.0, %v1162_v13 }
 0x15d   : > { %v2382_v25 = vpop.eup %2381  ;;  %2387 = vrcp.f32 %v1242_v30 }
 0x15e   : > { %v2384_v43 = vpop.eup %2383  ;;  %v1067_v38 = vadd.f32 1.0, %v2382_v25  ;;  %2389 = vrcp.f32 %v1258_v41  ;;  %v1243_v34 = vadd.f32 1.0, %v1115_v31  ;;  %v1856_v24 = vadd.f32 -1.0, %v1115_v31 }
 0x15f   : > { %v1083_v56 = vadd.f32 1.0, %v2384_v43  ;;  %2391 = vrcp.f32 %v1274_v22 }
 0x160   : > { %v1131_v46 = vmul.f32 %v1067_v38, %v1067_v38  ;;  %2393 = vrcp.f32 %v1243_v34 }
 0x161   : > { %v1147_v11 = vmul.f32 %v1083_v56, %v1083_v56  ;;  %2395 = vrcp.f32 %v1290_v39 }
 0x162   : > { %v2386_v52 = vpop.eup %2385  ;;  %v1259_v2 = vadd.f32 1.0, %v1131_v46  ;;  %v1872_v47 = vadd.f32 -1.0, %v1131_v46 }
 0x163   : > { %v2388_v10 = vpop.eup %2387  ;;  %v1275_v20 = vadd.f32 1.0, %v1147_v11  ;;  %v1099_v8 = vadd.f32 1.0, %v2386_v52  ;;  %v1888_v50 = vadd.f32 -1.0, %v1147_v11 }
 0x164   : > { %2397 = vrcp.f32 %v1259_v2  ;;  %v2390_v15 = vpop.eup %2389  ;;  %v1370_v40 = vmul.f32 %v2388_v10, %v1855_v62 }
 0x165   : > { %2399 = vrcp.f32 %v1275_v20  ;;  %v1163_v57 = vmul.f32 %v1099_v8, %v1099_v8  ;;  %v2392_v18 = vpop.eup %2391  ;;  %v1386_v28 = vmul.f32 %v2390_v15, %v1871_v7 }
 0x166   : > { %v2394_v51 = vpop.eup %2393  ;;  %v1434_v16 = vmul.f32 %v1370_v40, %v2941_v23  ;;  %v1402_v63 = vmul.f32 %v2392_v18, %v1887_v33 }
 0x167   : > { %v1291_v0 = vadd.f32 1.0, %v1163_v57  ;;  %v1371_v59 = vmul.f32 %v2394_v51, %v1856_v24  ;;  %v2396_v5 = vpop.eup %2395  ;;  %v1450_v44 = vmul.f32 %v1386_v28, %v2944_v45 }
 0x168   : > { %v1466_v26 = vmul.f32 %v1402_v63, %v2947_v29  ;;  %v1418_v37 = vmul.f32 %v2396_v5, %v1903_v54 }
 0x169   : > { %2401 = vrcp.f32 %v1291_v0  ;;  %v1435_v48 = vmul.f32 %v1371_v59, %v2964_v32  ;;  %v1904_v32 = vadd.f32 -1.0, %v1163_v57 }
 0x16a   : > { %v2398_v27 = vpop.eup %2397  ;;  %v1482_v58 = vmul.f32 %v1418_v37, %v2960_v49 }
 0x16b   : > { %v2400_v3 = vpop.eup %2399  ;;  %v1387_v17 = vmul.f32 %v2398_v27, %v1872_v47  ;;  %v1978_v21 = vpack.c.bf16 %v1435_v48, %v1434_v16 }
 0x16c   : > { %v1403_v35 = vmul.f32 %v2400_v3, %v1888_v50 }
 0x16d   : > { %v1451_v14 = vmul.f32 %v1387_v17, %v2973_v53  ;;  %2106 = vst [vmem:[%s2611_s6 + $0x38] sm:$0xff] %v1978_v21  }
 0x16e   : > { %v1467_v23 = vmul.f32 %v1403_v35, %v2976_v1 }
 0x16f   : > { %v2402_v36 = vpop.eup %2401  ;;  %v2018_v6 = vpack.c.bf16 %v1451_v14, %v1450_v44 }
 0x170   : > { %v2058_v61 = vpack.c.bf16 %v1467_v23, %v1466_v26  ;;  %v1419_v19 = vmul.f32 %v2402_v36, %v1904_v32 }
 0x171   : > { %2114 = vst [vmem:[%s2611_s6 + $0x78] sm:$0xff] %v2018_v6  }
 0x172   : > { %2122 = vst [vmem:[%s2611_s6 + $0xb8] sm:$0xff] %v2058_v61   ;;  %v1483_v45 = vmul.f32 %v1419_v19, %v2989_v4 }
 0x174   : > { %v2098_v42 = vpack.c.bf16 %v1483_v45, %v1482_v58 }
 0x176   : > { %2130 = vst [vmem:[%s2611_s6 + $0xf8] sm:$0xff] %v2098_v42  }
 0x177 PF: > { %s14_s15 = sadd.s32 1, %s2411_s15  }
 0x178   : > { %p11_p4 = scmp.ge.s32.totalorder %s14_s15, 8  }
 0x17a   :  { %13 = sbr.rel (!%p11_p4) target bundleno = 1 (0x1), region = 66 }

// kernel: mbsfc_forward.18
= control target key start
LH: loop header
LB: loop body
LE: loop exit
PB: predicated region body
PF: predicated region fallthrough
CT: control target
= control target key end

     0   :  { %vm351_vm0 = vcmask 1043456   ;;  %vm302_vm1 = vcmask 719872   ;;  %s2048_s1 = inlined_call_operand.vmem [shape: bf16[216,128], index: 1, kind: input, shape index: {}]   ;;  %s2049_s0 = inlined_call_operand.vmem [shape: bf16[256,216], index: 0, kind: input, shape index: {}]   ;;  %s2050_s2 = inlined_call_operand.vmem [shape: f32[1,128], index: 2, kind: input, shape index: {}]   ;;  %s2051_s3 = inlined_call_operand.vmem [shape: f32[1,128], index: 3, kind: input, shape index: {}]   ;;  %s2052_s4 = inlined_call_operand.vmem [shape: bf16[256,128], index: 4, kind: output, shape index: {}]  }
   0x1   :  { %v1260_v0 = vld [vmem:[%s2048_s1 + $0x38] sm:$0xff]  ;;  %v76_v1 = vld [vmem:[%s2048_s1 + $0x68] sm:$0xf]  ;;  %v1259_v3 = vld [vmem:[%s2048_s1 + $0x30] sm:$0xff] }
   0x2   :  { %v274_v2 = vunpack.c.l.b16 %v76_v1  ;;  %355 = vmatpush.bf16.msra.mxu0 %v1260_v0  ;;  %1361 = vmatpush.bf16.msra.mxu2 %v1260_v0  ;;  %v1265_v6 = vld [vmem:[%s2048_s1 + $0x60] sm:$0xff]  ;;  %v1258_v7 = vld [vmem:[%s2048_s1 + $0x28] sm:$0xff]  ;;  %v1264_v8 = vld [vmem:[%s2048_s1 + $0x58] sm:$0xff] }
   0x3   :  { %v1257_v9 = vld [vmem:[%s2048_s1 + $0x20] sm:$0xff]  ;;  %v1263_v10 = vld [vmem:[%s2048_s1 + $0x50] sm:$0xff]  ;;  %v1256_v11 = vld [vmem:[%s2048_s1 + $0x18] sm:$0xff] }
   0x4   :  { %v288_v4 = vpack.c.b16 %v274_v2, %v274_v2  ;;  %v1262_v12 = vld [vmem:[%s2048_s1 + $0x48] sm:$0xff]  ;;  %v1255_v13 = vld [vmem:[%s2048_s1 + $0x10] sm:$0xff]  ;;  %v1261_v14 = vld [vmem:[%s2048_s1 + $0x40] sm:$0xff] }
   0x5   :  { %v1254_v15 = vld [vmem:[%s2048_s1 + $0x8] sm:$0xff]  ;;  %v1221_v16 = vld [vmem:[%s2049_s0 + $0x4] sm:$0xf]  ;;  %v1239_v18 = vld [vmem:[%s2049_s0 + $0x94] sm:$0xf] }
   0x6   :  { %v353_v5 = vsel %vm351_vm0, %v288_v4, 0  ;;  %356 = vmatpush.bf16.msra.mxu0 %v1259_v3  ;;  %1362 = vmatpush.bf16.msra.mxu2 %v1259_v3  ;;  %v997_v17 = vld [vmem:[%s2049_s0 + $0x8] sm:$0xf0]  ;;  %v1069_v19 = vld [vmem:[%s2049_s0 + $0x98] sm:$0xf0]  ;;  %v1253_v21 = vld [vmem:[%s2048_s1] sm:$0xff] }
   0x7   :  { %446 = vmatpush.bf16.msra.mxu1 %v353_v5  ;;  %1369 = vmatpush.bf16.msra.mxu3 %v353_v5  ;;  %v1000_v20 = vor.u32 %v1221_v16, %v997_v17  ;;  %v995_v22 = vld [vmem:[%s2049_s0] sm:$0xf]  ;;  %v1222_v23 = vld [vmem:[%s2049_s0 + $0x4] sm:$0xf0]  ;;  %v1072_v24 = vor.u32 %v1239_v18, %v1069_v19  ;;  %v1223_v29 = vld [vmem:[%s2049_s0 + $0x14] sm:$0xf] }
   0x8   :  { %v1059_v25 = vld [vmem:[%s2049_s0 + $0x80] sm:$0xf]  ;;  %v1238_v26 = vld [vmem:[%s2049_s0 + $0x84] sm:$0xf0]  ;;  %v996_v27 = vor.u32 %v1222_v23, %v995_v22  ;;  %v1005_v30 = vld [vmem:[%s2049_s0 + $0x18] sm:$0xf0] }
   0x9   :  { %v1060_v28 = vor.u32 %v1238_v26, %v1059_v25  ;;  %v1241_v31 = vld [vmem:[%s2049_s0 + $0xa4] sm:$0xf]  ;;  %v1077_v32 = vld [vmem:[%s2049_s0 + $0xa8] sm:$0xf0]  ;;  %v1008_v33 = vor.u32 %v1223_v29, %v1005_v30  ;;  %v1003_v34 = vld [vmem:[%s2049_s0 + $0x10] sm:$0xf] }
   0xa   :  { %357 = vmatpush.bf16.msra.mxu0 %v1258_v7  ;;  %1363 = vmatpush.bf16.msra.mxu2 %v1258_v7  ;;  %v1224_v35 = vld [vmem:[%s2049_s0 + $0x14] sm:$0xf0]  ;;  %v1080_v36 = vor.u32 %v1241_v31, %v1077_v32  ;;  %v1067_v37 = vld [vmem:[%s2049_s0 + $0x90] sm:$0xf]  ;;  %v1225_v41 = vld [vmem:[%s2049_s0 + $0x24] sm:$0xf] }
   0xb   :  { %447 = vmatpush.bf16.msra.mxu1 %v1265_v6  ;;  %1370 = vmatpush.bf16.msra.mxu3 %v1265_v6  ;;  %v1240_v38 = vld [vmem:[%s2049_s0 + $0x94] sm:$0xf0]  ;;  %v1004_v39 = vor.u32 %v1224_v35, %v1003_v34  ;;  %v1013_v42 = vld [vmem:[%s2049_s0 + $0x28] sm:$0xf0]  ;;  %v1243_v43 = vld [vmem:[%s2049_s0 + $0xb4] sm:$0xf] }
   0xc   :  { %v1068_v40 = vor.u32 %v1240_v38, %v1067_v37  ;;  %v1085_v44 = vld [vmem:[%s2049_s0 + $0xb8] sm:$0xf0]  ;;  %v1016_v45 = vor.u32 %v1225_v41, %v1013_v42  ;;  %v1011_v46 = vld [vmem:[%s2049_s0 + $0x20] sm:$0xf]  ;;  %v1226_v47 = vld [vmem:[%s2049_s0 + $0x24] sm:$0xf0] }
   0xd   :  { %v1088_v48 = vor.u32 %v1243_v43, %v1085_v44  ;;  %v1075_v49 = vld [vmem:[%s2049_s0 + $0xa0] sm:$0xf]  ;;  %v1242_v50 = vld [vmem:[%s2049_s0 + $0xa4] sm:$0xf0]  ;;  %v1012_v51 = vor.u32 %v1226_v47, %v1011_v46  ;;  %v1227_v53 = vld [vmem:[%s2049_s0 + $0x34] sm:$0xf] }
   0xe   :  { %358 = vmatpush.bf16.msra.mxu0 %v1257_v9  ;;  %1364 = vmatpush.bf16.msra.mxu2 %v1257_v9  ;;  %v1076_v52 = vor.u32 %v1242_v50, %v1075_v49  ;;  %v1021_v54 = vld [vmem:[%s2049_s0 + $0x38] sm:$0xf0]  ;;  %v1245_v55 = vld [vmem:[%s2049_s0 + $0xc4] sm:$0xf]  ;;  %v1093_v56 = vld [vmem:[%s2049_s0 + $0xc8] sm:$0xf0] }
   0xf   :  { %448 = vmatpush.bf16.msra.mxu1 %v1264_v8  ;;  %1371 = vmatpush.bf16.msra.mxu3 %v1264_v8  ;;  %v1024_v57 = vor.u32 %v1227_v53, %v1021_v54  ;;  %v1019_v58 = vld [vmem:[%s2049_s0 + $0x30] sm:$0xf]  ;;  %v1228_v59 = vld [vmem:[%s2049_s0 + $0x34] sm:$0xf0]  ;;  %v1096_v60 = vor.u32 %v1245_v55, %v1093_v56  ;;  %v1229_v1 = vld [vmem:[%s2049_s0 + $0x44] sm:$0xf] }
  0x10   :  { %v1083_v61 = vld [vmem:[%s2049_s0 + $0xb0] sm:$0xf]  ;;  %v1244_v62 = vld [vmem:[%s2049_s0 + $0xb4] sm:$0xf0]  ;;  %v1020_v63 = vor.u32 %v1228_v59, %v1019_v58  ;;  %v1029_v2 = vld [vmem:[%s2049_s0 + $0x48] sm:$0xf0] }
  0x11   :  { %v1084_v0 = vor.u32 %v1244_v62, %v1083_v61  ;;  %v1247_v3 = vld [vmem:[%s2049_s0 + $0xd4] sm:$0xf]  ;;  %v1101_v4 = vld [vmem:[%s2049_s0 + $0xd8] sm:$0xf0]  ;;  %v1032_v5 = vor.u32 %v1229_v1, %v1029_v2  ;;  %v1027_v6 = vld [vmem:[%s2049_s0 + $0x40] sm:$0xf] }
  0x12   :  { %359 = vmatpush.bf16.msra.mxu0 %v1256_v11  ;;  %1365 = vmatpush.bf16.msra.mxu2 %v1256_v11  ;;  %v1230_v7 = vld [vmem:[%s2049_s0 + $0x44] sm:$0xf0]  ;;  %v1104_v8 = vor.u32 %v1247_v3, %v1101_v4  ;;  %v1091_v9 = vld [vmem:[%s2049_s0 + $0xc0] sm:$0xf]  ;;  %v1109_v16 = vld [vmem:[%s2049_s0 + $0xe8] sm:$0xf0] }
  0x13   :  { %449 = vmatpush.bf16.msra.mxu1 %v1263_v10  ;;  %1372 = vmatpush.bf16.msra.mxu3 %v1263_v10  ;;  %v1246_v10 = vld [vmem:[%s2049_s0 + $0xc4] sm:$0xf0]  ;;  %v1028_v11 = vor.u32 %v1230_v7, %v1027_v6  ;;  %v1035_v18 = vld [vmem:[%s2049_s0 + $0x50] sm:$0xf]  ;;  %v1232_v19 = vld [vmem:[%s2049_s0 + $0x54] sm:$0xf0] }
  0x14   :  { %v1248_v22 = vld [vmem:[%s2049_s0 + $0xd4] sm:$0xf0]  ;;  %v1036_v23 = vor.u32 %v1232_v19, %v1035_v18  ;;  %v1233_v25 = vld [vmem:[%s2049_s0 + $0x64] sm:$0xf]  ;;  %v1045_v26 = vld [vmem:[%s2049_s0 + $0x68] sm:$0xf0] }
  0x15   :  { %v1048_v29 = vor.u32 %v1233_v25, %v1045_v26  ;;  %v1043_v30 = vld [vmem:[%s2049_s0 + $0x60] sm:$0xf]  ;;  %v1234_v31 = vld [vmem:[%s2049_s0 + $0x64] sm:$0xf0]  ;;  %v1235_v37 = vld [vmem:[%s2049_s0 + $0x74] sm:$0xf] }
  0x16   :  { %360 = vmatpush.bf16.msra.mxu0 %v1255_v13  ;;  %1366 = vmatpush.bf16.msra.mxu2 %v1255_v13  ;;  %v1231_v13 = vld [vmem:[%s2049_s0 + $0x54] sm:$0xf]  ;;  %v1250_v34 = vld [vmem:[%s2049_s0 + $0xe4] sm:$0xf0]  ;;  %v1044_v35 = vor.u32 %v1234_v31, %v1043_v30  ;;  %v1053_v38 = vld [vmem:[%s2049_s0 + $0x78] sm:$0xf0] }
  0x17   :  { %450 = vmatpush.bf16.msra.mxu1 %v1262_v12  ;;  %1373 = vmatpush.bf16.msra.mxu3 %v1262_v12  ;;  %v1092_v12 = vor.u32 %v1246_v10, %v1091_v9  ;;  %v1236_v41 = vld [vmem:[%s2049_s0 + $0x74] sm:$0xf0]  ;;  %v1115_v42 = vld [vmem:[%s2049_s0 + $0xf0] sm:$0xf]  ;;  %v1237_v46 = vld [vmem:[%s2049_s0 + $0x84] sm:$0xf] }
  0x18   :  { %v1252_v43 = vld [vmem:[%s2049_s0 + $0xf4] sm:$0xf0]  ;;  %v1061_v47 = vld [vmem:[%s2049_s0 + $0x88] sm:$0xf0]  ;;  %v1783_v50 = vld [vmem:[%s2050_s2] ss:$0 sm:$0xff] }
  0x19   :  { %v1788_v53 = vld [vmem:[%s2051_s3] ss:$0 sm:$0xff] }
  0x1a   :  { %361 = vmatpush.bf16.msra.mxu0 %v1254_v15  ;;  %1367 = vmatpush.bf16.msra.mxu2 %v1254_v15  ;;  %v1249_v15 = vld [vmem:[%s2049_s0 + $0xe4] sm:$0xf] }
  0x1b   :  { %451 = vmatpush.bf16.msra.mxu1 %v1261_v14  ;;  %1374 = vmatpush.bf16.msra.mxu3 %v1261_v14  ;;  %v1037_v14 = vld [vmem:[%s2049_s0 + $0x58] sm:$0xf0] }
  0x1c   :  { %v1040_v17 = vor.u32 %v1231_v13, %v1037_v14 }
  0x1e   :  { %1173 = vmatmul.msk.bf16.vlgmr.msra.gmra.mxu1 %vm302_vm1, %v1000_v20  ;;  %362 = vmatpush.bf16.msra.mxu0 %v1253_v21  ;;  %v1112_v20 = vor.u32 %v1249_v15, %v1109_v16 }
  0x1f   :  { %1182 = vmatmul.msk.bf16.vlgmr.msra.gmra.mxu3 %vm302_vm1, %v1072_v24  ;;  %1368 = vmatpush.bf16.msra.mxu2 %v1253_v21  ;;  %v1099_v21 = vld [vmem:[%s2049_s0 + $0xd0] sm:$0xf] }
  0x20   :  { %v1100_v24 = vor.u32 %v1248_v22, %v1099_v21 }
  0x21   :  { %363 = vmatmul.bf16.vlgmr.msra.gmra.mxu0 %v996_v27  ;;  %v1251_v27 = vld [vmem:[%s2049_s0 + $0xf4] sm:$0xf] }
  0x22   :  { %403 = vmatmul.bf16.vlgmr.msra.gmra.mxu2 %v1060_v28  ;;  %v1117_v28 = vld [vmem:[%s2049_s0 + $0xf8] sm:$0xf0] }
  0x23   :  { %v1120_v32 = vor.u32 %v1251_v27, %v1117_v28 }
  0x2e   :  { %1174 = vmatmul.msk.bf16.gmra.mxu1 %vm302_vm1, %v1008_v33  ;;  %v1107_v33 = vld [vmem:[%s2049_s0 + $0xe0] sm:$0xf] }
  0x2f   :  { %1183 = vmatmul.msk.bf16.gmra.mxu3 %vm302_vm1, %v1080_v36  ;;  %v1108_v36 = vor.u32 %v1250_v34, %v1107_v33 }
  0x31   :  { %368 = vmatmul.bf16.gmra.mxu0 %v1004_v39  ;;  %v1056_v39 = vor.u32 %v1235_v37, %v1053_v38 }
  0x32   :  { %408 = vmatmul.bf16.gmra.mxu2 %v1068_v40  ;;  %v1051_v40 = vld [vmem:[%s2049_s0 + $0x70] sm:$0xf] }
  0x33   :  { %v1052_v44 = vor.u32 %v1236_v41, %v1051_v40 }
  0x3e   :  { %1175 = vmatmul.msk.bf16.gmra.mxu1 %vm302_vm1, %v1016_v45  ;;  %v1116_v45 = vor.u32 %v1252_v43, %v1115_v42 }
  0x3f   :  { %1184 = vmatmul.msk.bf16.gmra.mxu3 %vm302_vm1, %v1088_v48  ;;  %v1064_v48 = vor.u32 %v1237_v46, %v1061_v47 }
  0x41   :  { %373 = vmatmul.bf16.gmra.mxu0 %v1012_v51 }
  0x42   :  { %413 = vmatmul.bf16.gmra.mxu2 %v1076_v52 }
  0x4e   :  { %1176 = vmatmul.msk.bf16.gmra.mxu1 %vm302_vm1, %v1024_v57 }
  0x4f   :  { %1185 = vmatmul.msk.bf16.gmra.mxu3 %vm302_vm1, %v1096_v60 }
  0x51   :  { %378 = vmatmul.bf16.gmra.mxu0 %v1020_v63 }
  0x52   :  { %418 = vmatmul.bf16.gmra.mxu2 %v1084_v0 }
  0x5e   :  { %1177 = vmatmul.msk.bf16.gmra.mxu1 %vm302_vm1, %v1032_v5 }
  0x5f   :  { %1186 = vmatmul.msk.bf16.gmra.mxu3 %vm302_vm1, %v1104_v8 }
  0x61   :  { %383 = vmatmul.bf16.gmra.mxu0 %v1028_v11 }
  0x62   :  { %423 = vmatmul.bf16.gmra.mxu2 %v1092_v12 }
  0x6e   :  { %1178 = vmatmul.msk.bf16.gmra.mxu1 %vm302_vm1, %v1040_v17 }
  0x6f   :  { %1187 = vmatmul.msk.bf16.gmra.mxu3 %vm302_vm1, %v1112_v20 }
  0x71   :  { %388 = vmatmul.bf16.gmra.mxu0 %v1036_v23 }
  0x72   :  { %428 = vmatmul.bf16.gmra.mxu2 %v1100_v24 }
  0x7e   :  { %1179 = vmatmul.msk.bf16.gmra.mxu1 %vm302_vm1, %v1048_v29 }
  0x7f   :  { %1188 = vmatmul.msk.bf16.gmra.mxu3 %vm302_vm1, %v1120_v32 }
  0x81   :  { %393 = vmatmul.bf16.gmra.mxu0 %v1044_v35 }
  0x82   :  { %433 = vmatmul.bf16.gmra.mxu2 %v1108_v36 }
  0x8e   :  { %1180 = vmatmul.msk.bf16.gmra.mxu1 %vm302_vm1, %v1056_v39 }
  0x91   :  { %398 = vmatmul.bf16.gmra.mxu0 %v1052_v44 }
  0x92   :  { %438 = vmatmul.bf16.gmra.mxu2 %v1116_v45 }
  0x9b   :  { %v453_v49 = vpop.f32.mrf.mxu1 }
  0x9e   :  { %1181 = vmatmul.msk.bf16.gmra.mxu1 %vm302_vm1, %v1064_v48  ;;  %v364_v51 = vpop.f32.mrf.mxu0 }
  0x9f   :  { %v454_v52 = vadd.f32 %v453_v49, %v364_v51 }
  0xa1   :  { %v537_v54 = vmul.f32 %v1783_v50, %v454_v52 }
  0xa2   :  { %v498_v55 = vpop.f32.mrf.mxu3 }
  0xa3   :  { %v455_v56 = vpop.f32.mrf.mxu1  ;;  %v1792_v57 = vadd.f32 %v1788_v53, %v537_v54 }
  0xa5   :  { %v605_v58 = vmin.f32 %v1792_v57, 20.0  ;;  %v1795_v59 = vpop.f32.mrf.mxu2 }
  0xa6   :  { %v366_v60 = vpop.f32.mrf.mxu0 }
  0xa7   :  { %v637_v61 = vmul.f32 1.442695, %v605_v58  ;;  %v456_v62 = vadd.f32 %v455_v56, %v366_v60 }
  0xa9   :  { %1377 = vpow2.f32 %v637_v61  ;;  %v538_v63 = vmul.f32 %v1783_v50, %v456_v62 }
  0xaa   :  { %v500_v0 = vpop.f32.mrf.mxu3 }
  0xab   :  { %v458_v1 = vpop.f32.mrf.mxu1  ;;  %v1799_v2 = vadd.f32 %v1788_v53, %v538_v63 }
  0xad   :  { %v606_v3 = vmin.f32 %v1799_v2, 20.0  ;;  %v1802_v4 = vpop.f32.mrf.mxu2 }
  0xae   :  { %v369_v5 = vpop.f32.mrf.mxu0 }
  0xaf   :  { %v1378_v6 = vpop.eup %1377  ;;  %v639_v7 = vmul.f32 1.442695, %v606_v3  ;;  %v459_v8 = vadd.f32 %v458_v1, %v369_v5 }
  0xb0   :  { %v701_v9 = vadd.f32 1.0, %v1378_v6 }
  0xb1   :  { %1379 = vpow2.f32 %v639_v7  ;;  %v539_v10 = vmul.f32 %v1783_v50, %v459_v8 }
  0xb2   :  { %v503_v11 = vpop.f32.mrf.mxu3  ;;  %v733_v12 = vmul.f32 %v701_v9, %v701_v9 }
  0xb3   :  { %v460_v13 = vpop.f32.mrf.mxu1  ;;  %v1806_v14 = vadd.f32 %v1788_v53, %v539_v10 }
  0xb4   :  { %v797_v15 = vadd.f32 1.0, %v733_v12  ;;  %v1189_v42 = vadd.f32 -1.0, %v733_v12 }
  0xb5   :  { %v607_v16 = vmin.f32 %v1806_v14, 20.0  ;;  %v409_v17 = vpop.f32.mrf.mxu2 }
  0xb6   :  { %v499_v18 = vadd.f32 %v498_v55, %v409_v17  ;;  %v371_v19 = vpop.f32.mrf.mxu0  ;;  %1381 = vrcp.f32 %v797_v15 }
  0xb7   :  { %v1380_v20 = vpop.eup %1379  ;;  %v641_v21 = vmul.f32 1.442695, %v607_v16  ;;  %v461_v22 = vadd.f32 %v460_v13, %v371_v19 }
  0xb8   :  { %v702_v23 = vadd.f32 1.0, %v1380_v20  ;;  %v555_v24 = vmul.f32 %v1783_v50, %v499_v18 }
  0xb9   :  { %1383 = vpow2.f32 %v641_v21  ;;  %v540_v25 = vmul.f32 %v1783_v50, %v461_v22 }
  0xba   :  { %v1811_v26 = vpop.f32.mrf.mxu3  ;;  %v734_v27 = vmul.f32 %v702_v23, %v702_v23  ;;  %v1814_v28 = vadd.f32 %v1788_v53, %v555_v24 }
  0xbb   :  { %v463_v29 = vpop.f32.mrf.mxu1  ;;  %v1817_v30 = vadd.f32 %v1788_v53, %v540_v25 }
  0xbc   :  { %v798_v31 = vadd.f32 1.0, %v734_v27  ;;  %v623_v32 = vmin.f32 %v1814_v28, 20.0  ;;  %v1382_v35 = vpop.eup %1381  ;;  %v1190_v51 = vadd.f32 -1.0, %v734_v27 }
  0xbd   :  { %v608_v33 = vmin.f32 %v1817_v30, 20.0  ;;  %v411_v34 = vpop.f32.mrf.mxu2  ;;  %v861_v46 = vmul.f32 %v1382_v35, %v1189_v42 }
  0xbe   :  { %1385 = vrcp.f32 %v798_v31  ;;  %v673_v36 = vmul.f32 1.442695, %v623_v32  ;;  %v501_v37 = vadd.f32 %v500_v0, %v411_v34  ;;  %v374_v38 = vpop.f32.mrf.mxu0 }
  0xbf   :  { %v1384_v39 = vpop.eup %1383  ;;  %v643_v40 = vmul.f32 1.442695, %v608_v33  ;;  %v464_v41 = vadd.f32 %v463_v29, %v374_v38  ;;  %v893_v0 = vmul.f32 %v861_v46, %v1792_v57 }
  0xc0   :  { %v703_v43 = vadd.f32 1.0, %v1384_v39  ;;  %1387 = vpow2.f32 %v673_v36  ;;  %v556_v44 = vmul.f32 %v1783_v50, %v501_v37 }
  0xc1   :  { %1389 = vpow2.f32 %v643_v40  ;;  %v541_v45 = vmul.f32 %v1783_v50, %v464_v41 }
  0xc2   :  { %v735_v47 = vmul.f32 %v703_v43, %v703_v43  ;;  %v1824_v48 = vadd.f32 %v1788_v53, %v556_v44  ;;  %v1829_v54 = vpop.f32.mrf.mxu3 }
  0xc3   :  { %v465_v49 = vpop.f32.mrf.mxu1  ;;  %v1827_v52 = vadd.f32 %v1788_v53, %v541_v45 }
  0xc4   :  { %v1386_v55 = vpop.eup %1385  ;;  %v799_v56 = vadd.f32 1.0, %v735_v47  ;;  %v624_v58 = vmin.f32 %v1824_v48, 20.0  ;;  %v1191_v37 = vadd.f32 -1.0, %v735_v47 }
  0xc5   :  { %v862_v60 = vmul.f32 %v1386_v55, %v1190_v51  ;;  %v609_v61 = vmin.f32 %v1827_v52, 20.0  ;;  %v414_v62 = vpop.f32.mrf.mxu2 }
  0xc6   :  { %v1388_v63 = vpop.eup %1387  ;;  %1391 = vrcp.f32 %v799_v56  ;;  %v675_v1 = vmul.f32 1.442695, %v624_v58  ;;  %v504_v3 = vadd.f32 %v503_v11, %v414_v62  ;;  %v376_v5 = vpop.f32.mrf.mxu0 }
  0xc7   :  { %v1390_v6 = vpop.eup %1389  ;;  %v894_v7 = vmul.f32 %v862_v60, %v1799_v2  ;;  %v719_v8 = vadd.f32 1.0, %v1388_v63  ;;  %v645_v9 = vmul.f32 1.442695, %v609_v61  ;;  %v466_v10 = vadd.f32 %v465_v49, %v376_v5 }
  0xc8   :  { %v704_v12 = vadd.f32 1.0, %v1390_v6  ;;  %1393 = vpow2.f32 %v675_v1  ;;  %v557_v13 = vmul.f32 %v1783_v50, %v504_v3 }
  0xc9   :  { %v1269_v15 = vpack.c.bf16 %v894_v7, %v893_v0  ;;  %v751_v16 = vmul.f32 %v719_v8, %v719_v8  ;;  %1395 = vpow2.f32 %v645_v9  ;;  %v542_v17 = vmul.f32 %v1783_v50, %v466_v10 }
  0xca   :  { %v736_v57 = vmul.f32 %v704_v12, %v704_v12  ;;  %v1838_v18 = vadd.f32 %v1788_v53, %v557_v13  ;;  %v1848_v25 = vpop.f32.mrf.mxu3 }
  0xcb   :  { %v468_v11 = vpop.f32.mrf.mxu1  ;;  %1270 = vst [vmem:[%s2052_s4] sm:$0xff] %v1269_v15   ;;  %v815_v2 = vadd.f32 1.0, %v751_v16  ;;  %v1844_v19 = vadd.f32 %v1788_v53, %v542_v17  ;;  %v1207_v51 = vadd.f32 -1.0, %v751_v16 }
  0xcc   :  { %v1392_v20 = vpop.eup %1391  ;;  %v800_v21 = vadd.f32 1.0, %v736_v57  ;;  %v625_v22 = vmin.f32 %v1838_v18, 20.0  ;;  %v1192_v45 = vadd.f32 -1.0, %v736_v57 }
  0xcd   :  { %v610_v23 = vmin.f32 %v1844_v19, 20.0  ;;  %v416_v24 = vpop.f32.mrf.mxu2  ;;  %v863_v42 = vmul.f32 %v1392_v20, %v1191_v37 }
  0xce   :  { %v1394_v27 = vpop.eup %1393  ;;  %1397 = vrcp.f32 %v800_v21  ;;  %v677_v29 = vmul.f32 1.442695, %v625_v22  ;;  %v506_v31 = vadd.f32 %v1811_v26, %v416_v24  ;;  %v379_v32 = vpop.f32.mrf.mxu0 }
  0xcf   :  { %v1396_v33 = vpop.eup %1395  ;;  %1399 = vrcp.f32 %v815_v2  ;;  %v720_v34 = vadd.f32 1.0, %v1394_v27  ;;  %v647_v35 = vmul.f32 1.442695, %v610_v23  ;;  %v469_v36 = vadd.f32 %v468_v11, %v379_v32 }
  0xd0   :  { %v705_v38 = vadd.f32 1.0, %v1396_v33  ;;  %1401 = vpow2.f32 %v677_v29  ;;  %v558_v39 = vmul.f32 %v1783_v50, %v506_v31  ;;  %v895_v0 = vmul.f32 %v863_v42, %v1806_v14 }
  0xd1   :  { %v752_v40 = vmul.f32 %v720_v34, %v720_v34  ;;  %1403 = vpow2.f32 %v647_v35  ;;  %v543_v41 = vmul.f32 %v1783_v50, %v469_v36 }
  0xd2   :  { %v737_v43 = vmul.f32 %v705_v38, %v705_v38  ;;  %v1854_v44 = vadd.f32 %v1788_v53, %v558_v39  ;;  %v1864_v12 = vpop.f32.mrf.mxu3 }
  0xd3   :  { %v470_v26 = vpop.f32.mrf.mxu1  ;;  %v816_v46 = vadd.f32 1.0, %v752_v40  ;;  %v1857_v49 = vadd.f32 %v1788_v53, %v543_v41 }
  0xd4   :  { %v1398_v47 = vpop.eup %1397  ;;  %v801_v55 = vadd.f32 1.0, %v737_v43  ;;  %v626_v56 = vmin.f32 %v1854_v44, 20.0  ;;  %v1193_v32 = vadd.f32 -1.0, %v737_v43 }
  0xd5   :  { %v1400_v58 = vpop.eup %1399  ;;  %v864_v60 = vmul.f32 %v1398_v47, %v1192_v45  ;;  %1405 = vrcp.f32 %v816_v46  ;;  %v611_v61 = vmin.f32 %v1857_v49, 20.0  ;;  %v419_v62 = vpop.f32.mrf.mxu2 }
  0xd6   :  { %v1402_v63 = vpop.eup %1401  ;;  %1407 = vrcp.f32 %v801_v55  ;;  %v679_v1 = vmul.f32 1.442695, %v626_v56  ;;  %v509_v3 = vadd.f32 %v1829_v54, %v419_v62  ;;  %v381_v5 = vpop.f32.mrf.mxu0  ;;  %v879_v13 = vmul.f32 %v1400_v58, %v1207_v51 }
  0xd7   :  { %v1404_v6 = vpop.eup %1403  ;;  %v896_v7 = vmul.f32 %v864_v60, %v1817_v30  ;;  %v721_v8 = vadd.f32 1.0, %v1402_v63  ;;  %v649_v9 = vmul.f32 1.442695, %v611_v61  ;;  %v471_v10 = vadd.f32 %v470_v26, %v381_v5 }
  0xd8   :  { %v706_v15 = vadd.f32 1.0, %v1404_v6  ;;  %1409 = vpow2.f32 %v679_v1  ;;  %v559_v16 = vmul.f32 %v1783_v50, %v509_v3  ;;  %v1208_v54 = vadd.f32 -1.0, %v752_v40 }
  0xd9   :  { %v1274_v17 = vpack.c.bf16 %v896_v7, %v895_v0  ;;  %v753_v14 = vmul.f32 %v721_v8, %v721_v8  ;;  %1411 = vpow2.f32 %v649_v9  ;;  %v544_v57 = vmul.f32 %v1783_v50, %v471_v10 }
  0xda   :  { %v738_v11 = vmul.f32 %v706_v15, %v706_v15  ;;  %v1869_v2 = vadd.f32 %v1788_v53, %v559_v16  ;;  %v911_v31 = vmul.f32 %v879_v13, %v1814_v28 }
  0xdb   :  { %v473_v30 = vpop.f32.mrf.mxu1  ;;  %v1406_v20 = vpop.eup %1405  ;;  %1346 = vst [vmem:[%s2052_s4 + $0x8] sm:$0xff] %v1274_v17   ;;  %v817_v21 = vadd.f32 1.0, %v753_v14  ;;  %v1875_v22 = vadd.f32 %v1788_v53, %v544_v57  ;;  %v1209_v63 = vadd.f32 -1.0, %v753_v14 }
  0xdc   :  { %v1408_v23 = vpop.eup %1407  ;;  %v880_v24 = vmul.f32 %v1406_v20, %v1208_v54  ;;  %v802_v27 = vadd.f32 1.0, %v738_v11  ;;  %v627_v29 = vmin.f32 %v1869_v2, 20.0  ;;  %v1194_v58 = vadd.f32 -1.0, %v738_v11 }
  0xdd   :  { %v612_v33 = vmin.f32 %v1875_v22, 20.0  ;;  %v421_v34 = vpop.f32.mrf.mxu2 }
  0xde   :  { %v1410_v35 = vpop.eup %1409  ;;  %v912_v36 = vmul.f32 %v880_v24, %v1824_v48  ;;  %1413 = vrcp.f32 %v802_v27  ;;  %v681_v37 = vmul.f32 1.442695, %v627_v29  ;;  %v511_v38 = vadd.f32 %v1848_v25, %v421_v34  ;;  %v384_v39 = vpop.f32.mrf.mxu0 }
  0xdf   :  { %v1412_v40 = vpop.eup %1411  ;;  %1415 = vrcp.f32 %v817_v21  ;;  %v722_v41 = vadd.f32 1.0, %v1410_v35  ;;  %v651_v42 = vmul.f32 1.442695, %v612_v33  ;;  %v474_v26 = vadd.f32 %v473_v30, %v384_v39  ;;  %v515_v48 = vpop.f32.mrf.mxu3 }
  0xe0   :  { %v1314_v45 = vpack.c.bf16 %v912_v36, %v911_v31  ;;  %v707_v46 = vadd.f32 1.0, %v1412_v40  ;;  %1417 = vpow2.f32 %v681_v37  ;;  %v560_v28 = vmul.f32 %v1783_v50, %v511_v38 }
  0xe1   :  { %v754_v43 = vmul.f32 %v722_v41, %v722_v41  ;;  %1419 = vpow2.f32 %v651_v42  ;;  %v545_v47 = vmul.f32 %v1783_v50, %v474_v26  ;;  %v865_v25 = vmul.f32 %v1408_v23, %v1193_v32 }
  0xe2   :  { %1354 = vst [vmem:[%s2052_s4 + $0x48] sm:$0xff] %v1314_v45   ;;  %v739_v51 = vmul.f32 %v707_v46, %v707_v46  ;;  %v1888_v55 = vadd.f32 %v1788_v53, %v560_v28 }
  0xe3   :  { %v475_v56 = vpop.f32.mrf.mxu1  ;;  %v818_v60 = vadd.f32 1.0, %v754_v43  ;;  %v1891_v61 = vadd.f32 %v1788_v53, %v545_v47  ;;  %v897_v9 = vmul.f32 %v865_v25, %v1827_v52  ;;  %v1210_v24 = vadd.f32 -1.0, %v754_v43 }
  0xe4   :  { %v1414_v62 = vpop.eup %1413  ;;  %v803_v0 = vadd.f32 1.0, %v739_v51  ;;  %v628_v1 = vmin.f32 %v1888_v55, 20.0  ;;  %v1195_v39 = vadd.f32 -1.0, %v739_v51 }
  0xe5   :  { %v1416_v3 = vpop.eup %1415  ;;  %v866_v5 = vmul.f32 %v1414_v62, %v1194_v58  ;;  %1421 = vrcp.f32 %v818_v60  ;;  %v613_v6 = vmin.f32 %v1891_v61, 20.0  ;;  %v424_v7 = vpop.f32.mrf.mxu2 }
  0xe6   :  { %v1418_v8 = vpop.eup %1417  ;;  %1423 = vrcp.f32 %v803_v0  ;;  %v683_v10 = vmul.f32 1.442695, %v628_v1  ;;  %v514_v13 = vadd.f32 %v1864_v12, %v424_v7  ;;  %v386_v15 = vpop.f32.mrf.mxu0  ;;  %v881_v11 = vmul.f32 %v1416_v3, %v1209_v63 }
  0xe7   :  { %v1420_v16 = vpop.eup %1419  ;;  %v898_v17 = vmul.f32 %v866_v5, %v1844_v19  ;;  %v723_v14 = vadd.f32 1.0, %v1418_v8  ;;  %v653_v57 = vmul.f32 1.442695, %v613_v6  ;;  %v476_v54 = vadd.f32 %v475_v56, %v386_v15  ;;  %v518_v33 = vpop.f32.mrf.mxu3 }
  0xe8   :  { %v708_v30 = vadd.f32 1.0, %v1420_v16  ;;  %1425 = vpow2.f32 %v683_v10  ;;  %v561_v20 = vmul.f32 %v1783_v50, %v514_v13  ;;  %v913_v38 = vmul.f32 %v881_v11, %v1838_v18 }
  0xe9   :  { %v1279_v21 = vpack.c.bf16 %v898_v17, %v897_v9  ;;  %v755_v23 = vmul.f32 %v723_v14, %v723_v14  ;;  %1427 = vpow2.f32 %v653_v57  ;;  %v546_v52 = vmul.f32 %v1783_v50, %v476_v54 }
  0xea   :  { %v740_v27 = vmul.f32 %v708_v30, %v708_v30  ;;  %v1901_v12 = vadd.f32 %v1788_v53, %v561_v20 }
  0xeb   :  { %v478_v29 = vpop.f32.mrf.mxu1  ;;  %v1422_v19 = vpop.eup %1421  ;;  %1347 = vst [vmem:[%s2052_s4 + $0x10] sm:$0xff] %v1279_v21   ;;  %v819_v31 = vadd.f32 1.0, %v755_v23  ;;  %v1907_v32 = vadd.f32 %v1788_v53, %v546_v52  ;;  %v1211_v7 = vadd.f32 -1.0, %v755_v23 }
  0xec   :  { %v1424_v34 = vpop.eup %1423  ;;  %v882_v35 = vmul.f32 %v1422_v19, %v1210_v24  ;;  %v804_v36 = vadd.f32 1.0, %v740_v27  ;;  %v629_v37 = vmin.f32 %v1901_v12, 20.0  ;;  %v1196_v1 = vadd.f32 -1.0, %v740_v27 }
  0xed   :  { %v614_v40 = vmin.f32 %v1907_v32, 20.0  ;;  %v426_v41 = vpop.f32.mrf.mxu2 }
  0xee   :  { %v1426_v42 = vpop.eup %1425  ;;  %v914_v26 = vmul.f32 %v882_v35, %v1854_v44  ;;  %1429 = vrcp.f32 %v804_v36  ;;  %v685_v45 = vmul.f32 1.442695, %v629_v37  ;;  %v516_v46 = vadd.f32 %v515_v48, %v426_v41  ;;  %v389_v28 = vpop.f32.mrf.mxu0 }
  0xef   :  { %v1428_v43 = vpop.eup %1427  ;;  %1431 = vrcp.f32 %v819_v31  ;;  %v724_v47 = vadd.f32 1.0, %v1426_v42  ;;  %v655_v25 = vmul.f32 1.442695, %v614_v40  ;;  %v479_v56 = vadd.f32 %v478_v29, %v389_v28  ;;  %v520_v17 = vpop.f32.mrf.mxu3 }
  0xf0   :  { %v1319_v58 = vpack.c.bf16 %v914_v26, %v913_v38  ;;  %v709_v60 = vadd.f32 1.0, %v1428_v43  ;;  %1433 = vpow2.f32 %v685_v45  ;;  %v562_v18 = vmul.f32 %v1783_v50, %v516_v46 }
  0xf1   :  { %v756_v51 = vmul.f32 %v724_v47, %v724_v47  ;;  %1435 = vpow2.f32 %v655_v25  ;;  %v547_v62 = vmul.f32 %v1783_v50, %v479_v56  ;;  %v867_v44 = vmul.f32 %v1424_v34, %v1195_v39 }
  0xf2   :  { %1355 = vst [vmem:[%s2052_s4 + $0x50] sm:$0xff] %v1319_v58   ;;  %v741_v48 = vmul.f32 %v709_v60, %v709_v60  ;;  %v1919_v63 = vadd.f32 %v1788_v53, %v562_v18 }
  0xf3   :  { %v480_v0 = vpop.f32.mrf.mxu1  ;;  %v820_v3 = vadd.f32 1.0, %v756_v51  ;;  %v1922_v5 = vadd.f32 %v1788_v53, %v547_v62  ;;  %v899_v57 = vmul.f32 %v867_v44, %v1857_v49  ;;  %v1212_v35 = vadd.f32 -1.0, %v756_v51 }
  0xf4   :  { %v1430_v6 = vpop.eup %1429  ;;  %v805_v8 = vadd.f32 1.0, %v741_v48  ;;  %v630_v9 = vmin.f32 %v1919_v63, 20.0  ;;  %v1197_v46 = vadd.f32 -1.0, %v741_v48 }
  0xf5   :  { %v1432_v10 = vpop.eup %1431  ;;  %v868_v13 = vmul.f32 %v1430_v6, %v1196_v1  ;;  %1437 = vrcp.f32 %v820_v3  ;;  %v615_v15 = vmin.f32 %v1922_v5, 20.0  ;;  %v429_v16 = vpop.f32.mrf.mxu2 }
  0xf6   :  { %v1434_v14 = vpop.eup %1433  ;;  %1439 = vrcp.f32 %v805_v8  ;;  %v687_v54 = vmul.f32 1.442695, %v630_v9  ;;  %v519_v11 = vadd.f32 %v518_v33, %v429_v16  ;;  %v391_v30 = vpop.f32.mrf.mxu0  ;;  %v883_v27 = vmul.f32 %v1432_v10, %v1211_v7 }
  0xf7   :  { %v1436_v20 = vpop.eup %1435  ;;  %v900_v21 = vmul.f32 %v868_v13, %v1875_v22  ;;  %v725_v23 = vadd.f32 1.0, %v1434_v14  ;;  %v657_v52 = vmul.f32 1.442695, %v615_v15  ;;  %v481_v24 = vadd.f32 %v480_v0, %v391_v30  ;;  %v523_v0 = vpop.f32.mrf.mxu3 }
  0xf8   :  { %v710_v29 = vadd.f32 1.0, %v1436_v20  ;;  %1441 = vpow2.f32 %v687_v54  ;;  %v563_v19 = vmul.f32 %v1783_v50, %v519_v11  ;;  %v915_v45 = vmul.f32 %v883_v27, %v1869_v2 }
  0xf9   :  { %v1284_v31 = vpack.c.bf16 %v900_v21, %v899_v57  ;;  %v757_v34 = vmul.f32 %v725_v23, %v725_v23  ;;  %1443 = vpow2.f32 %v657_v52  ;;  %v548_v49 = vmul.f32 %v1783_v50, %v481_v24 }
  0xfa   :  { %v742_v36 = vmul.f32 %v710_v29, %v710_v29  ;;  %v1931_v33 = vadd.f32 %v1788_v53, %v563_v19 }
  0xfb   :  { %v483_v37 = vpop.f32.mrf.mxu1  ;;  %v1438_v22 = vpop.eup %1437  ;;  %1348 = vst [vmem:[%s2052_s4 + $0x18] sm:$0xff] %v1284_v31   ;;  %v821_v38 = vadd.f32 1.0, %v757_v34  ;;  %v1937_v39 = vadd.f32 %v1788_v53, %v548_v49 }
  0xfc   :  { %v1440_v40 = vpop.eup %1439  ;;  %v884_v41 = vmul.f32 %v1438_v22, %v1212_v35  ;;  %v806_v42 = vadd.f32 1.0, %v742_v36  ;;  %v631_v26 = vmin.f32 %v1931_v33, 20.0  ;;  %v1198_v10 = vadd.f32 -1.0, %v742_v36 }
  0xfd   :  { %v616_v28 = vmin.f32 %v1937_v39, 20.0  ;;  %v431_v43 = vpop.f32.mrf.mxu2 }
  0xfe   :  { %v1442_v47 = vpop.eup %1441  ;;  %v916_v25 = vmul.f32 %v884_v41, %v1888_v55  ;;  %1445 = vrcp.f32 %v806_v42  ;;  %v689_v56 = vmul.f32 1.442695, %v631_v26  ;;  %v521_v58 = vadd.f32 %v520_v17, %v431_v43  ;;  %v394_v60 = vpop.f32.mrf.mxu0 }
  0xff   :  { %v1444_v18 = vpop.eup %1443  ;;  %1447 = vrcp.f32 %v821_v38  ;;  %v726_v51 = vadd.f32 1.0, %v1442_v47  ;;  %v659_v62 = vmul.f32 1.442695, %v616_v28  ;;  %v484_v44 = vadd.f32 %v483_v37, %v394_v60 }
 0x100   :  { %v1324_v1 = vpack.c.bf16 %v916_v25, %v915_v45  ;;  %v711_v3 = vadd.f32 1.0, %v1444_v18  ;;  %1449 = vpow2.f32 %v689_v56  ;;  %v564_v2 = vmul.f32 %v1783_v50, %v521_v58 }
 0x101   :  { %v758_v48 = vmul.f32 %v726_v51, %v726_v51  ;;  %1451 = vpow2.f32 %v659_v62  ;;  %v549_v6 = vmul.f32 %v1783_v50, %v484_v44  ;;  %v869_v55 = vmul.f32 %v1440_v40, %v1197_v46  ;;  %v525_v40 = vpop.f32.mrf.mxu3 }
 0x102   :  { %1356 = vst [vmem:[%s2052_s4 + $0x58] sm:$0xff] %v1324_v1   ;;  %v743_v7 = vmul.f32 %v711_v3, %v711_v3  ;;  %v1949_v8 = vadd.f32 %v1788_v53, %v564_v2  ;;  %v1213_v17 = vadd.f32 -1.0, %v757_v34 }
 0x103   :  { %v485_v9 = vpop.f32.mrf.mxu1  ;;  %v822_v13 = vadd.f32 1.0, %v758_v48  ;;  %v1952_v15 = vadd.f32 %v1788_v53, %v549_v6  ;;  %v901_v23 = vmul.f32 %v869_v55, %v1891_v61  ;;  %v1214_v41 = vadd.f32 -1.0, %v758_v48 }
 0x104   :  { %v1446_v16 = vpop.eup %1445  ;;  %v807_v14 = vadd.f32 1.0, %v743_v7  ;;  %v632_v57 = vmin.f32 %v1949_v8, 20.0  ;;  %v1199_v60 = vadd.f32 -1.0, %v743_v7 }
 0x105   :  { %v1448_v54 = vpop.eup %1447  ;;  %v870_v11 = vmul.f32 %v1446_v16, %v1198_v10  ;;  %1453 = vrcp.f32 %v822_v13  ;;  %v617_v30 = vmin.f32 %v1952_v15, 20.0  ;;  %v434_v20 = vpop.f32.mrf.mxu2 }
 0x106   :  { %v1450_v21 = vpop.eup %1449  ;;  %1455 = vrcp.f32 %v807_v14  ;;  %v691_v52 = vmul.f32 1.442695, %v632_v57  ;;  %v524_v24 = vadd.f32 %v523_v0, %v434_v20  ;;  %v396_v27 = vpop.f32.mrf.mxu0  ;;  %v885_v35 = vmul.f32 %v1448_v54, %v1213_v17 }
 0x107   :  { %v1452_v29 = vpop.eup %1451  ;;  %v902_v19 = vmul.f32 %v870_v11, %v1907_v32  ;;  %v727_v31 = vadd.f32 1.0, %v1450_v21  ;;  %v661_v34 = vmul.f32 1.442695, %v617_v30  ;;  %v486_v49 = vadd.f32 %v485_v9, %v396_v27 }
 0x108   :  { %v712_v36 = vadd.f32 1.0, %v1452_v29  ;;  %1457 = vpow2.f32 %v691_v52  ;;  %v565_v37 = vmul.f32 %v1783_v50, %v524_v24  ;;  %v917_v58 = vmul.f32 %v885_v35, %v1901_v12 }
 0x109   :  { %v1289_v22 = vpack.c.bf16 %v902_v19, %v901_v23  ;;  %v759_v38 = vmul.f32 %v727_v31, %v727_v31  ;;  %1459 = vpow2.f32 %v661_v34  ;;  %v550_v61 = vmul.f32 %v1783_v50, %v486_v49  ;;  %v528_v30 = vpop.f32.mrf.mxu3 }
 0x10a   :  { %v744_v42 = vmul.f32 %v712_v36, %v712_v36  ;;  %v1961_v26 = vadd.f32 %v1788_v53, %v565_v37 }
 0x10b   :  { %v488_v32 = vpop.f32.mrf.mxu1  ;;  %v1454_v45 = vpop.eup %1453  ;;  %1349 = vst [vmem:[%s2052_s4 + $0x20] sm:$0xff] %v1289_v22   ;;  %v823_v46 = vadd.f32 1.0, %v759_v38  ;;  %v1967_v28 = vadd.f32 %v1788_v53, %v550_v61  ;;  %v1215_v21 = vadd.f32 -1.0, %v759_v38 }
 0x10c   :  { %v1456_v43 = vpop.eup %1455  ;;  %v886_v47 = vmul.f32 %v1454_v45, %v1214_v41  ;;  %v808_v25 = vadd.f32 1.0, %v744_v42  ;;  %v633_v56 = vmin.f32 %v1961_v26, 20.0  ;;  %v1200_v57 = vadd.f32 -1.0, %v744_v42 }
 0x10d   :  { %v618_v18 = vmin.f32 %v1967_v28, 20.0  ;;  %v436_v51 = vpop.f32.mrf.mxu2 }
 0x10e   :  { %v1458_v62 = vpop.eup %1457  ;;  %v918_v44 = vmul.f32 %v886_v47, %v1919_v63  ;;  %1461 = vrcp.f32 %v808_v25  ;;  %v693_v0 = vmul.f32 1.442695, %v633_v56  ;;  %v526_v1 = vadd.f32 %v525_v40, %v436_v51  ;;  %v399_v3 = vpop.f32.mrf.mxu0 }
 0x10f   :  { %v1460_v2 = vpop.eup %1459  ;;  %1463 = vrcp.f32 %v823_v46  ;;  %v728_v48 = vadd.f32 1.0, %v1458_v62  ;;  %v663_v6 = vmul.f32 1.442695, %v618_v18  ;;  %v489_v55 = vadd.f32 %v488_v32, %v399_v3 }
 0x110   :  { %v1329_v9 = vpack.c.bf16 %v918_v44, %v917_v58  ;;  %v713_v10 = vadd.f32 1.0, %v1460_v2  ;;  %1465 = vpow2.f32 %v693_v0  ;;  %v566_v12 = vmul.f32 %v1783_v50, %v526_v1 }
 0x111   :  { %v760_v7 = vmul.f32 %v728_v48, %v728_v48  ;;  %1467 = vpow2.f32 %v663_v6  ;;  %v551_v13 = vmul.f32 %v1783_v50, %v489_v55  ;;  %v871_v63 = vmul.f32 %v1456_v43, %v1199_v60  ;;  %v530_v6 = vpop.f32.mrf.mxu3 }
 0x112   :  { %1357 = vst [vmem:[%s2052_s4 + $0x60] sm:$0xff] %v1329_v9   ;;  %v745_v16 = vmul.f32 %v713_v10, %v713_v10  ;;  %v1979_v17 = vadd.f32 %v1788_v53, %v566_v12 }
 0x113   :  { %v490_v14 = vpop.f32.mrf.mxu1  ;;  %v824_v54 = vadd.f32 1.0, %v760_v7  ;;  %v1982_v11 = vadd.f32 %v1788_v53, %v551_v13  ;;  %v903_v34 = vmul.f32 %v871_v63, %v1922_v5  ;;  %v1216_v43 = vadd.f32 -1.0, %v760_v7 }
 0x114   :  { %v1462_v20 = vpop.eup %1461  ;;  %v809_v23 = vadd.f32 1.0, %v745_v16  ;;  %v634_v52 = vmin.f32 %v1979_v17, 20.0  ;;  %v1201_v3 = vadd.f32 -1.0, %v745_v16 }
 0x115   :  { %v1464_v24 = vpop.eup %1463  ;;  %v872_v27 = vmul.f32 %v1462_v20, %v1200_v57  ;;  %1469 = vrcp.f32 %v824_v54  ;;  %v619_v29 = vmin.f32 %v1982_v11, 20.0  ;;  %v439_v19 = vpop.f32.mrf.mxu2 }
 0x116   :  { %v1466_v31 = vpop.eup %1465  ;;  %1471 = vrcp.f32 %v809_v23  ;;  %v695_v49 = vmul.f32 1.442695, %v634_v52  ;;  %v529_v35 = vadd.f32 %v528_v30, %v439_v19  ;;  %v401_v36 = vpop.f32.mrf.mxu0  ;;  %v887_v41 = vmul.f32 %v1464_v24, %v1215_v21 }
 0x117   :  { %v1468_v37 = vpop.eup %1467  ;;  %v904_v22 = vmul.f32 %v872_v27, %v1937_v39  ;;  %v729_v38 = vadd.f32 1.0, %v1466_v31  ;;  %v665_v61 = vmul.f32 1.442695, %v619_v29  ;;  %v491_v40 = vadd.f32 %v490_v14, %v401_v36 }
 0x118   :  { %v714_v42 = vadd.f32 1.0, %v1468_v37  ;;  %1473 = vpow2.f32 %v695_v49  ;;  %v567_v32 = vmul.f32 %v1783_v50, %v529_v35  ;;  %v919_v1 = vmul.f32 %v887_v41, %v1931_v33 }
 0x119   :  { %v1294_v45 = vpack.c.bf16 %v904_v22, %v903_v34  ;;  %v761_v46 = vmul.f32 %v729_v38, %v729_v38  ;;  %1475 = vpow2.f32 %v665_v61  ;;  %v552_v5 = vmul.f32 %v1783_v50, %v491_v40 }
 0x11a   :  { %v746_v47 = vmul.f32 %v714_v42, %v714_v42  ;;  %v1991_v25 = vadd.f32 %v1788_v53, %v567_v32 }
 0x11b   :  { %v493_v56 = vpop.f32.mrf.mxu1  ;;  %v1470_v39 = vpop.eup %1469  ;;  %1350 = vst [vmem:[%s2052_s4 + $0x28] sm:$0xff] %v1294_v45   ;;  %v825_v58 = vadd.f32 1.0, %v761_v46  ;;  %v1997_v60 = vadd.f32 %v1788_v53, %v552_v5  ;;  %v1217_v22 = vadd.f32 -1.0, %v761_v46 }
 0x11c   :  { %v494_v18 = vadd.f32 %v493_v56, %v1795_v59  ;;  %v1472_v51 = vpop.eup %1471  ;;  %v888_v62 = vmul.f32 %v1470_v39, %v1216_v43  ;;  %v810_v44 = vadd.f32 1.0, %v746_v47  ;;  %v635_v0 = vmin.f32 %v1991_v25, 20.0 }
 0x11d   :  { %v620_v2 = vmin.f32 %v1997_v60, 20.0  ;;  %v441_v55 = vpop.f32.mrf.mxu2  ;;  %v1202_v52 = vadd.f32 -1.0, %v746_v47 }
 0x11e   :  { %v553_v48 = vmul.f32 %v1783_v50, %v494_v18  ;;  %v1474_v9 = vpop.eup %1473  ;;  %v920_v10 = vmul.f32 %v888_v62, %v1949_v8  ;;  %1477 = vrcp.f32 %v810_v44  ;;  %v697_v12 = vmul.f32 1.442695, %v635_v0 }
 0x11f   :  { %v531_v59 = vadd.f32 %v530_v6, %v441_v55  ;;  %v1476_v7 = vpop.eup %1475  ;;  %1479 = vrcp.f32 %v825_v58  ;;  %v730_v13 = vadd.f32 1.0, %v1474_v9  ;;  %v667_v63 = vmul.f32 1.442695, %v620_v2 }
 0x120   :  { %v2006_v14 = vadd.f32 %v1788_v53, %v553_v48  ;;  %v1334_v33 = vpack.c.bf16 %v920_v10, %v919_v1  ;;  %v715_v16 = vadd.f32 1.0, %v1476_v7  ;;  %1481 = vpow2.f32 %v697_v12 }
 0x121   :  { %v568_v57 = vmul.f32 %v1783_v50, %v531_v59  ;;  %v762_v54 = vmul.f32 %v730_v13, %v730_v13  ;;  %1483 = vpow2.f32 %v667_v63  ;;  %v873_v8 = vmul.f32 %v1472_v51, %v1201_v3 }
 0x122   :  { %v621_v30 = vmin.f32 %v2006_v14, 20.0  ;;  %1358 = vst [vmem:[%s2052_s4 + $0x68] sm:$0xff] %v1334_v33   ;;  %v747_v20 = vmul.f32 %v715_v16, %v715_v16 }
 0x123   :  { %v2014_v21 = vadd.f32 %v1788_v53, %v568_v57  ;;  %v495_v23 = vpop.f32.mrf.mxu1  ;;  %v826_v24 = vadd.f32 1.0, %v762_v54  ;;  %v905_v37 = vmul.f32 %v873_v8, %v1952_v15  ;;  %v1218_v47 = vadd.f32 -1.0, %v762_v54 }
 0x124   :  { %v669_v27 = vmul.f32 1.442695, %v621_v30  ;;  %v496_v29 = vadd.f32 %v495_v23, %v1802_v4  ;;  %v1478_v19 = vpop.eup %1477  ;;  %v811_v38 = vadd.f32 1.0, %v747_v20  ;;  %v1203_v48 = vadd.f32 -1.0, %v747_v20 }
 0x125   :  { %v636_v31 = vmin.f32 %v2014_v21, 20.0  ;;  %v1480_v34 = vpop.eup %1479  ;;  %v874_v49 = vmul.f32 %v1478_v19, %v1202_v52  ;;  %1485 = vrcp.f32 %v826_v24 }
 0x126   :  { %v554_v35 = vmul.f32 %v1783_v50, %v496_v29  ;;  %v1482_v36 = vpop.eup %1481  ;;  %1487 = vpow2.f32 %v669_v27  ;;  %v889_v43 = vmul.f32 %v1480_v34, %v1217_v22 }
 0x127   :  { %v699_v61 = vmul.f32 1.442695, %v636_v31  ;;  %v1484_v40 = vpop.eup %1483  ;;  %v906_v41 = vmul.f32 %v874_v49, %v1967_v28  ;;  %v731_v42 = vadd.f32 1.0, %v1482_v36 }
 0x128   :  { %v2022_v4 = vadd.f32 %v1788_v53, %v554_v35  ;;  %v716_v32 = vadd.f32 1.0, %v1484_v40  ;;  %v921_v51 = vmul.f32 %v889_v43, %v1961_v26 }
 0x129   :  { %1489 = vpow2.f32 %v699_v61  ;;  %v1299_v45 = vpack.c.bf16 %v906_v41, %v905_v37  ;;  %v763_v5 = vmul.f32 %v731_v42, %v731_v42 }
 0x12a   :  { %v622_v50 = vmin.f32 %v2022_v4, 20.0  ;;  %1491 = vrcp.f32 %v811_v38  ;;  %v748_v15 = vmul.f32 %v716_v32, %v716_v32 }
 0x12b   :  { %v1486_v46 = vpop.eup %1485  ;;  %1351 = vst [vmem:[%s2052_s4 + $0x30] sm:$0xff] %v1299_v45   ;;  %v827_v58 = vadd.f32 1.0, %v763_v5  ;;  %v1219_v7 = vadd.f32 -1.0, %v763_v5 }
 0x12c   :  { %v671_v28 = vmul.f32 1.442695, %v622_v50  ;;  %v890_v56 = vmul.f32 %v1486_v46, %v1218_v47  ;;  %v812_v39 = vadd.f32 1.0, %v748_v15  ;;  %v1488_v53 = vpop.eup %1487  ;;  %v1204_v9 = vadd.f32 -1.0, %v748_v15 }
 0x12d   :  { %v717_v44 = vadd.f32 1.0, %v1488_v53 }
 0x12e   :  { %v922_v62 = vmul.f32 %v890_v56, %v1979_v17  ;;  %1493 = vrcp.f32 %v812_v39 }
 0x12f   :  { %v1490_v18 = vpop.eup %1489  ;;  %1495 = vpow2.f32 %v671_v28  ;;  %v749_v2 = vmul.f32 %v717_v44, %v717_v44 }
 0x130   :  { %v732_v0 = vadd.f32 1.0, %v1490_v18  ;;  %v1492_v1 = vpop.eup %1491  ;;  %v1339_v3 = vpack.c.bf16 %v922_v62, %v921_v51  ;;  %1497 = vrcp.f32 %v827_v58 }
 0x131   :  { %v875_v55 = vmul.f32 %v1492_v1, %v1203_v48  ;;  %v813_v12 = vadd.f32 1.0, %v749_v2  ;;  %v1205_v29 = vadd.f32 -1.0, %v749_v2 }
 0x132   :  { %v764_v6 = vmul.f32 %v732_v0, %v732_v0  ;;  %1359 = vst [vmem:[%s2052_s4 + $0x70] sm:$0xff] %v1339_v3  }
 0x133   :  { %v907_v33 = vmul.f32 %v875_v55, %v1982_v11 }
 0x134   :  { %v828_v10 = vadd.f32 1.0, %v764_v6  ;;  %v1494_v26 = vpop.eup %1493  ;;  %v1220_v8 = vadd.f32 -1.0, %v764_v6 }
 0x135   :  { %v1496_v17 = vpop.eup %1495  ;;  %v876_v59 = vmul.f32 %v1494_v26, %v1204_v9 }
 0x136   :  { %1499 = vrcp.f32 %v828_v10  ;;  %v718_v13 = vadd.f32 1.0, %v1496_v17  ;;  %v1498_v63 = vpop.eup %1497 }
 0x137   :  { %v908_v16 = vmul.f32 %v876_v59, %v1997_v60  ;;  %1501 = vrcp.f32 %v813_v12  ;;  %v891_v30 = vmul.f32 %v1498_v63, %v1219_v7 }
 0x138   :  { %v750_v57 = vmul.f32 %v718_v13, %v718_v13 }
 0x139   :  { %v1304_v54 = vpack.c.bf16 %v908_v16, %v907_v33  ;;  %v923_v27 = vmul.f32 %v891_v30, %v1991_v25 }
 0x13a   :  { %v814_v20 = vadd.f32 1.0, %v750_v57  ;;  %v1206_v31 = vadd.f32 -1.0, %v750_v57 }
 0x13b   :  { %1352 = vst [vmem:[%s2052_s4 + $0x38] sm:$0xff] %v1304_v54  }
 0x13c   :  { %v1500_v23 = vpop.eup %1499  ;;  %1503 = vrcp.f32 %v814_v20 }
 0x13d   :  { %v892_v52 = vmul.f32 %v1500_v23, %v1220_v8  ;;  %v1502_v24 = vpop.eup %1501 }
 0x13e   :  { %v877_v19 = vmul.f32 %v1502_v24, %v1205_v29 }
 0x13f   :  { %v924_v11 = vmul.f32 %v892_v52, %v2014_v21 }
 0x140   :  { %v909_v35 = vmul.f32 %v877_v19, %v2006_v14 }
 0x141   :  { %v1344_v60 = vpack.c.bf16 %v924_v11, %v923_v27 }
 0x142   :  { %v1504_v34 = vpop.eup %1503 }
 0x143   :  { %1360 = vst [vmem:[%s2052_s4 + $0x78] sm:$0xff] %v1344_v60   ;;  %v878_v49 = vmul.f32 %v1504_v34, %v1206_v31 }
 0x145   :  { %v910_v36 = vmul.f32 %v878_v49, %v2022_v4 }
 0x147   :  { %v1309_v37 = vpack.c.bf16 %v910_v36, %v909_v35 }
 0x149   :  { %1353 = vst [vmem:[%s2052_s4 + $0x40] sm:$0xff] %v1309_v37  }

// kernel: mbsfc_forward.27
= control target key start
LH: loop header
LB: loop body
LE: loop exit
PB: predicated region body
PF: predicated region fallthrough
CT: control target
= control target key end

     0   :  { %vm238_vm0 = vcmask 1043456   ;;  %vm189_vm1 = vcmask 982016   ;;  %s1576_s1 = inlined_call_operand.vmem [shape: bf16[120,128], index: 1, kind: input, shape index: {}]   ;;  %s1577_s2 = inlined_call_operand.vmem [shape: f32[1,128], index: 2, kind: input, shape index: {}]   ;;  %s1578_s3 = inlined_call_operand.vmem [shape: f32[1,128], index: 3, kind: input, shape index: {}]   ;;  %s1579_s0 = inlined_call_operand.vmem [shape: bf16[256,120], index: 0, kind: input, shape index: {}]   ;;  %s1580_s4 = inlined_call_operand.vmem [shape: bf16[256,128], index: 4, kind: output, shape index: {}]  }
   0x1   :  { %v63_v0 = vld [vmem:[%s1576_s1 + $0x38] sm:$0xf]  ;;  %v953_v4 = vld [vmem:[%s1576_s1 + $0x30] sm:$0xff]  ;;  %v952_v5 = vld [vmem:[%s1576_s1 + $0x28] sm:$0xff] }
   0x2   :  { %v173_v1 = vunpack.c.l.b16 %v63_v0  ;;  %v951_v6 = vld [vmem:[%s1576_s1 + $0x20] sm:$0xff]  ;;  %v950_v7 = vld [vmem:[%s1576_s1 + $0x18] sm:$0xff]  ;;  %v949_v8 = vld [vmem:[%s1576_s1 + $0x10] sm:$0xff] }
   0x3   :  { %v948_v9 = vld [vmem:[%s1576_s1 + $0x8] sm:$0xff]  ;;  %v947_v10 = vld [vmem:[%s1576_s1] sm:$0xff]  ;;  %v933_v19 = vld [vmem:[%s1579_s0 + $0x10] sm:$0xff] }
   0x4   :  { %v181_v2 = vpack.c.b16 %v173_v1, %v173_v1  ;;  %v931_v11 = vld [vmem:[%s1579_s0] sm:$0xff]  ;;  %v932_v15 = vld [vmem:[%s1579_s0 + $0x8] sm:$0xff]  ;;  %v937_v20 = vld [vmem:[%s1579_s0 + $0x30] sm:$0xff] }
   0x5   :  { %v935_v12 = vld [vmem:[%s1579_s0 + $0x20] sm:$0xff]  ;;  %v936_v16 = vld [vmem:[%s1579_s0 + $0x28] sm:$0xff]  ;;  %v941_v21 = vld [vmem:[%s1579_s0 + $0x50] sm:$0xff] }
   0x6   :  { %v240_v3 = vsel %vm238_vm0, %v181_v2, 0  ;;  %v939_v13 = vld [vmem:[%s1579_s0 + $0x40] sm:$0xff]  ;;  %v940_v17 = vld [vmem:[%s1579_s0 + $0x48] sm:$0xff]  ;;  %v945_v22 = vld [vmem:[%s1579_s0 + $0x70] sm:$0xff] }
   0x7   :  { %242 = vmatpush.bf16.msra.mxu0 %v240_v3  ;;  %1049 = vmatpush.bf16.msra.mxu1 %v240_v3  ;;  %v943_v14 = vld [vmem:[%s1579_s0 + $0x60] sm:$0xff]  ;;  %v944_v18 = vld [vmem:[%s1579_s0 + $0x68] sm:$0xff]  ;;  %v934_v23 = vld [vmem:[%s1579_s0 + $0x18] sm:$0xff] }
   0x8   :  { %1050 = vmatpush.bf16.msra.mxu2 %v240_v3  ;;  %1051 = vmatpush.bf16.msra.mxu3 %v240_v3  ;;  %v938_v24 = vld [vmem:[%s1579_s0 + $0x38] sm:$0xff]  ;;  %v1319_v27 = vld [vmem:[%s1577_s2] ss:$0 sm:$0xff] }
   0x9   :  { %v942_v25 = vld [vmem:[%s1579_s0 + $0x58] sm:$0xff]  ;;  %v1324_v28 = vld [vmem:[%s1578_s3] ss:$0 sm:$0xff] }
   0xa   :  { %v946_v26 = vld [vmem:[%s1579_s0 + $0x78] sm:$0xff] }
   0xb   :  { %243 = vmatpush.bf16.msra.mxu0 %v953_v4  ;;  %1052 = vmatpush.bf16.msra.mxu1 %v953_v4 }
   0xc   :  { %1053 = vmatpush.bf16.msra.mxu2 %v953_v4  ;;  %1054 = vmatpush.bf16.msra.mxu3 %v953_v4 }
   0xf   :  { %244 = vmatpush.bf16.msra.mxu0 %v952_v5  ;;  %1055 = vmatpush.bf16.msra.mxu1 %v952_v5 }
  0x10   :  { %1056 = vmatpush.bf16.msra.mxu2 %v952_v5  ;;  %1057 = vmatpush.bf16.msra.mxu3 %v952_v5 }
  0x13   :  { %245 = vmatpush.bf16.msra.mxu0 %v951_v6  ;;  %1058 = vmatpush.bf16.msra.mxu1 %v951_v6 }
  0x14   :  { %1059 = vmatpush.bf16.msra.mxu2 %v951_v6  ;;  %1060 = vmatpush.bf16.msra.mxu3 %v951_v6 }
  0x17   :  { %246 = vmatpush.bf16.msra.mxu0 %v950_v7  ;;  %1061 = vmatpush.bf16.msra.mxu1 %v950_v7 }
  0x18   :  { %1062 = vmatpush.bf16.msra.mxu2 %v950_v7  ;;  %1063 = vmatpush.bf16.msra.mxu3 %v950_v7 }
  0x1b   :  { %247 = vmatpush.bf16.msra.mxu0 %v949_v8  ;;  %1064 = vmatpush.bf16.msra.mxu1 %v949_v8 }
  0x1c   :  { %1065 = vmatpush.bf16.msra.mxu2 %v949_v8  ;;  %1066 = vmatpush.bf16.msra.mxu3 %v949_v8 }
  0x1f   :  { %248 = vmatpush.bf16.msra.mxu0 %v948_v9  ;;  %1067 = vmatpush.bf16.msra.mxu1 %v948_v9 }
  0x20   :  { %1068 = vmatpush.bf16.msra.mxu2 %v948_v9  ;;  %1069 = vmatpush.bf16.msra.mxu3 %v948_v9 }
  0x23   :  { %249 = vmatpush.bf16.msra.mxu0 %v947_v10  ;;  %1070 = vmatpush.bf16.msra.mxu1 %v947_v10 }
  0x24   :  { %1071 = vmatpush.bf16.msra.mxu2 %v947_v10  ;;  %1072 = vmatpush.bf16.msra.mxu3 %v947_v10 }
  0x26   :  { %883 = vmatmul.msk.bf16.vlgmr.msra.gmra.mxu0 %vm189_vm1, %v931_v11  ;;  %887 = vmatmul.msk.bf16.vlgmr.msra.gmra.mxu1 %vm189_vm1, %v935_v12 }
  0x27   :  { %891 = vmatmul.msk.bf16.vlgmr.msra.gmra.mxu2 %vm189_vm1, %v939_v13  ;;  %895 = vmatmul.msk.bf16.vlgmr.msra.gmra.mxu3 %vm189_vm1, %v943_v14 }
  0x36   :  { %884 = vmatmul.msk.bf16.gmra.mxu0 %vm189_vm1, %v932_v15  ;;  %888 = vmatmul.msk.bf16.gmra.mxu1 %vm189_vm1, %v936_v16 }
  0x37   :  { %892 = vmatmul.msk.bf16.gmra.mxu2 %vm189_vm1, %v940_v17  ;;  %896 = vmatmul.msk.bf16.gmra.mxu3 %vm189_vm1, %v944_v18 }
  0x46   :  { %885 = vmatmul.msk.bf16.gmra.mxu0 %vm189_vm1, %v933_v19  ;;  %889 = vmatmul.msk.bf16.gmra.mxu1 %vm189_vm1, %v937_v20 }
  0x47   :  { %893 = vmatmul.msk.bf16.gmra.mxu2 %vm189_vm1, %v941_v21  ;;  %897 = vmatmul.msk.bf16.gmra.mxu3 %vm189_vm1, %v945_v22 }
  0x56   :  { %886 = vmatmul.msk.bf16.gmra.mxu0 %vm189_vm1, %v934_v23  ;;  %890 = vmatmul.msk.bf16.gmra.mxu1 %vm189_vm1, %v938_v24 }
  0x57   :  { %894 = vmatmul.msk.bf16.gmra.mxu2 %vm189_vm1, %v942_v25  ;;  %898 = vmatmul.msk.bf16.gmra.mxu3 %vm189_vm1, %v946_v26 }
  0xa3   :  { %v251_v29 = vpop.f32.mrf.mxu0  ;;  %v271_v30 = vpop.f32.mrf.mxu1 }
  0xa4   :  { %v335_v31 = vmul.f32 %v1319_v27, %v251_v29  ;;  %v343_v32 = vmul.f32 %v1319_v27, %v271_v30 }
  0xa6   :  { %v1329_v33 = vadd.f32 %v1324_v28, %v335_v31  ;;  %v1332_v34 = vadd.f32 %v1324_v28, %v343_v32 }
  0xa8   :  { %v403_v35 = vmin.f32 %v1329_v33, 20.0  ;;  %v411_v36 = vmin.f32 %v1332_v34, 20.0 }
  0xaa   :  { %v435_v37 = vmul.f32 1.442695, %v403_v35  ;;  %v451_v38 = vmul.f32 1.442695, %v411_v36  ;;  %v291_v39 = vpop.f32.mrf.mxu2  ;;  %v311_v40 = vpop.f32.mrf.mxu3 }
  0xab   :  { %v351_v41 = vmul.f32 %v1319_v27, %v291_v39  ;;  %v359_v42 = vmul.f32 %v1319_v27, %v311_v40  ;;  %v253_v43 = vpop.f32.mrf.mxu0  ;;  %v273_v44 = vpop.f32.mrf.mxu1 }
  0xac   :  { %1075 = vpow2.f32 %v435_v37  ;;  %v336_v45 = vmul.f32 %v1319_v27, %v253_v43  ;;  %v344_v46 = vmul.f32 %v1319_v27, %v273_v44 }
  0xad   :  { %1077 = vpow2.f32 %v451_v38  ;;  %v1341_v47 = vadd.f32 %v1324_v28, %v351_v41  ;;  %v1344_v48 = vadd.f32 %v1324_v28, %v359_v42 }
  0xae   :  { %v1347_v49 = vadd.f32 %v1324_v28, %v336_v45  ;;  %v1350_v50 = vadd.f32 %v1324_v28, %v344_v46 }
  0xaf   :  { %v419_v51 = vmin.f32 %v1341_v47, 20.0  ;;  %v427_v52 = vmin.f32 %v1344_v48, 20.0 }
  0xb0   :  { %v404_v53 = vmin.f32 %v1347_v49, 20.0  ;;  %v412_v54 = vmin.f32 %v1350_v50, 20.0 }
  0xb1   :  { %v467_v55 = vmul.f32 1.442695, %v419_v51  ;;  %v483_v56 = vmul.f32 1.442695, %v427_v52 }
  0xb2   :  { %v1076_v57 = vpop.eup %1075  ;;  %v437_v58 = vmul.f32 1.442695, %v404_v53  ;;  %v453_v59 = vmul.f32 1.442695, %v412_v54  ;;  %v293_v60 = vpop.f32.mrf.mxu2 }
  0xb3   :  { %v313_v61 = vpop.f32.mrf.mxu3  ;;  %v1078_v62 = vpop.eup %1077  ;;  %v499_v63 = vadd.f32 1.0, %v1076_v57  ;;  %1079 = vpow2.f32 %v467_v55  ;;  %v352_v0 = vmul.f32 %v1319_v27, %v293_v60 }
  0xb4   :  { %v360_v1 = vmul.f32 %v1319_v27, %v313_v61  ;;  %v256_v2 = vpop.f32.mrf.mxu0  ;;  %v276_v3 = vpop.f32.mrf.mxu1  ;;  %v507_v4 = vadd.f32 1.0, %v1078_v62  ;;  %1081 = vpow2.f32 %v483_v56 }
  0xb5   :  { %v337_v5 = vmul.f32 %v1319_v27, %v256_v2  ;;  %v345_v6 = vmul.f32 %v1319_v27, %v276_v3  ;;  %v531_v7 = vmul.f32 %v499_v63, %v499_v63  ;;  %1083 = vpow2.f32 %v437_v58 }
  0xb6   :  { %v1361_v8 = vadd.f32 %v1324_v28, %v352_v0  ;;  %v1364_v9 = vadd.f32 %v1324_v28, %v360_v1  ;;  %v539_v10 = vmul.f32 %v507_v4, %v507_v4  ;;  %1085 = vpow2.f32 %v453_v59 }
  0xb7   :  { %v1367_v11 = vadd.f32 %v1324_v28, %v337_v5  ;;  %v1370_v12 = vadd.f32 %v1324_v28, %v345_v6  ;;  %v595_v13 = vadd.f32 1.0, %v531_v7  ;;  %v899_v35 = vadd.f32 -1.0, %v531_v7 }
  0xb8   :  { %v420_v14 = vmin.f32 %v1361_v8, 20.0  ;;  %v428_v15 = vmin.f32 %v1364_v9, 20.0  ;;  %v603_v16 = vadd.f32 1.0, %v539_v10  ;;  %v907_v43 = vadd.f32 -1.0, %v539_v10 }
  0xb9   :  { %v405_v17 = vmin.f32 %v1367_v11, 20.0  ;;  %v413_v18 = vmin.f32 %v1370_v12, 20.0  ;;  %v1080_v19 = vpop.eup %1079  ;;  %1087 = vrcp.f32 %v595_v13 }
  0xba   :  { %v469_v20 = vmul.f32 1.442695, %v420_v14  ;;  %v485_v21 = vmul.f32 1.442695, %v428_v15  ;;  %v1082_v22 = vpop.eup %1081  ;;  %1089 = vrcp.f32 %v603_v16  ;;  %v515_v23 = vadd.f32 1.0, %v1080_v19  ;;  %v296_v26 = vpop.f32.mrf.mxu2 }
  0xbb   :  { %v439_v24 = vmul.f32 1.442695, %v405_v17  ;;  %v455_v25 = vmul.f32 1.442695, %v413_v18  ;;  %v1084_v29 = vpop.eup %1083  ;;  %v523_v30 = vadd.f32 1.0, %v1082_v22  ;;  %v353_v31 = vmul.f32 %v1319_v27, %v296_v26  ;;  %v316_v38 = vpop.f32.mrf.mxu3 }
  0xbc   :  { %1091 = vpow2.f32 %v469_v20  ;;  %v1086_v32 = vpop.eup %1085  ;;  %v547_v36 = vmul.f32 %v515_v23, %v515_v23  ;;  %v500_v37 = vadd.f32 1.0, %v1084_v29  ;;  %v258_v42 = vpop.f32.mrf.mxu0  ;;  %v361_v54 = vmul.f32 %v1319_v27, %v316_v38 }
  0xbd   :  { %1093 = vpow2.f32 %v485_v21  ;;  %v555_v39 = vmul.f32 %v523_v30, %v523_v30  ;;  %v508_v40 = vadd.f32 1.0, %v1086_v32  ;;  %v1378_v41 = vadd.f32 %v1324_v28, %v353_v31  ;;  %v278_v18 = vpop.f32.mrf.mxu1 }
  0xbe   :  { %1095 = vpow2.f32 %v439_v24  ;;  %v611_v44 = vadd.f32 1.0, %v547_v36  ;;  %v532_v45 = vmul.f32 %v500_v37, %v500_v37  ;;  %v338_v57 = vmul.f32 %v1319_v27, %v258_v42 }
  0xbf   :  { %1097 = vpow2.f32 %v455_v25  ;;  %v1088_v46 = vpop.eup %1087  ;;  %v619_v51 = vadd.f32 1.0, %v555_v39  ;;  %v540_v52 = vmul.f32 %v508_v40, %v508_v40  ;;  %v421_v53 = vmin.f32 %v1378_v41, 20.0 }
  0xc0   :  { %v1090_v55 = vpop.eup %1089  ;;  %1099 = vrcp.f32 %v611_v44  ;;  %v596_v56 = vadd.f32 1.0, %v532_v45  ;;  %v659_v59 = vmul.f32 %v1088_v46, %v899_v35  ;;  %v915_v60 = vadd.f32 -1.0, %v547_v36 }
  0xc1   :  { %1101 = vrcp.f32 %v619_v51  ;;  %v604_v61 = vadd.f32 1.0, %v540_v52  ;;  %v667_v63 = vmul.f32 %v1090_v55, %v907_v43  ;;  %v471_v1 = vmul.f32 1.442695, %v421_v53 }
  0xc2   :  { %v1092_v58 = vpop.eup %1091  ;;  %1103 = vrcp.f32 %v596_v56  ;;  %v923_v3 = vadd.f32 -1.0, %v555_v39  ;;  %v1384_v5 = vadd.f32 %v1324_v28, %v361_v54  ;;  %v1387_v13 = vadd.f32 %v1324_v28, %v338_v57 }
  0xc3   :  { %v1094_v62 = vpop.eup %1093  ;;  %v516_v0 = vadd.f32 1.0, %v1092_v58  ;;  %1105 = vrcp.f32 %v604_v61  ;;  %v900_v14 = vadd.f32 -1.0, %v532_v45  ;;  %v908_v15 = vadd.f32 -1.0, %v540_v52  ;;  %v318_v40 = vpop.f32.mrf.mxu3 }
  0xc4   :  { %v1096_v2 = vpop.eup %1095  ;;  %v524_v4 = vadd.f32 1.0, %v1094_v62  ;;  %1107 = vpow2.f32 %v471_v1  ;;  %v691_v20 = vmul.f32 %v659_v59, %v1329_v33  ;;  %v699_v21 = vmul.f32 %v667_v63, %v1332_v34  ;;  %v298_v34 = vpop.f32.mrf.mxu2 }
  0xc5   :  { %v1098_v6 = vpop.eup %1097  ;;  %v548_v7 = vmul.f32 %v516_v0, %v516_v0  ;;  %v501_v10 = vadd.f32 1.0, %v1096_v2  ;;  %v429_v29 = vmin.f32 %v1384_v5, 20.0  ;;  %v406_v30 = vmin.f32 %v1387_v13, 20.0  ;;  %v261_v54 = vpop.f32.mrf.mxu0 }
  0xc6   :  { %v556_v16 = vmul.f32 %v524_v4, %v524_v4  ;;  %v509_v17 = vadd.f32 1.0, %v1098_v6  ;;  %v1100_v19 = vpop.eup %1099  ;;  %v346_v36 = vmul.f32 %v1319_v27, %v278_v18  ;;  %v354_v57 = vmul.f32 %v1319_v27, %v298_v34 }
  0xc7   :  { %v612_v22 = vadd.f32 1.0, %v548_v7  ;;  %v533_v23 = vmul.f32 %v501_v10, %v501_v10  ;;  %v1102_v24 = vpop.eup %1101  ;;  %v916_v32 = vadd.f32 -1.0, %v548_v7  ;;  %v675_v38 = vmul.f32 %v1100_v19, %v915_v60 }
  0xc8   :  { %v620_v25 = vadd.f32 1.0, %v556_v16  ;;  %v541_v26 = vmul.f32 %v509_v17, %v509_v17  ;;  %v1104_v31 = vpop.eup %1103  ;;  %v924_v39 = vadd.f32 -1.0, %v556_v16  ;;  %v683_v43 = vmul.f32 %v1102_v24, %v923_v3 }
  0xc9   :  { %1109 = vrcp.f32 %v612_v22  ;;  %v597_v35 = vadd.f32 1.0, %v533_v23  ;;  %v1106_v37 = vpop.eup %1105  ;;  %v660_v33 = vmul.f32 %v1104_v31, %v900_v14  ;;  %v487_v52 = vmul.f32 1.442695, %v429_v29  ;;  %v281_v14 = vpop.f32.mrf.mxu1 }
  0xca   :  { %1111 = vrcp.f32 %v620_v25  ;;  %v1108_v42 = vpop.eup %1107  ;;  %v668_v44 = vmul.f32 %v1106_v37, %v908_v15  ;;  %v605_v45 = vadd.f32 1.0, %v541_v26  ;;  %v441_v53 = vmul.f32 1.442695, %v406_v30 }
  0xcb   :  { %1113 = vrcp.f32 %v597_v35  ;;  %v692_v46 = vmul.f32 %v660_v33, %v1347_v49  ;;  %v517_v51 = vadd.f32 1.0, %v1108_v42  ;;  %v1397_v56 = vadd.f32 %v1324_v28, %v346_v36 }
  0xcc   :  { %v700_v55 = vmul.f32 %v668_v44, %v1350_v50  ;;  %1115 = vrcp.f32 %v605_v45  ;;  %v901_v59 = vadd.f32 -1.0, %v533_v23  ;;  %v362_v60 = vmul.f32 %v1319_v27, %v318_v40  ;;  %v301_v31 = vpop.f32.mrf.mxu2 }
  0xcd   :  { %v957_v58 = vpack.c.bf16 %v692_v46, %v691_v20  ;;  %1117 = vpow2.f32 %v487_v52  ;;  %v414_v49 = vmin.f32 %v1397_v56, 20.0  ;;  %v1403_v63 = vadd.f32 %v1324_v28, %v354_v57 }
  0xce   :  { %v977_v62 = vpack.c.bf16 %v700_v55, %v699_v21  ;;  %1119 = vpow2.f32 %v441_v53  ;;  %v707_v0 = vmul.f32 %v675_v38, %v1341_v47  ;;  %v549_v2 = vmul.f32 %v517_v51, %v517_v51  ;;  %v263_v38 = vpop.f32.mrf.mxu0 }
  0xcf   :  { %v1110_v61 = vpop.eup %1109  ;;  %958 = vst [vmem:[%s1580_s4] sm:$0xff] %v957_v58   ;;  %v1410_v3 = vadd.f32 %v1324_v28, %v362_v60  ;;  %v457_v7 = vmul.f32 1.442695, %v414_v49  ;;  %v422_v10 = vmin.f32 %v1403_v63, 20.0  ;;  %v339_v47 = vmul.f32 %v1319_v27, %v261_v54 }
  0xd0   :  { %v1112_v50 = vpop.eup %1111  ;;  %v676_v1 = vmul.f32 %v1110_v61, %v916_v32  ;;  %1037 = vst [vmem:[%s1580_s4 + $0x20] sm:$0xff] %v977_v62   ;;  %v715_v15 = vmul.f32 %v683_v43, %v1344_v48  ;;  %v909_v17 = vadd.f32 -1.0, %v541_v26  ;;  %v613_v29 = vadd.f32 1.0, %v549_v2  ;;  %v321_v48 = vpop.f32.mrf.mxu3 }
  0xd1   :  { %v1114_v4 = vpop.eup %1113  ;;  %v684_v6 = vmul.f32 %v1112_v50, %v924_v39  ;;  %v430_v18 = vmin.f32 %v1410_v3, 20.0  ;;  %1121 = vpow2.f32 %v457_v7  ;;  %v473_v21 = vmul.f32 1.442695, %v422_v10  ;;  %v283_v61 = vpop.f32.mrf.mxu1 }
  0xd2   :  { %v708_v16 = vmul.f32 %v676_v1, %v1361_v8  ;;  %v1116_v19 = vpop.eup %1115  ;;  %v1422_v22 = vadd.f32 %v1324_v28, %v339_v47  ;;  %v661_v25 = vmul.f32 %v1114_v4, %v901_v59  ;;  %v347_v37 = vmul.f32 %v1319_v27, %v281_v14 }
  0xd3   :  { %v716_v20 = vmul.f32 %v684_v6, %v1364_v9  ;;  %v1118_v23 = vpop.eup %1117  ;;  %v489_v30 = vmul.f32 1.442695, %v430_v18  ;;  %1123 = vpow2.f32 %v473_v21  ;;  %v669_v9 = vmul.f32 %v1116_v19, %v909_v17 }
  0xd4   :  { %v997_v24 = vpack.c.bf16 %v708_v16, %v707_v0  ;;  %v1120_v32 = vpop.eup %1119  ;;  %v525_v26 = vadd.f32 1.0, %v1118_v23  ;;  %v407_v35 = vmin.f32 %v1422_v22, 20.0  ;;  %v355_v34 = vmul.f32 %v1319_v27, %v301_v31 }
  0xd5   :  { %v1017_v8 = vpack.c.bf16 %v716_v20, %v715_v15  ;;  %v502_v36 = vadd.f32 1.0, %v1120_v32  ;;  %1125 = vpow2.f32 %v489_v30  ;;  %v363_v40 = vmul.f32 %v1319_v27, %v321_v48  ;;  %v303_v20 = vpop.f32.mrf.mxu2 }
  0xd6   :  { %1041 = vst [vmem:[%s1580_s4 + $0x40] sm:$0xff] %v997_v24   ;;  %v557_v33 = vmul.f32 %v525_v26, %v525_v26  ;;  %v443_v39 = vmul.f32 1.442695, %v407_v35  ;;  %1127 = vrcp.f32 %v613_v29  ;;  %v1435_v43 = vadd.f32 %v1324_v28, %v347_v37  ;;  %v266_v35 = vpop.f32.mrf.mxu0 }
  0xd7   :  { %1045 = vst [vmem:[%s1580_s4 + $0x60] sm:$0xff] %v1017_v8   ;;  %v534_v42 = vmul.f32 %v502_v36, %v502_v36  ;;  %v1122_v44 = vpop.eup %1121  ;;  %v917_v45 = vadd.f32 -1.0, %v549_v2  ;;  %v340_v46 = vmul.f32 %v1319_v27, %v263_v38  ;;  %v1439_v51 = vmul.f32 %v661_v25, %v1367_v11 }
  0xd8   :  { %1129 = vpow2.f32 %v443_v39  ;;  %v510_v53 = vadd.f32 1.0, %v1122_v44  ;;  %v415_v54 = vmin.f32 %v1435_v43, 20.0  ;;  %v1443_v57 = vmul.f32 %v669_v9, %v1370_v12  ;;  %v323_v21 = vpop.f32.mrf.mxu3 }
  0xd9   :  { %v598_v52 = vadd.f32 1.0, %v534_v42  ;;  %v1124_v55 = vpop.eup %1123  ;;  %v621_v58 = vadd.f32 1.0, %v557_v33  ;;  %v1446_v59 = vadd.f32 %v1324_v28, %v355_v34  ;;  %v1449_v60 = vadd.f32 %v1324_v28, %v363_v40 }
  0xda   :  { %v542_v11 = vmul.f32 %v510_v53, %v510_v53  ;;  %v518_v49 = vadd.f32 1.0, %v1124_v55  ;;  %v459_v50 = vmul.f32 1.442695, %v415_v54  ;;  %v1454_v12 = vadd.f32 %v1324_v28, %v340_v46 }
  0xdb   :  { %v1126_v62 = vpop.eup %1125  ;;  %1131 = vrcp.f32 %v598_v52  ;;  %v423_v1 = vmin.f32 %v1446_v59, 20.0  ;;  %v431_v2 = vmin.f32 %v1449_v60, 20.0  ;;  %v348_v10 = vmul.f32 %v1319_v27, %v283_v61 }
  0xdc   :  { %v526_v0 = vadd.f32 1.0, %v1126_v62  ;;  %v1128_v4 = vpop.eup %1127  ;;  %v606_v6 = vadd.f32 1.0, %v542_v11  ;;  %v550_v7 = vmul.f32 %v518_v49, %v518_v49  ;;  %1133 = vpow2.f32 %v459_v50 }
  0xdd   :  { %1135 = vrcp.f32 %v621_v58  ;;  %v475_v15 = vmul.f32 1.442695, %v423_v1  ;;  %v408_v16 = vmin.f32 %v1454_v12, 20.0  ;;  %v491_v19 = vmul.f32 1.442695, %v431_v2 }
  0xde   :  { %v1130_v47 = vpop.eup %1129  ;;  %v558_v14 = vmul.f32 %v526_v0, %v526_v0  ;;  %1137 = vrcp.f32 %v606_v6  ;;  %v614_v17 = vadd.f32 1.0, %v550_v7  ;;  %v902_v23 = vadd.f32 -1.0, %v534_v42 }
  0xdf   :  { %v503_v18 = vadd.f32 1.0, %v1130_v47  ;;  %1139 = vpow2.f32 %v475_v15  ;;  %v445_v25 = vmul.f32 1.442695, %v408_v16  ;;  %v677_v30 = vmul.f32 %v1128_v4, %v917_v45 }
  0xe0   :  { %v622_v24 = vadd.f32 1.0, %v558_v14  ;;  %1141 = vrcp.f32 %v614_v17  ;;  %v1459_v48 = vadd.f32 %v1324_v28, %v348_v10  ;;  %v356_v8 = vmul.f32 %v1319_v27, %v303_v20 }
  0xe1   :  { %v1132_v29 = vpop.eup %1131  ;;  %v535_v31 = vmul.f32 %v503_v18, %v503_v18  ;;  %v364_v26 = vmul.f32 %v1319_v27, %v323_v21  ;;  %v925_v36 = vadd.f32 -1.0, %v557_v33  ;;  %v910_v37 = vadd.f32 -1.0, %v542_v11 }
  0xe2   :  { %v662_v32 = vmul.f32 %v1132_v29, %v902_v23  ;;  %1143 = vrcp.f32 %v622_v24  ;;  %v1134_v9 = vpop.eup %1133  ;;  %v416_v42 = vmin.f32 %v1459_v48, 20.0  ;;  %v918_v45 = vadd.f32 -1.0, %v550_v7  ;;  %v306_v29 = vpop.f32.mrf.mxu2 }
  0xe3   :  { %v599_v38 = vadd.f32 1.0, %v535_v31  ;;  %1145 = vpow2.f32 %v491_v19  ;;  %v1136_v39 = vpop.eup %1135  ;;  %v511_v40 = vadd.f32 1.0, %v1134_v9  ;;  %v1466_v46 = vadd.f32 %v1324_v28, %v356_v8 }
  0xe4   :  { %v694_v34 = vmul.f32 %v662_v32, %v1387_v13  ;;  %1147 = vpow2.f32 %v445_v25  ;;  %v1138_v44 = vpop.eup %1137  ;;  %v1469_v52 = vadd.f32 %v1324_v28, %v364_v26  ;;  %v341_v33 = vmul.f32 %v1319_v27, %v266_v35  ;;  %v268_v35 = vpop.f32.mrf.mxu0 }
  0xe5   :  { %v1140_v53 = vpop.eup %1139  ;;  %v670_v55 = vmul.f32 %v1138_v44, %v910_v37  ;;  %v1473_v58 = vmul.f32 %v511_v40, %v511_v40  ;;  %v461_v13 = vmul.f32 1.442695, %v416_v42  ;;  %v709_v62 = vmul.f32 %v677_v30, %v1378_v41 }
  0xe6   :  { %v962_v54 = vpack.c.bf16 %v694_v34, %v1439_v51  ;;  %v1142_v61 = vpop.eup %1141  ;;  %v685_v11 = vmul.f32 %v1136_v39, %v925_v36  ;;  %v926_v49 = vadd.f32 -1.0, %v558_v14  ;;  %v424_v50 = vmin.f32 %v1466_v46, 20.0 }
  0xe7   :  { %v702_v1 = vmul.f32 %v670_v55, %v1397_v56  ;;  %v678_v2 = vmul.f32 %v1142_v61, %v918_v45  ;;  %1149 = vrcp.f32 %v599_v38  ;;  %v519_v51 = vadd.f32 1.0, %v1140_v53 }
  0xe8   :  { %v1144_v0 = vpop.eup %1143  ;;  %1034 = vst [vmem:[%s1580_s4 + $0x8] sm:$0xff] %v962_v54   ;;  %1151 = vpow2.f32 %v461_v13  ;;  %v477_v7 = vmul.f32 1.442695, %v424_v50  ;;  %v432_v41 = vmin.f32 %v1469_v52, 20.0  ;;  %v607_v15 = vadd.f32 1.0, %v1473_v58 }
  0xe9   :  { %v1146_v4 = vpop.eup %1145  ;;  %v686_v6 = vmul.f32 %v1144_v0, %v926_v49  ;;  %v982_v47 = vpack.c.bf16 %v702_v1, %v1443_v57  ;;  %v710_v14 = vmul.f32 %v678_v2, %v1403_v63  ;;  %v1486_v16 = vadd.f32 %v1324_v28, %v341_v33  ;;  %v286_v57 = vpop.f32.mrf.mxu1 }
  0xea   :  { %v1148_v10 = vpop.eup %1147  ;;  %v717_v56 = vmul.f32 %v685_v11, %v1384_v5  ;;  %v527_v18 = vadd.f32 1.0, %v1146_v4  ;;  %v551_v21 = vmul.f32 %v519_v51, %v519_v51  ;;  %1153 = vpow2.f32 %v477_v7 }
  0xeb   :  { %v718_v17 = vmul.f32 %v686_v6, %v1410_v3  ;;  %v504_v19 = vadd.f32 1.0, %v1148_v10  ;;  %1038 = vst [vmem:[%s1580_s4 + $0x28] sm:$0xff] %v982_v47   ;;  %v1002_v20 = vpack.c.bf16 %v710_v14, %v709_v62  ;;  %v903_v23 = vadd.f32 -1.0, %v535_v31  ;;  %v326_v3 = vpop.f32.mrf.mxu3 }
  0xec   :  { %v493_v25 = vmul.f32 1.442695, %v432_v41  ;;  %1155 = vrcp.f32 %v607_v15  ;;  %v409_v5 = vmin.f32 %v1486_v16, 20.0  ;;  %v559_v8 = vmul.f32 %v527_v18, %v527_v18 }
  0xed   :  { %v1022_v63 = vpack.c.bf16 %v718_v17, %v717_v56  ;;  %v536_v24 = vmul.f32 %v504_v19, %v504_v19  ;;  %v1150_v30 = vpop.eup %1149  ;;  %1042 = vst [vmem:[%s1580_s4 + $0x48] sm:$0xff] %v1002_v20   ;;  %v349_v31 = vmul.f32 %v1319_v27, %v286_v57  ;;  %v615_v9 = vadd.f32 1.0, %v551_v21  ;;  %v308_v19 = vpop.f32.mrf.mxu2 }
  0xee   :  { %v1152_v32 = vpop.eup %1151  ;;  %1157 = vpow2.f32 %v493_v25  ;;  %v447_v37 = vmul.f32 1.442695, %v409_v5  ;;  %v357_v38 = vmul.f32 %v1319_v27, %v306_v29  ;;  %v663_v39 = vmul.f32 %v1150_v30, %v903_v23 }
  0xef   :  { %1046 = vst [vmem:[%s1580_s4 + $0x68] sm:$0xff] %v1022_v63   ;;  %v600_v26 = vadd.f32 1.0, %v536_v24  ;;  %v512_v36 = vadd.f32 1.0, %v1152_v32  ;;  %v1503_v34 = vadd.f32 %v1324_v28, %v349_v31  ;;  %v365_v40 = vmul.f32 %v1319_v27, %v326_v3 }
  0xf0   :  { %v1154_v42 = vpop.eup %1153  ;;  %v1507_v45 = vadd.f32 %v1324_v28, %v357_v38  ;;  %v342_v33 = vmul.f32 %v1319_v27, %v268_v35  ;;  %v623_v53 = vadd.f32 1.0, %v559_v8  ;;  %v911_v62 = vadd.f32 -1.0, %v1473_v58 }
  0xf1   :  { %1159 = vrcp.f32 %v600_v26  ;;  %v544_v44 = vmul.f32 %v512_v36, %v512_v36  ;;  %v520_v54 = vadd.f32 1.0, %v1154_v42  ;;  %v417_v55 = vmin.f32 %v1503_v34, 20.0  ;;  %v288_v18 = vpop.f32.mrf.mxu1 }
  0xf2   :  { %1161 = vpow2.f32 %v447_v37  ;;  %v1512_v13 = vadd.f32 %v1324_v28, %v365_v40  ;;  %v1156_v61 = vpop.eup %1155  ;;  %v425_v49 = vmin.f32 %v1507_v45, 20.0  ;;  %v1518_v51 = vadd.f32 %v1324_v28, %v342_v33 }
  0xf3   :  { %1163 = vrcp.f32 %v615_v9  ;;  %v608_v11 = vadd.f32 1.0, %v544_v44  ;;  %v552_v0 = vmul.f32 %v520_v54, %v520_v54  ;;  %v463_v1 = vmul.f32 1.442695, %v417_v55  ;;  %v328_v23 = vpop.f32.mrf.mxu3 }
  0xf4   :  { %v1158_v50 = vpop.eup %1157  ;;  %v433_v2 = vmin.f32 %v1512_v13, 20.0  ;;  %v904_v4 = vadd.f32 -1.0, %v536_v24  ;;  %v479_v7 = vmul.f32 1.442695, %v425_v49  ;;  %v695_v10 = vmul.f32 %v663_v39, %v1422_v22 }
  0xf5   :  { %1165 = vrcp.f32 %v608_v11  ;;  %v528_v6 = vadd.f32 1.0, %v1158_v50  ;;  %v919_v58 = vadd.f32 -1.0, %v551_v21  ;;  %v616_v47 = vadd.f32 1.0, %v552_v0 }
  0xf6   :  { %1167 = vrcp.f32 %v623_v53  ;;  %v495_v17 = vmul.f32 1.442695, %v433_v2  ;;  %v671_v20 = vmul.f32 %v1156_v61, %v911_v62  ;;  %v410_v63 = vmin.f32 %v1518_v51, 20.0 }
  0xf7   :  { %v1160_v41 = vpop.eup %1159  ;;  %v560_v56 = vmul.f32 %v528_v6, %v528_v6  ;;  %1169 = vpow2.f32 %v463_v1  ;;  %v912_v22 = vadd.f32 -1.0, %v544_v44  ;;  %v350_v30 = vmul.f32 %v1319_v27, %v288_v18 }
  0xf8   :  { %v1162_v14 = vpop.eup %1161  ;;  %v664_v15 = vmul.f32 %v1160_v41, %v904_v4  ;;  %1171 = vrcp.f32 %v616_v47  ;;  %v449_v29 = vmul.f32 1.442695, %v410_v63  ;;  %v358_v5 = vmul.f32 %v1319_v27, %v308_v19 }
  0xf9   :  { %v505_v57 = vadd.f32 1.0, %v1162_v14  ;;  %v1164_v24 = vpop.eup %1163  ;;  %v624_v21 = vadd.f32 1.0, %v560_v56  ;;  %1173 = vpow2.f32 %v479_v7  ;;  %v927_v32 = vadd.f32 -1.0, %v559_v8 }
  0xfa   :  { %v696_v25 = vmul.f32 %v664_v15, %v1454_v12  ;;  %1175 = vpow2.f32 %v495_v17  ;;  %v366_v31 = vmul.f32 %v1319_v27, %v328_v23  ;;  %v679_v9 = vmul.f32 %v1164_v24, %v919_v58 }
  0xfb   :  { %v1166_v3 = vpop.eup %1165  ;;  %1177 = vrcp.f32 %v624_v21  ;;  %v537_v37 = vmul.f32 %v505_v57, %v505_v57  ;;  %v920_v38 = vadd.f32 -1.0, %v552_v0  ;;  %v1530_v39 = vadd.f32 %v1324_v28, %v350_v30 }
  0xfc   :  { %v967_v26 = vpack.c.bf16 %v696_v25, %v695_v10  ;;  %v1168_v35 = vpop.eup %1167  ;;  %v672_v36 = vmul.f32 %v1166_v3, %v912_v22  ;;  %1179 = vpow2.f32 %v449_v29  ;;  %v1533_v8 = vadd.f32 %v1324_v28, %v358_v5 }
  0xfd   :  { %v1170_v12 = vpop.eup %1169  ;;  %v1536_v40 = vadd.f32 %v1324_v28, %v366_v31  ;;  %v703_v42 = vmul.f32 %v671_v20, %v1435_v43  ;;  %v687_v53 = vmul.f32 %v1168_v35, %v927_v32  ;;  %v418_v55 = vmin.f32 %v1530_v39, 20.0 }
  0xfe   :  { %1035 = vst [vmem:[%s1580_s4 + $0x10] sm:$0xff] %v967_v26   ;;  %v1172_v27 = vpop.eup %1171  ;;  %v704_v44 = vmul.f32 %v672_v36, %v1459_v48  ;;  %v426_v61 = vmin.f32 %v1533_v8, 20.0  ;;  %v928_v49 = vadd.f32 -1.0, %v560_v56  ;;  %v601_v50 = vadd.f32 1.0, %v537_v37 }
  0xff   :  { %v1174_v33 = vpop.eup %1173  ;;  %v680_v54 = vmul.f32 %v1172_v27, %v920_v38  ;;  %v513_v0 = vadd.f32 1.0, %v1170_v12  ;;  %v711_v28 = vmul.f32 %v679_v9, %v1446_v59  ;;  %v465_v43 = vmul.f32 1.442695, %v418_v55 }
 0x100   :  { %v1176_v62 = vpop.eup %1175  ;;  %v987_v11 = vpack.c.bf16 %v704_v44, %v703_v42  ;;  %v434_v48 = vmin.f32 %v1536_v40, 20.0  ;;  %v719_v7 = vmul.f32 %v687_v53, %v1449_v60  ;;  %v481_v58 = vmul.f32 1.442695, %v426_v61 }
 0x101   :  { %v1178_v1 = vpop.eup %1177  ;;  %v712_v2 = vmul.f32 %v680_v54, %v1466_v46  ;;  %1181 = vrcp.f32 %v601_v50  ;;  %v545_v59 = vmul.f32 %v513_v0, %v513_v0  ;;  %v521_v14 = vadd.f32 1.0, %v1174_v33 }
 0x102   :  { %v1180_v4 = vpop.eup %1179  ;;  %1039 = vst [vmem:[%s1580_s4 + $0x30] sm:$0xff] %v987_v11   ;;  %v688_v6 = vmul.f32 %v1178_v1, %v928_v49  ;;  %v529_v46 = vadd.f32 1.0, %v1176_v62  ;;  %1183 = vpow2.f32 %v465_v43  ;;  %v497_v56 = vmul.f32 1.442695, %v434_v48 }
 0x103   :  { %v1007_v41 = vpack.c.bf16 %v712_v2, %v711_v28  ;;  %v506_v10 = vadd.f32 1.0, %v1180_v4  ;;  %1185 = vpow2.f32 %v481_v58  ;;  %v553_v60 = vmul.f32 %v521_v14, %v521_v14 }
 0x104   :  { %v720_v47 = vmul.f32 %v688_v6, %v1469_v52  ;;  %1187 = vpow2.f32 %v497_v56  ;;  %v609_v52 = vadd.f32 1.0, %v545_v59  ;;  %v561_v19 = vmul.f32 %v529_v46, %v529_v46 }
 0x105   :  { %1043 = vst [vmem:[%s1580_s4 + $0x50] sm:$0xff] %v1007_v41   ;;  %v538_v15 = vmul.f32 %v506_v10, %v506_v10  ;;  %v905_v57 = vadd.f32 -1.0, %v537_v37  ;;  %v617_v23 = vadd.f32 1.0, %v553_v60  ;;  %v913_v42 = vadd.f32 -1.0, %v545_v59 }
 0x106   :  { %v1027_v17 = vpack.c.bf16 %v720_v47, %v719_v7  ;;  %v625_v22 = vadd.f32 1.0, %v561_v19  ;;  %v921_v61 = vadd.f32 -1.0, %v553_v60  ;;  %v929_v11 = vadd.f32 -1.0, %v561_v19 }
 0x107   :  { %v602_v18 = vadd.f32 1.0, %v538_v15  ;;  %v1182_v20 = vpop.eup %1181  ;;  %v906_v30 = vadd.f32 -1.0, %v538_v15 }
 0x108   :  { %1047 = vst [vmem:[%s1580_s4 + $0x70] sm:$0xff] %v1027_v17   ;;  %v1184_v63 = vpop.eup %1183  ;;  %v665_v29 = vmul.f32 %v1182_v20, %v905_v57 }
 0x109   :  { %1189 = vrcp.f32 %v602_v18  ;;  %v514_v24 = vadd.f32 1.0, %v1184_v63  ;;  %v1186_v25 = vpop.eup %1185 }
 0x10a   :  { %1191 = vrcp.f32 %v609_v52  ;;  %v1188_v21 = vpop.eup %1187  ;;  %v522_v3 = vadd.f32 1.0, %v1186_v25  ;;  %v697_v37 = vmul.f32 %v665_v29, %v1486_v16 }
 0x10b   :  { %v546_v5 = vmul.f32 %v514_v24, %v514_v24  ;;  %v530_v26 = vadd.f32 1.0, %v1188_v21  ;;  %1193 = vrcp.f32 %v617_v23 }
 0x10c   :  { %v554_v9 = vmul.f32 %v522_v3, %v522_v3  ;;  %1195 = vrcp.f32 %v625_v22 }
 0x10d   :  { %v610_v35 = vadd.f32 1.0, %v546_v5  ;;  %v562_v36 = vmul.f32 %v530_v26, %v530_v26  ;;  %v914_v62 = vadd.f32 -1.0, %v546_v5 }
 0x10e   :  { %v618_v38 = vadd.f32 1.0, %v554_v9  ;;  %v922_v50 = vadd.f32 -1.0, %v554_v9 }
 0x10f   :  { %v1190_v32 = vpop.eup %1189  ;;  %1197 = vrcp.f32 %v610_v35  ;;  %v626_v44 = vadd.f32 1.0, %v562_v36  ;;  %v930_v28 = vadd.f32 -1.0, %v562_v36 }
 0x110   :  { %v666_v31 = vmul.f32 %v1190_v32, %v906_v30  ;;  %v1192_v27 = vpop.eup %1191  ;;  %1199 = vrcp.f32 %v618_v38 }
 0x111   :  { %1201 = vrcp.f32 %v626_v44  ;;  %v1194_v53 = vpop.eup %1193  ;;  %v673_v55 = vmul.f32 %v1192_v27, %v913_v42 }
 0x112   :  { %v698_v12 = vmul.f32 %v666_v31, %v1518_v51  ;;  %v1196_v54 = vpop.eup %1195  ;;  %v681_v51 = vmul.f32 %v1194_v53, %v921_v61 }
 0x113   :  { %v689_v1 = vmul.f32 %v1196_v54, %v929_v11  ;;  %v705_v43 = vmul.f32 %v673_v55, %v1503_v34 }
 0x114   :  { %v972_v33 = vpack.c.bf16 %v698_v12, %v697_v37  ;;  %v713_v7 = vmul.f32 %v681_v51, %v1507_v45 }
 0x115   :  { %v1198_v16 = vpop.eup %1197  ;;  %v721_v58 = vmul.f32 %v689_v1, %v1512_v13 }
 0x116   :  { %1036 = vst [vmem:[%s1580_s4 + $0x18] sm:$0xff] %v972_v33   ;;  %v674_v49 = vmul.f32 %v1198_v16, %v914_v62  ;;  %v1200_v0 = vpop.eup %1199 }
 0x117   :  { %v1202_v2 = vpop.eup %1201  ;;  %v682_v4 = vmul.f32 %v1200_v0, %v922_v50 }
 0x118   :  { %v706_v48 = vmul.f32 %v674_v49, %v1530_v39  ;;  %v690_v6 = vmul.f32 %v1202_v2, %v930_v28 }
 0x119   :  { %v714_v10 = vmul.f32 %v682_v4, %v1533_v8 }
 0x11a   :  { %v992_v41 = vpack.c.bf16 %v706_v48, %v705_v43  ;;  %v722_v47 = vmul.f32 %v690_v6, %v1536_v40 }
 0x11b   :  { %v1012_v59 = vpack.c.bf16 %v714_v10, %v713_v7 }
 0x11c   :  { %1040 = vst [vmem:[%s1580_s4 + $0x38] sm:$0xff] %v992_v41   ;;  %v1032_v14 = vpack.c.bf16 %v722_v47, %v721_v58 }
 0x11d   :  { %1044 = vst [vmem:[%s1580_s4 + $0x58] sm:$0xff] %v1012_v59  }
 0x11e   :  { %1048 = vst [vmem:[%s1580_s4 + $0x78] sm:$0xff] %v1032_v14  }

// kernel: mbsfc_forward.19
= control target key start
LH: loop header
LB: loop body
LE: loop exit
PB: predicated region body
PF: predicated region fallthrough
CT: control target
= control target key end

     0   :  { %vm327_vm0 = vcmask 1043456   ;;  %vm278_vm1 = vcmask 326656   ;;  %s2027_s1 = inlined_call_operand.vmem [shape: bf16[168,128], index: 1, kind: input, shape index: {}]   ;;  %s2028_s0 = inlined_call_operand.vmem [shape: bf16[256,168], index: 0, kind: input, shape index: {}]   ;;  %s2029_s2 = inlined_call_operand.vmem [shape: f32[1,128], index: 2, kind: input, shape index: {}]   ;;  %s2030_s3 = inlined_call_operand.vmem [shape: f32[1,128], index: 3, kind: input, shape index: {}]   ;;  %s2031_s4 = inlined_call_operand.vmem [shape: bf16[256,128], index: 4, kind: output, shape index: {}]  }
   0x1   :  { %v1224_v0 = vld [vmem:[%s2027_s1 + $0x38] sm:$0xff]  ;;  %v70_v1 = vld [vmem:[%s2027_s1 + $0x50] sm:$0xf]  ;;  %v1226_v6 = vld [vmem:[%s2027_s1 + $0x48] sm:$0xff] }
   0x2   :  { %v256_v2 = vunpack.c.l.b16 %v70_v1  ;;  %331 = vmatpush.bf16.msra.mxu0 %v1224_v0  ;;  %1322 = vmatpush.bf16.msra.mxu2 %v1224_v0  ;;  %v1223_v3 = vld [vmem:[%s2027_s1 + $0x30] sm:$0xff]  ;;  %v1222_v7 = vld [vmem:[%s2027_s1 + $0x28] sm:$0xff]  ;;  %v1225_v8 = vld [vmem:[%s2027_s1 + $0x40] sm:$0xff] }
   0x3   :  { %v1221_v9 = vld [vmem:[%s2027_s1 + $0x20] sm:$0xff]  ;;  %v973_v11 = vld [vmem:[%s2028_s0 + $0x8] sm:$0xf0]  ;;  %v1203_v12 = vld [vmem:[%s2028_s0 + $0x94] sm:$0xf] }
   0x4   :  { %v267_v4 = vpack.c.b16 %v256_v2, %v256_v2  ;;  %v1185_v10 = vld [vmem:[%s2028_s0 + $0x4] sm:$0xf]  ;;  %v1045_v13 = vld [vmem:[%s2028_s0 + $0x98] sm:$0xf0]  ;;  %v1219_v17 = vld [vmem:[%s2027_s1 + $0x10] sm:$0xff] }
   0x5   :  { %v976_v14 = vor.u32 %v1185_v10, %v973_v11  ;;  %v1220_v15 = vld [vmem:[%s2027_s1 + $0x18] sm:$0xff]  ;;  %v1048_v16 = vor.u32 %v1203_v12, %v1045_v13  ;;  %v1218_v18 = vld [vmem:[%s2027_s1 + $0x8] sm:$0xff]  ;;  %v1217_v19 = vld [vmem:[%s2027_s1] sm:$0xff] }
   0x6   :  { %v329_v5 = vsel %vm327_vm0, %v267_v4, 0  ;;  %332 = vmatpush.bf16.msra.mxu0 %v1223_v3  ;;  %1323 = vmatpush.bf16.msra.mxu2 %v1223_v3  ;;  %v1187_v20 = vld [vmem:[%s2028_s0 + $0x14] sm:$0xf]  ;;  %v981_v21 = vld [vmem:[%s2028_s0 + $0x18] sm:$0xf0] }
   0x7   :  { %425 = vmatpush.bf16.msra.mxu1 %v329_v5  ;;  %1330 = vmatpush.bf16.msra.mxu3 %v329_v5  ;;  %v971_v22 = vld [vmem:[%s2028_s0] sm:$0xf]  ;;  %v1186_v23 = vld [vmem:[%s2028_s0 + $0x4] sm:$0xf0]  ;;  %v1205_v26 = vld [vmem:[%s2028_s0 + $0xa4] sm:$0xf]  ;;  %v984_v28 = vor.u32 %v1187_v20, %v981_v21 }
   0x8   :  { %v1035_v24 = vld [vmem:[%s2028_s0 + $0x80] sm:$0xf]  ;;  %v1202_v25 = vld [vmem:[%s2028_s0 + $0x84] sm:$0xf0]  ;;  %v1053_v27 = vld [vmem:[%s2028_s0 + $0xa8] sm:$0xf0]  ;;  %v972_v29 = vor.u32 %v1186_v23, %v971_v22 }
   0x9   :  { %v1036_v30 = vor.u32 %v1202_v25, %v1035_v24  ;;  %v1056_v31 = vor.u32 %v1205_v26, %v1053_v27  ;;  %v1189_v32 = vld [vmem:[%s2028_s0 + $0x24] sm:$0xf]  ;;  %v989_v33 = vld [vmem:[%s2028_s0 + $0x28] sm:$0xf0]  ;;  %v979_v34 = vld [vmem:[%s2028_s0 + $0x10] sm:$0xf] }
   0xa   :  { %333 = vmatpush.bf16.msra.mxu0 %v1222_v7  ;;  %1324 = vmatpush.bf16.msra.mxu2 %v1222_v7  ;;  %v1188_v35 = vld [vmem:[%s2028_s0 + $0x14] sm:$0xf0]  ;;  %v1043_v36 = vld [vmem:[%s2028_s0 + $0x90] sm:$0xf]  ;;  %v1207_v38 = vld [vmem:[%s2028_s0 + $0xb4] sm:$0xf]  ;;  %v992_v40 = vor.u32 %v1189_v32, %v989_v33 }
   0xb   :  { %426 = vmatpush.bf16.msra.mxu1 %v1226_v6  ;;  %1331 = vmatpush.bf16.msra.mxu3 %v1226_v6  ;;  %v1204_v37 = vld [vmem:[%s2028_s0 + $0x94] sm:$0xf0]  ;;  %v1061_v39 = vld [vmem:[%s2028_s0 + $0xb8] sm:$0xf0]  ;;  %v980_v41 = vor.u32 %v1188_v35, %v979_v34  ;;  %v1191_v44 = vld [vmem:[%s2028_s0 + $0x34] sm:$0xf] }
   0xc   :  { %v1044_v42 = vor.u32 %v1204_v37, %v1043_v36  ;;  %v1064_v43 = vor.u32 %v1207_v38, %v1061_v39  ;;  %v997_v45 = vld [vmem:[%s2028_s0 + $0x38] sm:$0xf0]  ;;  %v987_v46 = vld [vmem:[%s2028_s0 + $0x20] sm:$0xf]  ;;  %v1190_v47 = vld [vmem:[%s2028_s0 + $0x24] sm:$0xf0] }
   0xd   :  { %v1051_v48 = vld [vmem:[%s2028_s0 + $0xa0] sm:$0xf]  ;;  %v1206_v49 = vld [vmem:[%s2028_s0 + $0xa4] sm:$0xf0]  ;;  %v1209_v50 = vld [vmem:[%s2028_s0 + $0xc4] sm:$0xf]  ;;  %v1000_v52 = vor.u32 %v1191_v44, %v997_v45  ;;  %v988_v53 = vor.u32 %v1190_v47, %v987_v46 }
   0xe   :  { %334 = vmatpush.bf16.msra.mxu0 %v1221_v9  ;;  %1325 = vmatpush.bf16.msra.mxu2 %v1221_v9  ;;  %v1069_v51 = vld [vmem:[%s2028_s0 + $0xc8] sm:$0xf0]  ;;  %v1052_v54 = vor.u32 %v1206_v49, %v1051_v48  ;;  %v1193_v56 = vld [vmem:[%s2028_s0 + $0x44] sm:$0xf]  ;;  %v995_v58 = vld [vmem:[%s2028_s0 + $0x30] sm:$0xf] }
   0xf   :  { %427 = vmatpush.bf16.msra.mxu1 %v1225_v8  ;;  %1332 = vmatpush.bf16.msra.mxu3 %v1225_v8  ;;  %v1072_v55 = vor.u32 %v1209_v50, %v1069_v51  ;;  %v1005_v57 = vld [vmem:[%s2028_s0 + $0x48] sm:$0xf0]  ;;  %v1192_v59 = vld [vmem:[%s2028_s0 + $0x34] sm:$0xf0]  ;;  %v1059_v60 = vld [vmem:[%s2028_s0 + $0xb0] sm:$0xf] }
  0x10   :  { %v1208_v61 = vld [vmem:[%s2028_s0 + $0xb4] sm:$0xf0]  ;;  %v1211_v62 = vld [vmem:[%s2028_s0 + $0xd4] sm:$0xf]  ;;  %v1077_v63 = vld [vmem:[%s2028_s0 + $0xd8] sm:$0xf0]  ;;  %v1008_v0 = vor.u32 %v1193_v56, %v1005_v57  ;;  %v996_v1 = vor.u32 %v1192_v59, %v995_v58 }
  0x11   :  { %v1060_v2 = vor.u32 %v1208_v61, %v1059_v60  ;;  %v1080_v3 = vor.u32 %v1211_v62, %v1077_v63  ;;  %v1195_v4 = vld [vmem:[%s2028_s0 + $0x54] sm:$0xf]  ;;  %v1013_v5 = vld [vmem:[%s2028_s0 + $0x58] sm:$0xf0]  ;;  %v1003_v6 = vld [vmem:[%s2028_s0 + $0x40] sm:$0xf] }
  0x12   :  { %1137 = vmatmul.msk.bf16.vlgmr.msra.gmra.mxu1 %vm278_vm1, %v976_v14  ;;  %335 = vmatpush.bf16.msra.mxu0 %v1220_v15  ;;  %v1194_v7 = vld [vmem:[%s2028_s0 + $0x44] sm:$0xf0]  ;;  %v1067_v8 = vld [vmem:[%s2028_s0 + $0xc0] sm:$0xf]  ;;  %v1213_v10 = vld [vmem:[%s2028_s0 + $0xe4] sm:$0xf]  ;;  %v1016_v12 = vor.u32 %v1195_v4, %v1013_v5 }
  0x13   :  { %1146 = vmatmul.msk.bf16.vlgmr.msra.gmra.mxu3 %vm278_vm1, %v1048_v16  ;;  %1326 = vmatpush.bf16.msra.mxu2 %v1220_v15  ;;  %v1210_v9 = vld [vmem:[%s2028_s0 + $0xc4] sm:$0xf0]  ;;  %v1085_v11 = vld [vmem:[%s2028_s0 + $0xe8] sm:$0xf0]  ;;  %v1004_v13 = vor.u32 %v1194_v7, %v1003_v6  ;;  %v1197_v16 = vld [vmem:[%s2028_s0 + $0x64] sm:$0xf] }
  0x14   :  { %v1068_v14 = vor.u32 %v1210_v9, %v1067_v8  ;;  %v1088_v15 = vor.u32 %v1213_v10, %v1085_v11  ;;  %v1075_v20 = vld [vmem:[%s2028_s0 + $0xd0] sm:$0xf]  ;;  %v1212_v21 = vld [vmem:[%s2028_s0 + $0xd4] sm:$0xf0]  ;;  %v1215_v22 = vld [vmem:[%s2028_s0 + $0xf4] sm:$0xf] }
  0x15   :  { %v1093_v23 = vld [vmem:[%s2028_s0 + $0xf8] sm:$0xf0]  ;;  %v1076_v26 = vor.u32 %v1212_v21, %v1075_v20  ;;  %v1083_v32 = vld [vmem:[%s2028_s0 + $0xe0] sm:$0xf]  ;;  %v1214_v33 = vld [vmem:[%s2028_s0 + $0xe4] sm:$0xf0] }
  0x16   :  { %336 = vmatpush.bf16.msra.mxu0 %v1219_v17  ;;  %v1096_v27 = vor.u32 %v1215_v22, %v1093_v23  ;;  %v1084_v36 = vor.u32 %v1214_v33, %v1083_v32  ;;  %v1201_v37 = vld [vmem:[%s2028_s0 + $0x84] sm:$0xf]  ;;  %v1037_v38 = vld [vmem:[%s2028_s0 + $0x88] sm:$0xf0]  ;;  %v1027_v39 = vld [vmem:[%s2028_s0 + $0x70] sm:$0xf] }
  0x17   :  { %1327 = vmatpush.bf16.msra.mxu2 %v1219_v17  ;;  %v1021_v17 = vld [vmem:[%s2028_s0 + $0x68] sm:$0xf0]  ;;  %v1732_v49 = vld [vmem:[%s2029_s2] ss:$0 sm:$0xff] }
  0x18   :  { %v1024_v24 = vor.u32 %v1197_v16, %v1021_v17 }
  0x1a   :  { %337 = vmatpush.bf16.msra.mxu0 %v1218_v18 }
  0x1b   :  { %1328 = vmatpush.bf16.msra.mxu2 %v1218_v18  ;;  %v1011_v18 = vld [vmem:[%s2028_s0 + $0x50] sm:$0xf] }
  0x1e   :  { %338 = vmatpush.bf16.msra.mxu0 %v1217_v19 }
  0x1f   :  { %1329 = vmatpush.bf16.msra.mxu2 %v1217_v19  ;;  %v1196_v19 = vld [vmem:[%s2028_s0 + $0x54] sm:$0xf0] }
  0x20   :  { %v1012_v25 = vor.u32 %v1196_v19, %v1011_v18 }
  0x21   :  { %339 = vmatmul.bf16.vlgmr.msra.gmra.mxu0 %v972_v29  ;;  %v1029_v29 = vld [vmem:[%s2028_s0 + $0x78] sm:$0xf0] }
  0x22   :  { %1138 = vmatmul.msk.bf16.gmra.mxu1 %vm278_vm1, %v984_v28  ;;  %379 = vmatmul.bf16.vlgmr.msra.gmra.mxu2 %v1036_v30  ;;  %v1199_v28 = vld [vmem:[%s2028_s0 + $0x74] sm:$0xf]  ;;  %v1019_v30 = vld [vmem:[%s2028_s0 + $0x60] sm:$0xf] }
  0x23   :  { %1147 = vmatmul.msk.bf16.gmra.mxu3 %vm278_vm1, %v1056_v31  ;;  %v1198_v31 = vld [vmem:[%s2028_s0 + $0x64] sm:$0xf0]  ;;  %v1032_v34 = vor.u32 %v1199_v28, %v1029_v29 }
  0x24   :  { %v1020_v35 = vor.u32 %v1198_v31, %v1019_v30 }
  0x31   :  { %344 = vmatmul.bf16.gmra.mxu0 %v980_v41  ;;  %v1091_v41 = vld [vmem:[%s2028_s0 + $0xf0] sm:$0xf] }
  0x32   :  { %1139 = vmatmul.msk.bf16.gmra.mxu1 %vm278_vm1, %v992_v40  ;;  %384 = vmatmul.bf16.gmra.mxu2 %v1044_v42  ;;  %v1200_v40 = vld [vmem:[%s2028_s0 + $0x74] sm:$0xf0] }
  0x33   :  { %1148 = vmatmul.msk.bf16.gmra.mxu3 %vm278_vm1, %v1064_v43  ;;  %v1216_v42 = vld [vmem:[%s2028_s0 + $0xf4] sm:$0xf0]  ;;  %v1040_v43 = vor.u32 %v1201_v37, %v1037_v38  ;;  %v1028_v44 = vor.u32 %v1200_v40, %v1027_v39 }
  0x34   :  { %v1092_v46 = vor.u32 %v1216_v42, %v1091_v41 }
  0x41   :  { %349 = vmatmul.bf16.gmra.mxu0 %v988_v53  ;;  %v1737_v53 = vld [vmem:[%s2030_s3] ss:$0 sm:$0xff] }
  0x42   :  { %1140 = vmatmul.msk.bf16.gmra.mxu1 %vm278_vm1, %v1000_v52  ;;  %389 = vmatmul.bf16.gmra.mxu2 %v1052_v54 }
  0x43   :  { %1149 = vmatmul.msk.bf16.gmra.mxu3 %vm278_vm1, %v1072_v55 }
  0x51   :  { %354 = vmatmul.bf16.gmra.mxu0 %v996_v1 }
  0x52   :  { %1141 = vmatmul.msk.bf16.gmra.mxu1 %vm278_vm1, %v1008_v0  ;;  %394 = vmatmul.bf16.gmra.mxu2 %v1060_v2 }
  0x53   :  { %1150 = vmatmul.msk.bf16.gmra.mxu3 %vm278_vm1, %v1080_v3 }
  0x61   :  { %359 = vmatmul.bf16.gmra.mxu0 %v1004_v13 }
  0x62   :  { %1142 = vmatmul.msk.bf16.gmra.mxu1 %vm278_vm1, %v1016_v12  ;;  %399 = vmatmul.bf16.gmra.mxu2 %v1068_v14 }
  0x63   :  { %1151 = vmatmul.msk.bf16.gmra.mxu3 %vm278_vm1, %v1088_v15 }
  0x71   :  { %364 = vmatmul.bf16.gmra.mxu0 %v1012_v25 }
  0x72   :  { %1143 = vmatmul.msk.bf16.gmra.mxu1 %vm278_vm1, %v1024_v24  ;;  %404 = vmatmul.bf16.gmra.mxu2 %v1076_v26 }
  0x73   :  { %1152 = vmatmul.msk.bf16.gmra.mxu3 %vm278_vm1, %v1096_v27 }
  0x81   :  { %369 = vmatmul.bf16.gmra.mxu0 %v1020_v35 }
  0x82   :  { %1144 = vmatmul.msk.bf16.gmra.mxu1 %vm278_vm1, %v1032_v34  ;;  %409 = vmatmul.bf16.gmra.mxu2 %v1084_v36 }
  0x8f   :  { %v429_v45 = vpop.f32.mrf.mxu1 }
  0x91   :  { %374 = vmatmul.bf16.gmra.mxu0 %v1028_v44 }
  0x92   :  { %1145 = vmatmul.msk.bf16.gmra.mxu1 %vm278_vm1, %v1040_v43  ;;  %414 = vmatmul.bf16.gmra.mxu2 %v1092_v46 }
  0x96   :  { %v474_v48 = vpop.f32.mrf.mxu3 }
  0x97   :  { %v431_v47 = vpop.f32.mrf.mxu1 }
  0x9e   :  { %v340_v51 = vpop.f32.mrf.mxu0  ;;  %v476_v58 = vpop.f32.mrf.mxu3 }
  0x9f   :  { %v434_v50 = vpop.f32.mrf.mxu1  ;;  %v430_v52 = vadd.f32 %v429_v45, %v340_v51 }
  0xa1   :  { %v513_v54 = vmul.f32 %v1732_v49, %v430_v52 }
  0xa3   :  { %v1741_v55 = vadd.f32 %v1737_v53, %v513_v54 }
  0xa5   :  { %v581_v56 = vmin.f32 %v1741_v55, 20.0  ;;  %v1744_v57 = vpop.f32.mrf.mxu2 }
  0xa6   :  { %v342_v60 = vpop.f32.mrf.mxu0  ;;  %v479_v8 = vpop.f32.mrf.mxu3 }
  0xa7   :  { %v436_v59 = vpop.f32.mrf.mxu1  ;;  %v613_v61 = vmul.f32 1.442695, %v581_v56  ;;  %v432_v62 = vadd.f32 %v431_v47, %v342_v60 }
  0xa9   :  { %1335 = vpow2.f32 %v613_v61  ;;  %v514_v63 = vmul.f32 %v1732_v49, %v432_v62 }
  0xab   :  { %v1748_v0 = vadd.f32 %v1737_v53, %v514_v63 }
  0xad   :  { %v582_v1 = vmin.f32 %v1748_v0, 20.0  ;;  %v1751_v2 = vpop.f32.mrf.mxu2 }
  0xae   :  { %v345_v4 = vpop.f32.mrf.mxu0  ;;  %v1760_v25 = vpop.f32.mrf.mxu3 }
  0xaf   :  { %v439_v3 = vpop.f32.mrf.mxu1  ;;  %v1336_v5 = vpop.eup %1335  ;;  %v615_v6 = vmul.f32 1.442695, %v582_v1  ;;  %v435_v7 = vadd.f32 %v434_v50, %v345_v4 }
  0xb0   :  { %v677_v9 = vadd.f32 1.0, %v1336_v5 }
  0xb1   :  { %1337 = vpow2.f32 %v615_v6  ;;  %v515_v10 = vmul.f32 %v1732_v49, %v435_v7 }
  0xb2   :  { %v709_v11 = vmul.f32 %v677_v9, %v677_v9 }
  0xb3   :  { %v1755_v12 = vadd.f32 %v1737_v53, %v515_v10 }
  0xb4   :  { %v773_v13 = vadd.f32 1.0, %v709_v11  ;;  %v1153_v41 = vadd.f32 -1.0, %v709_v11 }
  0xb5   :  { %v583_v14 = vmin.f32 %v1755_v12, 20.0  ;;  %v385_v15 = vpop.f32.mrf.mxu2 }
  0xb6   :  { %v475_v16 = vadd.f32 %v474_v48, %v385_v15  ;;  %v347_v18 = vpop.f32.mrf.mxu0  ;;  %1339 = vrcp.f32 %v773_v13  ;;  %v1780_v51 = vpop.f32.mrf.mxu3 }
  0xb7   :  { %v441_v17 = vpop.f32.mrf.mxu1  ;;  %v1338_v19 = vpop.eup %1337  ;;  %v617_v20 = vmul.f32 1.442695, %v583_v14  ;;  %v437_v21 = vadd.f32 %v436_v59, %v347_v18 }
  0xb8   :  { %v678_v22 = vadd.f32 1.0, %v1338_v19  ;;  %v531_v23 = vmul.f32 %v1732_v49, %v475_v16 }
  0xb9   :  { %1341 = vpow2.f32 %v617_v20  ;;  %v516_v24 = vmul.f32 %v1732_v49, %v437_v21 }
  0xba   :  { %v710_v26 = vmul.f32 %v678_v22, %v678_v22  ;;  %v1763_v27 = vadd.f32 %v1737_v53, %v531_v23 }
  0xbb   :  { %v1766_v28 = vadd.f32 %v1737_v53, %v516_v24 }
  0xbc   :  { %v774_v29 = vadd.f32 1.0, %v710_v26  ;;  %v599_v30 = vmin.f32 %v1763_v27, 20.0  ;;  %v1340_v33 = vpop.eup %1339  ;;  %v1154_v48 = vadd.f32 -1.0, %v710_v26 }
  0xbd   :  { %v584_v31 = vmin.f32 %v1766_v28, 20.0  ;;  %v387_v32 = vpop.f32.mrf.mxu2  ;;  %v837_v45 = vmul.f32 %v1340_v33, %v1153_v41 }
  0xbe   :  { %1343 = vrcp.f32 %v774_v29  ;;  %v649_v34 = vmul.f32 1.442695, %v599_v30  ;;  %v477_v35 = vadd.f32 %v476_v58, %v387_v32  ;;  %v350_v37 = vpop.f32.mrf.mxu0  ;;  %v1801_v23 = vpop.f32.mrf.mxu3 }
  0xbf   :  { %v1770_v36 = vpop.f32.mrf.mxu1  ;;  %v1342_v38 = vpop.eup %1341  ;;  %v619_v39 = vmul.f32 1.442695, %v584_v31  ;;  %v440_v40 = vadd.f32 %v439_v3, %v350_v37  ;;  %v869_v62 = vmul.f32 %v837_v45, %v1741_v55 }
  0xc0   :  { %v679_v42 = vadd.f32 1.0, %v1342_v38  ;;  %1345 = vpow2.f32 %v649_v34  ;;  %v532_v43 = vmul.f32 %v1732_v49, %v477_v35 }
  0xc1   :  { %1347 = vpow2.f32 %v619_v39  ;;  %v517_v44 = vmul.f32 %v1732_v49, %v440_v40 }
  0xc2   :  { %v711_v46 = vmul.f32 %v679_v42, %v679_v42  ;;  %v1775_v47 = vadd.f32 %v1737_v53, %v532_v43 }
  0xc3   :  { %v1778_v50 = vadd.f32 %v1737_v53, %v517_v44 }
  0xc4   :  { %v1344_v52 = vpop.eup %1343  ;;  %v775_v54 = vadd.f32 1.0, %v711_v46  ;;  %v600_v56 = vmin.f32 %v1775_v47, 20.0  ;;  %v1155_v37 = vadd.f32 -1.0, %v711_v46 }
  0xc5   :  { %v838_v58 = vmul.f32 %v1344_v52, %v1154_v48  ;;  %v585_v59 = vmin.f32 %v1778_v50, 20.0  ;;  %v390_v60 = vpop.f32.mrf.mxu2 }
  0xc6   :  { %v1346_v61 = vpop.eup %1345  ;;  %1349 = vrcp.f32 %v775_v54  ;;  %v651_v63 = vmul.f32 1.442695, %v600_v56  ;;  %v480_v1 = vadd.f32 %v479_v8, %v390_v60  ;;  %v352_v4 = vpop.f32.mrf.mxu0 }
  0xc7   :  { %v1785_v3 = vpop.f32.mrf.mxu1  ;;  %v1348_v5 = vpop.eup %1347  ;;  %v870_v6 = vmul.f32 %v838_v58, %v1748_v0  ;;  %v695_v7 = vadd.f32 1.0, %v1346_v61  ;;  %v621_v9 = vmul.f32 1.442695, %v585_v59  ;;  %v442_v10 = vadd.f32 %v441_v17, %v352_v4 }
  0xc8   :  { %v680_v11 = vadd.f32 1.0, %v1348_v5  ;;  %1351 = vpow2.f32 %v651_v63  ;;  %v533_v13 = vmul.f32 %v1732_v49, %v480_v1 }
  0xc9   :  { %v1230_v14 = vpack.c.bf16 %v870_v6, %v869_v62  ;;  %v727_v15 = vmul.f32 %v695_v7, %v695_v7  ;;  %1353 = vpow2.f32 %v621_v9  ;;  %v518_v55 = vmul.f32 %v1732_v49, %v442_v10 }
  0xca   :  { %v712_v16 = vmul.f32 %v680_v11, %v680_v11  ;;  %v1791_v8 = vadd.f32 %v1737_v53, %v533_v13  ;;  %v1823_v13 = vpop.f32.mrf.mxu3 }
  0xcb   :  { %1231 = vst [vmem:[%s2031_s4] sm:$0xff] %v1230_v14   ;;  %v791_v0 = vadd.f32 1.0, %v727_v15  ;;  %v1797_v17 = vadd.f32 %v1737_v53, %v518_v55  ;;  %v1171_v56 = vadd.f32 -1.0, %v727_v15 }
  0xcc   :  { %v1350_v18 = vpop.eup %1349  ;;  %v776_v19 = vadd.f32 1.0, %v712_v16  ;;  %v601_v20 = vmin.f32 %v1791_v8, 20.0  ;;  %v1156_v44 = vadd.f32 -1.0, %v712_v16 }
  0xcd   :  { %v586_v21 = vmin.f32 %v1797_v17, 20.0  ;;  %v392_v22 = vpop.f32.mrf.mxu2  ;;  %v839_v42 = vmul.f32 %v1350_v18, %v1155_v37 }
  0xce   :  { %v1352_v24 = vpop.eup %1351  ;;  %1355 = vrcp.f32 %v776_v19  ;;  %v653_v26 = vmul.f32 1.442695, %v601_v20  ;;  %v482_v29 = vadd.f32 %v1760_v25, %v392_v22  ;;  %v355_v31 = vpop.f32.mrf.mxu0 }
  0xcf   :  { %v1804_v30 = vpop.f32.mrf.mxu1  ;;  %v1354_v32 = vpop.eup %1353  ;;  %1357 = vrcp.f32 %v791_v0  ;;  %v696_v33 = vadd.f32 1.0, %v1352_v24  ;;  %v623_v34 = vmul.f32 1.442695, %v586_v21  ;;  %v445_v35 = vadd.f32 %v1770_v36, %v355_v31 }
  0xd0   :  { %v681_v38 = vadd.f32 1.0, %v1354_v32  ;;  %1359 = vpow2.f32 %v653_v26  ;;  %v534_v39 = vmul.f32 %v1732_v49, %v482_v29  ;;  %v871_v62 = vmul.f32 %v839_v42, %v1755_v12 }
  0xd1   :  { %v728_v40 = vmul.f32 %v696_v33, %v696_v33  ;;  %1361 = vpow2.f32 %v623_v34  ;;  %v519_v41 = vmul.f32 %v1732_v49, %v445_v35 }
  0xd2   :  { %v713_v25 = vmul.f32 %v681_v38, %v681_v38  ;;  %v1810_v43 = vadd.f32 %v1737_v53, %v534_v39 }
  0xd3   :  { %v792_v45 = vadd.f32 1.0, %v728_v40  ;;  %v1813_v48 = vadd.f32 %v1737_v53, %v519_v41  ;;  %v1172_v0 = vadd.f32 -1.0, %v728_v40 }
  0xd4   :  { %v1356_v36 = vpop.eup %1355  ;;  %v777_v46 = vadd.f32 1.0, %v713_v25  ;;  %v602_v52 = vmin.f32 %v1810_v43, 20.0  ;;  %v1157_v31 = vadd.f32 -1.0, %v713_v25 }
  0xd5   :  { %v1358_v54 = vpop.eup %1357  ;;  %v840_v58 = vmul.f32 %v1356_v36, %v1156_v44  ;;  %1363 = vrcp.f32 %v792_v45  ;;  %v587_v59 = vmin.f32 %v1813_v48, 20.0  ;;  %v395_v60 = vpop.f32.mrf.mxu2 }
  0xd6   :  { %v1360_v61 = vpop.eup %1359  ;;  %1365 = vrcp.f32 %v777_v46  ;;  %v655_v63 = vmul.f32 1.442695, %v602_v52  ;;  %v485_v1 = vadd.f32 %v1780_v51, %v395_v60  ;;  %v357_v5 = vpop.f32.mrf.mxu0  ;;  %v855_v14 = vmul.f32 %v1358_v54, %v1171_v56 }
  0xd7   :  { %v1819_v4 = vpop.f32.mrf.mxu1  ;;  %v1362_v6 = vpop.eup %1361  ;;  %v872_v7 = vmul.f32 %v840_v58, %v1766_v28  ;;  %v697_v9 = vadd.f32 1.0, %v1360_v61  ;;  %v625_v10 = vmul.f32 1.442695, %v587_v59  ;;  %v447_v11 = vadd.f32 %v1785_v3, %v357_v5 }
  0xd8   :  { %v682_v15 = vadd.f32 1.0, %v1362_v6  ;;  %1367 = vpow2.f32 %v655_v63  ;;  %v535_v12 = vmul.f32 %v1732_v49, %v485_v1  ;;  %v887_v29 = vmul.f32 %v855_v14, %v1763_v27  ;;  %v491_v52 = vpop.f32.mrf.mxu3 }
  0xd9   :  { %v1235_v55 = vpack.c.bf16 %v872_v7, %v871_v62  ;;  %v729_v16 = vmul.f32 %v697_v9, %v697_v9  ;;  %1369 = vpow2.f32 %v625_v10  ;;  %v520_v51 = vmul.f32 %v1732_v49, %v447_v11 }
  0xda   :  { %v714_v18 = vmul.f32 %v682_v15, %v682_v15  ;;  %v1828_v28 = vadd.f32 %v1737_v53, %v535_v12 }
  0xdb   :  { %v1364_v19 = vpop.eup %1363  ;;  %1307 = vst [vmem:[%s2031_s4 + $0x8] sm:$0xff] %v1235_v55   ;;  %v793_v3 = vadd.f32 1.0, %v729_v16  ;;  %v1834_v20 = vadd.f32 %v1737_v53, %v520_v51  ;;  %v1173_v1 = vadd.f32 -1.0, %v729_v16 }
  0xdc   :  { %v1366_v21 = vpop.eup %1365  ;;  %v856_v22 = vmul.f32 %v1364_v19, %v1172_v0  ;;  %v778_v24 = vadd.f32 1.0, %v714_v18  ;;  %v603_v26 = vmin.f32 %v1828_v28, 20.0 }
  0xdd   :  { %v588_v32 = vmin.f32 %v1834_v20, 20.0  ;;  %v397_v33 = vpop.f32.mrf.mxu2 }
  0xde   :  { %v1368_v34 = vpop.eup %1367  ;;  %v888_v35 = vmul.f32 %v856_v22, %v1775_v47  ;;  %1371 = vrcp.f32 %v778_v24  ;;  %v657_v37 = vmul.f32 1.442695, %v603_v26  ;;  %v487_v38 = vadd.f32 %v1801_v23, %v397_v33  ;;  %v360_v40 = vpop.f32.mrf.mxu0 }
  0xdf   :  { %v1841_v39 = vpop.f32.mrf.mxu1  ;;  %v1370_v41 = vpop.eup %1369  ;;  %1373 = vrcp.f32 %v793_v3  ;;  %v698_v42 = vadd.f32 1.0, %v1368_v34  ;;  %v627_v44 = vmul.f32 1.442695, %v588_v32  ;;  %v450_v27 = vadd.f32 %v1804_v30, %v360_v40 }
  0xe0   :  { %v1275_v25 = vpack.c.bf16 %v888_v35, %v887_v29  ;;  %v683_v45 = vadd.f32 1.0, %v1370_v41  ;;  %1375 = vpow2.f32 %v657_v37  ;;  %v536_v36 = vmul.f32 %v1732_v49, %v487_v38  ;;  %v494_v32 = vpop.f32.mrf.mxu3 }
  0xe1   :  { %v730_v46 = vmul.f32 %v698_v42, %v698_v42  ;;  %1377 = vpow2.f32 %v627_v44  ;;  %v521_v47 = vmul.f32 %v1732_v49, %v450_v27  ;;  %v841_v23 = vmul.f32 %v1366_v21, %v1157_v31 }
  0xe2   :  { %1315 = vst [vmem:[%s2031_s4 + $0x48] sm:$0xff] %v1275_v25   ;;  %v715_v54 = vmul.f32 %v683_v45, %v683_v45  ;;  %v1850_v56 = vadd.f32 %v1737_v53, %v536_v36  ;;  %v1158_v30 = vadd.f32 -1.0, %v714_v18 }
  0xe3   :  { %v794_v58 = vadd.f32 1.0, %v730_v46  ;;  %v1853_v59 = vadd.f32 %v1737_v53, %v521_v47  ;;  %v873_v10 = vmul.f32 %v841_v23, %v1778_v50  ;;  %v1174_v24 = vadd.f32 -1.0, %v730_v46 }
  0xe4   :  { %v1372_v60 = vpop.eup %1371  ;;  %v779_v61 = vadd.f32 1.0, %v715_v54  ;;  %v604_v62 = vmin.f32 %v1850_v56, 20.0  ;;  %v1159_v40 = vadd.f32 -1.0, %v715_v54 }
  0xe5   :  { %v1374_v63 = vpop.eup %1373  ;;  %v842_v5 = vmul.f32 %v1372_v60, %v1158_v30  ;;  %1379 = vrcp.f32 %v794_v58  ;;  %v589_v6 = vmin.f32 %v1853_v59, 20.0  ;;  %v400_v7 = vpop.f32.mrf.mxu2 }
  0xe6   :  { %v1376_v9 = vpop.eup %1375  ;;  %1381 = vrcp.f32 %v779_v61  ;;  %v659_v11 = vmul.f32 1.442695, %v604_v62  ;;  %v490_v14 = vadd.f32 %v1823_v13, %v400_v7  ;;  %v362_v12 = vpop.f32.mrf.mxu0  ;;  %v857_v19 = vmul.f32 %v1374_v63, %v1173_v1 }
  0xe7   :  { %v1859_v15 = vpop.f32.mrf.mxu1  ;;  %v1378_v55 = vpop.eup %1377  ;;  %v874_v51 = vmul.f32 %v842_v5, %v1797_v17  ;;  %v699_v0 = vadd.f32 1.0, %v1376_v9  ;;  %v629_v16 = vmul.f32 1.442695, %v589_v6  ;;  %v452_v18 = vadd.f32 %v1819_v4, %v362_v12 }
  0xe8   :  { %v684_v3 = vadd.f32 1.0, %v1378_v55  ;;  %1383 = vpow2.f32 %v659_v11  ;;  %v537_v21 = vmul.f32 %v1732_v49, %v490_v14  ;;  %v889_v38 = vmul.f32 %v857_v19, %v1791_v8 }
  0xe9   :  { %v1240_v50 = vpack.c.bf16 %v874_v51, %v873_v10  ;;  %v731_v22 = vmul.f32 %v699_v0, %v699_v0  ;;  %1385 = vpow2.f32 %v629_v16  ;;  %v522_v13 = vmul.f32 %v1732_v49, %v452_v18  ;;  %v496_v51 = vpop.f32.mrf.mxu3 }
  0xea   :  { %v716_v26 = vmul.f32 %v684_v3, %v684_v3  ;;  %v1866_v29 = vadd.f32 %v1737_v53, %v537_v21 }
  0xeb   :  { %v1380_v17 = vpop.eup %1379  ;;  %1308 = vst [vmem:[%s2031_s4 + $0x10] sm:$0xff] %v1240_v50   ;;  %v795_v4 = vadd.f32 1.0, %v731_v22  ;;  %v1872_v31 = vadd.f32 %v1737_v53, %v522_v13  ;;  %v1175_v11 = vadd.f32 -1.0, %v731_v22 }
  0xec   :  { %v1382_v33 = vpop.eup %1381  ;;  %v858_v34 = vmul.f32 %v1380_v17, %v1174_v24  ;;  %v780_v35 = vadd.f32 1.0, %v716_v26  ;;  %v605_v37 = vmin.f32 %v1866_v29, 20.0  ;;  %v1160_v1 = vadd.f32 -1.0, %v716_v26 }
  0xed   :  { %v590_v41 = vmin.f32 %v1872_v31, 20.0  ;;  %v402_v42 = vpop.f32.mrf.mxu2 }
  0xee   :  { %v1384_v44 = vpop.eup %1383  ;;  %v890_v27 = vmul.f32 %v858_v34, %v1810_v43  ;;  %1387 = vrcp.f32 %v780_v35  ;;  %v661_v25 = vmul.f32 1.442695, %v605_v37  ;;  %v492_v45 = vadd.f32 %v491_v52, %v402_v42  ;;  %v365_v46 = vpop.f32.mrf.mxu0 }
  0xef   :  { %v1878_v36 = vpop.f32.mrf.mxu1  ;;  %v1386_v47 = vpop.eup %1385  ;;  %1389 = vrcp.f32 %v795_v4  ;;  %v700_v23 = vadd.f32 1.0, %v1384_v44  ;;  %v631_v30 = vmul.f32 1.442695, %v590_v41  ;;  %v455_v58 = vadd.f32 %v1841_v39, %v365_v46 }
  0xf0   :  { %v1280_v8 = vpack.c.bf16 %v890_v27, %v889_v38  ;;  %v685_v54 = vadd.f32 1.0, %v1386_v47  ;;  %1391 = vpow2.f32 %v661_v25  ;;  %v538_v60 = vmul.f32 %v1732_v49, %v492_v45 }
  0xf1   :  { %v732_v61 = vmul.f32 %v700_v23, %v700_v23  ;;  %1393 = vpow2.f32 %v631_v30  ;;  %v523_v43 = vmul.f32 %v1732_v49, %v455_v58  ;;  %v843_v52 = vmul.f32 %v1382_v33, %v1159_v40 }
  0xf2   :  { %1316 = vst [vmem:[%s2031_s4 + $0x50] sm:$0xff] %v1280_v8   ;;  %v717_v62 = vmul.f32 %v685_v54, %v685_v54  ;;  %v1887_v63 = vadd.f32 %v1737_v53, %v538_v60 }
  0xf3   :  { %v796_v39 = vadd.f32 1.0, %v732_v61  ;;  %v1890_v5 = vadd.f32 %v1737_v53, %v523_v43  ;;  %v875_v16 = vmul.f32 %v843_v52, %v1813_v48  ;;  %v1176_v35 = vadd.f32 -1.0, %v732_v61 }
  0xf4   :  { %v1388_v6 = vpop.eup %1387  ;;  %v781_v7 = vadd.f32 1.0, %v717_v62  ;;  %v606_v9 = vmin.f32 %v1887_v63, 20.0  ;;  %v1161_v45 = vadd.f32 -1.0, %v717_v62 }
  0xf5   :  { %v1390_v10 = vpop.eup %1389  ;;  %v844_v14 = vmul.f32 %v1388_v6, %v1160_v1  ;;  %1395 = vrcp.f32 %v796_v39  ;;  %v591_v12 = vmin.f32 %v1890_v5, 20.0  ;;  %v405_v55 = vpop.f32.mrf.mxu2 }
  0xf6   :  { %v1392_v0 = vpop.eup %1391  ;;  %1397 = vrcp.f32 %v781_v7  ;;  %v663_v18 = vmul.f32 1.442695, %v606_v9  ;;  %v495_v19 = vadd.f32 %v494_v32, %v405_v55  ;;  %v367_v21 = vpop.f32.mrf.mxu0  ;;  %v859_v17 = vmul.f32 %v1390_v10, %v1175_v11 }
  0xf7   :  { %v1895_v3 = vpop.f32.mrf.mxu1  ;;  %v1394_v50 = vpop.eup %1393  ;;  %v876_v13 = vmul.f32 %v844_v14, %v1834_v20  ;;  %v701_v24 = vadd.f32 1.0, %v1392_v0  ;;  %v633_v22 = vmul.f32 1.442695, %v591_v12  ;;  %v457_v26 = vadd.f32 %v1859_v15, %v367_v21 }
  0xf8   :  { %v686_v4 = vadd.f32 1.0, %v1394_v50  ;;  %1399 = vpow2.f32 %v663_v18  ;;  %v539_v33 = vmul.f32 %v1732_v49, %v495_v19  ;;  %v891_v25 = vmul.f32 %v859_v17, %v1828_v28  ;;  %v499_v1 = vpop.f32.mrf.mxu3 }
  0xf9   :  { %v1245_v34 = vpack.c.bf16 %v876_v13, %v875_v16  ;;  %v733_v48 = vmul.f32 %v701_v24, %v701_v24  ;;  %1401 = vpow2.f32 %v633_v22  ;;  %v524_v32 = vmul.f32 %v1732_v49, %v457_v26 }
  0xfa   :  { %v718_v37 = vmul.f32 %v686_v4, %v686_v4  ;;  %v1902_v38 = vadd.f32 %v1737_v53, %v539_v33 }
  0xfb   :  { %v1396_v20 = vpop.eup %1395  ;;  %1309 = vst [vmem:[%s2031_s4 + $0x18] sm:$0xff] %v1245_v34   ;;  %v797_v15 = vadd.f32 1.0, %v733_v48  ;;  %v1908_v40 = vadd.f32 %v1737_v53, %v524_v32  ;;  %v1177_v18 = vadd.f32 -1.0, %v733_v48 }
  0xfc   :  { %v1398_v41 = vpop.eup %1397  ;;  %v860_v42 = vmul.f32 %v1396_v20, %v1176_v35  ;;  %v782_v44 = vadd.f32 1.0, %v718_v37  ;;  %v607_v27 = vmin.f32 %v1902_v38, 20.0  ;;  %v1162_v14 = vadd.f32 -1.0, %v718_v37 }
  0xfd   :  { %v592_v46 = vmin.f32 %v1908_v40, 20.0  ;;  %v407_v47 = vpop.f32.mrf.mxu2  ;;  %v845_v9 = vmul.f32 %v1398_v41, %v1161_v45 }
  0xfe   :  { %v1400_v23 = vpop.eup %1399  ;;  %v892_v30 = vmul.f32 %v860_v42, %v1850_v56  ;;  %1403 = vrcp.f32 %v782_v44  ;;  %v665_v58 = vmul.f32 1.442695, %v607_v27  ;;  %v497_v8 = vadd.f32 %v496_v51, %v407_v47  ;;  %v370_v60 = vpop.f32.mrf.mxu0 }
  0xff   :  { %v1914_v54 = vpop.f32.mrf.mxu1  ;;  %v1402_v61 = vpop.eup %1401  ;;  %1405 = vrcp.f32 %v797_v15  ;;  %v702_v43 = vadd.f32 1.0, %v1400_v23  ;;  %v635_v52 = vmul.f32 1.442695, %v592_v46  ;;  %v460_v28 = vadd.f32 %v1878_v36, %v370_v60 }
 0x100   :  { %v1285_v62 = vpack.c.bf16 %v892_v30, %v891_v25  ;;  %v687_v39 = vadd.f32 1.0, %v1402_v61  ;;  %1407 = vpow2.f32 %v665_v58  ;;  %v540_v6 = vmul.f32 %v1732_v49, %v497_v8  ;;  %v501_v42 = vpop.f32.mrf.mxu3 }
 0x101   :  { %v734_v7 = vmul.f32 %v702_v43, %v702_v43  ;;  %1409 = vpow2.f32 %v635_v52  ;;  %v525_v56 = vmul.f32 %v1732_v49, %v460_v28  ;;  %v877_v24 = vmul.f32 %v845_v9, %v1853_v59 }
 0x102   :  { %1317 = vst [vmem:[%s2031_s4 + $0x58] sm:$0xff] %v1285_v62   ;;  %v719_v10 = vmul.f32 %v687_v39, %v687_v39  ;;  %v1923_v11 = vadd.f32 %v1737_v53, %v540_v6 }
 0x103   :  { %v798_v36 = vadd.f32 1.0, %v734_v7  ;;  %v1926_v12 = vadd.f32 %v1737_v53, %v525_v56  ;;  %v1178_v27 = vadd.f32 -1.0, %v734_v7 }
 0x104   :  { %v1404_v55 = vpop.eup %1403  ;;  %v783_v51 = vadd.f32 1.0, %v719_v10  ;;  %v608_v0 = vmin.f32 %v1923_v11, 20.0  ;;  %v1163_v60 = vadd.f32 -1.0, %v719_v10 }
 0x105   :  { %v1406_v16 = vpop.eup %1405  ;;  %v846_v19 = vmul.f32 %v1404_v55, %v1162_v14  ;;  %1411 = vrcp.f32 %v798_v36  ;;  %v593_v21 = vmin.f32 %v1926_v12, 20.0  ;;  %v410_v50 = vpop.f32.mrf.mxu2 }
 0x106   :  { %v1408_v13 = vpop.eup %1407  ;;  %1413 = vrcp.f32 %v783_v51  ;;  %v667_v22 = vmul.f32 1.442695, %v608_v0  ;;  %v500_v26 = vadd.f32 %v499_v1, %v410_v50  ;;  %v372_v4 = vpop.f32.mrf.mxu0  ;;  %v861_v37 = vmul.f32 %v1406_v16, %v1177_v18 }
 0x107   :  { %v1931_v17 = vpop.f32.mrf.mxu1  ;;  %v1410_v33 = vpop.eup %1409  ;;  %v878_v34 = vmul.f32 %v846_v19, %v1872_v31  ;;  %v703_v32 = vadd.f32 1.0, %v1408_v13  ;;  %v637_v35 = vmul.f32 1.442695, %v593_v21  ;;  %v462_v48 = vadd.f32 %v1895_v3, %v372_v4 }
 0x108   :  { %v688_v20 = vadd.f32 1.0, %v1410_v33  ;;  %1415 = vpow2.f32 %v667_v22  ;;  %v541_v15 = vmul.f32 %v1732_v49, %v500_v26  ;;  %v893_v8 = vmul.f32 %v861_v37, %v1866_v29  ;;  %v504_v13 = vpop.f32.mrf.mxu3 }
 0x109   :  { %v1250_v41 = vpack.c.bf16 %v878_v34, %v877_v24  ;;  %v735_v59 = vmul.f32 %v703_v32, %v703_v32  ;;  %1417 = vpow2.f32 %v637_v35  ;;  %v526_v44 = vmul.f32 %v1732_v49, %v462_v48 }
 0x10a   :  { %v720_v25 = vmul.f32 %v688_v20, %v688_v20  ;;  %v1938_v45 = vadd.f32 %v1737_v53, %v541_v15 }
 0x10b   :  { %v1412_v31 = vpop.eup %1411  ;;  %1310 = vst [vmem:[%s2031_s4 + $0x20] sm:$0xff] %v1250_v41   ;;  %v799_v3 = vadd.f32 1.0, %v735_v59  ;;  %v1944_v46 = vadd.f32 %v1737_v53, %v526_v44  ;;  %v1179_v16 = vadd.f32 -1.0, %v735_v59 }
 0x10c   :  { %v1414_v47 = vpop.eup %1413  ;;  %v862_v23 = vmul.f32 %v1412_v31, %v1178_v27  ;;  %v784_v30 = vadd.f32 1.0, %v720_v25  ;;  %v609_v58 = vmin.f32 %v1938_v45, 20.0  ;;  %v1164_v21 = vadd.f32 -1.0, %v720_v25 }
 0x10d   :  { %1419 = vrcp.f32 %v799_v3  ;;  %v594_v61 = vmin.f32 %v1944_v46, 20.0  ;;  %v412_v43 = vpop.f32.mrf.mxu2  ;;  %v847_v56 = vmul.f32 %v1414_v47, %v1163_v60 }
 0x10e   :  { %v1416_v52 = vpop.eup %1415  ;;  %v894_v1 = vmul.f32 %v862_v23, %v1887_v63  ;;  %1421 = vrcp.f32 %v784_v30  ;;  %v669_v28 = vmul.f32 1.442695, %v609_v58  ;;  %v502_v62 = vadd.f32 %v501_v42, %v412_v43  ;;  %v375_v6 = vpop.f32.mrf.mxu0 }
 0x10f   :  { %v469_v39 = vpop.f32.mrf.mxu1  ;;  %v1418_v7 = vpop.eup %1417  ;;  %v704_v9 = vadd.f32 1.0, %v1416_v52  ;;  %v639_v14 = vmul.f32 1.442695, %v594_v61  ;;  %v465_v0 = vadd.f32 %v1914_v54, %v375_v6  ;;  %v879_v54 = vmul.f32 %v847_v56, %v1890_v5 }
 0x110   :  { %v470_v36 = vadd.f32 %v469_v39, %v1744_v57  ;;  %v1290_v29 = vpack.c.bf16 %v894_v1, %v893_v8  ;;  %v689_v10 = vadd.f32 1.0, %v1418_v7  ;;  %1423 = vpow2.f32 %v669_v28 }
 0x111   :  { %v542_v55 = vmul.f32 %v1732_v49, %v502_v62  ;;  %v736_v51 = vmul.f32 %v704_v9, %v704_v9  ;;  %1425 = vpow2.f32 %v639_v14  ;;  %v527_v22 = vmul.f32 %v1732_v49, %v465_v0  ;;  %v506_v9 = vpop.f32.mrf.mxu3 }
 0x112   :  { %v529_v63 = vmul.f32 %v1732_v49, %v470_v36  ;;  %1318 = vst [vmem:[%s2031_s4 + $0x60] sm:$0xff] %v1290_v29   ;;  %v721_v18 = vmul.f32 %v689_v10, %v689_v10 }
 0x113   :  { %v1958_v19 = vadd.f32 %v1737_v53, %v542_v55  ;;  %v1420_v57 = vpop.eup %1419  ;;  %v800_v50 = vadd.f32 1.0, %v736_v51  ;;  %v1180_v4 = vadd.f32 -1.0, %v736_v51  ;;  %v1968_v48 = vadd.f32 %v1737_v53, %v527_v22 }
 0x114   :  { %v1961_v24 = vadd.f32 %v1737_v53, %v529_v63  ;;  %v1422_v26 = vpop.eup %1421  ;;  %v785_v33 = vadd.f32 1.0, %v721_v18  ;;  %v863_v15 = vmul.f32 %v1420_v57, %v1179_v16  ;;  %v1165_v56 = vadd.f32 -1.0, %v721_v18 }
 0x115   :  { %v610_v34 = vmin.f32 %v1958_v19, 20.0  ;;  %v848_v32 = vmul.f32 %v1422_v26, %v1164_v21  ;;  %1427 = vrcp.f32 %v800_v50  ;;  %v415_v37 = vpop.f32.mrf.mxu2  ;;  %v595_v31 = vmin.f32 %v1968_v48, 20.0 }
 0x116   :  { %v597_v35 = vmin.f32 %v1961_v24, 20.0  ;;  %v1424_v20 = vpop.eup %1423  ;;  %1429 = vrcp.f32 %v785_v33  ;;  %v505_v59 = vadd.f32 %v504_v13, %v415_v37  ;;  %v377_v3 = vpop.f32.mrf.mxu0  ;;  %v895_v7 = vmul.f32 %v863_v15, %v1902_v38 }
 0x117   :  { %v671_v41 = vmul.f32 1.442695, %v610_v34  ;;  %v471_v42 = vpop.f32.mrf.mxu1  ;;  %v1426_v44 = vpop.eup %1425  ;;  %v880_v5 = vmul.f32 %v848_v32, %v1908_v40  ;;  %v705_v27 = vadd.f32 1.0, %v1424_v20  ;;  %v641_v60 = vmul.f32 1.442695, %v595_v31 }
 0x118   :  { %v645_v25 = vmul.f32 1.442695, %v597_v35  ;;  %v690_v47 = vadd.f32 1.0, %v1426_v44  ;;  %v543_v23 = vmul.f32 %v1732_v49, %v505_v59  ;;  %v472_v30 = vadd.f32 %v471_v42, %v1751_v2 }
 0x119   :  { %1431 = vpow2.f32 %v671_v41  ;;  %v1255_v58 = vpack.c.bf16 %v880_v5, %v879_v54  ;;  %v737_v8 = vmul.f32 %v705_v27, %v705_v27  ;;  %v467_v52 = vadd.f32 %v1931_v17, %v377_v3 }
 0x11a   :  { %1433 = vpow2.f32 %v645_v25  ;;  %v722_v61 = vmul.f32 %v690_v47, %v690_v47  ;;  %v1975_v43 = vadd.f32 %v1737_v53, %v543_v23  ;;  %v530_v40 = vmul.f32 %v1732_v49, %v472_v30 }
 0x11b   :  { %v1428_v1 = vpop.eup %1427  ;;  %1311 = vst [vmem:[%s2031_s4 + $0x28] sm:$0xff] %v1255_v58   ;;  %v801_v28 = vadd.f32 1.0, %v737_v8  ;;  %1435 = vpow2.f32 %v641_v60  ;;  %v528_v17 = vmul.f32 %v1732_v49, %v467_v52  ;;  %v1181_v42 = vadd.f32 -1.0, %v737_v8 }
 0x11c   :  { %v1430_v2 = vpop.eup %1429  ;;  %v864_v62 = vmul.f32 %v1428_v1, %v1180_v4  ;;  %v786_v39 = vadd.f32 1.0, %v722_v61  ;;  %v611_v6 = vmin.f32 %v1975_v43, 20.0  ;;  %v1985_v14 = vadd.f32 %v1737_v53, %v530_v40 }
 0x11d   :  { %v417_v36 = vpop.f32.mrf.mxu2  ;;  %v1991_v38 = vadd.f32 %v1737_v53, %v528_v17  ;;  %v849_v26 = vmul.f32 %v1430_v2, %v1165_v56  ;;  %v1166_v33 = vadd.f32 -1.0, %v722_v61 }
 0x11e   :  { %v896_v10 = vmul.f32 %v864_v62, %v1923_v11  ;;  %1437 = vrcp.f32 %v786_v39  ;;  %v673_v55 = vmul.f32 1.442695, %v611_v6  ;;  %v507_v51 = vadd.f32 %v506_v9, %v417_v36 }
 0x11f   :  { %v1432_v29 = vpop.eup %1431  ;;  %1439 = vrcp.f32 %v801_v28  ;;  %v598_v16 = vmin.f32 %v1985_v14, 20.0  ;;  %v596_v11 = vmin.f32 %v1991_v38, 20.0  ;;  %v881_v59 = vmul.f32 %v849_v26, %v1926_v12 }
 0x120   :  { %v1434_v63 = vpop.eup %1433  ;;  %v706_v0 = vadd.f32 1.0, %v1432_v29  ;;  %v1295_v18 = vpack.c.bf16 %v896_v10, %v895_v7  ;;  %1441 = vpow2.f32 %v673_v55  ;;  %v544_v21 = vmul.f32 %v1732_v49, %v507_v51 }
 0x121   :  { %v693_v57 = vadd.f32 1.0, %v1434_v63  ;;  %v1436_v50 = vpop.eup %1435  ;;  %v647_v22 = vmul.f32 1.442695, %v598_v16  ;;  %v643_v32 = vmul.f32 1.442695, %v596_v11 }
 0x122   :  { %v738_v13 = vmul.f32 %v706_v0, %v706_v0  ;;  %1319 = vst [vmem:[%s2031_s4 + $0x68] sm:$0xff] %v1295_v18   ;;  %v691_v54 = vadd.f32 1.0, %v1436_v50  ;;  %v1999_v4 = vadd.f32 %v1737_v53, %v544_v21 }
 0x123   :  { %1443 = vpow2.f32 %v647_v22  ;;  %v725_v49 = vmul.f32 %v693_v57, %v693_v57 }
 0x124   :  { %v802_v34 = vadd.f32 1.0, %v738_v13  ;;  %v1438_v35 = vpop.eup %1437  ;;  %v612_v15 = vmin.f32 %v1999_v4, 20.0  ;;  %v723_v44 = vmul.f32 %v691_v54, %v691_v54  ;;  %v1182_v23 = vadd.f32 -1.0, %v738_v13 }
 0x125   :  { %v1440_v37 = vpop.eup %1439  ;;  %v850_v20 = vmul.f32 %v1438_v35, %v1166_v33  ;;  %v789_v25 = vadd.f32 1.0, %v725_v49 }
 0x126   :  { %1445 = vrcp.f32 %v802_v34  ;;  %v1442_v41 = vpop.eup %1441  ;;  %v675_v27 = vmul.f32 1.442695, %v612_v15  ;;  %v865_v3 = vmul.f32 %v1440_v37, %v1181_v42  ;;  %v787_v12 = vadd.f32 1.0, %v723_v44 }
 0x127   :  { %v882_v5 = vmul.f32 %v850_v20, %v1944_v46  ;;  %v707_v53 = vadd.f32 1.0, %v1442_v41  ;;  %1447 = vpow2.f32 %v643_v32  ;;  %v1167_v51 = vadd.f32 -1.0, %v723_v44 }
 0x128   :  { %1449 = vpow2.f32 %v675_v27  ;;  %v897_v40 = vmul.f32 %v865_v3, %v1938_v45  ;;  %v1169_v45 = vadd.f32 -1.0, %v725_v49 }
 0x129   :  { %v1444_v31 = vpop.eup %1443  ;;  %v1260_v47 = vpack.c.bf16 %v882_v5, %v881_v59  ;;  %v739_v30 = vmul.f32 %v707_v53, %v707_v53  ;;  %1451 = vrcp.f32 %v789_v25 }
 0x12a   :  { %v694_v58 = vadd.f32 1.0, %v1444_v31  ;;  %1453 = vrcp.f32 %v787_v12 }
 0x12b   :  { %1312 = vst [vmem:[%s2031_s4 + $0x30] sm:$0xff] %v1260_v47   ;;  %v803_v1 = vadd.f32 1.0, %v739_v30  ;;  %v1183_v16 = vadd.f32 -1.0, %v739_v30 }
 0x12c   :  { %v1446_v60 = vpop.eup %1445  ;;  %v726_v46 = vmul.f32 %v694_v58, %v694_v58 }
 0x12d   :  { %v866_v8 = vmul.f32 %v1446_v60, %v1182_v23  ;;  %v1448_v61 = vpop.eup %1447 }
 0x12e   :  { %v790_v28 = vadd.f32 1.0, %v726_v46  ;;  %v692_v2 = vadd.f32 1.0, %v1448_v61  ;;  %v1450_v62 = vpop.eup %1449  ;;  %v1170_v10 = vadd.f32 -1.0, %v726_v46 }
 0x12f   :  { %v898_v52 = vmul.f32 %v866_v8, %v1958_v19  ;;  %v708_v7 = vadd.f32 1.0, %v1450_v62  ;;  %v1452_v56 = vpop.eup %1451 }
 0x130   :  { %1455 = vrcp.f32 %v790_v28  ;;  %v724_v6 = vmul.f32 %v692_v2, %v692_v2  ;;  %v1454_v36 = vpop.eup %1453  ;;  %v853_v29 = vmul.f32 %v1452_v56, %v1169_v45 }
 0x131   :  { %v1300_v39 = vpack.c.bf16 %v898_v52, %v897_v40  ;;  %1457 = vrcp.f32 %v803_v1  ;;  %v740_v17 = vmul.f32 %v708_v7, %v708_v7  ;;  %v851_v57 = vmul.f32 %v1454_v36, %v1167_v51 }
 0x132   :  { %v788_v9 = vadd.f32 1.0, %v724_v6  ;;  %v885_v18 = vmul.f32 %v853_v29, %v1961_v24  ;;  %v1168_v50 = vadd.f32 -1.0, %v724_v6 }
 0x133   :  { %1320 = vst [vmem:[%s2031_s4 + $0x70] sm:$0xff] %v1300_v39   ;;  %v804_v19 = vadd.f32 1.0, %v740_v17  ;;  %v1184_v54 = vadd.f32 -1.0, %v740_v17  ;;  %v883_v34 = vmul.f32 %v851_v57, %v1968_v48 }
 0x134   :  { %1459 = vrcp.f32 %v788_v9 }
 0x135   :  { %1461 = vrcp.f32 %v804_v19 }
 0x136   :  { %v1456_v55 = vpop.eup %1455 }
 0x137   :  { %v854_v63 = vmul.f32 %v1456_v55, %v1170_v10  ;;  %v1458_v0 = vpop.eup %1457 }
 0x138   :  { %v867_v22 = vmul.f32 %v1458_v0, %v1183_v16 }
 0x139   :  { %v886_v21 = vmul.f32 %v854_v63, %v1985_v14 }
 0x13a   :  { %v1460_v13 = vpop.eup %1459  ;;  %v899_v24 = vmul.f32 %v867_v22, %v1975_v43 }
 0x13b   :  { %v1270_v11 = vpack.c.bf16 %v886_v21, %v885_v18  ;;  %v852_v26 = vmul.f32 %v1460_v13, %v1168_v50  ;;  %v1462_v33 = vpop.eup %1461 }
 0x13c   :  { %v868_v35 = vmul.f32 %v1462_v33, %v1184_v54 }
 0x13d   :  { %1314 = vst [vmem:[%s2031_s4 + $0x40] sm:$0xff] %v1270_v11   ;;  %v884_v32 = vmul.f32 %v852_v26, %v1991_v38 }
 0x13e   :  { %v900_v14 = vmul.f32 %v868_v35, %v1999_v4 }
 0x13f   :  { %v1265_v49 = vpack.c.bf16 %v884_v32, %v883_v34 }
 0x140   :  { %v1305_v37 = vpack.c.bf16 %v900_v14, %v899_v24 }
 0x141   :  { %1313 = vst [vmem:[%s2031_s4 + $0x38] sm:$0xff] %v1265_v49  }
 0x142   :  { %1321 = vst [vmem:[%s2031_s4 + $0x78] sm:$0xff] %v1305_v37  }

// kernel: mbsfc_forward.28
= control target key start
LH: loop header
LB: loop body
LE: loop exit
PB: predicated region body
PF: predicated region fallthrough
CT: control target
= control target key end

     0   :  { %vm335_vm0 = vcmask 1041408   ;;  %vm286_vm1 = vcmask 424960   ;;  %s2021_s1 = inlined_call_operand.vmem [shape: bf16[180,128], index: 1, kind: input, shape index: {}]   ;;  %s2022_s0 = inlined_call_operand.vmem [shape: bf16[256,180], index: 0, kind: input, shape index: {}]   ;;  %s2023_s2 = inlined_call_operand.vmem [shape: f32[1,128], index: 2, kind: input, shape index: {}]   ;;  %s2024_s3 = inlined_call_operand.vmem [shape: f32[1,128], index: 3, kind: input, shape index: {}]   ;;  %s2025_s4 = inlined_call_operand.vmem [shape: bf16[256,128], index: 4, kind: output, shape index: {}]  }
   0x1   :  { %v1236_v0 = vld [vmem:[%s2021_s1 + $0x38] sm:$0xff]  ;;  %v1235_v3 = vld [vmem:[%s2021_s1 + $0x30] sm:$0xff]  ;;  %v1234_v7 = vld [vmem:[%s2021_s1 + $0x28] sm:$0xff] }
   0x2   :  { %v72_v1 = vld [vmem:[%s2021_s1 + $0x58] sm:$0x3]  ;;  %339 = vmatpush.bf16.msra.mxu0 %v1236_v0  ;;  %1335 = vmatpush.bf16.msra.mxu2 %v1236_v0  ;;  %v1239_v6 = vld [vmem:[%s2021_s1 + $0x50] sm:$0xff]  ;;  %v1238_v8 = vld [vmem:[%s2021_s1 + $0x48] sm:$0xff] }
   0x3   :  { %v262_v2 = vunpack.c.l.b16 %v72_v1  ;;  %v1233_v9 = vld [vmem:[%s2021_s1 + $0x20] sm:$0xff]  ;;  %v1232_v11 = vld [vmem:[%s2021_s1 + $0x18] sm:$0xff]  ;;  %v981_v13 = vld [vmem:[%s2022_s0 + $0x8] sm:$0xf0] }
   0x4   :  { %v1237_v10 = vld [vmem:[%s2021_s1 + $0x40] sm:$0xff]  ;;  %v1215_v14 = vld [vmem:[%s2022_s0 + $0x94] sm:$0xf]  ;;  %v1053_v15 = vld [vmem:[%s2022_s0 + $0x98] sm:$0xf0] }
   0x5   :  { %v274_v4 = vpack.c.b16 %v262_v2, %v262_v2  ;;  %v1197_v12 = vld [vmem:[%s2022_s0 + $0x4] sm:$0xf]  ;;  %v1231_v17 = vld [vmem:[%s2021_s1 + $0x10] sm:$0xff]  ;;  %v1056_v18 = vor.u32 %v1215_v14, %v1053_v15  ;;  %v1230_v19 = vld [vmem:[%s2021_s1 + $0x8] sm:$0xff] }
   0x6   :  { %340 = vmatpush.bf16.msra.mxu0 %v1235_v3  ;;  %1336 = vmatpush.bf16.msra.mxu2 %v1235_v3  ;;  %v984_v16 = vor.u32 %v1197_v12, %v981_v13  ;;  %v1229_v20 = vld [vmem:[%s2021_s1] sm:$0xff]  ;;  %v1198_v22 = vld [vmem:[%s2022_s0 + $0x4] sm:$0xf0]  ;;  %v1199_v27 = vld [vmem:[%s2022_s0 + $0x14] sm:$0xf] }
   0x7   :  { %v337_v5 = vsel %vm335_vm0, %v274_v4, 0  ;;  %v979_v21 = vld [vmem:[%s2022_s0] sm:$0xf]  ;;  %v1214_v24 = vld [vmem:[%s2022_s0 + $0x84] sm:$0xf0] }
   0x8   :  { %432 = vmatpush.bf16.msra.mxu1 %v337_v5  ;;  %1343 = vmatpush.bf16.msra.mxu3 %v337_v5  ;;  %v1043_v23 = vld [vmem:[%s2022_s0 + $0x80] sm:$0xf]  ;;  %v980_v25 = vor.u32 %v1198_v22, %v979_v21  ;;  %v989_v28 = vld [vmem:[%s2022_s0 + $0x18] sm:$0xf0]  ;;  %v1217_v29 = vld [vmem:[%s2022_s0 + $0xa4] sm:$0xf] }
   0x9   :  { %v1044_v26 = vor.u32 %v1214_v24, %v1043_v23  ;;  %v1061_v30 = vld [vmem:[%s2022_s0 + $0xa8] sm:$0xf0]  ;;  %v992_v31 = vor.u32 %v1199_v27, %v989_v28  ;;  %v987_v33 = vld [vmem:[%s2022_s0 + $0x10] sm:$0xf]  ;;  %v1200_v34 = vld [vmem:[%s2022_s0 + $0x14] sm:$0xf0] }
   0xa   :  { %341 = vmatpush.bf16.msra.mxu0 %v1234_v7  ;;  %1337 = vmatpush.bf16.msra.mxu2 %v1234_v7  ;;  %v1064_v32 = vor.u32 %v1217_v29, %v1061_v30  ;;  %v1051_v35 = vld [vmem:[%s2022_s0 + $0x90] sm:$0xf]  ;;  %v1216_v36 = vld [vmem:[%s2022_s0 + $0x94] sm:$0xf0]  ;;  %v988_v37 = vor.u32 %v1200_v34, %v987_v33  ;;  %v1201_v39 = vld [vmem:[%s2022_s0 + $0x24] sm:$0xf] }
   0xb   :  { %v1052_v38 = vor.u32 %v1216_v36, %v1051_v35  ;;  %v997_v40 = vld [vmem:[%s2022_s0 + $0x28] sm:$0xf0]  ;;  %v1219_v41 = vld [vmem:[%s2022_s0 + $0xb4] sm:$0xf]  ;;  %v1069_v42 = vld [vmem:[%s2022_s0 + $0xb8] sm:$0xf0] }
   0xc   :  { %433 = vmatpush.bf16.msra.mxu1 %v1239_v6  ;;  %1344 = vmatpush.bf16.msra.mxu3 %v1239_v6  ;;  %v1000_v43 = vor.u32 %v1201_v39, %v997_v40  ;;  %v1072_v44 = vor.u32 %v1219_v41, %v1069_v42  ;;  %v995_v45 = vld [vmem:[%s2022_s0 + $0x20] sm:$0xf]  ;;  %v1202_v46 = vld [vmem:[%s2022_s0 + $0x24] sm:$0xf0]  ;;  %v1203_v51 = vld [vmem:[%s2022_s0 + $0x34] sm:$0xf] }
   0xd   :  { %v1059_v47 = vld [vmem:[%s2022_s0 + $0xa0] sm:$0xf]  ;;  %v1218_v48 = vld [vmem:[%s2022_s0 + $0xa4] sm:$0xf0]  ;;  %v996_v49 = vor.u32 %v1202_v46, %v995_v45  ;;  %v1005_v52 = vld [vmem:[%s2022_s0 + $0x38] sm:$0xf0] }
   0xe   :  { %342 = vmatpush.bf16.msra.mxu0 %v1233_v9  ;;  %1338 = vmatpush.bf16.msra.mxu2 %v1233_v9  ;;  %v1060_v50 = vor.u32 %v1218_v48, %v1059_v47  ;;  %v1221_v53 = vld [vmem:[%s2022_s0 + $0xc4] sm:$0xf]  ;;  %v1077_v54 = vld [vmem:[%s2022_s0 + $0xc8] sm:$0xf0]  ;;  %v1008_v55 = vor.u32 %v1203_v51, %v1005_v52  ;;  %v1003_v57 = vld [vmem:[%s2022_s0 + $0x30] sm:$0xf] }
   0xf   :  { %v1080_v56 = vor.u32 %v1221_v53, %v1077_v54  ;;  %v1204_v58 = vld [vmem:[%s2022_s0 + $0x34] sm:$0xf0]  ;;  %v1067_v59 = vld [vmem:[%s2022_s0 + $0xb0] sm:$0xf]  ;;  %v1205_v63 = vld [vmem:[%s2022_s0 + $0x44] sm:$0xf] }
  0x10   :  { %434 = vmatpush.bf16.msra.mxu1 %v1238_v8  ;;  %1345 = vmatpush.bf16.msra.mxu3 %v1238_v8  ;;  %v1220_v60 = vld [vmem:[%s2022_s0 + $0xb4] sm:$0xf0]  ;;  %v1004_v61 = vor.u32 %v1204_v58, %v1003_v57  ;;  %v1013_v0 = vld [vmem:[%s2022_s0 + $0x48] sm:$0xf0]  ;;  %v1223_v1 = vld [vmem:[%s2022_s0 + $0xd4] sm:$0xf] }
  0x11   :  { %v1068_v62 = vor.u32 %v1220_v60, %v1067_v59  ;;  %v1085_v2 = vld [vmem:[%s2022_s0 + $0xd8] sm:$0xf0]  ;;  %v1016_v3 = vor.u32 %v1205_v63, %v1013_v0  ;;  %v1011_v5 = vld [vmem:[%s2022_s0 + $0x40] sm:$0xf]  ;;  %v1206_v6 = vld [vmem:[%s2022_s0 + $0x44] sm:$0xf0] }
  0x12   :  { %343 = vmatpush.bf16.msra.mxu0 %v1232_v11  ;;  %1339 = vmatpush.bf16.msra.mxu2 %v1232_v11  ;;  %v1088_v4 = vor.u32 %v1223_v1, %v1085_v2  ;;  %v1075_v7 = vld [vmem:[%s2022_s0 + $0xc0] sm:$0xf]  ;;  %v1222_v8 = vld [vmem:[%s2022_s0 + $0xc4] sm:$0xf0]  ;;  %v1012_v9 = vor.u32 %v1206_v6, %v1011_v5  ;;  %v1207_v11 = vld [vmem:[%s2022_s0 + $0x54] sm:$0xf] }
  0x13   :  { %v1021_v12 = vld [vmem:[%s2022_s0 + $0x58] sm:$0xf0]  ;;  %v1225_v13 = vld [vmem:[%s2022_s0 + $0xe4] sm:$0xf]  ;;  %v1093_v14 = vld [vmem:[%s2022_s0 + $0xe8] sm:$0xf0] }
  0x14   :  { %435 = vmatpush.bf16.msra.mxu1 %v1237_v10  ;;  %1346 = vmatpush.bf16.msra.mxu3 %v1237_v10  ;;  %v1076_v10 = vor.u32 %v1222_v8, %v1075_v7  ;;  %v1024_v15 = vor.u32 %v1207_v11, %v1021_v12  ;;  %v1209_v23 = vld [vmem:[%s2022_s0 + $0x64] sm:$0xf]  ;;  %v1029_v24 = vld [vmem:[%s2022_s0 + $0x68] sm:$0xf0]  ;;  %v1027_v29 = vld [vmem:[%s2022_s0 + $0x60] sm:$0xf] }
  0x15   :  { %v1032_v27 = vor.u32 %v1209_v23, %v1029_v24  ;;  %v1210_v30 = vld [vmem:[%s2022_s0 + $0x64] sm:$0xf0]  ;;  %v1211_v35 = vld [vmem:[%s2022_s0 + $0x74] sm:$0xf]  ;;  %v1037_v36 = vld [vmem:[%s2022_s0 + $0x78] sm:$0xf0] }
  0x16   :  { %344 = vmatpush.bf16.msra.mxu0 %v1231_v17  ;;  %1340 = vmatpush.bf16.msra.mxu2 %v1231_v17  ;;  %v1019_v17 = vld [vmem:[%s2022_s0 + $0x50] sm:$0xf]  ;;  %v1028_v33 = vor.u32 %v1210_v30, %v1027_v29  ;;  %v1212_v39 = vld [vmem:[%s2022_s0 + $0x74] sm:$0xf0]  ;;  %v1045_v45 = vld [vmem:[%s2022_s0 + $0x88] sm:$0xf0] }
  0x17   :  { %1149 = vmatmul.msk.bf16.vlgmr.msra.gmra.mxu1 %vm286_vm1, %v984_v16  ;;  %1158 = vmatmul.msk.bf16.vlgmr.msra.gmra.mxu3 %vm286_vm1, %v1056_v18  ;;  %v1096_v16 = vor.u32 %v1225_v13, %v1093_v14  ;;  %v1208_v18 = vld [vmem:[%s2022_s0 + $0x54] sm:$0xf0]  ;;  %v1099_v40 = vld [vmem:[%s2022_s0 + $0xf0] sm:$0xf]  ;;  %v1754_v53 = vld [vmem:[%s2024_s3] ss:$0 sm:$0xff] }
  0x18   :  { %v1020_v21 = vor.u32 %v1208_v18, %v1019_v17  ;;  %v1228_v41 = vld [vmem:[%s2022_s0 + $0xf4] sm:$0xf0] }
  0x1a   :  { %345 = vmatpush.bf16.msra.mxu0 %v1230_v19  ;;  %1341 = vmatpush.bf16.msra.mxu2 %v1230_v19  ;;  %v1083_v19 = vld [vmem:[%s2022_s0 + $0xd0] sm:$0xf] }
  0x1e   :  { %346 = vmatpush.bf16.msra.mxu0 %v1229_v20  ;;  %1342 = vmatpush.bf16.msra.mxu2 %v1229_v20  ;;  %v1224_v20 = vld [vmem:[%s2022_s0 + $0xd4] sm:$0xf0] }
  0x1f   :  { %v1084_v22 = vor.u32 %v1224_v20, %v1083_v19 }
  0x21   :  { %347 = vmatmul.bf16.vlgmr.msra.gmra.mxu0 %v980_v25  ;;  %387 = vmatmul.bf16.vlgmr.msra.gmra.mxu2 %v1044_v26  ;;  %v1227_v25 = vld [vmem:[%s2022_s0 + $0xf4] sm:$0xf]  ;;  %v1101_v26 = vld [vmem:[%s2022_s0 + $0xf8] sm:$0xf0] }
  0x22   :  { %v1104_v28 = vor.u32 %v1227_v25, %v1101_v26 }
  0x27   :  { %1150 = vmatmul.msk.bf16.gmra.mxu1 %vm286_vm1, %v992_v31  ;;  %1159 = vmatmul.msk.bf16.gmra.mxu3 %vm286_vm1, %v1064_v32  ;;  %v1091_v31 = vld [vmem:[%s2022_s0 + $0xe0] sm:$0xf]  ;;  %v1226_v32 = vld [vmem:[%s2022_s0 + $0xe4] sm:$0xf0] }
  0x28   :  { %v1092_v34 = vor.u32 %v1226_v32, %v1091_v31 }
  0x31   :  { %352 = vmatmul.bf16.gmra.mxu0 %v988_v37  ;;  %392 = vmatmul.bf16.gmra.mxu2 %v1052_v38  ;;  %v1040_v37 = vor.u32 %v1211_v35, %v1037_v36  ;;  %v1035_v38 = vld [vmem:[%s2022_s0 + $0x70] sm:$0xf] }
  0x32   :  { %v1036_v42 = vor.u32 %v1212_v39, %v1035_v38 }
  0x37   :  { %1151 = vmatmul.msk.bf16.gmra.mxu1 %vm286_vm1, %v1000_v43  ;;  %1160 = vmatmul.msk.bf16.gmra.mxu3 %vm286_vm1, %v1072_v44  ;;  %v1100_v43 = vor.u32 %v1228_v41, %v1099_v40  ;;  %v1213_v44 = vld [vmem:[%s2022_s0 + $0x84] sm:$0xf] }
  0x38   :  { %v1048_v46 = vor.u32 %v1213_v44, %v1045_v45 }
  0x41   :  { %357 = vmatmul.bf16.gmra.mxu0 %v996_v49  ;;  %397 = vmatmul.bf16.gmra.mxu2 %v1060_v50  ;;  %v1749_v50 = vld [vmem:[%s2023_s2] ss:$0 sm:$0xff] }
  0x47   :  { %1152 = vmatmul.msk.bf16.gmra.mxu1 %vm286_vm1, %v1008_v55  ;;  %1161 = vmatmul.msk.bf16.gmra.mxu3 %vm286_vm1, %v1080_v56 }
  0x51   :  { %362 = vmatmul.bf16.gmra.mxu0 %v1004_v61  ;;  %402 = vmatmul.bf16.gmra.mxu2 %v1068_v62 }
  0x57   :  { %1153 = vmatmul.msk.bf16.gmra.mxu1 %vm286_vm1, %v1016_v3  ;;  %1162 = vmatmul.msk.bf16.gmra.mxu3 %vm286_vm1, %v1088_v4 }
  0x61   :  { %367 = vmatmul.bf16.gmra.mxu0 %v1012_v9  ;;  %407 = vmatmul.bf16.gmra.mxu2 %v1076_v10 }
  0x67   :  { %1154 = vmatmul.msk.bf16.gmra.mxu1 %vm286_vm1, %v1024_v15  ;;  %1163 = vmatmul.msk.bf16.gmra.mxu3 %vm286_vm1, %v1096_v16 }
  0x71   :  { %372 = vmatmul.bf16.gmra.mxu0 %v1020_v21  ;;  %412 = vmatmul.bf16.gmra.mxu2 %v1084_v22 }
  0x77   :  { %1155 = vmatmul.msk.bf16.gmra.mxu1 %vm286_vm1, %v1032_v27  ;;  %1164 = vmatmul.msk.bf16.gmra.mxu3 %vm286_vm1, %v1104_v28 }
  0x81   :  { %377 = vmatmul.bf16.gmra.mxu0 %v1028_v33  ;;  %417 = vmatmul.bf16.gmra.mxu2 %v1092_v34 }
  0x87   :  { %1156 = vmatmul.msk.bf16.gmra.mxu1 %vm286_vm1, %v1040_v37 }
  0x91   :  { %382 = vmatmul.bf16.gmra.mxu0 %v1036_v42  ;;  %422 = vmatmul.bf16.gmra.mxu2 %v1100_v43 }
  0x94   :  { %v437_v47 = vpop.f32.mrf.mxu1 }
  0x97   :  { %1157 = vmatmul.msk.bf16.gmra.mxu1 %vm286_vm1, %v1048_v46 }
  0x9a   :  { %v482_v49 = vpop.f32.mrf.mxu3 }
  0x9c   :  { %v439_v48 = vpop.f32.mrf.mxu1 }
  0x9e   :  { %v348_v51 = vpop.f32.mrf.mxu0 }
  0x9f   :  { %v438_v52 = vadd.f32 %v437_v47, %v348_v51 }
  0xa1   :  { %v521_v54 = vmul.f32 %v1749_v50, %v438_v52 }
  0xa2   :  { %v484_v59 = vpop.f32.mrf.mxu3 }
  0xa3   :  { %v1758_v56 = vadd.f32 %v1754_v53, %v521_v54 }
  0xa4   :  { %v442_v55 = vpop.f32.mrf.mxu1  ;;  %v1761_v58 = vpop.f32.mrf.mxu2 }
  0xa5   :  { %v589_v57 = vmin.f32 %v1758_v56, 20.0 }
  0xa6   :  { %v350_v60 = vpop.f32.mrf.mxu0 }
  0xa7   :  { %v621_v61 = vmul.f32 1.442695, %v589_v57  ;;  %v440_v62 = vadd.f32 %v439_v48, %v350_v60 }
  0xa9   :  { %1349 = vpow2.f32 %v621_v61  ;;  %v522_v63 = vmul.f32 %v1749_v50, %v440_v62 }
  0xaa   :  { %v487_v8 = vpop.f32.mrf.mxu3 }
  0xab   :  { %v1765_v1 = vadd.f32 %v1754_v53, %v522_v63 }
  0xac   :  { %v444_v0 = vpop.f32.mrf.mxu1  ;;  %v1768_v3 = vpop.f32.mrf.mxu2 }
  0xad   :  { %v590_v2 = vmin.f32 %v1765_v1, 20.0 }
  0xae   :  { %v353_v4 = vpop.f32.mrf.mxu0 }
  0xaf   :  { %v1350_v5 = vpop.eup %1349  ;;  %v623_v6 = vmul.f32 1.442695, %v590_v2  ;;  %v443_v7 = vadd.f32 %v442_v55, %v353_v4 }
  0xb0   :  { %v685_v9 = vadd.f32 1.0, %v1350_v5 }
  0xb1   :  { %1351 = vpow2.f32 %v623_v6  ;;  %v523_v10 = vmul.f32 %v1749_v50, %v443_v7 }
  0xb2   :  { %v717_v11 = vmul.f32 %v685_v9, %v685_v9  ;;  %v1777_v25 = vpop.f32.mrf.mxu3 }
  0xb3   :  { %v1772_v13 = vadd.f32 %v1754_v53, %v523_v10 }
  0xb4   :  { %v447_v12 = vpop.f32.mrf.mxu1  ;;  %v781_v14 = vadd.f32 1.0, %v717_v11  ;;  %v393_v16 = vpop.f32.mrf.mxu2  ;;  %v1165_v41 = vadd.f32 -1.0, %v717_v11 }
  0xb5   :  { %v591_v15 = vmin.f32 %v1772_v13, 20.0  ;;  %v483_v17 = vadd.f32 %v482_v49, %v393_v16 }
  0xb6   :  { %v355_v18 = vpop.f32.mrf.mxu0  ;;  %1353 = vrcp.f32 %v781_v14 }
  0xb7   :  { %v1352_v19 = vpop.eup %1351  ;;  %v625_v20 = vmul.f32 1.442695, %v591_v15  ;;  %v445_v21 = vadd.f32 %v444_v0, %v355_v18  ;;  %v539_v23 = vmul.f32 %v1749_v50, %v483_v17 }
  0xb8   :  { %v686_v22 = vadd.f32 1.0, %v1352_v19 }
  0xb9   :  { %1355 = vpow2.f32 %v625_v20  ;;  %v524_v24 = vmul.f32 %v1749_v50, %v445_v21  ;;  %v1780_v27 = vadd.f32 %v1754_v53, %v539_v23 }
  0xba   :  { %v718_v26 = vmul.f32 %v686_v22, %v686_v22  ;;  %v1795_v52 = vpop.f32.mrf.mxu3 }
  0xbb   :  { %v1783_v29 = vadd.f32 %v1754_v53, %v524_v24  ;;  %v607_v31 = vmin.f32 %v1780_v27, 20.0 }
  0xbc   :  { %v449_v28 = vpop.f32.mrf.mxu1  ;;  %v782_v30 = vadd.f32 1.0, %v718_v26  ;;  %v395_v33 = vpop.f32.mrf.mxu2  ;;  %v1166_v49 = vadd.f32 -1.0, %v718_v26 }
  0xbd   :  { %v592_v32 = vmin.f32 %v1783_v29, 20.0  ;;  %v1354_v34 = vpop.eup %1353  ;;  %v657_v35 = vmul.f32 1.442695, %v607_v31  ;;  %v485_v36 = vadd.f32 %v484_v59, %v395_v33 }
  0xbe   :  { %1357 = vrcp.f32 %v782_v30  ;;  %v358_v37 = vpop.f32.mrf.mxu0  ;;  %v845_v45 = vmul.f32 %v1354_v34, %v1165_v41 }
  0xbf   :  { %v1356_v38 = vpop.eup %1355  ;;  %v627_v39 = vmul.f32 1.442695, %v592_v32  ;;  %v448_v40 = vadd.f32 %v447_v12, %v358_v37  ;;  %1359 = vpow2.f32 %v657_v35  ;;  %v540_v43 = vmul.f32 %v1749_v50, %v485_v36 }
  0xc0   :  { %v687_v42 = vadd.f32 1.0, %v1356_v38  ;;  %v877_v63 = vmul.f32 %v845_v45, %v1758_v56 }
  0xc1   :  { %1361 = vpow2.f32 %v627_v39  ;;  %v525_v44 = vmul.f32 %v1749_v50, %v448_v40  ;;  %v1790_v47 = vadd.f32 %v1754_v53, %v540_v43 }
  0xc2   :  { %v719_v46 = vmul.f32 %v687_v42, %v687_v42  ;;  %v1814_v24 = vpop.f32.mrf.mxu3 }
  0xc3   :  { %v1793_v51 = vadd.f32 %v1754_v53, %v525_v44  ;;  %v608_v57 = vmin.f32 %v1790_v47, 20.0 }
  0xc4   :  { %v452_v48 = vpop.f32.mrf.mxu1  ;;  %v1358_v54 = vpop.eup %1357  ;;  %v783_v55 = vadd.f32 1.0, %v719_v46  ;;  %v1167_v36 = vadd.f32 -1.0, %v719_v46 }
  0xc5   :  { %v846_v59 = vmul.f32 %v1358_v54, %v1166_v49  ;;  %v593_v60 = vmin.f32 %v1793_v51, 20.0  ;;  %v398_v61 = vpop.f32.mrf.mxu2  ;;  %v1360_v62 = vpop.eup %1359  ;;  %v659_v0 = vmul.f32 1.442695, %v608_v57 }
  0xc6   :  { %1363 = vrcp.f32 %v783_v55  ;;  %v488_v2 = vadd.f32 %v487_v8, %v398_v61  ;;  %v360_v4 = vpop.f32.mrf.mxu0  ;;  %v703_v7 = vadd.f32 1.0, %v1360_v62 }
  0xc7   :  { %v1362_v5 = vpop.eup %1361  ;;  %v878_v6 = vmul.f32 %v846_v59, %v1765_v1  ;;  %v629_v9 = vmul.f32 1.442695, %v593_v60  ;;  %v450_v10 = vadd.f32 %v449_v28, %v360_v4  ;;  %1365 = vpow2.f32 %v659_v0 }
  0xc8   :  { %v688_v11 = vadd.f32 1.0, %v1362_v5  ;;  %v541_v12 = vmul.f32 %v1749_v50, %v488_v2  ;;  %v735_v15 = vmul.f32 %v703_v7, %v703_v7 }
  0xc9   :  { %v1243_v14 = vpack.c.bf16 %v878_v6, %v877_v63  ;;  %1367 = vpow2.f32 %v629_v9  ;;  %v526_v16 = vmul.f32 %v1749_v50, %v450_v10 }
  0xca   :  { %v720_v56 = vmul.f32 %v688_v11, %v688_v11  ;;  %v1804_v17 = vadd.f32 %v1754_v53, %v541_v12  ;;  %v799_v1 = vadd.f32 1.0, %v735_v15  ;;  %v1183_v57 = vadd.f32 -1.0, %v735_v15  ;;  %v1830_v11 = vpop.f32.mrf.mxu3 }
  0xcb   :  { %1244 = vst [vmem:[%s2025_s4] sm:$0xff] %v1243_v14   ;;  %v1810_v18 = vadd.f32 %v1754_v53, %v526_v16 }
  0xcc   :  { %v454_v8 = vpop.f32.mrf.mxu1  ;;  %v1364_v19 = vpop.eup %1363  ;;  %v784_v20 = vadd.f32 1.0, %v720_v56  ;;  %v609_v21 = vmin.f32 %v1804_v17, 20.0  ;;  %v1168_v44 = vadd.f32 -1.0, %v720_v56 }
  0xcd   :  { %v594_v22 = vmin.f32 %v1810_v18, 20.0  ;;  %v400_v23 = vpop.f32.mrf.mxu2  ;;  %v1366_v26 = vpop.eup %1365  ;;  %v847_v41 = vmul.f32 %v1364_v19, %v1167_v36 }
  0xce   :  { %1369 = vrcp.f32 %v784_v20  ;;  %v661_v28 = vmul.f32 1.442695, %v609_v21  ;;  %v490_v30 = vadd.f32 %v1777_v25, %v400_v23  ;;  %v363_v31 = vpop.f32.mrf.mxu0  ;;  %v704_v33 = vadd.f32 1.0, %v1366_v26 }
  0xcf   :  { %v1368_v32 = vpop.eup %1367  ;;  %1371 = vrcp.f32 %v799_v1  ;;  %v631_v34 = vmul.f32 1.442695, %v594_v22  ;;  %v453_v35 = vadd.f32 %v452_v48, %v363_v31  ;;  %v879_v63 = vmul.f32 %v847_v41, %v1772_v13 }
  0xd0   :  { %v689_v37 = vadd.f32 1.0, %v1368_v32  ;;  %1373 = vpow2.f32 %v661_v28  ;;  %v542_v38 = vmul.f32 %v1749_v50, %v490_v30  ;;  %v736_v39 = vmul.f32 %v704_v33, %v704_v33 }
  0xd1   :  { %1375 = vpow2.f32 %v631_v34  ;;  %v527_v40 = vmul.f32 %v1749_v50, %v453_v35 }
  0xd2   :  { %v721_v42 = vmul.f32 %v689_v37, %v689_v37  ;;  %v1820_v43 = vadd.f32 %v1754_v53, %v542_v38  ;;  %v800_v45 = vadd.f32 1.0, %v736_v39 }
  0xd3   :  { %v1823_v49 = vadd.f32 %v1754_v53, %v527_v40 }
  0xd4   :  { %v457_v25 = vpop.f32.mrf.mxu1  ;;  %v1370_v46 = vpop.eup %1369  ;;  %v785_v48 = vadd.f32 1.0, %v721_v42  ;;  %v610_v54 = vmin.f32 %v1820_v43, 20.0  ;;  %1377 = vrcp.f32 %v800_v45  ;;  %v1169_v31 = vadd.f32 -1.0, %v721_v42 }
  0xd5   :  { %v1372_v55 = vpop.eup %1371  ;;  %v848_v59 = vmul.f32 %v1370_v46, %v1168_v44  ;;  %v595_v60 = vmin.f32 %v1823_v49, 20.0  ;;  %v403_v61 = vpop.f32.mrf.mxu2 }
  0xd6   :  { %v1374_v62 = vpop.eup %1373  ;;  %1379 = vrcp.f32 %v785_v48  ;;  %v663_v0 = vmul.f32 1.442695, %v610_v54  ;;  %v493_v2 = vadd.f32 %v1795_v52, %v403_v61  ;;  %v365_v4 = vpop.f32.mrf.mxu0  ;;  %v863_v12 = vmul.f32 %v1372_v55, %v1183_v57 }
  0xd7   :  { %v1376_v5 = vpop.eup %1375  ;;  %v880_v6 = vmul.f32 %v848_v59, %v1783_v29  ;;  %v705_v7 = vadd.f32 1.0, %v1374_v62  ;;  %v633_v9 = vmul.f32 1.442695, %v595_v60  ;;  %v455_v10 = vadd.f32 %v454_v8, %v365_v4 }
  0xd8   :  { %v690_v14 = vadd.f32 1.0, %v1376_v5  ;;  %1381 = vpow2.f32 %v663_v0  ;;  %v543_v15 = vmul.f32 %v1749_v50, %v493_v2  ;;  %v1184_v52 = vadd.f32 -1.0, %v736_v39 }
  0xd9   :  { %v1248_v16 = vpack.c.bf16 %v880_v6, %v879_v63  ;;  %v737_v13 = vmul.f32 %v705_v7, %v705_v7  ;;  %1383 = vpow2.f32 %v633_v9  ;;  %v528_v56 = vmul.f32 %v1749_v50, %v455_v10 }
  0xda   :  { %v722_v1 = vmul.f32 %v690_v14, %v690_v14  ;;  %v1835_v19 = vadd.f32 %v1754_v53, %v543_v15  ;;  %v1378_v20 = vpop.eup %1377  ;;  %v895_v30 = vmul.f32 %v863_v12, %v1780_v27 }
  0xdb   :  { %1320 = vst [vmem:[%s2025_s4 + $0x8] sm:$0xff] %v1248_v16   ;;  %v801_v8 = vadd.f32 1.0, %v737_v13  ;;  %v1841_v21 = vadd.f32 %v1754_v53, %v528_v56  ;;  %v864_v23 = vmul.f32 %v1378_v20, %v1184_v52  ;;  %v1185_v2 = vadd.f32 -1.0, %v737_v13 }
  0xdc   :  { %v459_v29 = vpop.f32.mrf.mxu1  ;;  %v1380_v22 = vpop.eup %1379  ;;  %v786_v26 = vadd.f32 1.0, %v722_v1  ;;  %v611_v28 = vmin.f32 %v1835_v19, 20.0  ;;  %v1170_v57 = vadd.f32 -1.0, %v722_v1 }
  0xdd   :  { %v596_v32 = vmin.f32 %v1841_v21, 20.0  ;;  %v405_v33 = vpop.f32.mrf.mxu2  ;;  %v896_v35 = vmul.f32 %v864_v23, %v1790_v47  ;;  %v499_v47 = vpop.f32.mrf.mxu3 }
  0xde   :  { %v1382_v34 = vpop.eup %1381  ;;  %1385 = vrcp.f32 %v786_v26  ;;  %v665_v36 = vmul.f32 1.442695, %v611_v28  ;;  %v495_v37 = vadd.f32 %v1814_v24, %v405_v33  ;;  %v368_v38 = vpop.f32.mrf.mxu0  ;;  %v849_v24 = vmul.f32 %v1380_v22, %v1169_v31 }
  0xdf   :  { %v1384_v39 = vpop.eup %1383  ;;  %1387 = vrcp.f32 %v801_v8  ;;  %v706_v40 = vadd.f32 1.0, %v1382_v34  ;;  %v635_v41 = vmul.f32 1.442695, %v596_v32  ;;  %v458_v44 = vadd.f32 %v457_v25, %v368_v38 }
  0xe0   :  { %v1288_v45 = vpack.c.bf16 %v896_v35, %v895_v30  ;;  %v691_v46 = vadd.f32 1.0, %v1384_v39  ;;  %1389 = vpow2.f32 %v665_v36  ;;  %v544_v27 = vmul.f32 %v1749_v50, %v495_v37 }
  0xe1   :  { %v738_v42 = vmul.f32 %v706_v40, %v706_v40  ;;  %1391 = vpow2.f32 %v635_v41  ;;  %v529_v48 = vmul.f32 %v1749_v50, %v458_v44  ;;  %v881_v9 = vmul.f32 %v849_v24, %v1793_v51 }
  0xe2   :  { %1328 = vst [vmem:[%s2025_s4 + $0x48] sm:$0xff] %v1288_v45   ;;  %v723_v54 = vmul.f32 %v691_v46, %v691_v46  ;;  %v1854_v55 = vadd.f32 %v1754_v53, %v544_v27 }
  0xe3   :  { %v802_v59 = vadd.f32 1.0, %v738_v42  ;;  %v1857_v60 = vadd.f32 %v1754_v53, %v529_v48  ;;  %v1186_v26 = vadd.f32 -1.0, %v738_v42 }
  0xe4   :  { %v462_v25 = vpop.f32.mrf.mxu1  ;;  %v1386_v61 = vpop.eup %1385  ;;  %v787_v62 = vadd.f32 1.0, %v723_v54  ;;  %v612_v63 = vmin.f32 %v1854_v55, 20.0  ;;  %v1171_v38 = vadd.f32 -1.0, %v723_v54 }
  0xe5   :  { %v1388_v0 = vpop.eup %1387  ;;  %v850_v4 = vmul.f32 %v1386_v61, %v1170_v57  ;;  %1393 = vrcp.f32 %v802_v59  ;;  %v597_v5 = vmin.f32 %v1857_v60, 20.0  ;;  %v408_v6 = vpop.f32.mrf.mxu2 }
  0xe6   :  { %v1390_v7 = vpop.eup %1389  ;;  %1395 = vrcp.f32 %v787_v62  ;;  %v667_v10 = vmul.f32 1.442695, %v612_v63  ;;  %v498_v12 = vadd.f32 %v1830_v11, %v408_v6  ;;  %v370_v14 = vpop.f32.mrf.mxu0  ;;  %v865_v13 = vmul.f32 %v1388_v0, %v1185_v2 }
  0xe7   :  { %v1392_v15 = vpop.eup %1391  ;;  %v882_v16 = vmul.f32 %v850_v4, %v1810_v18  ;;  %v707_v56 = vadd.f32 1.0, %v1390_v7  ;;  %v637_v52 = vmul.f32 1.442695, %v597_v5  ;;  %v460_v1 = vadd.f32 %v459_v29, %v370_v14  ;;  %v502_v32 = vpop.f32.mrf.mxu3 }
  0xe8   :  { %v692_v20 = vadd.f32 1.0, %v1392_v15  ;;  %1397 = vpow2.f32 %v667_v10  ;;  %v545_v8 = vmul.f32 %v1749_v50, %v498_v12  ;;  %v897_v37 = vmul.f32 %v865_v13, %v1804_v17 }
  0xe9   :  { %v1253_v22 = vpack.c.bf16 %v882_v16, %v881_v9  ;;  %v739_v23 = vmul.f32 %v707_v56, %v707_v56  ;;  %1399 = vpow2.f32 %v637_v52  ;;  %v530_v51 = vmul.f32 %v1749_v50, %v460_v1 }
  0xea   :  { %v724_v28 = vmul.f32 %v692_v20, %v692_v20  ;;  %v1867_v11 = vadd.f32 %v1754_v53, %v545_v8 }
  0xeb   :  { %v1394_v18 = vpop.eup %1393  ;;  %1321 = vst [vmem:[%s2025_s4 + $0x10] sm:$0xff] %v1253_v22   ;;  %v803_v29 = vadd.f32 1.0, %v739_v23  ;;  %v1873_v31 = vadd.f32 %v1754_v53, %v530_v51  ;;  %v1187_v10 = vadd.f32 -1.0, %v739_v23 }
  0xec   :  { %v464_v30 = vpop.f32.mrf.mxu1  ;;  %v1396_v33 = vpop.eup %1395  ;;  %v866_v34 = vmul.f32 %v1394_v18, %v1186_v26  ;;  %v788_v35 = vadd.f32 1.0, %v724_v28  ;;  %v613_v36 = vmin.f32 %v1867_v11, 20.0 }
  0xed   :  { %v598_v39 = vmin.f32 %v1873_v31, 20.0  ;;  %v410_v40 = vpop.f32.mrf.mxu2 }
  0xee   :  { %v1398_v41 = vpop.eup %1397  ;;  %v898_v44 = vmul.f32 %v866_v34, %v1820_v43  ;;  %1401 = vrcp.f32 %v788_v35  ;;  %v669_v45 = vmul.f32 1.442695, %v613_v36  ;;  %v500_v46 = vadd.f32 %v499_v47, %v410_v40  ;;  %v373_v27 = vpop.f32.mrf.mxu0 }
  0xef   :  { %v1400_v42 = vpop.eup %1399  ;;  %1403 = vrcp.f32 %v803_v29  ;;  %v708_v48 = vadd.f32 1.0, %v1398_v41  ;;  %v639_v24 = vmul.f32 1.442695, %v598_v39  ;;  %v463_v57 = vadd.f32 %v462_v25, %v373_v27  ;;  %v504_v16 = vpop.f32.mrf.mxu3 }
  0xf0   :  { %v1293_v59 = vpack.c.bf16 %v898_v44, %v897_v37  ;;  %v693_v61 = vadd.f32 1.0, %v1400_v42  ;;  %1405 = vpow2.f32 %v669_v45  ;;  %v546_v17 = vmul.f32 %v1749_v50, %v500_v46 }
  0xf1   :  { %v740_v54 = vmul.f32 %v708_v48, %v708_v48  ;;  %1407 = vpow2.f32 %v639_v24  ;;  %v531_v62 = vmul.f32 %v1749_v50, %v463_v57  ;;  %v851_v43 = vmul.f32 %v1396_v33, %v1171_v38 }
  0xf2   :  { %1329 = vst [vmem:[%s2025_s4 + $0x50] sm:$0xff] %v1293_v59   ;;  %v725_v47 = vmul.f32 %v693_v61, %v693_v61  ;;  %v1885_v63 = vadd.f32 %v1754_v53, %v546_v17  ;;  %v1172_v25 = vadd.f32 -1.0, %v724_v28 }
  0xf3   :  { %v804_v2 = vadd.f32 1.0, %v740_v54  ;;  %v1888_v4 = vadd.f32 %v1754_v53, %v531_v62  ;;  %v883_v52 = vmul.f32 %v851_v43, %v1823_v49  ;;  %v1188_v35 = vadd.f32 -1.0, %v740_v54 }
  0xf4   :  { %v467_v0 = vpop.f32.mrf.mxu1  ;;  %v1402_v5 = vpop.eup %1401  ;;  %v789_v6 = vadd.f32 1.0, %v725_v47  ;;  %v614_v7 = vmin.f32 %v1885_v63, 20.0  ;;  %v1173_v46 = vadd.f32 -1.0, %v725_v47 }
  0xf5   :  { %v1404_v9 = vpop.eup %1403  ;;  %v852_v12 = vmul.f32 %v1402_v5, %v1172_v25  ;;  %1409 = vrcp.f32 %v804_v2  ;;  %v599_v14 = vmin.f32 %v1888_v4, 20.0  ;;  %v413_v15 = vpop.f32.mrf.mxu2 }
  0xf6   :  { %v1406_v56 = vpop.eup %1405  ;;  %1411 = vrcp.f32 %v789_v6  ;;  %v671_v1 = vmul.f32 1.442695, %v614_v7  ;;  %v503_v13 = vadd.f32 %v502_v32, %v413_v15  ;;  %v375_v20 = vpop.f32.mrf.mxu0  ;;  %v867_v23 = vmul.f32 %v1404_v9, %v1187_v10 }
  0xf7   :  { %v1408_v8 = vpop.eup %1407  ;;  %v884_v22 = vmul.f32 %v852_v12, %v1841_v21  ;;  %v709_v51 = vadd.f32 1.0, %v1406_v56  ;;  %v641_v26 = vmul.f32 1.442695, %v599_v14  ;;  %v465_v28 = vadd.f32 %v464_v30, %v375_v20  ;;  %v507_v43 = vpop.f32.mrf.mxu3 }
  0xf8   :  { %v694_v18 = vadd.f32 1.0, %v1408_v8  ;;  %1413 = vpow2.f32 %v671_v1  ;;  %v547_v29 = vmul.f32 %v1749_v50, %v503_v13  ;;  %v899_v45 = vmul.f32 %v867_v23, %v1835_v19 }
  0xf9   :  { %v1258_v33 = vpack.c.bf16 %v884_v22, %v883_v52  ;;  %v741_v34 = vmul.f32 %v709_v51, %v709_v51  ;;  %1415 = vpow2.f32 %v641_v26  ;;  %v532_v49 = vmul.f32 %v1749_v50, %v465_v28 }
  0xfa   :  { %v726_v36 = vmul.f32 %v694_v18, %v694_v18  ;;  %v1897_v32 = vadd.f32 %v1754_v53, %v547_v29 }
  0xfb   :  { %v1410_v21 = vpop.eup %1409  ;;  %1322 = vst [vmem:[%s2025_s4 + $0x18] sm:$0xff] %v1258_v33   ;;  %v805_v30 = vadd.f32 1.0, %v741_v34  ;;  %v1903_v38 = vadd.f32 %v1754_v53, %v532_v49  ;;  %v1189_v1 = vadd.f32 -1.0, %v741_v34 }
  0xfc   :  { %v469_v37 = vpop.f32.mrf.mxu1  ;;  %v1412_v39 = vpop.eup %1411  ;;  %v868_v40 = vmul.f32 %v1410_v21, %v1188_v35  ;;  %v790_v41 = vadd.f32 1.0, %v726_v36  ;;  %v615_v44 = vmin.f32 %v1897_v32, 20.0 }
  0xfd   :  { %v600_v27 = vmin.f32 %v1903_v38, 20.0  ;;  %v415_v42 = vpop.f32.mrf.mxu2 }
  0xfe   :  { %v1414_v48 = vpop.eup %1413  ;;  %v900_v24 = vmul.f32 %v868_v40, %v1854_v55  ;;  %1417 = vrcp.f32 %v790_v41  ;;  %v673_v57 = vmul.f32 1.442695, %v615_v44  ;;  %v505_v59 = vadd.f32 %v504_v16, %v415_v42  ;;  %v378_v61 = vpop.f32.mrf.mxu0 }
  0xff   :  { %v1416_v17 = vpop.eup %1415  ;;  %1419 = vrcp.f32 %v805_v30  ;;  %v710_v54 = vadd.f32 1.0, %v1414_v48  ;;  %v643_v62 = vmul.f32 1.442695, %v600_v27  ;;  %v468_v25 = vadd.f32 %v467_v0, %v378_v61  ;;  %v509_v40 = vpop.f32.mrf.mxu3 }
 0x100   :  { %v1298_v2 = vpack.c.bf16 %v900_v24, %v899_v45  ;;  %v695_v5 = vadd.f32 1.0, %v1416_v17  ;;  %1421 = vpow2.f32 %v673_v57  ;;  %v548_v19 = vmul.f32 %v1749_v50, %v505_v59 }
 0x101   :  { %v742_v47 = vmul.f32 %v710_v54, %v710_v54  ;;  %1423 = vpow2.f32 %v643_v62  ;;  %v533_v6 = vmul.f32 %v1749_v50, %v468_v25  ;;  %v853_v55 = vmul.f32 %v1412_v39, %v1173_v46 }
 0x102   :  { %1330 = vst [vmem:[%s2025_s4 + $0x58] sm:$0xff] %v1298_v2   ;;  %v727_v7 = vmul.f32 %v695_v5, %v695_v5  ;;  %v1915_v9 = vadd.f32 %v1754_v53, %v548_v19  ;;  %v1174_v0 = vadd.f32 -1.0, %v726_v36 }
 0x103   :  { %v806_v12 = vadd.f32 1.0, %v742_v47  ;;  %v1918_v14 = vadd.f32 %v1754_v53, %v533_v6  ;;  %v885_v51 = vmul.f32 %v853_v55, %v1857_v60  ;;  %v1190_v41 = vadd.f32 -1.0, %v742_v47 }
 0x104   :  { %v472_v10 = vpop.f32.mrf.mxu1  ;;  %v1418_v15 = vpop.eup %1417  ;;  %v791_v16 = vadd.f32 1.0, %v727_v7  ;;  %v616_v56 = vmin.f32 %v1915_v9, 20.0  ;;  %v1175_v61 = vadd.f32 -1.0, %v727_v7 }
 0x105   :  { %v1420_v52 = vpop.eup %1419  ;;  %v854_v13 = vmul.f32 %v1418_v15, %v1174_v0  ;;  %1425 = vrcp.f32 %v806_v12  ;;  %v601_v20 = vmin.f32 %v1918_v14, 20.0  ;;  %v418_v8 = vpop.f32.mrf.mxu2 }
 0x106   :  { %v1422_v22 = vpop.eup %1421  ;;  %1427 = vrcp.f32 %v791_v16  ;;  %v675_v26 = vmul.f32 1.442695, %v616_v56  ;;  %v508_v28 = vadd.f32 %v507_v43, %v418_v8  ;;  %v380_v23 = vpop.f32.mrf.mxu0  ;;  %v869_v36 = vmul.f32 %v1420_v52, %v1189_v1 }
 0x107   :  { %v1424_v18 = vpop.eup %1423  ;;  %v886_v29 = vmul.f32 %v854_v13, %v1873_v31  ;;  %v711_v33 = vadd.f32 1.0, %v1422_v22  ;;  %v645_v49 = vmul.f32 1.442695, %v601_v20  ;;  %v470_v35 = vadd.f32 %v469_v37, %v380_v23  ;;  %v512_v20 = vpop.f32.mrf.mxu3 }
 0x108   :  { %v696_v34 = vadd.f32 1.0, %v1424_v18  ;;  %1429 = vpow2.f32 %v675_v26  ;;  %v549_v21 = vmul.f32 %v1749_v50, %v508_v28  ;;  %v901_v59 = vmul.f32 %v869_v36, %v1867_v11 }
 0x109   :  { %v1263_v30 = vpack.c.bf16 %v886_v29, %v885_v51  ;;  %v743_v39 = vmul.f32 %v711_v33, %v711_v33  ;;  %1431 = vpow2.f32 %v645_v49  ;;  %v534_v60 = vmul.f32 %v1749_v50, %v470_v35 }
 0x10a   :  { %v728_v44 = vmul.f32 %v696_v34, %v696_v34  ;;  %v1927_v45 = vadd.f32 %v1754_v53, %v549_v21 }
 0x10b   :  { %v1426_v46 = vpop.eup %1425  ;;  %1323 = vst [vmem:[%s2025_s4 + $0x20] sm:$0xff] %v1263_v30   ;;  %v807_v37 = vadd.f32 1.0, %v743_v39  ;;  %v1935_v27 = vadd.f32 %v1754_v53, %v534_v60  ;;  %v1191_v28 = vadd.f32 -1.0, %v743_v39 }
 0x10c   :  { %v1929_v31 = vpop.f32.mrf.mxu1  ;;  %v1428_v42 = vpop.eup %1427  ;;  %v870_v48 = vmul.f32 %v1426_v46, %v1190_v41  ;;  %v792_v24 = vadd.f32 1.0, %v728_v44  ;;  %v617_v57 = vmin.f32 %v1927_v45, 20.0  ;;  %v1176_v1 = vadd.f32 -1.0, %v728_v44 }
 0x10d   :  { %1433 = vrcp.f32 %v807_v37  ;;  %v602_v17 = vmin.f32 %v1935_v27, 20.0  ;;  %v420_v54 = vpop.f32.mrf.mxu2  ;;  %v855_v47 = vmul.f32 %v1428_v42, %v1175_v61 }
 0x10e   :  { %v1430_v62 = vpop.eup %1429  ;;  %v902_v43 = vmul.f32 %v870_v48, %v1885_v63  ;;  %1435 = vrcp.f32 %v792_v24  ;;  %v677_v25 = vmul.f32 1.442695, %v617_v57  ;;  %v510_v2 = vadd.f32 %v509_v40, %v420_v54  ;;  %v383_v5 = vpop.f32.mrf.mxu0 }
 0x10f   :  { %v1432_v19 = vpop.eup %1431  ;;  %v712_v6 = vadd.f32 1.0, %v1430_v62  ;;  %v647_v55 = vmul.f32 1.442695, %v602_v17  ;;  %v473_v0 = vadd.f32 %v472_v10, %v383_v5  ;;  %v887_v26 = vmul.f32 %v855_v47, %v1888_v4 }
 0x110   :  { %v1303_v12 = vpack.c.bf16 %v902_v43, %v901_v59  ;;  %v697_v15 = vadd.f32 1.0, %v1432_v19  ;;  %1437 = vpow2.f32 %v677_v25  ;;  %v550_v11 = vmul.f32 %v1749_v50, %v510_v2 }
 0x111   :  { %v744_v7 = vmul.f32 %v712_v6, %v712_v6  ;;  %1439 = vpow2.f32 %v647_v55  ;;  %v535_v16 = vmul.f32 %v1749_v50, %v473_v0  ;;  %v514_v6 = vpop.f32.mrf.mxu3 }
 0x112   :  { %1331 = vst [vmem:[%s2025_s4 + $0x60] sm:$0xff] %v1303_v12   ;;  %v1946_v63 = vmul.f32 %v697_v15, %v697_v15  ;;  %v1949_v56 = vadd.f32 %v1754_v53, %v550_v11 }
 0x113   :  { %v1434_v10 = vpop.eup %1433  ;;  %v808_v13 = vadd.f32 1.0, %v744_v7  ;;  %v1952_v8 = vadd.f32 %v1754_v53, %v535_v16  ;;  %v1192_v57 = vadd.f32 -1.0, %v744_v7 }
 0x114   :  { %v477_v52 = vpop.f32.mrf.mxu1  ;;  %v1436_v51 = vpop.eup %1435  ;;  %v793_v23 = vadd.f32 1.0, %v1946_v63  ;;  %v618_v18 = vmin.f32 %v1949_v56, 20.0  ;;  %v871_v34 = vmul.f32 %v1434_v10, %v1191_v28 }
 0x115   :  { %v478_v22 = vadd.f32 %v477_v52, %v1761_v58  ;;  %v856_v29 = vmul.f32 %v1436_v51, %v1176_v1  ;;  %1441 = vrcp.f32 %v808_v13  ;;  %v603_v33 = vmin.f32 %v1952_v8, 20.0  ;;  %v423_v35 = vpop.f32.mrf.mxu2 }
 0x116   :  { %v1438_v36 = vpop.eup %1437  ;;  %1443 = vrcp.f32 %v793_v23  ;;  %v679_v21 = vmul.f32 1.442695, %v618_v18  ;;  %v513_v58 = vadd.f32 %v512_v20, %v423_v35  ;;  %v385_v30 = vpop.f32.mrf.mxu0  ;;  %v903_v47 = vmul.f32 %v871_v34, %v1897_v32 }
 0x117   :  { %v537_v49 = vmul.f32 %v1749_v50, %v478_v22  ;;  %v1440_v40 = vpop.eup %1439  ;;  %v888_v4 = vmul.f32 %v856_v29, %v1903_v38  ;;  %v713_v39 = vadd.f32 1.0, %v1438_v36  ;;  %v649_v60 = vmul.f32 1.442695, %v603_v33 }
 0x118   :  { %v698_v44 = vadd.f32 1.0, %v1440_v40  ;;  %1445 = vpow2.f32 %v679_v21  ;;  %v551_v46 = vmul.f32 %v1749_v50, %v513_v58  ;;  %v475_v37 = vadd.f32 %v1929_v31, %v385_v30 }
 0x119   :  { %v1962_v41 = vadd.f32 %v1754_v53, %v537_v49  ;;  %v1268_v42 = vpack.c.bf16 %v888_v4, %v887_v26  ;;  %v745_v48 = vmul.f32 %v713_v39, %v713_v39  ;;  %1447 = vpow2.f32 %v649_v60 }
 0x11a   :  { %v730_v59 = vmul.f32 %v698_v44, %v698_v44  ;;  %v1968_v38 = vadd.f32 %v1754_v53, %v551_v46  ;;  %v536_v61 = vmul.f32 %v1749_v50, %v475_v37  ;;  %v1177_v52 = vadd.f32 -1.0, %v1946_v63 }
 0x11b   :  { %v605_v24 = vmin.f32 %v1962_v41, 20.0  ;;  %v1442_v54 = vpop.eup %1441  ;;  %1324 = vst [vmem:[%s2025_s4 + $0x28] sm:$0xff] %v1268_v42   ;;  %v809_v62 = vadd.f32 1.0, %v745_v48  ;;  %v1193_v30 = vadd.f32 -1.0, %v745_v48 }
 0x11c   :  { %v479_v17 = vpop.f32.mrf.mxu1  ;;  %v1444_v25 = vpop.eup %1443  ;;  %v872_v2 = vmul.f32 %v1442_v54, %v1192_v57  ;;  %v794_v5 = vadd.f32 1.0, %v730_v59  ;;  %v619_v19 = vmin.f32 %v1968_v38, 20.0  ;;  %v1978_v55 = vadd.f32 %v1754_v53, %v536_v61 }
 0x11d   :  { %v653_v31 = vmul.f32 1.442695, %v605_v24  ;;  %v480_v43 = vadd.f32 %v479_v17, %v1768_v3  ;;  %1449 = vrcp.f32 %v809_v62  ;;  %v425_v12 = vpop.f32.mrf.mxu2  ;;  %v857_v26 = vmul.f32 %v1444_v25, %v1177_v52 }
 0x11e   :  { %v1446_v15 = vpop.eup %1445  ;;  %v904_v11 = vmul.f32 %v872_v2, %v1915_v9  ;;  %1451 = vrcp.f32 %v794_v5  ;;  %v681_v3 = vmul.f32 1.442695, %v619_v19  ;;  %v515_v7 = vadd.f32 %v514_v6, %v425_v12 }
 0x11f   :  { %v538_v0 = vmul.f32 %v1749_v50, %v480_v43  ;;  %v1448_v16 = vpop.eup %1447  ;;  %v714_v10 = vadd.f32 1.0, %v1446_v15  ;;  %1453 = vpow2.f32 %v653_v31  ;;  %v604_v32 = vmin.f32 %v1978_v55, 20.0 }
 0x120   :  { %v1308_v1 = vpack.c.bf16 %v904_v11, %v903_v47  ;;  %v699_v13 = vadd.f32 1.0, %v1448_v16  ;;  %1455 = vpow2.f32 %v681_v3  ;;  %v552_v9 = vmul.f32 %v1749_v50, %v515_v7 }
 0x121   :  { %v1985_v20 = vadd.f32 %v1754_v53, %v538_v0  ;;  %v746_v22 = vmul.f32 %v714_v10, %v714_v10  ;;  %v651_v51 = vmul.f32 1.442695, %v604_v32  ;;  %v1178_v23 = vadd.f32 -1.0, %v730_v59 }
 0x122   :  { %1332 = vst [vmem:[%s2025_s4 + $0x68] sm:$0xff] %v1308_v1   ;;  %v1993_v29 = vadd.f32 %v1754_v53, %v552_v9  ;;  %v731_v49 = vmul.f32 %v699_v13, %v699_v13  ;;  %v889_v58 = vmul.f32 %v857_v26, %v1918_v14 }
 0x123   :  { %v606_v63 = vmin.f32 %v1985_v20, 20.0  ;;  %v1450_v28 = vpop.eup %1449  ;;  %v810_v18 = vadd.f32 1.0, %v746_v22  ;;  %1457 = vpow2.f32 %v651_v51  ;;  %v1194_v24 = vadd.f32 -1.0, %v746_v22 }
 0x124   :  { %v1452_v33 = vpop.eup %1451  ;;  %v620_v50 = vmin.f32 %v1993_v29, 20.0  ;;  %v795_v53 = vadd.f32 1.0, %v731_v49  ;;  %v873_v37 = vmul.f32 %v1450_v28, %v1193_v30 }
 0x125   :  { %v655_v35 = vmul.f32 1.442695, %v606_v63  ;;  %v1454_v36 = vpop.eup %1453  ;;  %v858_v34 = vmul.f32 %v1452_v33, %v1178_v23  ;;  %1459 = vrcp.f32 %v810_v18 }
 0x126   :  { %v1456_v21 = vpop.eup %1455  ;;  %v701_v40 = vadd.f32 1.0, %v1454_v36  ;;  %v683_v60 = vmul.f32 1.442695, %v620_v50  ;;  %v905_v54 = vmul.f32 %v873_v37, %v1927_v45  ;;  %v1179_v45 = vadd.f32 -1.0, %v731_v49 }
 0x127   :  { %v890_v4 = vmul.f32 %v858_v34, %v1935_v27  ;;  %v715_v39 = vadd.f32 1.0, %v1456_v21  ;;  %1461 = vpow2.f32 %v655_v35 }
 0x128   :  { %v733_v44 = vmul.f32 %v701_v40, %v701_v40  ;;  %1463 = vpow2.f32 %v683_v60 }
 0x129   :  { %v1458_v46 = vpop.eup %1457  ;;  %v1273_v42 = vpack.c.bf16 %v890_v4, %v889_v58  ;;  %v747_v57 = vmul.f32 %v715_v39, %v715_v39  ;;  %1465 = vrcp.f32 %v795_v53 }
 0x12a   :  { %v700_v59 = vadd.f32 1.0, %v1458_v46  ;;  %v797_v14 = vadd.f32 1.0, %v733_v44  ;;  %v1181_v16 = vadd.f32 -1.0, %v733_v44 }
 0x12b   :  { %v1460_v61 = vpop.eup %1459  ;;  %1325 = vst [vmem:[%s2025_s4 + $0x30] sm:$0xff] %v1273_v42   ;;  %v811_v31 = vadd.f32 1.0, %v747_v57  ;;  %v1195_v32 = vadd.f32 -1.0, %v747_v57 }
 0x12c   :  { %v874_v48 = vmul.f32 %v1460_v61, %v1194_v24  ;;  %v732_v27 = vmul.f32 %v700_v59, %v700_v59  ;;  %1467 = vrcp.f32 %v797_v14 }
 0x12d   :  { %v1462_v17 = vpop.eup %1461 }
 0x12e   :  { %v906_v62 = vmul.f32 %v874_v48, %v1949_v56  ;;  %v796_v43 = vadd.f32 1.0, %v732_v27  ;;  %v702_v25 = vadd.f32 1.0, %v1462_v17  ;;  %v1464_v2 = vpop.eup %1463  ;;  %v1180_v3 = vadd.f32 -1.0, %v732_v27 }
 0x12f   :  { %v716_v47 = vadd.f32 1.0, %v1464_v2  ;;  %v1466_v6 = vpop.eup %1465 }
 0x130   :  { %v1313_v5 = vpack.c.bf16 %v906_v62, %v905_v54  ;;  %1469 = vrcp.f32 %v796_v43  ;;  %v734_v19 = vmul.f32 %v702_v25, %v702_v25  ;;  %v859_v11 = vmul.f32 %v1466_v6, %v1179_v45 }
 0x131   :  { %1471 = vrcp.f32 %v811_v31  ;;  %v748_v12 = vmul.f32 %v716_v47, %v716_v47 }
 0x132   :  { %1333 = vst [vmem:[%s2025_s4 + $0x70] sm:$0xff] %v1313_v5   ;;  %v798_v0 = vadd.f32 1.0, %v734_v19  ;;  %v1468_v15 = vpop.eup %1467  ;;  %v891_v1 = vmul.f32 %v859_v11, %v1952_v8  ;;  %v1182_v51 = vadd.f32 -1.0, %v734_v19 }
 0x133   :  { %v812_v56 = vadd.f32 1.0, %v748_v12  ;;  %v861_v13 = vmul.f32 %v1468_v15, %v1181_v16  ;;  %v1196_v23 = vadd.f32 -1.0, %v748_v12 }
 0x134   :  { %1473 = vrcp.f32 %v798_v0 }
 0x135   :  { %1475 = vrcp.f32 %v812_v56  ;;  %v893_v33 = vmul.f32 %v861_v13, %v1962_v41 }
 0x136   :  { %v1470_v7 = vpop.eup %1469 }
 0x137   :  { %v860_v52 = vmul.f32 %v1470_v7, %v1180_v3  ;;  %v1472_v10 = vpop.eup %1471 }
 0x138   :  { %v875_v26 = vmul.f32 %v1472_v10, %v1195_v32 }
 0x139   :  { %v892_v22 = vmul.f32 %v860_v52, %v1978_v55 }
 0x13a   :  { %v1474_v9 = vpop.eup %1473  ;;  %v907_v8 = vmul.f32 %v875_v26, %v1968_v38 }
 0x13b   :  { %v1278_v63 = vpack.c.bf16 %v892_v22, %v891_v1  ;;  %v862_v28 = vmul.f32 %v1474_v9, %v1182_v51  ;;  %v1476_v18 = vpop.eup %1475 }
 0x13c   :  { %v876_v35 = vmul.f32 %v1476_v18, %v1196_v23 }
 0x13d   :  { %1326 = vst [vmem:[%s2025_s4 + $0x38] sm:$0xff] %v1278_v63   ;;  %v894_v49 = vmul.f32 %v862_v28, %v1985_v20 }
 0x13e   :  { %v908_v55 = vmul.f32 %v876_v35, %v1993_v29 }
 0x13f   :  { %v1283_v36 = vpack.c.bf16 %v894_v49, %v893_v33 }
 0x140   :  { %v1318_v34 = vpack.c.bf16 %v908_v55, %v907_v8 }
 0x141   :  { %1327 = vst [vmem:[%s2025_s4 + $0x40] sm:$0xff] %v1283_v36  }
 0x142   :  { %1334 = vst [vmem:[%s2025_s4 + $0x78] sm:$0xff] %v1318_v34  }

// kernel: mbsfc_forward.20
= control target key start
LH: loop header
LB: loop body
LE: loop exit
PB: predicated region body
PF: predicated region fallthrough
CT: control target
= control target key end

     0   :  { %vm369_vm0 = vcmask 1045504   ;;  %vm320_vm1 = vcmask 1014784   ;;  %s2070_s1 = inlined_call_operand.vmem [shape: bf16[252,128], index: 1, kind: input, shape index: {}]   ;;  %s2071_s0 = inlined_call_operand.vmem [shape: bf16[256,252], index: 0, kind: input, shape index: {}]   ;;  %s2072_s2 = inlined_call_operand.vmem [shape: f32[1,128], index: 2, kind: input, shape index: {}]   ;;  %s2073_s3 = inlined_call_operand.vmem [shape: f32[1,128], index: 3, kind: input, shape index: {}]   ;;  %s2074_s4 = inlined_call_operand.vmem [shape: bf16[256,128], index: 4, kind: output, shape index: {}]  }
   0x1   :  { %v1290_v0 = vld [vmem:[%s2070_s1 + $0x38] sm:$0xff]  ;;  %v1289_v4 = vld [vmem:[%s2070_s1 + $0x30] sm:$0xff]  ;;  %v1288_v7 = vld [vmem:[%s2070_s1 + $0x28] sm:$0xff] }
   0x2   :  { %v1201_v1 = vld [vmem:[%s2070_s1 + $0x78] sm:$0xf]  ;;  %v1298_v2 = vld [vmem:[%s2070_s1 + $0x78] sm:$0x30]  ;;  %373 = vmatpush.bf16.msra.mxu0 %v1290_v0  ;;  %1394 = vmatpush.bf16.msra.mxu2 %v1290_v0  ;;  %v1297_v6 = vld [vmem:[%s2070_s1 + $0x70] sm:$0xff] }
   0x3   :  { %v1202_v3 = vor.u32 %v1298_v2, %v1201_v1  ;;  %v1296_v8 = vld [vmem:[%s2070_s1 + $0x68] sm:$0xff]  ;;  %v1287_v9 = vld [vmem:[%s2070_s1 + $0x20] sm:$0xff]  ;;  %v1286_v11 = vld [vmem:[%s2070_s1 + $0x18] sm:$0xff] }
   0x4   :  { %v1295_v10 = vld [vmem:[%s2070_s1 + $0x60] sm:$0xff]  ;;  %v1294_v12 = vld [vmem:[%s2070_s1 + $0x58] sm:$0xff]  ;;  %v1285_v13 = vld [vmem:[%s2070_s1 + $0x10] sm:$0xff] }
   0x5   :  { %v371_v5 = vsel %vm369_vm0, %v1202_v3, 0  ;;  %v1293_v14 = vld [vmem:[%s2070_s1 + $0x50] sm:$0xff]  ;;  %v1284_v15 = vld [vmem:[%s2070_s1 + $0x8] sm:$0xff]  ;;  %v1283_v17 = vld [vmem:[%s2070_s1] sm:$0xff] }
   0x6   :  { %462 = vmatpush.bf16.msra.mxu1 %v371_v5  ;;  %1402 = vmatpush.bf16.msra.mxu3 %v371_v5  ;;  %v1292_v16 = vld [vmem:[%s2070_s1 + $0x48] sm:$0xff]  ;;  %v1013_v18 = vld [vmem:[%s2071_s0] sm:$0xf]  ;;  %v1251_v23 = vld [vmem:[%s2071_s0 + $0x4] sm:$0xf] }
   0x7   :  { %374 = vmatpush.bf16.msra.mxu0 %v1289_v4  ;;  %1395 = vmatpush.bf16.msra.mxu2 %v1289_v4  ;;  %v1252_v19 = vld [vmem:[%s2071_s0 + $0x4] sm:$0xf0]  ;;  %v1077_v20 = vld [vmem:[%s2071_s0 + $0x80] sm:$0xf]  ;;  %v1015_v24 = vld [vmem:[%s2071_s0 + $0x8] sm:$0xf0] }
   0x8   :  { %v1268_v21 = vld [vmem:[%s2071_s0 + $0x84] sm:$0xf0]  ;;  %v1291_v22 = vld [vmem:[%s2070_s1 + $0x40] sm:$0xff]  ;;  %v1079_v26 = vld [vmem:[%s2071_s0 + $0x88] sm:$0xf0]  ;;  %v1014_v27 = vor.u32 %v1252_v19, %v1013_v18  ;;  %v1018_v29 = vor.u32 %v1251_v23, %v1015_v24 }
   0x9   :  { %v1267_v25 = vld [vmem:[%s2071_s0 + $0x84] sm:$0xf]  ;;  %v1078_v28 = vor.u32 %v1268_v21, %v1077_v20  ;;  %v1021_v31 = vld [vmem:[%s2071_s0 + $0x10] sm:$0xf]  ;;  %v1254_v32 = vld [vmem:[%s2071_s0 + $0x14] sm:$0xf0] }
   0xa   :  { %463 = vmatpush.bf16.msra.mxu1 %v1297_v6  ;;  %1403 = vmatpush.bf16.msra.mxu3 %v1297_v6  ;;  %v1082_v30 = vor.u32 %v1267_v25, %v1079_v26  ;;  %v1085_v33 = vld [vmem:[%s2071_s0 + $0x90] sm:$0xf]  ;;  %v1270_v34 = vld [vmem:[%s2071_s0 + $0x94] sm:$0xf0]  ;;  %v1253_v35 = vld [vmem:[%s2071_s0 + $0x14] sm:$0xf]  ;;  %v1022_v39 = vor.u32 %v1254_v32, %v1021_v31 }
   0xb   :  { %375 = vmatpush.bf16.msra.mxu0 %v1288_v7  ;;  %1396 = vmatpush.bf16.msra.mxu2 %v1288_v7  ;;  %v1023_v36 = vld [vmem:[%s2071_s0 + $0x18] sm:$0xf0]  ;;  %v1269_v37 = vld [vmem:[%s2071_s0 + $0x94] sm:$0xf]  ;;  %v1086_v40 = vor.u32 %v1270_v34, %v1085_v33  ;;  %v1029_v43 = vld [vmem:[%s2071_s0 + $0x20] sm:$0xf] }
   0xc   :  { %v1087_v38 = vld [vmem:[%s2071_s0 + $0x98] sm:$0xf0]  ;;  %v1026_v41 = vor.u32 %v1253_v35, %v1023_v36  ;;  %v1256_v44 = vld [vmem:[%s2071_s0 + $0x24] sm:$0xf0]  ;;  %v1093_v45 = vld [vmem:[%s2071_s0 + $0xa0] sm:$0xf] }
   0xd   :  { %v1090_v42 = vor.u32 %v1269_v37, %v1087_v38  ;;  %v1272_v46 = vld [vmem:[%s2071_s0 + $0xa4] sm:$0xf0]  ;;  %v1255_v47 = vld [vmem:[%s2071_s0 + $0x24] sm:$0xf]  ;;  %v1031_v48 = vld [vmem:[%s2071_s0 + $0x28] sm:$0xf0]  ;;  %v1030_v51 = vor.u32 %v1256_v44, %v1029_v43 }
   0xe   :  { %464 = vmatpush.bf16.msra.mxu1 %v1296_v8  ;;  %1404 = vmatpush.bf16.msra.mxu3 %v1296_v8  ;;  %v1271_v49 = vld [vmem:[%s2071_s0 + $0xa4] sm:$0xf]  ;;  %v1095_v50 = vld [vmem:[%s2071_s0 + $0xa8] sm:$0xf0]  ;;  %v1094_v52 = vor.u32 %v1272_v46, %v1093_v45  ;;  %v1034_v53 = vor.u32 %v1255_v47, %v1031_v48  ;;  %v1037_v55 = vld [vmem:[%s2071_s0 + $0x30] sm:$0xf] }
   0xf   :  { %376 = vmatpush.bf16.msra.mxu0 %v1287_v9  ;;  %1397 = vmatpush.bf16.msra.mxu2 %v1287_v9  ;;  %v1098_v54 = vor.u32 %v1271_v49, %v1095_v50  ;;  %v1258_v56 = vld [vmem:[%s2071_s0 + $0x34] sm:$0xf0]  ;;  %v1101_v57 = vld [vmem:[%s2071_s0 + $0xb0] sm:$0xf]  ;;  %v1257_v59 = vld [vmem:[%s2071_s0 + $0x34] sm:$0xf] }
  0x10   :  { %v1274_v58 = vld [vmem:[%s2071_s0 + $0xb4] sm:$0xf0]  ;;  %v1039_v60 = vld [vmem:[%s2071_s0 + $0x38] sm:$0xf0]  ;;  %v1273_v61 = vld [vmem:[%s2071_s0 + $0xb4] sm:$0xf]  ;;  %v1038_v63 = vor.u32 %v1258_v56, %v1037_v55 }
  0x11   :  { %v1103_v62 = vld [vmem:[%s2071_s0 + $0xb8] sm:$0xf0]  ;;  %v1102_v0 = vor.u32 %v1274_v58, %v1101_v57  ;;  %v1042_v1 = vor.u32 %v1257_v59, %v1039_v60  ;;  %v1045_v3 = vld [vmem:[%s2071_s0 + $0x40] sm:$0xf]  ;;  %v1260_v4 = vld [vmem:[%s2071_s0 + $0x44] sm:$0xf0] }
  0x12   :  { %465 = vmatpush.bf16.msra.mxu1 %v1295_v10  ;;  %1405 = vmatpush.bf16.msra.mxu3 %v1295_v10  ;;  %v1106_v2 = vor.u32 %v1273_v61, %v1103_v62  ;;  %v1109_v5 = vld [vmem:[%s2071_s0 + $0xc0] sm:$0xf]  ;;  %v1276_v6 = vld [vmem:[%s2071_s0 + $0xc4] sm:$0xf0]  ;;  %v1259_v7 = vld [vmem:[%s2071_s0 + $0x44] sm:$0xf] }
  0x13   :  { %377 = vmatpush.bf16.msra.mxu0 %v1286_v11  ;;  %1398 = vmatpush.bf16.msra.mxu2 %v1286_v11  ;;  %v1047_v8 = vld [vmem:[%s2071_s0 + $0x48] sm:$0xf0]  ;;  %v1275_v9 = vld [vmem:[%s2071_s0 + $0xc4] sm:$0xf]  ;;  %v1046_v11 = vor.u32 %v1260_v4, %v1045_v3  ;;  %v1278_v18 = vld [vmem:[%s2071_s0 + $0xd4] sm:$0xf0] }
  0x14   :  { %v1111_v10 = vld [vmem:[%s2071_s0 + $0xc8] sm:$0xf0]  ;;  %v1261_v19 = vld [vmem:[%s2071_s0 + $0x54] sm:$0xf]  ;;  %v1055_v20 = vld [vmem:[%s2071_s0 + $0x58] sm:$0xf0] }
  0x15   :  { %v1277_v21 = vld [vmem:[%s2071_s0 + $0xd4] sm:$0xf]  ;;  %v1058_v25 = vor.u32 %v1261_v19, %v1055_v20  ;;  %v1263_v31 = vld [vmem:[%s2071_s0 + $0x64] sm:$0xf]  ;;  %v1063_v32 = vld [vmem:[%s2071_s0 + $0x68] sm:$0xf0] }
  0x16   :  { %466 = vmatpush.bf16.msra.mxu1 %v1294_v12  ;;  %1406 = vmatpush.bf16.msra.mxu3 %v1294_v12  ;;  %v1110_v12 = vor.u32 %v1276_v6, %v1109_v5  ;;  %v1279_v33 = vld [vmem:[%s2071_s0 + $0xe4] sm:$0xf]  ;;  %v1127_v34 = vld [vmem:[%s2071_s0 + $0xe8] sm:$0xf0]  ;;  %v1066_v37 = vor.u32 %v1263_v31, %v1063_v32  ;;  %v1265_v43 = vld [vmem:[%s2071_s0 + $0x74] sm:$0xf] }
  0x17   :  { %378 = vmatpush.bf16.msra.mxu0 %v1285_v13  ;;  %1399 = vmatpush.bf16.msra.mxu2 %v1285_v13  ;;  %v1050_v13 = vor.u32 %v1259_v7, %v1047_v8  ;;  %v1130_v38 = vor.u32 %v1279_v33, %v1127_v34  ;;  %v1071_v44 = vld [vmem:[%s2071_s0 + $0x78] sm:$0xf0]  ;;  %v1281_v45 = vld [vmem:[%s2071_s0 + $0xf4] sm:$0xf]  ;;  %v1832_v55 = vld [vmem:[%s2073_s3] ss:$0 sm:$0xff] }
  0x18   :  { %v1135_v46 = vld [vmem:[%s2071_s0 + $0xf8] sm:$0xf0]  ;;  %v1074_v49 = vor.u32 %v1265_v43, %v1071_v44 }
  0x19   :  { %v1138_v50 = vor.u32 %v1281_v45, %v1135_v46 }
  0x1a   :  { %467 = vmatpush.bf16.msra.mxu1 %v1293_v14  ;;  %1407 = vmatpush.bf16.msra.mxu3 %v1293_v14  ;;  %v1114_v14 = vor.u32 %v1275_v9, %v1111_v10 }
  0x1b   :  { %379 = vmatpush.bf16.msra.mxu0 %v1284_v15  ;;  %1400 = vmatpush.bf16.msra.mxu2 %v1284_v15  ;;  %v1053_v15 = vld [vmem:[%s2071_s0 + $0x50] sm:$0xf] }
  0x1e   :  { %468 = vmatpush.bf16.msra.mxu1 %v1292_v16  ;;  %1408 = vmatpush.bf16.msra.mxu3 %v1292_v16  ;;  %v1262_v16 = vld [vmem:[%s2071_s0 + $0x54] sm:$0xf0] }
  0x1f   :  { %380 = vmatpush.bf16.msra.mxu0 %v1283_v17  ;;  %1401 = vmatpush.bf16.msra.mxu2 %v1283_v17  ;;  %v1117_v17 = vld [vmem:[%s2071_s0 + $0xd0] sm:$0xf]  ;;  %v1054_v23 = vor.u32 %v1262_v16, %v1053_v15 }
  0x20   :  { %v1118_v24 = vor.u32 %v1278_v18, %v1117_v17 }
  0x22   :  { %469 = vmatpush.bf16.msra.mxu1 %v1291_v22  ;;  %1409 = vmatpush.bf16.msra.mxu3 %v1291_v22  ;;  %v1119_v22 = vld [vmem:[%s2071_s0 + $0xd8] sm:$0xf0] }
  0x23   :  { %381 = vmatmul.bf16.vlgmr.msra.gmra.mxu0 %v1014_v27  ;;  %421 = vmatmul.bf16.vlgmr.msra.gmra.mxu2 %v1078_v28  ;;  %v1122_v26 = vor.u32 %v1277_v21, %v1119_v22  ;;  %v1061_v27 = vld [vmem:[%s2071_s0 + $0x60] sm:$0xf]  ;;  %v1264_v28 = vld [vmem:[%s2071_s0 + $0x64] sm:$0xf0] }
  0x24   :  { %v1062_v35 = vor.u32 %v1264_v28, %v1061_v27 }
  0x25   :  { %1203 = vmatmul.msk.bf16.vlgmr.msra.gmra.mxu1 %vm320_vm1, %v1018_v29  ;;  %1211 = vmatmul.msk.bf16.vlgmr.msra.gmra.mxu3 %vm320_vm1, %v1082_v30  ;;  %v1125_v29 = vld [vmem:[%s2071_s0 + $0xe0] sm:$0xf]  ;;  %v1280_v30 = vld [vmem:[%s2071_s0 + $0xe4] sm:$0xf0] }
  0x26   :  { %v1126_v36 = vor.u32 %v1280_v30, %v1125_v29 }
  0x33   :  { %386 = vmatmul.bf16.gmra.mxu0 %v1022_v39  ;;  %426 = vmatmul.bf16.gmra.mxu2 %v1086_v40  ;;  %v1069_v39 = vld [vmem:[%s2071_s0 + $0x70] sm:$0xf]  ;;  %v1266_v40 = vld [vmem:[%s2071_s0 + $0x74] sm:$0xf0] }
  0x34   :  { %v1070_v47 = vor.u32 %v1266_v40, %v1069_v39 }
  0x35   :  { %1204 = vmatmul.msk.bf16.gmra.mxu1 %vm320_vm1, %v1026_v41  ;;  %1212 = vmatmul.msk.bf16.gmra.mxu3 %vm320_vm1, %v1090_v42  ;;  %v1133_v41 = vld [vmem:[%s2071_s0 + $0xf0] sm:$0xf]  ;;  %v1282_v42 = vld [vmem:[%s2071_s0 + $0xf4] sm:$0xf0] }
  0x36   :  { %v1134_v48 = vor.u32 %v1282_v42, %v1133_v41 }
  0x43   :  { %391 = vmatmul.bf16.gmra.mxu0 %v1030_v51  ;;  %431 = vmatmul.bf16.gmra.mxu2 %v1094_v52  ;;  %v1827_v52 = vld [vmem:[%s2072_s2] ss:$0 sm:$0xff] }
  0x45   :  { %1205 = vmatmul.msk.bf16.gmra.mxu1 %vm320_vm1, %v1034_v53  ;;  %1213 = vmatmul.msk.bf16.gmra.mxu3 %vm320_vm1, %v1098_v54 }
  0x53   :  { %396 = vmatmul.bf16.gmra.mxu0 %v1038_v63  ;;  %436 = vmatmul.bf16.gmra.mxu2 %v1102_v0 }
  0x55   :  { %1206 = vmatmul.msk.bf16.gmra.mxu1 %vm320_vm1, %v1042_v1  ;;  %1214 = vmatmul.msk.bf16.gmra.mxu3 %vm320_vm1, %v1106_v2 }
  0x63   :  { %401 = vmatmul.bf16.gmra.mxu0 %v1046_v11  ;;  %441 = vmatmul.bf16.gmra.mxu2 %v1110_v12 }
  0x65   :  { %1207 = vmatmul.msk.bf16.gmra.mxu1 %vm320_vm1, %v1050_v13  ;;  %1215 = vmatmul.msk.bf16.gmra.mxu3 %vm320_vm1, %v1114_v14 }
  0x73   :  { %406 = vmatmul.bf16.gmra.mxu0 %v1054_v23  ;;  %446 = vmatmul.bf16.gmra.mxu2 %v1118_v24 }
  0x75   :  { %1208 = vmatmul.msk.bf16.gmra.mxu1 %vm320_vm1, %v1058_v25  ;;  %1216 = vmatmul.msk.bf16.gmra.mxu3 %vm320_vm1, %v1122_v26 }
  0x83   :  { %411 = vmatmul.bf16.gmra.mxu0 %v1062_v35  ;;  %451 = vmatmul.bf16.gmra.mxu2 %v1126_v36 }
  0x85   :  { %1209 = vmatmul.msk.bf16.gmra.mxu1 %vm320_vm1, %v1066_v37  ;;  %1217 = vmatmul.msk.bf16.gmra.mxu3 %vm320_vm1, %v1130_v38 }
  0x93   :  { %416 = vmatmul.bf16.gmra.mxu0 %v1070_v47  ;;  %456 = vmatmul.bf16.gmra.mxu2 %v1134_v48 }
  0x95   :  { %1210 = vmatmul.msk.bf16.gmra.mxu1 %vm320_vm1, %v1074_v49  ;;  %1218 = vmatmul.msk.bf16.gmra.mxu3 %vm320_vm1, %v1138_v50 }
  0xa0   :  { %v382_v51 = vpop.f32.mrf.mxu0 }
  0xa2   :  { %v471_v53 = vpop.f32.mrf.mxu1 }
  0xa3   :  { %v472_v54 = vadd.f32 %v471_v53, %v382_v51 }
  0xa5   :  { %v555_v56 = vmul.f32 %v1827_v52, %v472_v54 }
  0xa6   :  { %v422_v57 = vpop.f32.mrf.mxu2 }
  0xa7   :  { %v1836_v58 = vadd.f32 %v1832_v55, %v555_v56 }
  0xa8   :  { %v511_v59 = vpop.f32.mrf.mxu3  ;;  %v384_v60 = vpop.f32.mrf.mxu0 }
  0xa9   :  { %v623_v61 = vmin.f32 %v1836_v58, 20.0  ;;  %v512_v62 = vadd.f32 %v511_v59, %v422_v57 }
  0xaa   :  { %v473_v63 = vpop.f32.mrf.mxu1 }
  0xab   :  { %v655_v0 = vmul.f32 1.442695, %v623_v61  ;;  %v571_v1 = vmul.f32 %v1827_v52, %v512_v62  ;;  %v474_v2 = vadd.f32 %v473_v63, %v384_v60 }
  0xad   :  { %1412 = vpow2.f32 %v655_v0  ;;  %v1841_v3 = vadd.f32 %v1832_v55, %v571_v1  ;;  %v556_v4 = vmul.f32 %v1827_v52, %v474_v2 }
  0xae   :  { %v424_v5 = vpop.f32.mrf.mxu2 }
  0xaf   :  { %v639_v6 = vmin.f32 %v1841_v3, 20.0  ;;  %v1846_v7 = vadd.f32 %v1832_v55, %v556_v4 }
  0xb0   :  { %v513_v8 = vpop.f32.mrf.mxu3  ;;  %v387_v9 = vpop.f32.mrf.mxu0 }
  0xb1   :  { %v687_v10 = vmul.f32 1.442695, %v639_v6  ;;  %v624_v11 = vmin.f32 %v1846_v7, 20.0  ;;  %v514_v12 = vadd.f32 %v513_v8, %v424_v5 }
  0xb2   :  { %v476_v13 = vpop.f32.mrf.mxu1 }
  0xb3   :  { %v1413_v14 = vpop.eup %1412  ;;  %1414 = vpow2.f32 %v687_v10  ;;  %v657_v15 = vmul.f32 1.442695, %v624_v11  ;;  %v572_v16 = vmul.f32 %v1827_v52, %v514_v12  ;;  %v477_v17 = vadd.f32 %v476_v13, %v387_v9 }
  0xb4   :  { %v719_v18 = vadd.f32 1.0, %v1413_v14 }
  0xb5   :  { %1416 = vpow2.f32 %v657_v15  ;;  %v1851_v19 = vadd.f32 %v1832_v55, %v572_v16  ;;  %v557_v20 = vmul.f32 %v1827_v52, %v477_v17 }
  0xb6   :  { %v751_v21 = vmul.f32 %v719_v18, %v719_v18  ;;  %v427_v22 = vpop.f32.mrf.mxu2 }
  0xb7   :  { %v640_v23 = vmin.f32 %v1851_v19, 20.0  ;;  %v1856_v24 = vadd.f32 %v1832_v55, %v557_v20 }
  0xb8   :  { %v815_v25 = vadd.f32 1.0, %v751_v21  ;;  %v516_v26 = vpop.f32.mrf.mxu3  ;;  %v389_v27 = vpop.f32.mrf.mxu0  ;;  %v1219_v57 = vadd.f32 -1.0, %v751_v21 }
  0xb9   :  { %v1415_v28 = vpop.eup %1414  ;;  %v689_v29 = vmul.f32 1.442695, %v640_v23  ;;  %v625_v30 = vmin.f32 %v1856_v24, 20.0  ;;  %v517_v31 = vadd.f32 %v516_v26, %v427_v22 }
  0xba   :  { %v735_v32 = vadd.f32 1.0, %v1415_v28  ;;  %v478_v33 = vpop.f32.mrf.mxu1 }
  0xbb   :  { %v1417_v34 = vpop.eup %1416  ;;  %1418 = vpow2.f32 %v689_v29  ;;  %v659_v35 = vmul.f32 1.442695, %v625_v30  ;;  %v573_v36 = vmul.f32 %v1827_v52, %v517_v31  ;;  %v479_v37 = vadd.f32 %v478_v33, %v389_v27 }
  0xbc   :  { %1420 = vrcp.f32 %v815_v25  ;;  %v767_v38 = vmul.f32 %v735_v32, %v735_v32  ;;  %v720_v39 = vadd.f32 1.0, %v1417_v34 }
  0xbd   :  { %1422 = vpow2.f32 %v659_v35  ;;  %v1861_v40 = vadd.f32 %v1832_v55, %v573_v36  ;;  %v558_v41 = vmul.f32 %v1827_v52, %v479_v37 }
  0xbe   :  { %v831_v42 = vadd.f32 1.0, %v767_v38  ;;  %v752_v43 = vmul.f32 %v720_v39, %v720_v39  ;;  %v429_v44 = vpop.f32.mrf.mxu2  ;;  %v1235_v15 = vadd.f32 -1.0, %v767_v38 }
  0xbf   :  { %v641_v45 = vmin.f32 %v1861_v40, 20.0  ;;  %v1866_v46 = vadd.f32 %v1832_v55, %v558_v41 }
  0xc0   :  { %v816_v47 = vadd.f32 1.0, %v752_v43  ;;  %v518_v48 = vpop.f32.mrf.mxu3  ;;  %v392_v49 = vpop.f32.mrf.mxu0  ;;  %1424 = vrcp.f32 %v831_v42  ;;  %v1220_v12 = vadd.f32 -1.0, %v752_v43 }
  0xc1   :  { %v1419_v50 = vpop.eup %1418  ;;  %v691_v51 = vmul.f32 1.442695, %v641_v45  ;;  %v626_v53 = vmin.f32 %v1866_v46, 20.0  ;;  %v519_v54 = vadd.f32 %v518_v48, %v429_v44 }
  0xc2   :  { %v1421_v56 = vpop.eup %1420  ;;  %1426 = vrcp.f32 %v816_v47  ;;  %v736_v59 = vadd.f32 1.0, %v1419_v50  ;;  %v481_v60 = vpop.f32.mrf.mxu1 }
  0xc3   :  { %v1423_v61 = vpop.eup %1422  ;;  %1428 = vpow2.f32 %v691_v51  ;;  %v661_v62 = vmul.f32 1.442695, %v626_v53  ;;  %v574_v63 = vmul.f32 %v1827_v52, %v519_v54  ;;  %v482_v2 = vadd.f32 %v481_v60, %v392_v49 }
  0xc4   :  { %v768_v0 = vmul.f32 %v736_v59, %v736_v59  ;;  %v721_v1 = vadd.f32 1.0, %v1423_v61  ;;  %v879_v5 = vmul.f32 %v1421_v56, %v1219_v57 }
  0xc5   :  { %1430 = vpow2.f32 %v661_v62  ;;  %v1871_v4 = vadd.f32 %v1832_v55, %v574_v63  ;;  %v559_v9 = vmul.f32 %v1827_v52, %v482_v2 }
  0xc6   :  { %v832_v6 = vadd.f32 1.0, %v768_v0  ;;  %v753_v8 = vmul.f32 %v721_v1, %v721_v1  ;;  %v432_v10 = vpop.f32.mrf.mxu2  ;;  %v1425_v11 = vpop.eup %1424  ;;  %v911_v26 = vmul.f32 %v879_v5, %v1836_v58  ;;  %v1236_v39 = vadd.f32 -1.0, %v768_v0 }
  0xc7   :  { %v642_v13 = vmin.f32 %v1871_v4, 20.0  ;;  %v1876_v17 = vadd.f32 %v1832_v55, %v559_v9  ;;  %v895_v27 = vmul.f32 %v1425_v11, %v1235_v15 }
  0xc8   :  { %v1427_v14 = vpop.eup %1426  ;;  %1432 = vrcp.f32 %v832_v6  ;;  %v817_v16 = vadd.f32 1.0, %v753_v8  ;;  %v521_v18 = vpop.f32.mrf.mxu3  ;;  %v1221_v50 = vadd.f32 -1.0, %v753_v8 }
  0xc9   :  { %v394_v20 = vpop.f32.mrf.mxu0  ;;  %v1429_v21 = vpop.eup %1428  ;;  %v880_v22 = vmul.f32 %v1427_v14, %v1220_v12  ;;  %v693_v23 = vmul.f32 1.442695, %v642_v13  ;;  %v522_v25 = vadd.f32 %v521_v18, %v432_v10  ;;  %v627_v29 = vmin.f32 %v1876_v17, 20.0 }
  0xca   :  { %v737_v28 = vadd.f32 1.0, %v1429_v21  ;;  %v483_v30 = vpop.f32.mrf.mxu1  ;;  %v927_v49 = vmul.f32 %v895_v27, %v1841_v3 }
  0xcb   :  { %v1431_v31 = vpop.eup %1430  ;;  %v912_v32 = vmul.f32 %v880_v22, %v1846_v7  ;;  %1434 = vpow2.f32 %v693_v23  ;;  %v575_v33 = vmul.f32 %v1827_v52, %v522_v25  ;;  %v484_v34 = vadd.f32 %v483_v30, %v394_v20 }
  0xcc   :  { %1436 = vrcp.f32 %v817_v16  ;;  %v769_v35 = vmul.f32 %v737_v28, %v737_v28  ;;  %v722_v36 = vadd.f32 1.0, %v1431_v31  ;;  %v663_v37 = vmul.f32 1.442695, %v627_v29 }
  0xcd   :  { %v1302_v38 = vpack.c.bf16 %v912_v32, %v911_v26  ;;  %v1883_v58 = vadd.f32 %v1832_v55, %v575_v33  ;;  %v560_v41 = vmul.f32 %v1827_v52, %v484_v34 }
  0xce   :  { %v1433_v42 = vpop.eup %1432  ;;  %v833_v43 = vadd.f32 1.0, %v769_v35  ;;  %v754_v44 = vmul.f32 %v722_v36, %v722_v36  ;;  %1438 = vpow2.f32 %v663_v37  ;;  %v434_v7 = vpop.f32.mrf.mxu2  ;;  %v1237_v27 = vadd.f32 -1.0, %v769_v35 }
  0xcf   :  { %1303 = vst [vmem:[%s2074_s4] sm:$0xff] %v1302_v38   ;;  %v896_v45 = vmul.f32 %v1433_v42, %v1236_v39  ;;  %v643_v47 = vmin.f32 %v1883_v58, 20.0  ;;  %v1891_v48 = vadd.f32 %v1832_v55, %v560_v41 }
  0xd0   :  { %v818_v51 = vadd.f32 1.0, %v754_v44  ;;  %v523_v53 = vpop.f32.mrf.mxu3  ;;  %1440 = vrcp.f32 %v833_v43  ;;  %v1222_v15 = vadd.f32 -1.0, %v754_v44 }
  0xd1   :  { %v397_v54 = vpop.f32.mrf.mxu0  ;;  %v1435_v56 = vpop.eup %1434  ;;  %v928_v57 = vmul.f32 %v896_v45, %v1851_v19  ;;  %v695_v59 = vmul.f32 1.442695, %v643_v47  ;;  %v628_v60 = vmin.f32 %v1891_v48, 20.0  ;;  %v524_v63 = vadd.f32 %v523_v53, %v434_v7 }
  0xd2   :  { %v1437_v61 = vpop.eup %1436  ;;  %1442 = vrcp.f32 %v818_v51  ;;  %v738_v62 = vadd.f32 1.0, %v1435_v56  ;;  %v486_v0 = vpop.f32.mrf.mxu1 }
  0xd3   :  { %v1342_v1 = vpack.c.bf16 %v928_v57, %v927_v49  ;;  %1444 = vpow2.f32 %v695_v59  ;;  %v665_v2 = vmul.f32 1.442695, %v628_v60  ;;  %v576_v6 = vmul.f32 %v1827_v52, %v524_v63 }
  0xd4   :  { %v1439_v3 = vpop.eup %1438  ;;  %v770_v5 = vmul.f32 %v738_v62, %v738_v62  ;;  %v487_v8 = vadd.f32 %v486_v0, %v397_v54  ;;  %v881_v19 = vmul.f32 %v1437_v61, %v1221_v50 }
  0xd5   :  { %1386 = vst [vmem:[%s2074_s4 + $0x40] sm:$0xff] %v1342_v1   ;;  %v723_v9 = vadd.f32 1.0, %v1439_v3  ;;  %1446 = vpow2.f32 %v665_v2  ;;  %v1901_v11 = vadd.f32 %v1832_v55, %v576_v6 }
  0xd6   :  { %v834_v10 = vadd.f32 1.0, %v770_v5  ;;  %v561_v12 = vmul.f32 %v1827_v52, %v487_v8  ;;  %v437_v13 = vpop.f32.mrf.mxu2  ;;  %v1441_v14 = vpop.eup %1440  ;;  %v913_v26 = vmul.f32 %v881_v19, %v1856_v24  ;;  %v1238_v39 = vadd.f32 -1.0, %v770_v5 }
  0xd7   :  { %v755_v16 = vmul.f32 %v723_v9, %v723_v9  ;;  %v644_v20 = vmin.f32 %v1901_v11, 20.0  ;;  %v897_v37 = vmul.f32 %v1441_v14, %v1237_v27 }
  0xd8   :  { %v1443_v18 = vpop.eup %1442  ;;  %1448 = vrcp.f32 %v834_v10  ;;  %v1906_v21 = vadd.f32 %v1832_v55, %v561_v12  ;;  %v526_v22 = vpop.f32.mrf.mxu3 }
  0xd9   :  { %v399_v23 = vpop.f32.mrf.mxu0  ;;  %v1445_v25 = vpop.eup %1444  ;;  %v882_v28 = vmul.f32 %v1443_v18, %v1222_v15  ;;  %v819_v29 = vadd.f32 1.0, %v755_v16  ;;  %v697_v31 = vmul.f32 1.442695, %v644_v20  ;;  %v527_v33 = vadd.f32 %v526_v22, %v437_v13 }
  0xda   :  { %v739_v30 = vadd.f32 1.0, %v1445_v25  ;;  %v629_v32 = vmin.f32 %v1906_v21, 20.0  ;;  %v488_v34 = vpop.f32.mrf.mxu1  ;;  %v929_v54 = vmul.f32 %v897_v37, %v1861_v40  ;;  %v1223_v1 = vadd.f32 -1.0, %v755_v16 }
  0xdb   :  { %v1447_v36 = vpop.eup %1446  ;;  %v914_v38 = vmul.f32 %v882_v28, %v1866_v46  ;;  %v489_v41 = vadd.f32 %v488_v34, %v399_v23  ;;  %1450 = vpow2.f32 %v697_v31  ;;  %v577_v35 = vmul.f32 %v1827_v52, %v527_v33 }
  0xdc   :  { %v771_v42 = vmul.f32 %v739_v30, %v739_v30  ;;  %v724_v43 = vadd.f32 1.0, %v1447_v36  ;;  %v667_v44 = vmul.f32 1.442695, %v629_v32  ;;  %1452 = vrcp.f32 %v819_v29 }
  0xdd   :  { %v1307_v24 = vpack.c.bf16 %v914_v38, %v913_v26  ;;  %v562_v7 = vmul.f32 %v1827_v52, %v489_v41  ;;  %v1917_v51 = vadd.f32 %v1832_v55, %v577_v35 }
  0xde   :  { %v1449_v45 = vpop.eup %1448  ;;  %v835_v47 = vadd.f32 1.0, %v771_v42  ;;  %v756_v49 = vmul.f32 %v724_v43, %v724_v43  ;;  %1454 = vpow2.f32 %v667_v44  ;;  %v439_v50 = vpop.f32.mrf.mxu2  ;;  %v1239_v30 = vadd.f32 -1.0, %v771_v42 }
  0xdf   :  { %1379 = vst [vmem:[%s2074_s4 + $0x8] sm:$0xff] %v1307_v24   ;;  %v898_v46 = vmul.f32 %v1449_v45, %v1238_v39  ;;  %v1920_v53 = vadd.f32 %v1832_v55, %v562_v7  ;;  %v645_v61 = vmin.f32 %v1917_v51, 20.0 }
  0xe0   :  { %1456 = vrcp.f32 %v835_v47  ;;  %v820_v56 = vadd.f32 1.0, %v756_v49  ;;  %v528_v57 = vpop.f32.mrf.mxu3  ;;  %v1224_v20 = vadd.f32 -1.0, %v756_v49 }
  0xe1   :  { %v402_v59 = vpop.f32.mrf.mxu0  ;;  %v930_v60 = vmul.f32 %v898_v46, %v1871_v4  ;;  %v630_v62 = vmin.f32 %v1920_v53, 20.0  ;;  %v529_v63 = vadd.f32 %v528_v57, %v439_v50  ;;  %v1451_v0 = vpop.eup %1450  ;;  %v699_v8 = vmul.f32 1.442695, %v645_v61 }
  0xe2   :  { %1458 = vrcp.f32 %v820_v56  ;;  %v491_v2 = vpop.f32.mrf.mxu1  ;;  %v1453_v3 = vpop.eup %1452  ;;  %v740_v6 = vadd.f32 1.0, %v1451_v0 }
  0xe3   :  { %v1347_v5 = vpack.c.bf16 %v930_v60, %v929_v54  ;;  %v669_v40 = vmul.f32 1.442695, %v630_v62  ;;  %v578_v9 = vmul.f32 %v1827_v52, %v529_v63  ;;  %v492_v10 = vadd.f32 %v491_v2, %v402_v59 }
  0xe4   :  { %v1455_v19 = vpop.eup %1454  ;;  %v772_v4 = vmul.f32 %v740_v6, %v740_v6  ;;  %1460 = vpow2.f32 %v699_v8  ;;  %v883_v18 = vmul.f32 %v1453_v3, %v1223_v1 }
  0xe5   :  { %1387 = vst [vmem:[%s2074_s4 + $0x48] sm:$0xff] %v1347_v5   ;;  %v725_v12 = vadd.f32 1.0, %v1455_v19  ;;  %1462 = vpow2.f32 %v669_v40  ;;  %v1931_v14 = vadd.f32 %v1832_v55, %v578_v9  ;;  %v563_v15 = vmul.f32 %v1827_v52, %v492_v10 }
  0xe6   :  { %v1457_v13 = vpop.eup %1456  ;;  %v442_v16 = vpop.f32.mrf.mxu2  ;;  %v836_v22 = vadd.f32 1.0, %v772_v4  ;;  %v915_v39 = vmul.f32 %v883_v18, %v1876_v17  ;;  %v1240_v50 = vadd.f32 -1.0, %v772_v4 }
  0xe7   :  { %v757_v23 = vmul.f32 %v725_v12, %v725_v12  ;;  %v646_v26 = vmin.f32 %v1931_v14, 20.0  ;;  %v1936_v27 = vadd.f32 %v1832_v55, %v563_v15  ;;  %v899_v41 = vmul.f32 %v1457_v13, %v1239_v30 }
  0xe8   :  { %v1459_v25 = vpop.eup %1458  ;;  %v531_v28 = vpop.f32.mrf.mxu3  ;;  %1464 = vrcp.f32 %v836_v22 }
  0xe9   :  { %v404_v29 = vpop.f32.mrf.mxu0  ;;  %v884_v31 = vmul.f32 %v1459_v25, %v1224_v20  ;;  %v821_v32 = vadd.f32 1.0, %v757_v23  ;;  %v701_v33 = vmul.f32 1.442695, %v646_v26  ;;  %v631_v34 = vmin.f32 %v1936_v27, 20.0 }
  0xea   :  { %v532_v36 = vadd.f32 %v531_v28, %v442_v16  ;;  %v493_v37 = vpop.f32.mrf.mxu1  ;;  %v1461_v38 = vpop.eup %1460  ;;  %v931_v5 = vmul.f32 %v899_v41, %v1883_v58  ;;  %v1225_v9 = vadd.f32 -1.0, %v757_v23 }
  0xeb   :  { %v916_v43 = vmul.f32 %v884_v31, %v1891_v48  ;;  %v494_v44 = vadd.f32 %v493_v37, %v404_v29  ;;  %v1463_v24 = vpop.eup %1462  ;;  %1466 = vrcp.f32 %v821_v32  ;;  %v741_v35 = vadd.f32 1.0, %v1461_v38 }
  0xec   :  { %v671_v7 = vmul.f32 1.442695, %v631_v34  ;;  %v579_v42 = vmul.f32 %v1827_v52, %v532_v36  ;;  %v726_v47 = vadd.f32 1.0, %v1463_v24  ;;  %1468 = vpow2.f32 %v701_v33 }
  0xed   :  { %v1312_v45 = vpack.c.bf16 %v916_v43, %v915_v39  ;;  %v564_v49 = vmul.f32 %v1827_v52, %v494_v44  ;;  %v773_v46 = vmul.f32 %v741_v35, %v741_v35 }
  0xee   :  { %1470 = vpow2.f32 %v671_v7  ;;  %v1944_v17 = vadd.f32 %v1832_v55, %v579_v42  ;;  %v444_v54 = vpop.f32.mrf.mxu2  ;;  %v1465_v48 = vpop.eup %1464  ;;  %v758_v56 = vmul.f32 %v726_v47, %v726_v47 }
  0xef   :  { %1380 = vst [vmem:[%s2074_s4 + $0x10] sm:$0xff] %v1312_v45   ;;  %v1950_v57 = vadd.f32 %v1832_v55, %v564_v49  ;;  %v900_v59 = vmul.f32 %v1465_v48, %v1240_v50  ;;  %v837_v60 = vadd.f32 1.0, %v773_v46  ;;  %v1241_v7 = vadd.f32 -1.0, %v773_v46 }
  0xf0   :  { %v647_v61 = vmin.f32 %v1944_v17, 20.0  ;;  %v533_v62 = vpop.f32.mrf.mxu3  ;;  %v822_v0 = vadd.f32 1.0, %v758_v56  ;;  %v1226_v29 = vadd.f32 -1.0, %v758_v56 }
  0xf1   :  { %v407_v63 = vpop.f32.mrf.mxu0  ;;  %v632_v1 = vmin.f32 %v1950_v57, 20.0  ;;  %v534_v2 = vadd.f32 %v533_v62, %v444_v54  ;;  %v1467_v3 = vpop.eup %1466  ;;  %v932_v6 = vmul.f32 %v900_v59, %v1901_v11  ;;  %1472 = vrcp.f32 %v837_v60 }
  0xf2   :  { %v703_v8 = vmul.f32 1.442695, %v647_v61  ;;  %v496_v40 = vpop.f32.mrf.mxu1  ;;  %v1469_v19 = vpop.eup %1468  ;;  %1474 = vrcp.f32 %v822_v0  ;;  %v885_v23 = vmul.f32 %v1467_v3, %v1225_v9 }
  0xf3   :  { %v673_v10 = vmul.f32 1.442695, %v632_v1  ;;  %v580_v4 = vmul.f32 %v1827_v52, %v534_v2  ;;  %v1352_v13 = vpack.c.bf16 %v932_v6, %v931_v5  ;;  %v742_v15 = vadd.f32 1.0, %v1469_v19 }
  0xf4   :  { %v1471_v12 = vpop.eup %1470  ;;  %1476 = vpow2.f32 %v703_v8  ;;  %v497_v16 = vadd.f32 %v496_v40, %v407_v63  ;;  %v917_v35 = vmul.f32 %v885_v23, %v1906_v21 }
  0xf5   :  { %v727_v18 = vadd.f32 1.0, %v1471_v12  ;;  %1478 = vpow2.f32 %v673_v10  ;;  %v1958_v58 = vadd.f32 %v1832_v55, %v580_v4  ;;  %1388 = vst [vmem:[%s2074_s4 + $0x50] sm:$0xff] %v1352_v13   ;;  %v774_v11 = vmul.f32 %v742_v15, %v742_v15 }
  0xf6   :  { %v565_v20 = vmul.f32 %v1827_v52, %v497_v16  ;;  %v447_v22 = vpop.f32.mrf.mxu2 }
  0xf7   :  { %v759_v25 = vmul.f32 %v727_v18, %v727_v18  ;;  %v648_v26 = vmin.f32 %v1958_v58, 20.0  ;;  %v1473_v28 = vpop.eup %1472  ;;  %v838_v30 = vadd.f32 1.0, %v774_v11  ;;  %v1242_v21 = vadd.f32 -1.0, %v774_v11 }
  0xf8   :  { %v1966_v31 = vadd.f32 %v1832_v55, %v565_v20  ;;  %v536_v32 = vpop.f32.mrf.mxu3  ;;  %v1475_v34 = vpop.eup %1474  ;;  %v901_v59 = vmul.f32 %v1473_v28, %v1241_v7 }
  0xf9   :  { %v409_v33 = vpop.f32.mrf.mxu0  ;;  %v823_v36 = vadd.f32 1.0, %v759_v25  ;;  %v705_v37 = vmul.f32 1.442695, %v648_v26  ;;  %v886_v39 = vmul.f32 %v1475_v34, %v1226_v29  ;;  %1480 = vrcp.f32 %v838_v30 }
  0xfa   :  { %v1477_v38 = vpop.eup %1476  ;;  %v633_v41 = vmin.f32 %v1966_v31, 20.0  ;;  %v537_v43 = vadd.f32 %v536_v32, %v447_v22  ;;  %v498_v44 = vpop.f32.mrf.mxu1  ;;  %v933_v19 = vmul.f32 %v901_v59, %v1917_v51  ;;  %v1227_v9 = vadd.f32 -1.0, %v759_v25 }
  0xfb   :  { %v1479_v24 = vpop.eup %1478  ;;  %v743_v42 = vadd.f32 1.0, %v1477_v38  ;;  %v499_v45 = vadd.f32 %v498_v44, %v409_v33  ;;  %v918_v47 = vmul.f32 %v886_v39, %v1920_v53  ;;  %1482 = vpow2.f32 %v705_v37 }
  0xfc   :  { %v728_v49 = vadd.f32 1.0, %v1479_v24  ;;  %v675_v50 = vmul.f32 1.442695, %v633_v41  ;;  %1484 = vrcp.f32 %v823_v36  ;;  %v581_v48 = vmul.f32 %v1827_v52, %v537_v43 }
  0xfd   :  { %v775_v54 = vmul.f32 %v743_v42, %v743_v42  ;;  %v566_v56 = vmul.f32 %v1827_v52, %v499_v45  ;;  %v1317_v60 = vpack.c.bf16 %v918_v47, %v917_v35 }
  0xfe   :  { %v760_v61 = vmul.f32 %v728_v49, %v728_v49  ;;  %1486 = vpow2.f32 %v675_v50  ;;  %v449_v62 = vpop.f32.mrf.mxu2  ;;  %v1974_v46 = vadd.f32 %v1832_v55, %v581_v48 }
  0xff   :  { %v1977_v53 = vadd.f32 %v1832_v55, %v566_v56  ;;  %v1481_v63 = vpop.eup %1480  ;;  %1381 = vst [vmem:[%s2074_s4 + $0x18] sm:$0xff] %v1317_v60   ;;  %v839_v0 = vadd.f32 1.0, %v775_v54  ;;  %v1243_v24 = vadd.f32 -1.0, %v775_v54 }
 0x100   :  { %v824_v1 = vadd.f32 1.0, %v760_v61  ;;  %v538_v2 = vpop.f32.mrf.mxu3  ;;  %v902_v5 = vmul.f32 %v1481_v63, %v1242_v21  ;;  %v649_v6 = vmin.f32 %v1974_v46, 20.0  ;;  %v1228_v30 = vadd.f32 -1.0, %v760_v61 }
 0x101   :  { %v412_v3 = vpop.f32.mrf.mxu0  ;;  %v634_v8 = vmin.f32 %v1977_v53, 20.0  ;;  %v1483_v40 = vpop.eup %1482  ;;  %v539_v10 = vadd.f32 %v538_v2, %v449_v62 }
 0x102   :  { %1488 = vrcp.f32 %v824_v1  ;;  %v501_v4 = vpop.f32.mrf.mxu1  ;;  %v1485_v12 = vpop.eup %1484  ;;  %v934_v13 = vmul.f32 %v902_v5, %v1931_v14  ;;  %v744_v15 = vadd.f32 1.0, %v1483_v40  ;;  %v707_v16 = vmul.f32 1.442695, %v649_v6 }
 0x103   :  { %v677_v18 = vmul.f32 1.442695, %v634_v8  ;;  %1490 = vrcp.f32 %v839_v0  ;;  %v582_v20 = vmul.f32 %v1827_v52, %v539_v10  ;;  %v502_v22 = vadd.f32 %v501_v4, %v412_v3 }
 0x104   :  { %v1487_v11 = vpop.eup %1486  ;;  %v1357_v23 = vpack.c.bf16 %v934_v13, %v933_v19  ;;  %v776_v26 = vmul.f32 %v744_v15, %v744_v15  ;;  %1492 = vpow2.f32 %v707_v16  ;;  %v887_v14 = vmul.f32 %v1485_v12, %v1227_v9 }
 0x105   :  { %v729_v28 = vadd.f32 1.0, %v1487_v11  ;;  %1494 = vpow2.f32 %v677_v18  ;;  %v1988_v51 = vadd.f32 %v1832_v55, %v582_v20  ;;  %v567_v25 = vmul.f32 %v1827_v52, %v502_v22 }
 0x106   :  { %v452_v29 = vpop.f32.mrf.mxu2  ;;  %1389 = vst [vmem:[%s2074_s4 + $0x58] sm:$0xff] %v1357_v23   ;;  %v840_v32 = vadd.f32 1.0, %v776_v26  ;;  %v919_v49 = vmul.f32 %v887_v14, %v1936_v27  ;;  %v1244_v48 = vadd.f32 -1.0, %v776_v26 }
 0x107   :  { %v761_v33 = vmul.f32 %v729_v28, %v729_v28  ;;  %v650_v36 = vmin.f32 %v1988_v51, 20.0  ;;  %v1996_v37 = vadd.f32 %v1832_v55, %v567_v25 }
 0x108   :  { %v1489_v34 = vpop.eup %1488  ;;  %v541_v38 = vpop.f32.mrf.mxu3  ;;  %1496 = vrcp.f32 %v840_v32 }
 0x109   :  { %v414_v39 = vpop.f32.mrf.mxu0  ;;  %v888_v41 = vmul.f32 %v1489_v34, %v1228_v30  ;;  %v825_v43 = vadd.f32 1.0, %v761_v33  ;;  %v1491_v44 = vpop.eup %1490  ;;  %v709_v35 = vmul.f32 1.442695, %v650_v36  ;;  %v635_v7 = vmin.f32 %v1996_v37, 20.0 }
 0x10a   :  { %v542_v42 = vadd.f32 %v541_v38, %v452_v29  ;;  %v503_v45 = vpop.f32.mrf.mxu1  ;;  %v1493_v47 = vpop.eup %1492  ;;  %v903_v0 = vmul.f32 %v1491_v44, %v1243_v24  ;;  %v1229_v10 = vadd.f32 -1.0, %v761_v33 }
 0x10b   :  { %v920_v50 = vmul.f32 %v888_v41, %v1950_v57  ;;  %v504_v56 = vadd.f32 %v503_v45, %v414_v39  ;;  %v1495_v59 = vpop.eup %1494  ;;  %v745_v60 = vadd.f32 1.0, %v1493_v47  ;;  %1498 = vpow2.f32 %v709_v35 }
 0x10c   :  { %v679_v61 = vmul.f32 1.442695, %v635_v7  ;;  %v583_v62 = vmul.f32 %v1827_v52, %v542_v42  ;;  %1500 = vrcp.f32 %v825_v43  ;;  %v730_v54 = vadd.f32 1.0, %v1495_v59 }
 0x10d   :  { %v1322_v21 = vpack.c.bf16 %v920_v50, %v919_v49  ;;  %v568_v63 = vmul.f32 %v1827_v52, %v504_v56  ;;  %v777_v1 = vmul.f32 %v745_v60, %v745_v60  ;;  %v935_v16 = vmul.f32 %v903_v0, %v1944_v17 }
 0x10e   :  { %1502 = vpow2.f32 %v679_v61  ;;  %v2004_v27 = vadd.f32 %v1832_v55, %v583_v62  ;;  %v454_v57 = vpop.f32.mrf.mxu2  ;;  %v1497_v2 = vpop.eup %1496  ;;  %v762_v3 = vmul.f32 %v730_v54, %v730_v54 }
 0x10f   :  { %1382 = vst [vmem:[%s2074_s4 + $0x20] sm:$0xff] %v1322_v21   ;;  %v2010_v5 = vadd.f32 %v1832_v55, %v568_v63  ;;  %v904_v6 = vmul.f32 %v1497_v2, %v1244_v48  ;;  %v841_v8 = vadd.f32 1.0, %v777_v1  ;;  %v1245_v7 = vadd.f32 -1.0, %v777_v1 }
 0x110   :  { %v651_v40 = vmin.f32 %v2004_v27, 20.0  ;;  %v543_v19 = vpop.f32.mrf.mxu3  ;;  %v826_v4 = vadd.f32 1.0, %v762_v3  ;;  %v1230_v43 = vadd.f32 -1.0, %v762_v3 }
 0x111   :  { %v417_v9 = vpop.f32.mrf.mxu0  ;;  %v636_v12 = vmin.f32 %v2010_v5, 20.0  ;;  %v544_v13 = vadd.f32 %v543_v19, %v454_v57  ;;  %v1499_v15 = vpop.eup %1498  ;;  %v936_v18 = vmul.f32 %v904_v6, %v1958_v58  ;;  %1504 = vrcp.f32 %v841_v8 }
 0x112   :  { %v711_v11 = vmul.f32 1.442695, %v651_v40  ;;  %v506_v20 = vpop.f32.mrf.mxu1  ;;  %v1501_v22 = vpop.eup %1500  ;;  %1506 = vrcp.f32 %v826_v4  ;;  %v746_v23 = vadd.f32 1.0, %v1499_v15 }
 0x113   :  { %v681_v26 = vmul.f32 1.442695, %v636_v12  ;;  %v584_v28 = vmul.f32 %v1827_v52, %v544_v13  ;;  %v1362_v29 = vpack.c.bf16 %v936_v18, %v935_v16  ;;  %v507_v14 = vadd.f32 %v506_v20, %v417_v9 }
 0x114   :  { %v1503_v25 = vpop.eup %1502  ;;  %1508 = vpow2.f32 %v711_v11  ;;  %v778_v30 = vmul.f32 %v746_v23, %v746_v23  ;;  %v889_v34 = vmul.f32 %v1501_v22, %v1229_v10 }
 0x115   :  { %v731_v32 = vadd.f32 1.0, %v1503_v25  ;;  %1510 = vpow2.f32 %v681_v26  ;;  %v2018_v17 = vadd.f32 %v1832_v55, %v584_v28  ;;  %1390 = vst [vmem:[%s2074_s4 + $0x60] sm:$0xff] %v1362_v29   ;;  %v569_v58 = vmul.f32 %v1827_v52, %v507_v14 }
 0x116   :  { %v457_v33 = vpop.f32.mrf.mxu2  ;;  %v842_v36 = vadd.f32 1.0, %v778_v30  ;;  %v921_v61 = vmul.f32 %v889_v34, %v1966_v31  ;;  %v1246_v62 = vadd.f32 -1.0, %v778_v30 }
 0x117   :  { %v763_v38 = vmul.f32 %v731_v32, %v731_v32  ;;  %v652_v39 = vmin.f32 %v2018_v17, 20.0  ;;  %v1505_v41 = vpop.eup %1504  ;;  %v2026_v44 = vadd.f32 %v1832_v55, %v569_v58 }
 0x118   :  { %v546_v24 = vpop.f32.mrf.mxu3  ;;  %v1507_v35 = vpop.eup %1506  ;;  %1512 = vrcp.f32 %v842_v36  ;;  %v905_v6 = vmul.f32 %v1505_v41, %v1245_v7 }
 0x119   :  { %v827_v42 = vadd.f32 1.0, %v763_v38  ;;  %v890_v47 = vmul.f32 %v1507_v35, %v1230_v43  ;;  %v713_v49 = vmul.f32 1.442695, %v652_v39  ;;  %v637_v50 = vmin.f32 %v2026_v44, 20.0  ;;  %v419_v56 = vpop.f32.mrf.mxu0 }
 0x11a   :  { %v1509_v45 = vpop.eup %1508  ;;  %v547_v48 = vadd.f32 %v546_v24, %v457_v33  ;;  %v508_v59 = vpop.f32.mrf.mxu1  ;;  %v937_v20 = vmul.f32 %v905_v6, %v1974_v46  ;;  %v1231_v23 = vadd.f32 -1.0, %v763_v38 }
 0x11b   :  { %v1511_v60 = vpop.eup %1510  ;;  %v747_v21 = vadd.f32 1.0, %v1509_v45  ;;  %v509_v54 = vadd.f32 %v508_v59, %v419_v56  ;;  %v922_v63 = vmul.f32 %v890_v47, %v1977_v53  ;;  %1514 = vpow2.f32 %v713_v49 }
 0x11c   :  { %v732_v0 = vadd.f32 1.0, %v1511_v60  ;;  %v683_v1 = vmul.f32 1.442695, %v637_v50  ;;  %1516 = vrcp.f32 %v827_v42  ;;  %v585_v2 = vmul.f32 %v1827_v52, %v547_v48 }
 0x11d   :  { %v779_v57 = vmul.f32 %v747_v21, %v747_v21  ;;  %v570_v3 = vmul.f32 %v1827_v52, %v509_v54  ;;  %v1327_v8 = vpack.c.bf16 %v922_v63, %v921_v61 }
 0x11e   :  { %v764_v40 = vmul.f32 %v732_v0, %v732_v0  ;;  %1518 = vpow2.f32 %v683_v1  ;;  %v1513_v19 = vpop.eup %1512  ;;  %v2034_v31 = vadd.f32 %v1832_v55, %v585_v2  ;;  %v459_v12 = vpop.f32.mrf.mxu2 }
 0x11f   :  { %v2037_v9 = vadd.f32 %v1832_v55, %v570_v3  ;;  %1383 = vst [vmem:[%s2074_s4 + $0x28] sm:$0xff] %v1327_v8   ;;  %v906_v53 = vmul.f32 %v1513_v19, %v1246_v62  ;;  %v843_v10 = vadd.f32 1.0, %v779_v57  ;;  %v1247_v47 = vadd.f32 -1.0, %v779_v57 }
 0x120   :  { %v828_v4 = vadd.f32 1.0, %v764_v40  ;;  %v548_v13 = vpop.f32.mrf.mxu3  ;;  %v653_v15 = vmin.f32 %v2034_v31, 20.0  ;;  %v1232_v46 = vadd.f32 -1.0, %v764_v40 }
 0x121   :  { %v638_v16 = vmin.f32 %v2037_v9, 20.0  ;;  %v549_v18 = vadd.f32 %v548_v13, %v459_v12  ;;  %v1515_v11 = vpop.eup %1514  ;;  %v938_v22 = vmul.f32 %v906_v53, %v1988_v51 }
 0x122   :  { %1520 = vrcp.f32 %v828_v4  ;;  %v1517_v26 = vpop.eup %1516  ;;  %v748_v28 = vadd.f32 1.0, %v1515_v11  ;;  %v715_v25 = vmul.f32 1.442695, %v653_v15 }
 0x123   :  { %v685_v29 = vmul.f32 1.442695, %v638_v16  ;;  %v586_v14 = vmul.f32 %v1827_v52, %v549_v18  ;;  %v1367_v32 = vpack.c.bf16 %v938_v22, %v937_v20  ;;  %1522 = vrcp.f32 %v843_v10 }
 0x124   :  { %v1519_v30 = vpop.eup %1518  ;;  %v780_v58 = vmul.f32 %v748_v28, %v748_v28  ;;  %1524 = vpow2.f32 %v715_v25  ;;  %v891_v51 = vmul.f32 %v1517_v26, %v1231_v23 }
 0x125   :  { %v733_v33 = vadd.f32 1.0, %v1519_v30  ;;  %v622_v34 = vadd.f32 %v1832_v55, %v586_v14  ;;  %1391 = vst [vmem:[%s2074_s4 + $0x68] sm:$0xff] %v1367_v32   ;;  %1526 = vpow2.f32 %v685_v29 }
 0x126   :  { %v844_v36 = vadd.f32 1.0, %v780_v58  ;;  %v923_v7 = vmul.f32 %v891_v51, %v1996_v37  ;;  %v1248_v59 = vadd.f32 -1.0, %v780_v58 }
 0x127   :  { %v765_v38 = vmul.f32 %v733_v33, %v733_v33  ;;  %v654_v39 = vmin.f32 %v622_v34, 20.0 }
 0x128   :  { %v1521_v41 = vpop.eup %1520  ;;  %1528 = vrcp.f32 %v844_v36 }
 0x129   :  { %v892_v52 = vmul.f32 %v1521_v41, %v1232_v46  ;;  %v1523_v43 = vpop.eup %1522  ;;  %v717_v24 = vmul.f32 1.442695, %v654_v39  ;;  %v829_v42 = vadd.f32 1.0, %v765_v38  ;;  %v1233_v2 = vadd.f32 -1.0, %v765_v38 }
 0x12a   :  { %v1525_v35 = vpop.eup %1524  ;;  %v907_v56 = vmul.f32 %v1523_v43, %v1247_v47 }
 0x12b   :  { %v924_v55 = vmul.f32 %v892_v52, %v2010_v5  ;;  %v1527_v45 = vpop.eup %1526  ;;  %v749_v49 = vadd.f32 1.0, %v1525_v35  ;;  %1530 = vpow2.f32 %v717_v24 }
 0x12c   :  { %v734_v48 = vadd.f32 1.0, %v1527_v45  ;;  %1532 = vrcp.f32 %v829_v42  ;;  %v939_v63 = vmul.f32 %v907_v56, %v2004_v27 }
 0x12d   :  { %v1332_v50 = vpack.c.bf16 %v924_v55, %v923_v7  ;;  %v781_v60 = vmul.f32 %v749_v49, %v749_v49 }
 0x12e   :  { %v1529_v61 = vpop.eup %1528  ;;  %v766_v62 = vmul.f32 %v734_v48, %v734_v48 }
 0x12f   :  { %1384 = vst [vmem:[%s2074_s4 + $0x30] sm:$0xff] %v1332_v50   ;;  %v908_v37 = vmul.f32 %v1529_v61, %v1248_v59  ;;  %v845_v21 = vadd.f32 1.0, %v781_v60  ;;  %v1249_v4 = vadd.f32 -1.0, %v781_v60 }
 0x130   :  { %v830_v5 = vadd.f32 1.0, %v766_v62  ;;  %v1234_v19 = vadd.f32 -1.0, %v766_v62 }
 0x131   :  { %v1531_v54 = vpop.eup %1530  ;;  %v940_v0 = vmul.f32 %v908_v37, %v2018_v17 }
 0x132   :  { %1534 = vrcp.f32 %v830_v5  ;;  %v750_v1 = vadd.f32 1.0, %v1531_v54  ;;  %v1533_v3 = vpop.eup %1532 }
 0x133   :  { %v1372_v57 = vpack.c.bf16 %v940_v0, %v939_v63  ;;  %1536 = vrcp.f32 %v845_v21  ;;  %v893_v40 = vmul.f32 %v1533_v3, %v1233_v2 }
 0x134   :  { %v782_v6 = vmul.f32 %v750_v1, %v750_v1 }
 0x135   :  { %1392 = vst [vmem:[%s2074_s4 + $0x70] sm:$0xff] %v1372_v57   ;;  %v925_v17 = vmul.f32 %v893_v40, %v2026_v44 }
 0x136   :  { %v846_v8 = vadd.f32 1.0, %v782_v6  ;;  %v1250_v16 = vadd.f32 -1.0, %v782_v6 }
 0x138   :  { %v1535_v53 = vpop.eup %1534  ;;  %1538 = vrcp.f32 %v846_v8 }
 0x139   :  { %v894_v10 = vmul.f32 %v1535_v53, %v1234_v19  ;;  %v1537_v27 = vpop.eup %1536 }
 0x13a   :  { %v909_v13 = vmul.f32 %v1537_v27, %v1249_v4 }
 0x13b   :  { %v926_v12 = vmul.f32 %v894_v10, %v2037_v9 }
 0x13c   :  { %v941_v20 = vmul.f32 %v909_v13, %v2034_v31 }
 0x13d   :  { %v1337_v15 = vpack.c.bf16 %v926_v12, %v925_v17 }
 0x13e   :  { %v1539_v18 = vpop.eup %1538 }
 0x13f   :  { %1385 = vst [vmem:[%s2074_s4 + $0x38] sm:$0xff] %v1337_v15   ;;  %v910_v11 = vmul.f32 %v1539_v18, %v1250_v16 }
 0x141   :  { %v942_v22 = vmul.f32 %v910_v11, %v622_v34 }
 0x143   :  { %v1377_v23 = vpack.c.bf16 %v942_v22, %v941_v20 }
 0x145   :  { %1393 = vst [vmem:[%s2074_s4 + $0x78] sm:$0xff] %v1377_v23  }

// kernel: mbsfc_forward.29
= control target key start
LH: loop header
LB: loop body
LE: loop exit
PB: predicated region body
PF: predicated region fallthrough
CT: control target
= control target key end

     0   :  { %vm314_vm0 = vcmask 916480   ;;  %s2066_s1 = inlined_call_operand.vmem [shape: bf16[240,128], index: 1, kind: input, shape index: {}]   ;;  %s2067_s0 = inlined_call_operand.vmem [shape: bf16[256,240], index: 0, kind: input, shape index: {}]   ;;  %s2068_s2 = inlined_call_operand.vmem [shape: f32[1,128], index: 2, kind: input, shape index: {}]   ;;  %s2069_s3 = inlined_call_operand.vmem [shape: f32[1,128], index: 3, kind: input, shape index: {}]   ;;  %s2070_s4 = inlined_call_operand.vmem [shape: bf16[256,128], index: 4, kind: output, shape index: {}]  }
   0x1   :  { %v1276_v0 = vld [vmem:[%s2066_s1 + $0x38] sm:$0xff]  ;;  %v1283_v1 = vld [vmem:[%s2066_s1 + $0x70] sm:$0xff]  ;;  %v1282_v3 = vld [vmem:[%s2066_s1 + $0x68] sm:$0xff] }
   0x2   :  { %363 = vmatpush.bf16.msra.mxu0 %v1276_v0  ;;  %1379 = vmatpush.bf16.msra.mxu2 %v1276_v0  ;;  %v1275_v2 = vld [vmem:[%s2066_s1 + $0x30] sm:$0xff]  ;;  %v1274_v4 = vld [vmem:[%s2066_s1 + $0x28] sm:$0xff]  ;;  %v1281_v5 = vld [vmem:[%s2066_s1 + $0x60] sm:$0xff] }
   0x3   :  { %453 = vmatpush.bf16.msra.mxu1 %v1283_v1  ;;  %1387 = vmatpush.bf16.msra.mxu3 %v1283_v1  ;;  %v1273_v6 = vld [vmem:[%s2066_s1 + $0x20] sm:$0xff]  ;;  %v1280_v7 = vld [vmem:[%s2066_s1 + $0x58] sm:$0xff]  ;;  %v1279_v9 = vld [vmem:[%s2066_s1 + $0x50] sm:$0xff] }
   0x4   :  { %v1272_v8 = vld [vmem:[%s2066_s1 + $0x18] sm:$0xff]  ;;  %v1271_v10 = vld [vmem:[%s2066_s1 + $0x10] sm:$0xff]  ;;  %v1278_v11 = vld [vmem:[%s2066_s1 + $0x48] sm:$0xff] }
   0x5   :  { %v1270_v12 = vld [vmem:[%s2066_s1 + $0x8] sm:$0xff]  ;;  %v1277_v13 = vld [vmem:[%s2066_s1 + $0x40] sm:$0xff]  ;;  %v1255_v16 = vld [vmem:[%s2067_s0 + $0x94] sm:$0xf] }
   0x6   :  { %364 = vmatpush.bf16.msra.mxu0 %v1275_v2  ;;  %1380 = vmatpush.bf16.msra.mxu2 %v1275_v2  ;;  %v1237_v14 = vld [vmem:[%s2067_s0 + $0x4] sm:$0xf]  ;;  %v1005_v15 = vld [vmem:[%s2067_s0 + $0x8] sm:$0xf0]  ;;  %v1077_v17 = vld [vmem:[%s2067_s0 + $0x98] sm:$0xf0] }
   0x7   :  { %454 = vmatpush.bf16.msra.mxu1 %v1282_v3  ;;  %1388 = vmatpush.bf16.msra.mxu3 %v1282_v3  ;;  %v1008_v18 = vor.u32 %v1237_v14, %v1005_v15  ;;  %v1269_v19 = vld [vmem:[%s2066_s1] sm:$0xff]  ;;  %v1238_v21 = vld [vmem:[%s2067_s0 + $0x4] sm:$0xf0]  ;;  %v1080_v24 = vor.u32 %v1255_v16, %v1077_v17  ;;  %v1239_v27 = vld [vmem:[%s2067_s0 + $0x14] sm:$0xf] }
   0x8   :  { %v1003_v20 = vld [vmem:[%s2067_s0] sm:$0xf]  ;;  %v1254_v23 = vld [vmem:[%s2067_s0 + $0x84] sm:$0xf0]  ;;  %v1013_v28 = vld [vmem:[%s2067_s0 + $0x18] sm:$0xf0] }
   0x9   :  { %v1067_v22 = vld [vmem:[%s2067_s0 + $0x80] sm:$0xf]  ;;  %v1004_v25 = vor.u32 %v1238_v21, %v1003_v20  ;;  %v1257_v29 = vld [vmem:[%s2067_s0 + $0xa4] sm:$0xf]  ;;  %v1085_v30 = vld [vmem:[%s2067_s0 + $0xa8] sm:$0xf0]  ;;  %v1016_v31 = vor.u32 %v1239_v27, %v1013_v28 }
   0xa   :  { %365 = vmatpush.bf16.msra.mxu0 %v1274_v4  ;;  %1381 = vmatpush.bf16.msra.mxu2 %v1274_v4  ;;  %v1068_v26 = vor.u32 %v1254_v23, %v1067_v22  ;;  %v1011_v32 = vld [vmem:[%s2067_s0 + $0x10] sm:$0xf]  ;;  %v1240_v33 = vld [vmem:[%s2067_s0 + $0x14] sm:$0xf0]  ;;  %v1088_v36 = vor.u32 %v1257_v29, %v1085_v30  ;;  %v1241_v39 = vld [vmem:[%s2067_s0 + $0x24] sm:$0xf] }
   0xb   :  { %455 = vmatpush.bf16.msra.mxu1 %v1281_v5  ;;  %1389 = vmatpush.bf16.msra.mxu3 %v1281_v5  ;;  %v1075_v34 = vld [vmem:[%s2067_s0 + $0x90] sm:$0xf]  ;;  %v1256_v35 = vld [vmem:[%s2067_s0 + $0x94] sm:$0xf0]  ;;  %v1012_v37 = vor.u32 %v1240_v33, %v1011_v32  ;;  %v1021_v40 = vld [vmem:[%s2067_s0 + $0x28] sm:$0xf0] }
   0xc   :  { %v1076_v38 = vor.u32 %v1256_v35, %v1075_v34  ;;  %v1259_v41 = vld [vmem:[%s2067_s0 + $0xb4] sm:$0xf]  ;;  %v1093_v42 = vld [vmem:[%s2067_s0 + $0xb8] sm:$0xf0]  ;;  %v1024_v43 = vor.u32 %v1241_v39, %v1021_v40  ;;  %v1019_v44 = vld [vmem:[%s2067_s0 + $0x20] sm:$0xf] }
   0xd   :  { %v1242_v45 = vld [vmem:[%s2067_s0 + $0x24] sm:$0xf0]  ;;  %v1083_v46 = vld [vmem:[%s2067_s0 + $0xa0] sm:$0xf]  ;;  %v1096_v48 = vor.u32 %v1259_v41, %v1093_v42  ;;  %v1243_v51 = vld [vmem:[%s2067_s0 + $0x34] sm:$0xf] }
   0xe   :  { %366 = vmatpush.bf16.msra.mxu0 %v1273_v6  ;;  %1382 = vmatpush.bf16.msra.mxu2 %v1273_v6  ;;  %v1258_v47 = vld [vmem:[%s2067_s0 + $0xa4] sm:$0xf0]  ;;  %v1020_v49 = vor.u32 %v1242_v45, %v1019_v44  ;;  %v1029_v52 = vld [vmem:[%s2067_s0 + $0x38] sm:$0xf0]  ;;  %v1261_v53 = vld [vmem:[%s2067_s0 + $0xc4] sm:$0xf] }
   0xf   :  { %456 = vmatpush.bf16.msra.mxu1 %v1280_v7  ;;  %1390 = vmatpush.bf16.msra.mxu3 %v1280_v7  ;;  %v1084_v50 = vor.u32 %v1258_v47, %v1083_v46  ;;  %v1101_v54 = vld [vmem:[%s2067_s0 + $0xc8] sm:$0xf0]  ;;  %v1032_v55 = vor.u32 %v1243_v51, %v1029_v52  ;;  %v1027_v56 = vld [vmem:[%s2067_s0 + $0x30] sm:$0xf]  ;;  %v1244_v57 = vld [vmem:[%s2067_s0 + $0x34] sm:$0xf0] }
  0x10   :  { %v1091_v58 = vld [vmem:[%s2067_s0 + $0xb0] sm:$0xf]  ;;  %v1260_v59 = vld [vmem:[%s2067_s0 + $0xb4] sm:$0xf0]  ;;  %v1104_v60 = vor.u32 %v1261_v53, %v1101_v54  ;;  %v1028_v61 = vor.u32 %v1244_v57, %v1027_v56  ;;  %v1245_v63 = vld [vmem:[%s2067_s0 + $0x44] sm:$0xf] }
  0x11   :  { %v1092_v62 = vor.u32 %v1260_v59, %v1091_v58  ;;  %v1037_v0 = vld [vmem:[%s2067_s0 + $0x48] sm:$0xf0]  ;;  %v1263_v1 = vld [vmem:[%s2067_s0 + $0xd4] sm:$0xf]  ;;  %v1109_v2 = vld [vmem:[%s2067_s0 + $0xd8] sm:$0xf0] }
  0x12   :  { %367 = vmatpush.bf16.msra.mxu0 %v1272_v8  ;;  %1383 = vmatpush.bf16.msra.mxu2 %v1272_v8  ;;  %v1040_v3 = vor.u32 %v1245_v63, %v1037_v0  ;;  %v1035_v4 = vld [vmem:[%s2067_s0 + $0x40] sm:$0xf]  ;;  %v1246_v5 = vld [vmem:[%s2067_s0 + $0x44] sm:$0xf0]  ;;  %v1112_v8 = vor.u32 %v1263_v1, %v1109_v2  ;;  %v1117_v14 = vld [vmem:[%s2067_s0 + $0xe8] sm:$0xf0] }
  0x13   :  { %457 = vmatpush.bf16.msra.mxu1 %v1279_v9  ;;  %1391 = vmatpush.bf16.msra.mxu3 %v1279_v9  ;;  %v1099_v6 = vld [vmem:[%s2067_s0 + $0xc0] sm:$0xf]  ;;  %v1262_v7 = vld [vmem:[%s2067_s0 + $0xc4] sm:$0xf0]  ;;  %v1036_v9 = vor.u32 %v1246_v5, %v1035_v4  ;;  %v1043_v16 = vld [vmem:[%s2067_s0 + $0x50] sm:$0xf] }
  0x14   :  { %v1248_v17 = vld [vmem:[%s2067_s0 + $0x54] sm:$0xf0]  ;;  %v1249_v23 = vld [vmem:[%s2067_s0 + $0x64] sm:$0xf]  ;;  %v1051_v28 = vld [vmem:[%s2067_s0 + $0x60] sm:$0xf] }
  0x15   :  { %v1044_v21 = vor.u32 %v1248_v17, %v1043_v16  ;;  %v1250_v29 = vld [vmem:[%s2067_s0 + $0x64] sm:$0xf0]  ;;  %v1115_v30 = vld [vmem:[%s2067_s0 + $0xe0] sm:$0xf]  ;;  %v1251_v35 = vld [vmem:[%s2067_s0 + $0x74] sm:$0xf] }
  0x16   :  { %368 = vmatpush.bf16.msra.mxu0 %v1271_v10  ;;  %1384 = vmatpush.bf16.msra.mxu2 %v1271_v10  ;;  %v1100_v10 = vor.u32 %v1262_v7, %v1099_v6  ;;  %v1052_v33 = vor.u32 %v1250_v29, %v1051_v28  ;;  %v1252_v39 = vld [vmem:[%s2067_s0 + $0x74] sm:$0xf0]  ;;  %v1123_v40 = vld [vmem:[%s2067_s0 + $0xf0] sm:$0xf]  ;;  %v1253_v44 = vld [vmem:[%s2067_s0 + $0x84] sm:$0xf] }
  0x17   :  { %458 = vmatpush.bf16.msra.mxu1 %v1278_v11  ;;  %1392 = vmatpush.bf16.msra.mxu3 %v1278_v11  ;;  %v1247_v11 = vld [vmem:[%s2067_s0 + $0x54] sm:$0xf]  ;;  %v1268_v41 = vld [vmem:[%s2067_s0 + $0xf4] sm:$0xf0]  ;;  %v1069_v45 = vld [vmem:[%s2067_s0 + $0x88] sm:$0xf0] }
  0x18   :  { %v1072_v46 = vor.u32 %v1253_v44, %v1069_v45  ;;  %v1810_v51 = vld [vmem:[%s2069_s3] ss:$0 sm:$0xff] }
  0x1a   :  { %369 = vmatpush.bf16.msra.mxu0 %v1270_v12  ;;  %1385 = vmatpush.bf16.msra.mxu2 %v1270_v12  ;;  %v1045_v12 = vld [vmem:[%s2067_s0 + $0x58] sm:$0xf0] }
  0x1b   :  { %459 = vmatpush.bf16.msra.mxu1 %v1277_v13  ;;  %1393 = vmatpush.bf16.msra.mxu3 %v1277_v13  ;;  %v1265_v13 = vld [vmem:[%s2067_s0 + $0xe4] sm:$0xf]  ;;  %v1048_v15 = vor.u32 %v1247_v11, %v1045_v12 }
  0x1c   :  { %v1120_v20 = vor.u32 %v1265_v13, %v1117_v14 }
  0x1e   :  { %1189 = vmatmul.msk.bf16.vlgmr.msra.gmra.mxu1 %vm314_vm0, %v1008_v18  ;;  %370 = vmatpush.bf16.msra.mxu0 %v1269_v19  ;;  %v1107_v18 = vld [vmem:[%s2067_s0 + $0xd0] sm:$0xf] }
  0x1f   :  { %1386 = vmatpush.bf16.msra.mxu2 %v1269_v19  ;;  %1198 = vmatmul.msk.bf16.vlgmr.msra.gmra.mxu3 %vm314_vm0, %v1080_v24  ;;  %v1264_v19 = vld [vmem:[%s2067_s0 + $0xd4] sm:$0xf0]  ;;  %v1053_v24 = vld [vmem:[%s2067_s0 + $0x68] sm:$0xf0] }
  0x20   :  { %v1108_v22 = vor.u32 %v1264_v19, %v1107_v18  ;;  %v1056_v27 = vor.u32 %v1249_v23, %v1053_v24 }
  0x21   :  { %371 = vmatmul.bf16.vlgmr.msra.gmra.mxu0 %v1004_v25  ;;  %v1267_v25 = vld [vmem:[%s2067_s0 + $0xf4] sm:$0xf] }
  0x22   :  { %411 = vmatmul.bf16.vlgmr.msra.gmra.mxu2 %v1068_v26  ;;  %v1125_v26 = vld [vmem:[%s2067_s0 + $0xf8] sm:$0xf0] }
  0x23   :  { %v1128_v32 = vor.u32 %v1267_v25, %v1125_v26 }
  0x2e   :  { %1190 = vmatmul.msk.bf16.gmra.mxu1 %vm314_vm0, %v1016_v31  ;;  %v1266_v31 = vld [vmem:[%s2067_s0 + $0xe4] sm:$0xf0] }
  0x2f   :  { %1199 = vmatmul.msk.bf16.gmra.mxu3 %vm314_vm0, %v1088_v36  ;;  %v1116_v34 = vor.u32 %v1266_v31, %v1115_v30  ;;  %v1061_v36 = vld [vmem:[%s2067_s0 + $0x78] sm:$0xf0] }
  0x31   :  { %376 = vmatmul.bf16.gmra.mxu0 %v1012_v37  ;;  %v1064_v37 = vor.u32 %v1251_v35, %v1061_v36 }
  0x32   :  { %416 = vmatmul.bf16.gmra.mxu2 %v1076_v38  ;;  %v1059_v38 = vld [vmem:[%s2067_s0 + $0x70] sm:$0xf] }
  0x33   :  { %v1060_v42 = vor.u32 %v1252_v39, %v1059_v38 }
  0x3e   :  { %1191 = vmatmul.msk.bf16.gmra.mxu1 %vm314_vm0, %v1024_v43  ;;  %v1124_v43 = vor.u32 %v1268_v41, %v1123_v40 }
  0x3f   :  { %1200 = vmatmul.msk.bf16.gmra.mxu3 %vm314_vm0, %v1096_v48  ;;  %v1804_v48 = vld [vmem:[%s2068_s2] ss:$0 sm:$0xff] }
  0x41   :  { %381 = vmatmul.bf16.gmra.mxu0 %v1020_v49 }
  0x42   :  { %421 = vmatmul.bf16.gmra.mxu2 %v1084_v50 }
  0x4e   :  { %1192 = vmatmul.msk.bf16.gmra.mxu1 %vm314_vm0, %v1032_v55 }
  0x4f   :  { %1201 = vmatmul.msk.bf16.gmra.mxu3 %vm314_vm0, %v1104_v60 }
  0x51   :  { %386 = vmatmul.bf16.gmra.mxu0 %v1028_v61 }
  0x52   :  { %426 = vmatmul.bf16.gmra.mxu2 %v1092_v62 }
  0x5e   :  { %1193 = vmatmul.msk.bf16.gmra.mxu1 %vm314_vm0, %v1040_v3 }
  0x5f   :  { %1202 = vmatmul.msk.bf16.gmra.mxu3 %vm314_vm0, %v1112_v8 }
  0x61   :  { %391 = vmatmul.bf16.gmra.mxu0 %v1036_v9 }
  0x62   :  { %431 = vmatmul.bf16.gmra.mxu2 %v1100_v10 }
  0x6e   :  { %1194 = vmatmul.msk.bf16.gmra.mxu1 %vm314_vm0, %v1048_v15 }
  0x6f   :  { %1203 = vmatmul.msk.bf16.gmra.mxu3 %vm314_vm0, %v1120_v20 }
  0x71   :  { %396 = vmatmul.bf16.gmra.mxu0 %v1044_v21 }
  0x72   :  { %436 = vmatmul.bf16.gmra.mxu2 %v1108_v22 }
  0x7e   :  { %1195 = vmatmul.msk.bf16.gmra.mxu1 %vm314_vm0, %v1056_v27 }
  0x7f   :  { %1204 = vmatmul.msk.bf16.gmra.mxu3 %vm314_vm0, %v1128_v32 }
  0x81   :  { %401 = vmatmul.bf16.gmra.mxu0 %v1052_v33 }
  0x82   :  { %441 = vmatmul.bf16.gmra.mxu2 %v1116_v34 }
  0x8e   :  { %1196 = vmatmul.msk.bf16.gmra.mxu1 %vm314_vm0, %v1064_v37 }
  0x91   :  { %406 = vmatmul.bf16.gmra.mxu0 %v1060_v42 }
  0x92   :  { %446 = vmatmul.bf16.gmra.mxu2 %v1124_v43 }
  0x9b   :  { %v461_v47 = vpop.f32.mrf.mxu1 }
  0x9e   :  { %1197 = vmatmul.msk.bf16.gmra.mxu1 %vm314_vm0, %v1072_v46  ;;  %v372_v49 = vpop.f32.mrf.mxu0 }
  0x9f   :  { %v462_v50 = vadd.f32 %v461_v47, %v372_v49 }
  0xa1   :  { %v545_v52 = vmul.f32 %v1804_v48, %v462_v50 }
  0xa2   :  { %v506_v53 = vpop.f32.mrf.mxu3 }
  0xa3   :  { %v1814_v54 = vadd.f32 %v1810_v51, %v545_v52  ;;  %v463_v55 = vpop.f32.mrf.mxu1 }
  0xa5   :  { %v613_v56 = vmin.f32 %v1814_v54, 20.0  ;;  %v1817_v57 = vpop.f32.mrf.mxu2 }
  0xa6   :  { %v374_v58 = vpop.f32.mrf.mxu0 }
  0xa7   :  { %v645_v59 = vmul.f32 1.442695, %v613_v56  ;;  %v464_v60 = vadd.f32 %v463_v55, %v374_v58 }
  0xa9   :  { %1396 = vpow2.f32 %v645_v59  ;;  %v546_v61 = vmul.f32 %v1804_v48, %v464_v60 }
  0xaa   :  { %v508_v62 = vpop.f32.mrf.mxu3 }
  0xab   :  { %v1821_v63 = vadd.f32 %v1810_v51, %v546_v61  ;;  %v466_v0 = vpop.f32.mrf.mxu1 }
  0xad   :  { %v614_v1 = vmin.f32 %v1821_v63, 20.0  ;;  %v1824_v2 = vpop.f32.mrf.mxu2 }
  0xae   :  { %v377_v3 = vpop.f32.mrf.mxu0 }
  0xaf   :  { %v1397_v4 = vpop.eup %1396  ;;  %v647_v5 = vmul.f32 1.442695, %v614_v1  ;;  %v467_v6 = vadd.f32 %v466_v0, %v377_v3 }
  0xb0   :  { %v709_v7 = vadd.f32 1.0, %v1397_v4 }
  0xb1   :  { %1398 = vpow2.f32 %v647_v5  ;;  %v547_v8 = vmul.f32 %v1804_v48, %v467_v6 }
  0xb2   :  { %v741_v9 = vmul.f32 %v709_v7, %v709_v7  ;;  %v511_v10 = vpop.f32.mrf.mxu3 }
  0xb3   :  { %v1828_v11 = vadd.f32 %v1810_v51, %v547_v8  ;;  %v468_v12 = vpop.f32.mrf.mxu1 }
  0xb4   :  { %v805_v13 = vadd.f32 1.0, %v741_v9  ;;  %v1205_v40 = vadd.f32 -1.0, %v741_v9 }
  0xb5   :  { %v615_v14 = vmin.f32 %v1828_v11, 20.0  ;;  %v417_v15 = vpop.f32.mrf.mxu2 }
  0xb6   :  { %v507_v16 = vadd.f32 %v506_v53, %v417_v15  ;;  %v379_v17 = vpop.f32.mrf.mxu0  ;;  %1400 = vrcp.f32 %v805_v13 }
  0xb7   :  { %v1399_v18 = vpop.eup %1398  ;;  %v649_v19 = vmul.f32 1.442695, %v615_v14  ;;  %v469_v20 = vadd.f32 %v468_v12, %v379_v17 }
  0xb8   :  { %v710_v21 = vadd.f32 1.0, %v1399_v18  ;;  %v563_v22 = vmul.f32 %v1804_v48, %v507_v16 }
  0xb9   :  { %1402 = vpow2.f32 %v649_v19  ;;  %v548_v23 = vmul.f32 %v1804_v48, %v469_v20 }
  0xba   :  { %v742_v24 = vmul.f32 %v710_v21, %v710_v21  ;;  %v1834_v25 = vadd.f32 %v1810_v51, %v563_v22  ;;  %v1836_v26 = vpop.f32.mrf.mxu3 }
  0xbb   :  { %v1839_v27 = vadd.f32 %v1810_v51, %v548_v23  ;;  %v471_v28 = vpop.f32.mrf.mxu1 }
  0xbc   :  { %v806_v29 = vadd.f32 1.0, %v742_v24  ;;  %v631_v30 = vmin.f32 %v1834_v25, 20.0  ;;  %v1401_v33 = vpop.eup %1400  ;;  %v1206_v47 = vadd.f32 -1.0, %v742_v24 }
  0xbd   :  { %v616_v31 = vmin.f32 %v1839_v27, 20.0  ;;  %v419_v32 = vpop.f32.mrf.mxu2  ;;  %v869_v44 = vmul.f32 %v1401_v33, %v1205_v40 }
  0xbe   :  { %1404 = vrcp.f32 %v806_v29  ;;  %v681_v34 = vmul.f32 1.442695, %v631_v30  ;;  %v509_v35 = vadd.f32 %v508_v62, %v419_v32  ;;  %v382_v36 = vpop.f32.mrf.mxu0 }
  0xbf   :  { %v1403_v37 = vpop.eup %1402  ;;  %v651_v38 = vmul.f32 1.442695, %v616_v31  ;;  %v472_v39 = vadd.f32 %v471_v28, %v382_v36  ;;  %v901_v62 = vmul.f32 %v869_v44, %v1814_v54 }
  0xc0   :  { %v711_v41 = vadd.f32 1.0, %v1403_v37  ;;  %1406 = vpow2.f32 %v681_v34  ;;  %v564_v42 = vmul.f32 %v1804_v48, %v509_v35 }
  0xc1   :  { %1408 = vpow2.f32 %v651_v38  ;;  %v549_v43 = vmul.f32 %v1804_v48, %v472_v39 }
  0xc2   :  { %v743_v45 = vmul.f32 %v711_v41, %v711_v41  ;;  %v1846_v46 = vadd.f32 %v1810_v51, %v564_v42  ;;  %v1851_v52 = vpop.f32.mrf.mxu3 }
  0xc3   :  { %v1849_v49 = vadd.f32 %v1810_v51, %v549_v43  ;;  %v473_v50 = vpop.f32.mrf.mxu1 }
  0xc4   :  { %v1405_v53 = vpop.eup %1404  ;;  %v807_v55 = vadd.f32 1.0, %v743_v45  ;;  %v632_v56 = vmin.f32 %v1846_v46, 20.0  ;;  %v1207_v35 = vadd.f32 -1.0, %v743_v45 }
  0xc5   :  { %v870_v58 = vmul.f32 %v1405_v53, %v1206_v47  ;;  %v617_v59 = vmin.f32 %v1849_v49, 20.0  ;;  %v422_v60 = vpop.f32.mrf.mxu2 }
  0xc6   :  { %v1407_v61 = vpop.eup %1406  ;;  %1410 = vrcp.f32 %v807_v55  ;;  %v683_v0 = vmul.f32 1.442695, %v632_v56  ;;  %v512_v1 = vadd.f32 %v511_v10, %v422_v60  ;;  %v384_v3 = vpop.f32.mrf.mxu0 }
  0xc7   :  { %v1409_v4 = vpop.eup %1408  ;;  %v902_v5 = vmul.f32 %v870_v58, %v1821_v63  ;;  %v727_v6 = vadd.f32 1.0, %v1407_v61  ;;  %v653_v7 = vmul.f32 1.442695, %v617_v59  ;;  %v474_v8 = vadd.f32 %v473_v50, %v384_v3 }
  0xc8   :  { %v712_v9 = vadd.f32 1.0, %v1409_v4  ;;  %1412 = vpow2.f32 %v683_v0  ;;  %v565_v12 = vmul.f32 %v1804_v48, %v512_v1 }
  0xc9   :  { %v1287_v13 = vpack.c.bf16 %v902_v5, %v901_v62  ;;  %v759_v14 = vmul.f32 %v727_v6, %v727_v6  ;;  %1414 = vpow2.f32 %v653_v7  ;;  %v550_v15 = vmul.f32 %v1804_v48, %v474_v8 }
  0xca   :  { %v744_v54 = vmul.f32 %v712_v9, %v712_v9  ;;  %v1860_v16 = vadd.f32 %v1810_v51, %v565_v12  ;;  %v1870_v23 = vpop.f32.mrf.mxu3 }
  0xcb   :  { %1288 = vst [vmem:[%s2070_s4] sm:$0xff] %v1287_v13   ;;  %v823_v63 = vadd.f32 1.0, %v759_v14  ;;  %v1866_v10 = vadd.f32 %v1810_v51, %v550_v15  ;;  %v476_v17 = vpop.f32.mrf.mxu1  ;;  %v1223_v50 = vadd.f32 -1.0, %v759_v14 }
  0xcc   :  { %v1411_v18 = vpop.eup %1410  ;;  %v808_v19 = vadd.f32 1.0, %v744_v54  ;;  %v633_v20 = vmin.f32 %v1860_v16, 20.0 }
  0xcd   :  { %v618_v21 = vmin.f32 %v1866_v10, 20.0  ;;  %v424_v22 = vpop.f32.mrf.mxu2  ;;  %v871_v40 = vmul.f32 %v1411_v18, %v1207_v35 }
  0xce   :  { %v1413_v24 = vpop.eup %1412  ;;  %1416 = vrcp.f32 %v808_v19  ;;  %v685_v28 = vmul.f32 1.442695, %v633_v20  ;;  %v514_v29 = vadd.f32 %v1836_v26, %v424_v22  ;;  %v387_v30 = vpop.f32.mrf.mxu0  ;;  %v1208_v26 = vadd.f32 -1.0, %v744_v54 }
  0xcf   :  { %v1415_v31 = vpop.eup %1414  ;;  %1418 = vrcp.f32 %v823_v63  ;;  %v728_v32 = vadd.f32 1.0, %v1413_v24  ;;  %v655_v33 = vmul.f32 1.442695, %v618_v21  ;;  %v477_v34 = vadd.f32 %v476_v17, %v387_v30 }
  0xd0   :  { %v713_v36 = vadd.f32 1.0, %v1415_v31  ;;  %1420 = vpow2.f32 %v685_v28  ;;  %v566_v37 = vmul.f32 %v1804_v48, %v514_v29  ;;  %v903_v62 = vmul.f32 %v871_v40, %v1828_v11 }
  0xd1   :  { %v760_v38 = vmul.f32 %v728_v32, %v728_v32  ;;  %1422 = vpow2.f32 %v655_v33  ;;  %v551_v39 = vmul.f32 %v1804_v48, %v477_v34 }
  0xd2   :  { %v745_v41 = vmul.f32 %v713_v36, %v713_v36  ;;  %v1876_v42 = vadd.f32 %v1810_v51, %v566_v37  ;;  %v1886_v9 = vpop.f32.mrf.mxu3 }
  0xd3   :  { %v824_v43 = vadd.f32 1.0, %v760_v38  ;;  %v1879_v44 = vadd.f32 %v1810_v51, %v551_v39  ;;  %v478_v47 = vpop.f32.mrf.mxu1 }
  0xd4   :  { %v1417_v45 = vpop.eup %1416  ;;  %v809_v53 = vadd.f32 1.0, %v745_v41  ;;  %v634_v55 = vmin.f32 %v1876_v42, 20.0  ;;  %v1209_v30 = vadd.f32 -1.0, %v745_v41 }
  0xd5   :  { %v1419_v56 = vpop.eup %1418  ;;  %v872_v58 = vmul.f32 %v1417_v45, %v1208_v26  ;;  %1424 = vrcp.f32 %v824_v43  ;;  %v619_v59 = vmin.f32 %v1879_v44, 20.0  ;;  %v427_v60 = vpop.f32.mrf.mxu2 }
  0xd6   :  { %v1421_v61 = vpop.eup %1420  ;;  %1426 = vrcp.f32 %v809_v53  ;;  %v687_v0 = vmul.f32 1.442695, %v634_v55  ;;  %v517_v1 = vadd.f32 %v1851_v52, %v427_v60  ;;  %v389_v3 = vpop.f32.mrf.mxu0  ;;  %v887_v12 = vmul.f32 %v1419_v56, %v1223_v50 }
  0xd7   :  { %v1423_v4 = vpop.eup %1422  ;;  %v904_v5 = vmul.f32 %v872_v58, %v1839_v27  ;;  %v729_v6 = vadd.f32 1.0, %v1421_v61  ;;  %v657_v7 = vmul.f32 1.442695, %v619_v59  ;;  %v479_v8 = vadd.f32 %v478_v47, %v389_v3 }
  0xd8   :  { %v714_v13 = vadd.f32 1.0, %v1423_v4  ;;  %1428 = vpow2.f32 %v687_v0  ;;  %v567_v14 = vmul.f32 %v1804_v48, %v517_v1  ;;  %v1224_v52 = vadd.f32 -1.0, %v760_v38 }
  0xd9   :  { %v1292_v15 = vpack.c.bf16 %v904_v5, %v903_v62  ;;  %v761_v11 = vmul.f32 %v729_v6, %v729_v6  ;;  %1430 = vpow2.f32 %v657_v7  ;;  %v552_v54 = vmul.f32 %v1804_v48, %v479_v8 }
  0xda   :  { %v746_v63 = vmul.f32 %v714_v13, %v714_v13  ;;  %v1891_v17 = vadd.f32 %v1810_v51, %v567_v14  ;;  %v919_v29 = vmul.f32 %v887_v12, %v1834_v25 }
  0xdb   :  { %v1425_v27 = vpop.eup %1424  ;;  %1364 = vst [vmem:[%s2070_s4 + $0x8] sm:$0xff] %v1292_v15   ;;  %v825_v18 = vadd.f32 1.0, %v761_v11  ;;  %v1897_v19 = vadd.f32 %v1810_v51, %v552_v54  ;;  %v481_v20 = vpop.f32.mrf.mxu1  ;;  %v1225_v61 = vadd.f32 -1.0, %v761_v11 }
  0xdc   :  { %v1427_v21 = vpop.eup %1426  ;;  %v888_v22 = vmul.f32 %v1425_v27, %v1224_v52  ;;  %v810_v24 = vadd.f32 1.0, %v746_v63  ;;  %v635_v28 = vmin.f32 %v1891_v17, 20.0  ;;  %v1210_v55 = vadd.f32 -1.0, %v746_v63 }
  0xdd   :  { %v620_v31 = vmin.f32 %v1897_v19, 20.0  ;;  %v429_v32 = vpop.f32.mrf.mxu2 }
  0xde   :  { %v1429_v33 = vpop.eup %1428  ;;  %v920_v34 = vmul.f32 %v888_v22, %v1846_v46  ;;  %1432 = vrcp.f32 %v810_v24  ;;  %v689_v35 = vmul.f32 1.442695, %v635_v28  ;;  %v519_v36 = vadd.f32 %v1870_v23, %v429_v32  ;;  %v392_v37 = vpop.f32.mrf.mxu0 }
  0xdf   :  { %v1431_v38 = vpop.eup %1430  ;;  %1434 = vrcp.f32 %v825_v18  ;;  %v730_v39 = vadd.f32 1.0, %v1429_v33  ;;  %v659_v40 = vmul.f32 1.442695, %v620_v31  ;;  %v482_v26 = vadd.f32 %v481_v20, %v392_v37  ;;  %v523_v46 = vpop.f32.mrf.mxu3 }
  0xe0   :  { %v1332_v43 = vpack.c.bf16 %v920_v34, %v919_v29  ;;  %v715_v47 = vadd.f32 1.0, %v1431_v38  ;;  %1436 = vpow2.f32 %v689_v35  ;;  %v568_v25 = vmul.f32 %v1804_v48, %v519_v36 }
  0xe1   :  { %v762_v41 = vmul.f32 %v730_v39, %v730_v39  ;;  %1438 = vpow2.f32 %v659_v40  ;;  %v553_v45 = vmul.f32 %v1804_v48, %v482_v26  ;;  %v873_v23 = vmul.f32 %v1427_v21, %v1209_v30 }
  0xe2   :  { %1372 = vst [vmem:[%s2070_s4 + $0x48] sm:$0xff] %v1332_v43   ;;  %v747_v50 = vmul.f32 %v715_v47, %v715_v47  ;;  %v1910_v53 = vadd.f32 %v1810_v51, %v568_v25 }
  0xe3   :  { %v826_v56 = vadd.f32 1.0, %v762_v41  ;;  %v1913_v58 = vadd.f32 %v1810_v51, %v553_v45  ;;  %v483_v59 = vpop.f32.mrf.mxu1  ;;  %v905_v7 = vmul.f32 %v873_v23, %v1849_v49  ;;  %v1226_v22 = vadd.f32 -1.0, %v762_v41 }
  0xe4   :  { %v1433_v60 = vpop.eup %1432  ;;  %v811_v62 = vadd.f32 1.0, %v747_v50  ;;  %v636_v0 = vmin.f32 %v1910_v53, 20.0  ;;  %v1211_v37 = vadd.f32 -1.0, %v747_v50 }
  0xe5   :  { %v1435_v1 = vpop.eup %1434  ;;  %v874_v3 = vmul.f32 %v1433_v60, %v1210_v55  ;;  %1440 = vrcp.f32 %v826_v56  ;;  %v621_v4 = vmin.f32 %v1913_v58, 20.0  ;;  %v432_v5 = vpop.f32.mrf.mxu2 }
  0xe6   :  { %v1437_v6 = vpop.eup %1436  ;;  %1442 = vrcp.f32 %v811_v62  ;;  %v691_v8 = vmul.f32 1.442695, %v636_v0  ;;  %v522_v12 = vadd.f32 %v1886_v9, %v432_v5  ;;  %v394_v13 = vpop.f32.mrf.mxu0  ;;  %v889_v63 = vmul.f32 %v1435_v1, %v1225_v61 }
  0xe7   :  { %v1439_v14 = vpop.eup %1438  ;;  %v906_v15 = vmul.f32 %v874_v3, %v1866_v10  ;;  %v731_v11 = vadd.f32 1.0, %v1437_v6  ;;  %v661_v54 = vmul.f32 1.442695, %v621_v4  ;;  %v484_v52 = vadd.f32 %v483_v59, %v394_v13  ;;  %v526_v31 = vpop.f32.mrf.mxu3 }
  0xe8   :  { %v716_v27 = vadd.f32 1.0, %v1439_v14  ;;  %1444 = vpow2.f32 %v691_v8  ;;  %v569_v18 = vmul.f32 %v1804_v48, %v522_v12  ;;  %v921_v36 = vmul.f32 %v889_v63, %v1860_v16 }
  0xe9   :  { %v1297_v20 = vpack.c.bf16 %v906_v15, %v905_v7  ;;  %v763_v21 = vmul.f32 %v731_v11, %v731_v11  ;;  %1446 = vpow2.f32 %v661_v54  ;;  %v554_v49 = vmul.f32 %v1804_v48, %v484_v52 }
  0xea   :  { %v748_v24 = vmul.f32 %v716_v27, %v716_v27  ;;  %v1923_v9 = vadd.f32 %v1810_v51, %v569_v18 }
  0xeb   :  { %v1441_v28 = vpop.eup %1440  ;;  %1365 = vst [vmem:[%s2070_s4 + $0x10] sm:$0xff] %v1297_v20   ;;  %v827_v10 = vadd.f32 1.0, %v763_v21  ;;  %v1929_v29 = vadd.f32 %v1810_v51, %v554_v49  ;;  %v486_v30 = vpop.f32.mrf.mxu1  ;;  %v1227_v5 = vadd.f32 -1.0, %v763_v21 }
  0xec   :  { %v1443_v32 = vpop.eup %1442  ;;  %v890_v33 = vmul.f32 %v1441_v28, %v1226_v22  ;;  %v812_v34 = vadd.f32 1.0, %v748_v24  ;;  %v637_v35 = vmin.f32 %v1923_v9, 20.0  ;;  %v1212_v62 = vadd.f32 -1.0, %v748_v24 }
  0xed   :  { %v622_v38 = vmin.f32 %v1929_v29, 20.0  ;;  %v434_v39 = vpop.f32.mrf.mxu2 }
  0xee   :  { %v1445_v40 = vpop.eup %1444  ;;  %v922_v26 = vmul.f32 %v890_v33, %v1876_v42  ;;  %1448 = vrcp.f32 %v812_v34  ;;  %v693_v43 = vmul.f32 1.442695, %v637_v35  ;;  %v524_v47 = vadd.f32 %v523_v46, %v434_v39  ;;  %v397_v25 = vpop.f32.mrf.mxu0 }
  0xef   :  { %v1447_v41 = vpop.eup %1446  ;;  %1450 = vrcp.f32 %v827_v10  ;;  %v732_v45 = vadd.f32 1.0, %v1445_v40  ;;  %v663_v23 = vmul.f32 1.442695, %v622_v38  ;;  %v487_v55 = vadd.f32 %v486_v30, %v397_v25  ;;  %v528_v15 = vpop.f32.mrf.mxu3 }
  0xf0   :  { %v1337_v56 = vpack.c.bf16 %v922_v26, %v921_v36  ;;  %v717_v59 = vadd.f32 1.0, %v1447_v41  ;;  %1452 = vpow2.f32 %v693_v43  ;;  %v570_v16 = vmul.f32 %v1804_v48, %v524_v47 }
  0xf1   :  { %v764_v50 = vmul.f32 %v732_v45, %v732_v45  ;;  %1454 = vpow2.f32 %v663_v23  ;;  %v555_v60 = vmul.f32 %v1804_v48, %v487_v55  ;;  %v875_v42 = vmul.f32 %v1443_v32, %v1211_v37 }
  0xf2   :  { %1373 = vst [vmem:[%s2070_s4 + $0x50] sm:$0xff] %v1337_v56   ;;  %v749_v46 = vmul.f32 %v717_v59, %v717_v59  ;;  %v1941_v61 = vadd.f32 %v1810_v51, %v570_v16 }
  0xf3   :  { %v828_v0 = vadd.f32 1.0, %v764_v50  ;;  %v1944_v1 = vadd.f32 %v1810_v51, %v555_v60  ;;  %v488_v3 = vpop.f32.mrf.mxu1  ;;  %v907_v54 = vmul.f32 %v875_v42, %v1879_v44  ;;  %v1228_v33 = vadd.f32 -1.0, %v764_v50 }
  0xf4   :  { %v1449_v4 = vpop.eup %1448  ;;  %v813_v6 = vadd.f32 1.0, %v749_v46  ;;  %v638_v7 = vmin.f32 %v1941_v61, 20.0  ;;  %v1213_v47 = vadd.f32 -1.0, %v749_v46 }
  0xf5   :  { %v1451_v8 = vpop.eup %1450  ;;  %v876_v12 = vmul.f32 %v1449_v4, %v1212_v62  ;;  %1456 = vrcp.f32 %v828_v0  ;;  %v623_v13 = vmin.f32 %v1944_v1, 20.0  ;;  %v437_v14 = vpop.f32.mrf.mxu2 }
  0xf6   :  { %v1453_v11 = vpop.eup %1452  ;;  %1458 = vrcp.f32 %v813_v6  ;;  %v695_v52 = vmul.f32 1.442695, %v638_v7  ;;  %v527_v63 = vadd.f32 %v526_v31, %v437_v14  ;;  %v399_v27 = vpop.f32.mrf.mxu0  ;;  %v891_v24 = vmul.f32 %v1451_v8, %v1227_v5 }
  0xf7   :  { %v1455_v18 = vpop.eup %1454  ;;  %v908_v20 = vmul.f32 %v876_v12, %v1897_v19  ;;  %v733_v21 = vadd.f32 1.0, %v1453_v11  ;;  %v665_v49 = vmul.f32 1.442695, %v623_v13  ;;  %v489_v22 = vadd.f32 %v488_v3, %v399_v27  ;;  %v531_v62 = vpop.f32.mrf.mxu3 }
  0xf8   :  { %v718_v28 = vadd.f32 1.0, %v1455_v18  ;;  %1460 = vpow2.f32 %v695_v52  ;;  %v571_v10 = vmul.f32 %v1804_v48, %v527_v63  ;;  %v923_v43 = vmul.f32 %v891_v24, %v1891_v17 }
  0xf9   :  { %v1302_v30 = vpack.c.bf16 %v908_v20, %v907_v54  ;;  %v765_v32 = vmul.f32 %v733_v21, %v733_v21  ;;  %1462 = vpow2.f32 %v665_v49  ;;  %v556_v44 = vmul.f32 %v1804_v48, %v489_v22 }
  0xfa   :  { %v750_v34 = vmul.f32 %v718_v28, %v718_v28  ;;  %v1953_v31 = vadd.f32 %v1810_v51, %v571_v10 }
  0xfb   :  { %v1457_v35 = vpop.eup %1456  ;;  %1366 = vst [vmem:[%s2070_s4 + $0x18] sm:$0xff] %v1302_v30   ;;  %v829_v19 = vadd.f32 1.0, %v765_v32  ;;  %v1959_v36 = vadd.f32 %v1810_v51, %v556_v44  ;;  %v491_v37 = vpop.f32.mrf.mxu1 }
  0xfc   :  { %v1459_v38 = vpop.eup %1458  ;;  %v892_v39 = vmul.f32 %v1457_v35, %v1228_v33  ;;  %v814_v40 = vadd.f32 1.0, %v750_v34  ;;  %v639_v26 = vmin.f32 %v1953_v31, 20.0  ;;  %v1214_v7 = vadd.f32 -1.0, %v750_v34 }
  0xfd   :  { %v624_v25 = vmin.f32 %v1959_v36, 20.0  ;;  %v439_v41 = vpop.f32.mrf.mxu2 }
  0xfe   :  { %v1461_v45 = vpop.eup %1460  ;;  %v924_v23 = vmul.f32 %v892_v39, %v1910_v53  ;;  %1464 = vrcp.f32 %v814_v40  ;;  %v697_v55 = vmul.f32 1.442695, %v639_v26  ;;  %v529_v56 = vadd.f32 %v528_v15, %v439_v41  ;;  %v402_v59 = vpop.f32.mrf.mxu0 }
  0xff   :  { %v1463_v16 = vpop.eup %1462  ;;  %1466 = vrcp.f32 %v829_v19  ;;  %v734_v50 = vadd.f32 1.0, %v1461_v45  ;;  %v667_v60 = vmul.f32 1.442695, %v624_v25  ;;  %v492_v42 = vadd.f32 %v491_v37, %v402_v59 }
 0x100   :  { %v1342_v0 = vpack.c.bf16 %v924_v23, %v923_v43  ;;  %v719_v3 = vadd.f32 1.0, %v1463_v16  ;;  %1468 = vpow2.f32 %v697_v55  ;;  %v572_v17 = vmul.f32 %v1804_v48, %v529_v56 }
 0x101   :  { %v766_v46 = vmul.f32 %v734_v50, %v734_v50  ;;  %1470 = vpow2.f32 %v667_v60  ;;  %v557_v4 = vmul.f32 %v1804_v48, %v492_v42  ;;  %v877_v53 = vmul.f32 %v1459_v38, %v1213_v47  ;;  %v533_v38 = vpop.f32.mrf.mxu3 }
 0x102   :  { %1374 = vst [vmem:[%s2070_s4 + $0x58] sm:$0xff] %v1342_v0   ;;  %v751_v5 = vmul.f32 %v719_v3, %v719_v3  ;;  %v1971_v6 = vadd.f32 %v1810_v51, %v572_v17  ;;  %v1229_v15 = vadd.f32 -1.0, %v765_v32 }
 0x103   :  { %v830_v8 = vadd.f32 1.0, %v766_v46  ;;  %v1974_v12 = vadd.f32 %v1810_v51, %v557_v4  ;;  %v493_v13 = vpop.f32.mrf.mxu1  ;;  %v909_v21 = vmul.f32 %v877_v53, %v1913_v58  ;;  %v1230_v39 = vadd.f32 -1.0, %v766_v46 }
 0x104   :  { %v1465_v14 = vpop.eup %1464  ;;  %v815_v11 = vadd.f32 1.0, %v751_v5  ;;  %v640_v54 = vmin.f32 %v1971_v6, 20.0  ;;  %v1215_v59 = vadd.f32 -1.0, %v751_v5 }
 0x105   :  { %v1467_v52 = vpop.eup %1466  ;;  %v878_v63 = vmul.f32 %v1465_v14, %v1214_v7  ;;  %1472 = vrcp.f32 %v830_v8  ;;  %v625_v27 = vmin.f32 %v1974_v12, 20.0  ;;  %v442_v18 = vpop.f32.mrf.mxu2 }
 0x106   :  { %v1469_v20 = vpop.eup %1468  ;;  %1474 = vrcp.f32 %v815_v11  ;;  %v699_v49 = vmul.f32 1.442695, %v640_v54  ;;  %v532_v22 = vadd.f32 %v531_v62, %v442_v18  ;;  %v404_v24 = vpop.f32.mrf.mxu0  ;;  %v893_v33 = vmul.f32 %v1467_v52, %v1229_v15 }
 0x107   :  { %v1471_v28 = vpop.eup %1470  ;;  %v910_v10 = vmul.f32 %v878_v63, %v1929_v29  ;;  %v735_v30 = vadd.f32 1.0, %v1469_v20  ;;  %v669_v32 = vmul.f32 1.442695, %v625_v27  ;;  %v494_v44 = vadd.f32 %v493_v13, %v404_v24 }
 0x108   :  { %v720_v34 = vadd.f32 1.0, %v1471_v28  ;;  %1476 = vpow2.f32 %v699_v49  ;;  %v573_v35 = vmul.f32 %v1804_v48, %v532_v22  ;;  %v925_v56 = vmul.f32 %v893_v33, %v1923_v9 }
 0x109   :  { %v1307_v19 = vpack.c.bf16 %v910_v10, %v909_v21  ;;  %v767_v37 = vmul.f32 %v735_v30, %v735_v30  ;;  %1478 = vpow2.f32 %v669_v32  ;;  %v558_v58 = vmul.f32 %v1804_v48, %v494_v44  ;;  %v536_v27 = vpop.f32.mrf.mxu3 }
 0x10a   :  { %v752_v40 = vmul.f32 %v720_v34, %v720_v34  ;;  %v1983_v26 = vadd.f32 %v1810_v51, %v573_v35 }
 0x10b   :  { %v1473_v29 = vpop.eup %1472  ;;  %1367 = vst [vmem:[%s2070_s4 + $0x20] sm:$0xff] %v1307_v19   ;;  %v831_v43 = vadd.f32 1.0, %v767_v37  ;;  %v1989_v47 = vadd.f32 %v1810_v51, %v558_v58  ;;  %v496_v25 = vpop.f32.mrf.mxu1  ;;  %v1231_v20 = vadd.f32 -1.0, %v767_v37 }
 0x10c   :  { %v1475_v41 = vpop.eup %1474  ;;  %v894_v45 = vmul.f32 %v1473_v29, %v1230_v39  ;;  %v816_v23 = vadd.f32 1.0, %v752_v40  ;;  %v641_v55 = vmin.f32 %v1983_v26, 20.0  ;;  %v1216_v11 = vadd.f32 -1.0, %v752_v40 }
 0x10d   :  { %v626_v16 = vmin.f32 %v1989_v47, 20.0  ;;  %v444_v50 = vpop.f32.mrf.mxu2 }
 0x10e   :  { %v1477_v60 = vpop.eup %1476  ;;  %v926_v42 = vmul.f32 %v894_v45, %v1941_v61  ;;  %1480 = vrcp.f32 %v816_v23  ;;  %v701_v62 = vmul.f32 1.442695, %v641_v55  ;;  %v534_v0 = vadd.f32 %v533_v38, %v444_v50  ;;  %v407_v3 = vpop.f32.mrf.mxu0 }
 0x10f   :  { %v1479_v17 = vpop.eup %1478  ;;  %1482 = vrcp.f32 %v831_v43  ;;  %v736_v46 = vadd.f32 1.0, %v1477_v60  ;;  %v671_v4 = vmul.f32 1.442695, %v626_v16  ;;  %v497_v53 = vadd.f32 %v496_v25, %v407_v3 }
 0x110   :  { %v1347_v7 = vpack.c.bf16 %v926_v42, %v925_v56  ;;  %v721_v8 = vadd.f32 1.0, %v1479_v17  ;;  %1484 = vpow2.f32 %v701_v62  ;;  %v574_v9 = vmul.f32 %v1804_v48, %v534_v0 }
 0x111   :  { %v768_v5 = vmul.f32 %v736_v46, %v736_v46  ;;  %1486 = vpow2.f32 %v671_v4  ;;  %v559_v13 = vmul.f32 %v1804_v48, %v497_v53  ;;  %v879_v61 = vmul.f32 %v1475_v41, %v1215_v59  ;;  %v538_v46 = vpop.f32.mrf.mxu3 }
 0x112   :  { %1375 = vst [vmem:[%s2070_s4 + $0x60] sm:$0xff] %v1347_v7   ;;  %v753_v14 = vmul.f32 %v721_v8, %v721_v8  ;;  %v2001_v15 = vadd.f32 %v1810_v51, %v574_v9 }
 0x113   :  { %v832_v54 = vadd.f32 1.0, %v768_v5  ;;  %v2004_v52 = vadd.f32 %v1810_v51, %v559_v13  ;;  %v498_v63 = vpop.f32.mrf.mxu1  ;;  %v911_v32 = vmul.f32 %v879_v61, %v1944_v1  ;;  %v1232_v41 = vadd.f32 -1.0, %v768_v5 }
 0x114   :  { %v1481_v18 = vpop.eup %1480  ;;  %v817_v21 = vadd.f32 1.0, %v753_v14  ;;  %v642_v49 = vmin.f32 %v2001_v15, 20.0  ;;  %v1217_v0 = vadd.f32 -1.0, %v753_v14 }
 0x115   :  { %v1483_v22 = vpop.eup %1482  ;;  %v880_v24 = vmul.f32 %v1481_v18, %v1216_v11  ;;  %1488 = vrcp.f32 %v832_v54  ;;  %v627_v28 = vmin.f32 %v2004_v52, 20.0  ;;  %v447_v10 = vpop.f32.mrf.mxu2 }
 0x116   :  { %v1485_v30 = vpop.eup %1484  ;;  %1490 = vrcp.f32 %v817_v21  ;;  %v703_v44 = vmul.f32 1.442695, %v642_v49  ;;  %v537_v33 = vadd.f32 %v536_v27, %v447_v10  ;;  %v409_v34 = vpop.f32.mrf.mxu0  ;;  %v895_v39 = vmul.f32 %v1483_v22, %v1231_v20 }
 0x117   :  { %v1487_v35 = vpop.eup %1486  ;;  %v912_v19 = vmul.f32 %v880_v24, %v1959_v36  ;;  %v737_v37 = vadd.f32 1.0, %v1485_v30  ;;  %v673_v58 = vmul.f32 1.442695, %v627_v28  ;;  %v499_v38 = vadd.f32 %v498_v63, %v409_v34 }
 0x118   :  { %v722_v40 = vadd.f32 1.0, %v1487_v35  ;;  %1492 = vpow2.f32 %v703_v44  ;;  %v575_v29 = vmul.f32 %v1804_v48, %v537_v33  ;;  %v927_v62 = vmul.f32 %v895_v39, %v1953_v31 }
 0x119   :  { %v1312_v43 = vpack.c.bf16 %v912_v19, %v911_v32  ;;  %v769_v25 = vmul.f32 %v737_v37, %v737_v37  ;;  %1494 = vpow2.f32 %v673_v58  ;;  %v560_v1 = vmul.f32 %v1804_v48, %v499_v38 }
 0x11a   :  { %v754_v45 = vmul.f32 %v722_v40, %v722_v40  ;;  %v2013_v23 = vadd.f32 %v1810_v51, %v575_v29 }
 0x11b   :  { %v1489_v55 = vpop.eup %1488  ;;  %1368 = vst [vmem:[%s2070_s4 + $0x28] sm:$0xff] %v1312_v43   ;;  %v833_v36 = vadd.f32 1.0, %v769_v25  ;;  %v2019_v56 = vadd.f32 %v1810_v51, %v560_v1  ;;  %v501_v59 = vpop.f32.mrf.mxu1  ;;  %v1233_v35 = vadd.f32 -1.0, %v769_v25 }
 0x11c   :  { %v1491_v16 = vpop.eup %1490  ;;  %v896_v50 = vmul.f32 %v1489_v55, %v1232_v41  ;;  %v818_v60 = vadd.f32 1.0, %v754_v45  ;;  %v643_v42 = vmin.f32 %v2013_v23, 20.0  ;;  %v502_v17 = vadd.f32 %v501_v59, %v1817_v57 }
 0x11d   :  { %v628_v3 = vmin.f32 %v2019_v56, 20.0  ;;  %v449_v4 = vpop.f32.mrf.mxu2  ;;  %v1218_v20 = vadd.f32 -1.0, %v754_v45 }
 0x11e   :  { %v1493_v53 = vpop.eup %1492  ;;  %v928_v7 = vmul.f32 %v896_v50, %v1971_v6  ;;  %1496 = vrcp.f32 %v818_v60  ;;  %v705_v8 = vmul.f32 1.442695, %v643_v42  ;;  %v539_v9 = vadd.f32 %v538_v46, %v449_v4 }
 0x11f   :  { %v1495_v5 = vpop.eup %1494  ;;  %1498 = vrcp.f32 %v833_v36  ;;  %v738_v13 = vadd.f32 1.0, %v1493_v53  ;;  %v675_v61 = vmul.f32 1.442695, %v628_v3  ;;  %v561_v11 = vmul.f32 %v1804_v48, %v502_v17 }
 0x120   :  { %v1352_v31 = vpack.c.bf16 %v928_v7, %v927_v62  ;;  %v723_v14 = vadd.f32 1.0, %v1495_v5  ;;  %1500 = vpow2.f32 %v705_v8  ;;  %v576_v54 = vmul.f32 %v1804_v48, %v539_v9 }
 0x121   :  { %v770_v57 = vmul.f32 %v738_v13, %v738_v13  ;;  %1502 = vpow2.f32 %v675_v61  ;;  %v2029_v63 = vadd.f32 %v1810_v51, %v561_v11  ;;  %v881_v6 = vmul.f32 %v1491_v16, %v1217_v0 }
 0x122   :  { %1376 = vst [vmem:[%s2070_s4 + $0x68] sm:$0xff] %v1352_v31   ;;  %v755_v27 = vmul.f32 %v723_v14, %v723_v14  ;;  %v2035_v18 = vadd.f32 %v1810_v51, %v576_v54 }
 0x123   :  { %v834_v21 = vadd.f32 1.0, %v770_v57  ;;  %v629_v49 = vmin.f32 %v2029_v63, 20.0  ;;  %v503_v22 = vpop.f32.mrf.mxu1  ;;  %v913_v34 = vmul.f32 %v881_v6, %v1974_v12  ;;  %v1234_v45 = vadd.f32 -1.0, %v770_v57 }
 0x124   :  { %v1497_v24 = vpop.eup %1496  ;;  %v644_v28 = vmin.f32 %v2035_v18, 20.0  ;;  %v504_v44 = vadd.f32 %v503_v22, %v1824_v2  ;;  %v819_v19 = vadd.f32 1.0, %v755_v27  ;;  %v1219_v46 = vadd.f32 -1.0, %v755_v27 }
 0x125   :  { %v1499_v10 = vpop.eup %1498  ;;  %v882_v30 = vmul.f32 %v1497_v24, %v1218_v20  ;;  %1504 = vrcp.f32 %v834_v21  ;;  %v677_v32 = vmul.f32 1.442695, %v629_v49 }
 0x126   :  { %v1501_v33 = vpop.eup %1500  ;;  %v707_v37 = vmul.f32 1.442695, %v644_v28  ;;  %v562_v40 = vmul.f32 %v1804_v48, %v504_v44  ;;  %v897_v2 = vmul.f32 %v1499_v10, %v1233_v35 }
 0x127   :  { %v1503_v58 = vpop.eup %1502  ;;  %v914_v38 = vmul.f32 %v882_v30, %v1989_v47  ;;  %v739_v39 = vadd.f32 1.0, %v1501_v33  ;;  %1506 = vpow2.f32 %v677_v32 }
 0x128   :  { %v724_v29 = vadd.f32 1.0, %v1503_v58  ;;  %1508 = vpow2.f32 %v707_v37  ;;  %v598_v41 = vadd.f32 %v1810_v51, %v562_v40  ;;  %v929_v60 = vmul.f32 %v897_v2, %v1983_v26 }
 0x129   :  { %v1317_v43 = vpack.c.bf16 %v914_v38, %v913_v34  ;;  %v771_v1 = vmul.f32 %v739_v39, %v739_v39  ;;  %1510 = vrcp.f32 %v819_v19 }
 0x12a   :  { %v756_v12 = vmul.f32 %v724_v29, %v724_v29  ;;  %v630_v47 = vmin.f32 %v598_v41, 20.0 }
 0x12b   :  { %v1505_v25 = vpop.eup %1504  ;;  %1369 = vst [vmem:[%s2070_s4 + $0x30] sm:$0xff] %v1317_v43   ;;  %v835_v48 = vadd.f32 1.0, %v771_v1  ;;  %v1235_v13 = vadd.f32 -1.0, %v771_v1 }
 0x12c   :  { %v898_v55 = vmul.f32 %v1505_v25, %v1234_v45  ;;  %v820_v36 = vadd.f32 1.0, %v756_v12  ;;  %v679_v16 = vmul.f32 1.442695, %v630_v47  ;;  %v1220_v7 = vadd.f32 -1.0, %v756_v12 }
 0x12d   :  { %v1507_v59 = vpop.eup %1506 }
 0x12e   :  { %v1509_v50 = vpop.eup %1508  ;;  %v930_v51 = vmul.f32 %v898_v55, %v2001_v15  ;;  %1512 = vrcp.f32 %v820_v36  ;;  %v725_v42 = vadd.f32 1.0, %v1507_v59 }
 0x12f   :  { %v740_v62 = vadd.f32 1.0, %v1509_v50  ;;  %1514 = vpow2.f32 %v679_v16  ;;  %v1511_v0 = vpop.eup %1510 }
 0x130   :  { %v1357_v3 = vpack.c.bf16 %v930_v51, %v929_v60  ;;  %v757_v17 = vmul.f32 %v725_v42, %v725_v42  ;;  %1516 = vrcp.f32 %v835_v48  ;;  %v883_v53 = vmul.f32 %v1511_v0, %v1219_v46 }
 0x131   :  { %v772_v4 = vmul.f32 %v740_v62, %v740_v62 }
 0x132   :  { %1377 = vst [vmem:[%s2070_s4 + $0x70] sm:$0xff] %v1357_v3   ;;  %v821_v9 = vadd.f32 1.0, %v757_v17  ;;  %v915_v31 = vmul.f32 %v883_v53, %v2004_v52  ;;  %v1221_v28 = vadd.f32 -1.0, %v757_v17 }
 0x133   :  { %v836_v8 = vadd.f32 1.0, %v772_v4  ;;  %v1236_v27 = vadd.f32 -1.0, %v772_v4 }
 0x134   :  { %v1513_v26 = vpop.eup %1512 }
 0x135   :  { %v1515_v15 = vpop.eup %1514  ;;  %v884_v5 = vmul.f32 %v1513_v26, %v1220_v7  ;;  %1518 = vrcp.f32 %v836_v8 }
 0x136   :  { %v726_v61 = vadd.f32 1.0, %v1515_v15  ;;  %v1517_v11 = vpop.eup %1516  ;;  %1520 = vrcp.f32 %v821_v9 }
 0x137   :  { %v916_v14 = vmul.f32 %v884_v5, %v2019_v56  ;;  %v899_v6 = vmul.f32 %v1517_v11, %v1235_v13 }
 0x138   :  { %v758_v54 = vmul.f32 %v726_v61, %v726_v61 }
 0x139   :  { %v1322_v57 = vpack.c.bf16 %v916_v14, %v915_v31  ;;  %v931_v24 = vmul.f32 %v899_v6, %v2013_v23 }
 0x13a   :  { %v822_v20 = vadd.f32 1.0, %v758_v54  ;;  %v1222_v30 = vadd.f32 -1.0, %v758_v54 }
 0x13b   :  { %v1519_v21 = vpop.eup %1518  ;;  %1370 = vst [vmem:[%s2070_s4 + $0x38] sm:$0xff] %v1322_v57  }
 0x13c   :  { %v900_v49 = vmul.f32 %v1519_v21, %v1236_v27  ;;  %1522 = vrcp.f32 %v822_v20  ;;  %v1521_v22 = vpop.eup %1520 }
 0x13d   :  { %v885_v10 = vmul.f32 %v1521_v22, %v1221_v28 }
 0x13e   :  { %v932_v52 = vmul.f32 %v900_v49, %v2035_v18 }
 0x13f   :  { %v917_v33 = vmul.f32 %v885_v10, %v2029_v63 }
 0x140   :  { %v1362_v56 = vpack.c.bf16 %v932_v52, %v931_v24 }
 0x142   :  { %v1523_v32 = vpop.eup %1522  ;;  %1378 = vst [vmem:[%s2070_s4 + $0x78] sm:$0xff] %v1362_v56  }
 0x143   :  { %v886_v44 = vmul.f32 %v1523_v32, %v1222_v30 }
 0x145   :  { %v918_v34 = vmul.f32 %v886_v44, %v598_v41 }
 0x147   :  { %v1327_v35 = vpack.c.bf16 %v918_v34, %v917_v33 }
 0x149   :  { %1371 = vst [vmem:[%s2070_s4 + $0x40] sm:$0xff] %v1327_v35  }

// kernel: mbsfc_forward.21
= control target key start
LH: loop header
LB: loop body
LE: loop exit
PB: predicated region body
PF: predicated region fallthrough
CT: control target
= control target key end

     0   :  { %vm490_vm0 = vcmask 654336   ;;  %s2635_s1 = inlined_call_operand.vmem [shape: bf16[336,128], index: 1, kind: input, shape index: {}]   ;;  %s2636_s0 = inlined_call_operand.vmem [shape: bf16[256,336], index: 0, kind: input, shape index: {}]   ;;  %s2637_s2 = inlined_call_operand.vmem [shape: f32[1,128], index: 2, kind: input, shape index: {}]   ;;  %s2638_s3 = inlined_call_operand.vmem [shape: f32[1,128], index: 3, kind: input, shape index: {}]   ;;  %s2639_s4 = inlined_call_operand.vmem [shape: bf16[256,128], index: 4, kind: output, shape index: {}]  }
   0x1   :  { %v1645_v0 = vld [vmem:[%s2635_s1 + $0x38] sm:$0xff]  ;;  %v1943_v2 = vld [vmem:[%s2635_s1 + $0xa0] sm:$0xff]  ;;  %v1644_v3 = vld [vmem:[%s2635_s1 + $0x30] sm:$0xff] }
   0x2   :  { %v1938_v1 = vld [vmem:[%s2635_s1 + $0x78] sm:$0xff]  ;;  %539 = vmatpush.bf16.msra.mxu0 %v1645_v0  ;;  %1754 = vmatpush.bf16.msra.mxu3 %v1645_v0  ;;  %v1953_v4 = vld [vmem:[%s2635_s1 + $0x70] sm:$0xff]  ;;  %v1643_v6 = vld [vmem:[%s2635_s1 + $0x28] sm:$0xff] }
   0x3   :  { %628 = vmatpush.bf16.msra.mxu1 %v1938_v1  ;;  %720 = vmatpush.bf16.msra.mxu2 %v1943_v2  ;;  %v1958_v5 = vld [vmem:[%s2635_s1 + $0x98] sm:$0xff]  ;;  %v1651_v7 = vld [vmem:[%s2635_s1 + $0x68] sm:$0xff]  ;;  %v1971_v8 = vld [vmem:[%s2635_s1 + $0x90] sm:$0xff] }
   0x4   :  { %v1642_v9 = vld [vmem:[%s2635_s1 + $0x20] sm:$0xff]  ;;  %v1983_v11 = vld [vmem:[%s2635_s1 + $0x88] sm:$0xff]  ;;  %v1641_v12 = vld [vmem:[%s2635_s1 + $0x18] sm:$0xff] }
   0x5   :  { %v1650_v10 = vld [vmem:[%s2635_s1 + $0x60] sm:$0xff]  ;;  %v1649_v13 = vld [vmem:[%s2635_s1 + $0x58] sm:$0xff]  ;;  %v1276_v15 = vld [vmem:[%s2636_s0 + $0x8] sm:$0xf] }
   0x6   :  { %540 = vmatpush.bf16.msra.mxu0 %v1644_v3  ;;  %1755 = vmatpush.bf16.msra.mxu3 %v1644_v3  ;;  %v1995_v14 = vld [vmem:[%s2635_s1 + $0x80] sm:$0xff]  ;;  %v1592_v16 = vld [vmem:[%s2636_s0 + $0x10] sm:$0xf0]  ;;  %v1639_v20 = vld [vmem:[%s2635_s1 + $0x8] sm:$0xff] }
   0x7   :  { %629 = vmatpush.bf16.msra.mxu1 %v1953_v4  ;;  %721 = vmatpush.bf16.msra.mxu2 %v1958_v5  ;;  %v1277_v17 = vor.u32 %v1592_v16, %v1276_v15  ;;  %v1640_v18 = vld [vmem:[%s2635_s1 + $0x10] sm:$0xff]  ;;  %v1647_v21 = vld [vmem:[%s2635_s1 + $0x48] sm:$0xff]  ;;  %v1638_v22 = vld [vmem:[%s2635_s1] sm:$0xff] }
   0x8   :  { %v1648_v19 = vld [vmem:[%s2635_s1 + $0x50] sm:$0xff]  ;;  %v1646_v23 = vld [vmem:[%s2635_s1 + $0x40] sm:$0xff]  ;;  %v1591_v25 = vld [vmem:[%s2636_s0 + $0x8] sm:$0xf0] }
   0x9   :  { %v1268_v24 = vld [vmem:[%s2636_s0] sm:$0xf]  ;;  %v1627_v27 = vld [vmem:[%s2636_s0 + $0x128] sm:$0xf0]  ;;  %v1590_v28 = vld [vmem:[%s2636_s0 + $0x4] sm:$0xf] }
   0xa   :  { %541 = vmatpush.bf16.msra.mxu0 %v1643_v6  ;;  %1756 = vmatpush.bf16.msra.mxu3 %v1643_v6  ;;  %v1412_v26 = vld [vmem:[%s2636_s0 + $0x120] sm:$0xf]  ;;  %v1270_v29 = vld [vmem:[%s2636_s0 + $0xc] sm:$0xf0]  ;;  %v1269_v30 = vor.u32 %v1591_v25, %v1268_v24  ;;  %v1595_v34 = vld [vmem:[%s2636_s0 + $0x28] sm:$0xf0] }
   0xb   :  { %630 = vmatpush.bf16.msra.mxu1 %v1651_v7  ;;  %722 = vmatpush.bf16.msra.mxu2 %v1971_v8  ;;  %v1413_v31 = vor.u32 %v1627_v27, %v1412_v26  ;;  %v1273_v32 = vor.u32 %v1590_v28, %v1270_v29  ;;  %v1288_v33 = vld [vmem:[%s2636_s0 + $0x20] sm:$0xf]  ;;  %v1280_v36 = vld [vmem:[%s2636_s0 + $0x18] sm:$0xf]  ;;  %v1594_v37 = vld [vmem:[%s2636_s0 + $0x20] sm:$0xf0] }
   0xc   :  { %v1289_v35 = vor.u32 %v1595_v34, %v1288_v33  ;;  %v1424_v38 = vld [vmem:[%s2636_s0 + $0x138] sm:$0xf]  ;;  %v1630_v39 = vld [vmem:[%s2636_s0 + $0x140] sm:$0xf0]  ;;  %v1593_v40 = vld [vmem:[%s2636_s0 + $0x1c] sm:$0xf]  ;;  %v1281_v42 = vor.u32 %v1594_v37, %v1280_v36 }
   0xd   :  { %v1282_v41 = vld [vmem:[%s2636_s0 + $0x24] sm:$0xf0]  ;;  %v1425_v43 = vor.u32 %v1630_v39, %v1424_v38  ;;  %v1300_v45 = vld [vmem:[%s2636_s0 + $0x38] sm:$0xf]  ;;  %v1598_v46 = vld [vmem:[%s2636_s0 + $0x40] sm:$0xf0] }
   0xe   :  { %542 = vmatpush.bf16.msra.mxu0 %v1642_v9  ;;  %1757 = vmatpush.bf16.msra.mxu3 %v1642_v9  ;;  %v1285_v44 = vor.u32 %v1593_v40, %v1282_v41  ;;  %v1301_v47 = vor.u32 %v1598_v46, %v1300_v45  ;;  %v1292_v48 = vld [vmem:[%s2636_s0 + $0x30] sm:$0xf]  ;;  %v1597_v49 = vld [vmem:[%s2636_s0 + $0x38] sm:$0xf0]  ;;  %v1596_v52 = vld [vmem:[%s2636_s0 + $0x34] sm:$0xf] }
   0xf   :  { %631 = vmatpush.bf16.msra.mxu1 %v1650_v10  ;;  %723 = vmatpush.bf16.msra.mxu2 %v1983_v11  ;;  %v1436_v50 = vld [vmem:[%s2636_s0 + $0x150] sm:$0xf]  ;;  %v1633_v51 = vld [vmem:[%s2636_s0 + $0x158] sm:$0xf0]  ;;  %v1294_v53 = vld [vmem:[%s2636_s0 + $0x3c] sm:$0xf0]  ;;  %v1293_v54 = vor.u32 %v1597_v49, %v1292_v48 }
  0x10   :  { %v1437_v55 = vor.u32 %v1633_v51, %v1436_v50  ;;  %v1297_v56 = vor.u32 %v1596_v52, %v1294_v53  ;;  %v1312_v57 = vld [vmem:[%s2636_s0 + $0x50] sm:$0xf]  ;;  %v1601_v58 = vld [vmem:[%s2636_s0 + $0x58] sm:$0xf0]  ;;  %v1304_v60 = vld [vmem:[%s2636_s0 + $0x48] sm:$0xf] }
  0x11   :  { %v1313_v59 = vor.u32 %v1601_v58, %v1312_v57  ;;  %v1600_v61 = vld [vmem:[%s2636_s0 + $0x50] sm:$0xf0]  ;;  %v1448_v62 = vld [vmem:[%s2636_s0 + $0x168] sm:$0xf]  ;;  %v1599_v0 = vld [vmem:[%s2636_s0 + $0x4c] sm:$0xf] }
  0x12   :  { %543 = vmatpush.bf16.msra.mxu0 %v1641_v12  ;;  %1758 = vmatpush.bf16.msra.mxu3 %v1641_v12  ;;  %v1636_v63 = vld [vmem:[%s2636_s0 + $0x170] sm:$0xf0]  ;;  %v1603_v9 = vld [vmem:[%s2636_s0 + $0x68] sm:$0xf0]  ;;  %v1626_v12 = vld [vmem:[%s2636_s0 + $0x124] sm:$0xf] }
  0x13   :  { %632 = vmatpush.bf16.msra.mxu1 %v1649_v13  ;;  %724 = vmatpush.bf16.msra.mxu2 %v1995_v14  ;;  %v1449_v3 = vor.u32 %v1636_v63, %v1448_v62  ;;  %v1604_v6 = vld [vmem:[%s2636_s0 + $0x70] sm:$0xf0]  ;;  %v1629_v24 = vld [vmem:[%s2636_s0 + $0x13c] sm:$0xf]  ;;  %v1426_v25 = vld [vmem:[%s2636_s0 + $0x144] sm:$0xf0] }
  0x14   :  { %v1429_v28 = vor.u32 %v1629_v24, %v1426_v25  ;;  %v1348_v29 = vld [vmem:[%s2636_s0 + $0x98] sm:$0xf]  ;;  %v1609_v33 = vld [vmem:[%s2636_s0 + $0x98] sm:$0xf0]  ;;  %v1608_v34 = vld [vmem:[%s2636_s0 + $0x94] sm:$0xf] }
  0x15   :  { %v1632_v36 = vld [vmem:[%s2636_s0 + $0x154] sm:$0xf]  ;;  %v1438_v37 = vld [vmem:[%s2636_s0 + $0x15c] sm:$0xf0]  ;;  %v1360_v41 = vld [vmem:[%s2636_s0 + $0xb0] sm:$0xf] }
  0x16   :  { %1542 = vmatmul.msk.bf16.vlgmr.msra.gmra.mxu2 %vm490_vm0, %v1277_v17  ;;  %544 = vmatpush.bf16.msra.mxu0 %v1640_v18  ;;  %v1336_v17 = vld [vmem:[%s2636_s0 + $0x80] sm:$0xf]  ;;  %v1441_v40 = vor.u32 %v1632_v36, %v1438_v37  ;;  %v1612_v45 = vld [vmem:[%s2636_s0 + $0xb0] sm:$0xf0]  ;;  %v1611_v46 = vld [vmem:[%s2636_s0 + $0xac] sm:$0xf] }
  0x17   :  { %1759 = vmatpush.bf16.msra.mxu3 %v1640_v18  ;;  %633 = vmatpush.bf16.msra.mxu1 %v1648_v19  ;;  %v1607_v18 = vld [vmem:[%s2636_s0 + $0x88] sm:$0xf0]  ;;  %v1450_v49 = vld [vmem:[%s2636_s0 + $0x174] sm:$0xf0]  ;;  %v1372_v53 = vld [vmem:[%s2636_s0 + $0xc8] sm:$0xf] }
  0x18   :  { %v1635_v48 = vld [vmem:[%s2636_s0 + $0x16c] sm:$0xf]  ;;  %v1364_v57 = vld [vmem:[%s2636_s0 + $0xc0] sm:$0xf]  ;;  %v1617_v24 = vld [vmem:[%s2636_s0 + $0xdc] sm:$0xf] }
  0x19   :  { %v1453_v52 = vor.u32 %v1635_v48, %v1450_v49  ;;  %v1615_v58 = vld [vmem:[%s2636_s0 + $0xc8] sm:$0xf0]  ;;  %v1378_v25 = vld [vmem:[%s2636_s0 + $0xe4] sm:$0xf0]  ;;  %v1396_v36 = vld [vmem:[%s2636_s0 + $0xf8] sm:$0xf] }
  0x1a   :  { %545 = vmatpush.bf16.msra.mxu0 %v1639_v20  ;;  %v1631_v62 = vld [vmem:[%s2636_s0 + $0x148] sm:$0xf0]  ;;  %v1365_v63 = vor.u32 %v1615_v58, %v1364_v57  ;;  %v1622_v37 = vld [vmem:[%s2636_s0 + $0x100] sm:$0xf0]  ;;  %v1621_v57 = vld [vmem:[%s2636_s0 + $0xf8] sm:$0xf0] }
  0x1b   :  { %1760 = vmatpush.bf16.msra.mxu3 %v1639_v20  ;;  %634 = vmatpush.bf16.msra.mxu1 %v1647_v21  ;;  %v1328_v20 = vld [vmem:[%s2636_s0 + $0x78] sm:$0xf] }
  0x1e   :  { %546 = vmatpush.bf16.msra.mxu0 %v1638_v22 }
  0x1f   :  { %1761 = vmatpush.bf16.msra.mxu3 %v1638_v22  ;;  %635 = vmatpush.bf16.msra.mxu1 %v1646_v23  ;;  %v1605_v22 = vld [vmem:[%s2636_s0 + $0x7c] sm:$0xf] }
  0x21   :  { %547 = vmatmul.bf16.vlgmr.msra.gmra.mxu0 %v1269_v30  ;;  %v1610_v30 = vld [vmem:[%s2636_s0 + $0xa0] sm:$0xf0] }
  0x22   :  { %607 = vmatmul.bf16.vlgmr.msra.gmra.mxu3 %v1413_v31  ;;  %636 = vmatmul.bf16.vlgmr.msra.gmra.mxu1 %v1273_v32  ;;  %v1349_v31 = vor.u32 %v1610_v30, %v1348_v29  ;;  %v1340_v32 = vld [vmem:[%s2636_s0 + $0x90] sm:$0xf] }
  0x23   :  { %1762 = vmatpush.bf16.msrb.mxu3 %v1938_v1  ;;  %v1306_v1 = vld [vmem:[%s2636_s0 + $0x54] sm:$0xf0]  ;;  %v1341_v38 = vor.u32 %v1609_v33, %v1340_v32  ;;  %v1381_v33 = vor.u32 %v1617_v24, %v1378_v25 }
  0x26   :  { %1543 = vmatmul.msk.bf16.gmra.mxu2 %vm490_vm0, %v1289_v35  ;;  %v1342_v35 = vld [vmem:[%s2636_s0 + $0x9c] sm:$0xf0] }
  0x27   :  { %1763 = vmatpush.bf16.msrb.mxu3 %v1953_v4  ;;  %v1309_v4 = vor.u32 %v1599_v0, %v1306_v1  ;;  %v1345_v39 = vor.u32 %v1608_v34, %v1342_v35 }
  0x2b   :  { %1764 = vmatpush.bf16.msrb.mxu3 %v1651_v7 }
  0x2f   :  { %1765 = vmatpush.bf16.msrb.mxu3 %v1650_v10  ;;  %v1602_v10 = vld [vmem:[%s2636_s0 + $0x64] sm:$0xf] }
  0x31   :  { %552 = vmatmul.bf16.gmra.mxu0 %v1281_v42  ;;  %v1613_v42 = vld [vmem:[%s2636_s0 + $0xb8] sm:$0xf0] }
  0x32   :  { %612 = vmatmul.bf16.gmra.mxu3 %v1425_v43  ;;  %641 = vmatmul.bf16.gmra.mxu1 %v1285_v44  ;;  %v1361_v43 = vor.u32 %v1613_v42, %v1360_v41  ;;  %v1352_v44 = vld [vmem:[%s2636_s0 + $0xa8] sm:$0xf] }
  0x33   :  { %1766 = vmatpush.bf16.msrb.mxu3 %v1649_v13  ;;  %v1414_v13 = vld [vmem:[%s2636_s0 + $0x12c] sm:$0xf0]  ;;  %v1353_v50 = vor.u32 %v1612_v45, %v1352_v44  ;;  %v1397_v44 = vor.u32 %v1622_v37, %v1396_v36 }
  0x34   :  { %v1417_v16 = vor.u32 %v1626_v12, %v1414_v13 }
  0x36   :  { %1544 = vmatmul.msk.bf16.gmra.mxu2 %vm490_vm0, %v1301_v47  ;;  %v1354_v47 = vld [vmem:[%s2636_s0 + $0xb4] sm:$0xf0] }
  0x37   :  { %1767 = vmatpush.bf16.msrb.mxu3 %v1648_v19  ;;  %v1337_v19 = vor.u32 %v1607_v18, %v1336_v17  ;;  %v1357_v51 = vor.u32 %v1611_v46, %v1354_v47 }
  0x3b   :  { %1768 = vmatpush.bf16.msrb.mxu3 %v1647_v21  ;;  %v1606_v21 = vld [vmem:[%s2636_s0 + $0x80] sm:$0xf0] }
  0x3c   :  { %v1329_v26 = vor.u32 %v1606_v21, %v1328_v20  ;;  %v1376_v20 = vld [vmem:[%s2636_s0 + $0xd8] sm:$0xf] }
  0x3f   :  { %1769 = vmatpush.bf16.msrb.mxu3 %v1646_v23  ;;  %v1330_v23 = vld [vmem:[%s2636_s0 + $0x84] sm:$0xf0] }
  0x40   :  { %v1333_v27 = vor.u32 %v1605_v22, %v1330_v23  ;;  %v1618_v23 = vld [vmem:[%s2636_s0 + $0xe0] sm:$0xf0] }
  0x41   :  { %557 = vmatmul.bf16.gmra.mxu0 %v1293_v54  ;;  %v1616_v54 = vld [vmem:[%s2636_s0 + $0xd0] sm:$0xf0]  ;;  %v1377_v30 = vor.u32 %v1618_v23, %v1376_v20 }
  0x42   :  { %617 = vmatmul.bf16.gmra.mxu3 %v1437_v55  ;;  %646 = vmatmul.bf16.gmra.mxu1 %v1297_v56  ;;  %v1373_v55 = vor.u32 %v1616_v54, %v1372_v53 }
  0x43   :  { %1770 = vmatpush.bf16.msra.mxu3 %v1943_v2  ;;  %v1305_v2 = vor.u32 %v1600_v61, %v1304_v60  ;;  %v1366_v60 = vld [vmem:[%s2636_s0 + $0xcc] sm:$0xf0]  ;;  %v1432_v61 = vld [vmem:[%s2636_s0 + $0x140] sm:$0xf] }
  0x46   :  { %1545 = vmatmul.msk.bf16.gmra.mxu2 %vm490_vm0, %v1313_v59  ;;  %v1614_v59 = vld [vmem:[%s2636_s0 + $0xc4] sm:$0xf] }
  0x47   :  { %1771 = vmatpush.bf16.msra.mxu3 %v1958_v5  ;;  %v1324_v5 = vld [vmem:[%s2636_s0 + $0x68] sm:$0xf]  ;;  %v1369_v1 = vor.u32 %v1614_v59, %v1366_v60 }
  0x48   :  { %v1325_v7 = vor.u32 %v1604_v6, %v1324_v5  ;;  %v1619_v5 = vld [vmem:[%s2636_s0 + $0xe8] sm:$0xf0] }
  0x4b   :  { %1772 = vmatpush.bf16.msra.mxu3 %v1971_v8  ;;  %v1316_v8 = vld [vmem:[%s2636_s0 + $0x60] sm:$0xf] }
  0x4f   :  { %1773 = vmatpush.bf16.msra.mxu3 %v1983_v11  ;;  %v1318_v11 = vld [vmem:[%s2636_s0 + $0x6c] sm:$0xf0] }
  0x50   :  { %v1321_v15 = vor.u32 %v1602_v10, %v1318_v11  ;;  %v2262_v10 = vld [vmem:[%s2638_s3] ss:$0 sm:$0xff] }
  0x51   :  { %562 = vmatmul.bf16.gmra.mxu0 %v1305_v2  ;;  %v1433_v2 = vor.u32 %v1631_v62, %v1432_v61  ;;  %v1620_v61 = vld [vmem:[%s2636_s0 + $0xf4] sm:$0xf]  ;;  %v1390_v62 = vld [vmem:[%s2636_s0 + $0xfc] sm:$0xf0] }
  0x52   :  { %622 = vmatmul.bf16.gmra.mxu3 %v1449_v3  ;;  %651 = vmatmul.bf16.gmra.mxu1 %v1309_v4  ;;  %v1384_v4 = vld [vmem:[%s2636_s0 + $0xe0] sm:$0xf] }
  0x53   :  { %1774 = vmatpush.bf16.msra.mxu3 %v1995_v14  ;;  %v1317_v14 = vor.u32 %v1603_v9, %v1316_v8  ;;  %v1385_v11 = vor.u32 %v1619_v5, %v1384_v4 }
  0x56   :  { %1546 = vmatmul.msk.bf16.gmra.mxu2 %vm490_vm0, %v1325_v7  ;;  %v2257_v7 = vld [vmem:[%s2637_s2] ss:$0 sm:$0xff] }
  0x61   :  { %567 = vmatmul.bf16.gmra.mxu0 %v1317_v14 }
  0x62   :  { %656 = vmatmul.bf16.gmra.mxu1 %v1321_v15  ;;  %696 = vmatmul.bf16.vlgmr.msrb.gmra.mxu3 %v1417_v16 }
  0x66   :  { %1547 = vmatmul.msk.bf16.gmra.mxu2 %vm490_vm0, %v1337_v19 }
  0x71   :  { %572 = vmatmul.bf16.gmra.mxu0 %v1329_v26  ;;  %v1444_v26 = vld [vmem:[%s2636_s0 + $0x158] sm:$0xf] }
  0x72   :  { %661 = vmatmul.bf16.gmra.mxu1 %v1333_v27  ;;  %701 = vmatmul.bf16.gmra.mxu3 %v1429_v28  ;;  %v1634_v27 = vld [vmem:[%s2636_s0 + $0x160] sm:$0xf0] }
  0x73   :  { %v1445_v34 = vor.u32 %v1634_v27, %v1444_v26 }
  0x76   :  { %1548 = vmatmul.msk.bf16.gmra.mxu2 %vm490_vm0, %v1349_v31 }
  0x81   :  { %577 = vmatmul.bf16.gmra.mxu0 %v1341_v38 }
  0x82   :  { %666 = vmatmul.bf16.gmra.mxu1 %v1345_v39  ;;  %706 = vmatmul.bf16.gmra.mxu3 %v1441_v40 }
  0x86   :  { %1549 = vmatmul.msk.bf16.gmra.mxu2 %vm490_vm0, %v1361_v43 }
  0x91   :  { %582 = vmatmul.bf16.gmra.mxu0 %v1353_v50 }
  0x92   :  { %671 = vmatmul.bf16.gmra.mxu1 %v1357_v51  ;;  %711 = vmatmul.bf16.gmra.mxu3 %v1453_v52 }
  0x96   :  { %1550 = vmatmul.msk.bf16.gmra.mxu2 %vm490_vm0, %v1373_v55 }
  0x99   :  { %v726_v56 = vpop.f32.mrf.mxu2 }
  0x9e   :  { %v548_v0 = vpop.f32.mrf.mxu0 }
  0x9f   :  { %v637_v3 = vpop.f32.mrf.mxu1 }
  0xa0   :  { %v638_v6 = vadd.f32 %v637_v3, %v548_v0  ;;  %v1456_v0 = vld [vmem:[%s2636_s0 + $0x170] sm:$0xf] }
  0xa1   :  { %v728_v8 = vpop.f32.mrf.mxu2  ;;  %587 = vmatmul.bf16.gmra.mxu0 %v1365_v63 }
  0xa2   :  { %v727_v9 = vadd.f32 %v726_v56, %v638_v6  ;;  %676 = vmatmul.bf16.gmra.mxu1 %v1369_v1  ;;  %1555 = vmatmul.msk.bf16.vlgmr.msra.gmra.mxu3 %vm490_vm0, %v1433_v2  ;;  %v1388_v56 = vld [vmem:[%s2636_s0 + $0xf0] sm:$0xf]  ;;  %v1637_v1 = vld [vmem:[%s2636_s0 + $0x178] sm:$0xf0] }
  0xa3   :  { %v1389_v5 = vor.u32 %v1621_v57, %v1388_v56 }
  0xa4   :  { %v810_v12 = vmul.f32 %v2257_v7, %v727_v9  ;;  %v1393_v9 = vor.u32 %v1620_v61, %v1390_v62 }
  0xa5   :  { %v2266_v13 = vpop.f32.mrf.mxu3 }
  0xa6   :  { %v2269_v14 = vadd.f32 %v2262_v10, %v810_v12  ;;  %1551 = vmatmul.msk.bf16.gmra.mxu2 %vm490_vm0, %v1385_v11  ;;  %v550_v15 = vpop.f32.mrf.mxu0  ;;  %v1457_v11 = vor.u32 %v1637_v1, %v1456_v0  ;;  %v1420_v0 = vld [vmem:[%s2636_s0 + $0x128] sm:$0xf]  ;;  %v1628_v1 = vld [vmem:[%s2636_s0 + $0x130] sm:$0xf0] }
  0xa7   :  { %v639_v16 = vpop.f32.mrf.mxu1 }
  0xa8   :  { %v878_v17 = vmin.f32 %v2269_v14, 20.0  ;;  %v640_v18 = vadd.f32 %v639_v16, %v550_v15  ;;  %v1408_v16 = vld [vmem:[%s2636_s0 + $0x110] sm:$0xf] }
  0xa9   :  { %v731_v19 = vpop.f32.mrf.mxu2 }
  0xaa   :  { %v910_v21 = vmul.f32 1.442695, %v878_v17  ;;  %v729_v22 = vadd.f32 %v728_v8, %v640_v18  ;;  %v1625_v17 = vld [vmem:[%s2636_s0 + $0x118] sm:$0xf0] }
  0xab   :  { %v1409_v24 = vor.u32 %v1625_v17, %v1408_v16 }
  0xac   :  { %1777 = vpow2.f32 %v910_v21  ;;  %v811_v28 = vmul.f32 %v2257_v7, %v729_v22 }
  0xad   :  { %v2292_v29 = vpop.f32.mrf.mxu3 }
  0xae   :  { %v2295_v31 = vadd.f32 %v2262_v10, %v811_v28  ;;  %v553_v32 = vpop.f32.mrf.mxu0 }
  0xaf   :  { %v642_v35 = vpop.f32.mrf.mxu1 }
  0xb0   :  { %v879_v38 = vmin.f32 %v2295_v31, 20.0  ;;  %v643_v39 = vadd.f32 %v642_v35, %v553_v32 }
  0xb1   :  { %v733_v40 = vpop.f32.mrf.mxu2  ;;  %592 = vmatmul.bf16.gmra.mxu0 %v1377_v30 }
  0xb2   :  { %v1778_v41 = vpop.eup %1777  ;;  %v912_v42 = vmul.f32 1.442695, %v879_v38  ;;  %v732_v43 = vadd.f32 %v731_v19, %v643_v39  ;;  %681 = vmatmul.bf16.gmra.mxu1 %v1381_v33  ;;  %1556 = vmatmul.msk.bf16.gmra.mxu3 %vm490_vm0, %v1445_v34 }
  0xb3   :  { %v974_v45 = vadd.f32 1.0, %v1778_v41 }
  0xb4   :  { %1779 = vpow2.f32 %v912_v42  ;;  %v812_v46 = vmul.f32 %v2257_v7, %v732_v43 }
  0xb5   :  { %v1006_v47 = vmul.f32 %v974_v45, %v974_v45  ;;  %v2306_v48 = vpop.f32.mrf.mxu3 }
  0xb6   :  { %v2309_v49 = vadd.f32 %v2262_v10, %v812_v46  ;;  %1552 = vmatmul.msk.bf16.gmra.mxu2 %vm490_vm0, %v1397_v44  ;;  %v555_v50 = vpop.f32.mrf.mxu0 }
  0xb7   :  { %v644_v51 = vpop.f32.mrf.mxu1  ;;  %v1070_v54 = vadd.f32 1.0, %v1006_v47  ;;  %v1558_v27 = vadd.f32 -1.0, %v1006_v47 }
  0xb8   :  { %v880_v52 = vmin.f32 %v2309_v49, 20.0  ;;  %v645_v53 = vadd.f32 %v644_v51, %v555_v50  ;;  %v1400_v51 = vld [vmem:[%s2636_s0 + $0x108] sm:$0xf] }
  0xb9   :  { %v736_v55 = vpop.f32.mrf.mxu2 }
  0xba   :  { %v1780_v58 = vpop.eup %1779  ;;  %v914_v59 = vmul.f32 1.442695, %v880_v52  ;;  %v734_v60 = vadd.f32 %v733_v40, %v645_v53  ;;  %v1624_v52 = vld [vmem:[%s2636_s0 + $0x110] sm:$0xf0] }
  0xbb   :  { %v975_v63 = vadd.f32 1.0, %v1780_v58  ;;  %v1401_v58 = vor.u32 %v1624_v52, %v1400_v51 }
  0xbc   :  { %1781 = vpow2.f32 %v914_v59  ;;  %v813_v2 = vmul.f32 %v2257_v7, %v734_v60 }
  0xbd   :  { %1783 = vrcp.f32 %v1070_v54  ;;  %v1007_v3 = vmul.f32 %v975_v63, %v975_v63  ;;  %v2332_v4 = vpop.f32.mrf.mxu3  ;;  %v1623_v54 = vld [vmem:[%s2636_s0 + $0x10c] sm:$0xf] }
  0xbe   :  { %v2335_v6 = vadd.f32 %v2262_v10, %v813_v2  ;;  %v558_v8 = vpop.f32.mrf.mxu0 }
  0xbf   :  { %v1071_v12 = vadd.f32 1.0, %v1007_v3  ;;  %v647_v15 = vpop.f32.mrf.mxu1  ;;  %v1559_v34 = vadd.f32 -1.0, %v1007_v3 }
  0xc0   :  { %v881_v18 = vmin.f32 %v2335_v6, 20.0  ;;  %v648_v19 = vadd.f32 %v647_v15, %v558_v8 }
  0xc1   :  { %1785 = vrcp.f32 %v1071_v12  ;;  %v738_v20 = vpop.f32.mrf.mxu2  ;;  %597 = vmatmul.bf16.gmra.mxu0 %v1389_v5  ;;  %v1421_v12 = vor.u32 %v1628_v1, %v1420_v0 }
  0xc2   :  { %v1782_v21 = vpop.eup %1781  ;;  %v916_v22 = vmul.f32 1.442695, %v881_v18  ;;  %v737_v23 = vadd.f32 %v736_v55, %v648_v19  ;;  %686 = vmatmul.bf16.gmra.mxu1 %v1393_v9  ;;  %1557 = vmatmul.msk.bf16.gmra.mxu3 %vm490_vm0, %v1457_v11 }
  0xc3   :  { %v1784_v25 = vpop.eup %1783  ;;  %v976_v26 = vadd.f32 1.0, %v1782_v21 }
  0xc4   :  { %1787 = vpow2.f32 %v916_v22  ;;  %v814_v28 = vmul.f32 %v2257_v7, %v737_v23  ;;  %v1134_v33 = vmul.f32 %v1784_v25, %v1558_v27 }
  0xc5   :  { %v1008_v30 = vmul.f32 %v976_v26, %v976_v26  ;;  %v2346_v32 = vpop.f32.mrf.mxu3 }
  0xc6   :  { %v2349_v35 = vadd.f32 %v2262_v10, %v814_v28  ;;  %1553 = vmatmul.msk.bf16.gmra.mxu2 %vm490_vm0, %v1409_v24  ;;  %v560_v36 = vpop.f32.mrf.mxu0  ;;  %v1166_v45 = vmul.f32 %v1134_v33, %v2269_v14  ;;  %v1402_v14 = vld [vmem:[%s2636_s0 + $0x114] sm:$0xf0] }
  0xc7   :  { %v1786_v37 = vpop.eup %1785  ;;  %v649_v38 = vpop.f32.mrf.mxu1  ;;  %v1072_v42 = vadd.f32 1.0, %v1008_v30  ;;  %v1405_v61 = vor.u32 %v1623_v54, %v1402_v14  ;;  %v1560_v17 = vadd.f32 -1.0, %v1008_v30 }
  0xc8   :  { %v1135_v39 = vmul.f32 %v1786_v37, %v1559_v34  ;;  %v882_v40 = vmin.f32 %v2349_v35, 20.0  ;;  %v650_v41 = vadd.f32 %v649_v38, %v560_v36 }
  0xc9   :  { %v741_v43 = vpop.f32.mrf.mxu2 }
  0xca   :  { %v1788_v44 = vpop.eup %1787  ;;  %v1167_v46 = vmul.f32 %v1135_v39, %v2295_v31  ;;  %v918_v47 = vmul.f32 1.442695, %v882_v40  ;;  %v739_v50 = vadd.f32 %v738_v20, %v650_v41 }
  0xcb   :  { %v977_v53 = vadd.f32 1.0, %v1788_v44 }
  0xcc   :  { %v1662_v31 = vpack.c.bf16 %v1167_v46, %v1166_v45  ;;  %1789 = vpow2.f32 %v918_v47  ;;  %v815_v55 = vmul.f32 %v2257_v7, %v739_v50 }
  0xcd   :  { %1791 = vrcp.f32 %v1072_v42  ;;  %v1009_v56 = vmul.f32 %v977_v53, %v977_v53  ;;  %v2368_v57 = vpop.f32.mrf.mxu3 }
  0xce   :  { %1663 = vst [vmem:[%s2639_s4] sm:$0xff] %v1662_v31   ;;  %v2374_v59 = vadd.f32 %v2262_v10, %v815_v55  ;;  %v563_v60 = vpop.f32.mrf.mxu0 }
  0xcf   :  { %v1073_v62 = vadd.f32 1.0, %v1009_v56  ;;  %v652_v63 = vpop.f32.mrf.mxu1  ;;  %v1561_v22 = vadd.f32 -1.0, %v1009_v56 }
  0xd0   :  { %v883_v2 = vmin.f32 %v2374_v59, 20.0  ;;  %v653_v3 = vadd.f32 %v652_v63, %v563_v60 }
  0xd1   :  { %1793 = vrcp.f32 %v1073_v62  ;;  %v743_v5 = vpop.f32.mrf.mxu2  ;;  %602 = vmatmul.bf16.gmra.mxu0 %v1401_v58 }
  0xd2   :  { %v1790_v8 = vpop.eup %1789  ;;  %v920_v9 = vmul.f32 1.442695, %v883_v2  ;;  %v742_v11 = vadd.f32 %v741_v43, %v653_v3  ;;  %691 = vmatmul.bf16.gmra.mxu1 %v1405_v61 }
  0xd3   :  { %v1792_v15 = vpop.eup %1791  ;;  %v978_v16 = vadd.f32 1.0, %v1790_v8 }
  0xd4   :  { %1795 = vpow2.f32 %v920_v9  ;;  %v816_v18 = vmul.f32 %v2257_v7, %v742_v11  ;;  %v1136_v21 = vmul.f32 %v1792_v15, %v1560_v17 }
  0xd5   :  { %v1010_v19 = vmul.f32 %v978_v16, %v978_v16  ;;  %v2384_v20 = vpop.f32.mrf.mxu3 }
  0xd6   :  { %v2387_v23 = vadd.f32 %v2262_v10, %v816_v18  ;;  %1554 = vmatmul.msk.bf16.gmra.mxu2 %vm490_vm0, %v1421_v12  ;;  %v565_v24 = vpop.f32.mrf.mxu0  ;;  %v1168_v37 = vmul.f32 %v1136_v21, %v2309_v49 }
  0xd7   :  { %v1794_v25 = vpop.eup %1793  ;;  %v654_v26 = vpop.f32.mrf.mxu1  ;;  %v1074_v33 = vadd.f32 1.0, %v1010_v19  ;;  %v1562_v56 = vadd.f32 -1.0, %v1010_v19 }
  0xd8   :  { %v1137_v27 = vmul.f32 %v1794_v25, %v1561_v22  ;;  %v884_v28 = vmin.f32 %v2387_v23, 20.0  ;;  %v655_v30 = vadd.f32 %v654_v26, %v565_v24 }
  0xd9   :  { %v746_v34 = vpop.f32.mrf.mxu2 }
  0xda   :  { %v1796_v36 = vpop.eup %1795  ;;  %v1169_v38 = vmul.f32 %v1137_v27, %v2335_v6  ;;  %v922_v39 = vmul.f32 1.442695, %v884_v28  ;;  %v744_v40 = vadd.f32 %v743_v5, %v655_v30 }
  0xdb   :  { %v979_v41 = vadd.f32 1.0, %v1796_v36 }
  0xdc   :  { %v1667_v42 = vpack.c.bf16 %v1169_v38, %v1168_v37  ;;  %1797 = vpow2.f32 %v922_v39  ;;  %v817_v43 = vmul.f32 %v2257_v7, %v744_v40 }
  0xdd   :  { %1799 = vrcp.f32 %v1074_v33  ;;  %v1011_v44 = vmul.f32 %v979_v41, %v979_v41  ;;  %v2394_v45 = vpop.f32.mrf.mxu3 }
  0xde   :  { %1739 = vst [vmem:[%s2639_s4 + $0x8] sm:$0xff] %v1667_v42   ;;  %v2400_v46 = vadd.f32 %v2262_v10, %v817_v43  ;;  %v568_v49 = vpop.f32.mrf.mxu0 }
  0xdf   :  { %v1075_v6 = vadd.f32 1.0, %v1011_v44  ;;  %v657_v47 = vpop.f32.mrf.mxu1  ;;  %v1563_v63 = vadd.f32 -1.0, %v1011_v44 }
  0xe0   :  { %v885_v50 = vmin.f32 %v2400_v46, 20.0  ;;  %v658_v51 = vadd.f32 %v657_v47, %v568_v49 }
  0xe1   :  { %1801 = vrcp.f32 %v1075_v6  ;;  %v748_v52 = vpop.f32.mrf.mxu2 }
  0xe2   :  { %v1798_v53 = vpop.eup %1797  ;;  %v924_v54 = vmul.f32 1.442695, %v885_v50  ;;  %v747_v14 = vadd.f32 %v746_v34, %v658_v51 }
  0xe3   :  { %v1800_v31 = vpop.eup %1799  ;;  %v980_v55 = vadd.f32 1.0, %v1798_v53 }
  0xe4   :  { %1803 = vpow2.f32 %v924_v54  ;;  %v818_v58 = vmul.f32 %v2257_v7, %v747_v14  ;;  %v1138_v62 = vmul.f32 %v1800_v31, %v1562_v56 }
  0xe5   :  { %v1012_v60 = vmul.f32 %v980_v55, %v980_v55  ;;  %v697_v61 = vpop.f32.mrf.mxu3 }
  0xe6   :  { %v2405_v0 = vadd.f32 %v2262_v10, %v818_v58  ;;  %v2408_v1 = vadd.f32 %v697_v61, %v2266_v13  ;;  %v570_v2 = vpop.f32.mrf.mxu0  ;;  %v1170_v17 = vmul.f32 %v1138_v62, %v2349_v35 }
  0xe7   :  { %v1802_v3 = vpop.eup %1801  ;;  %v659_v5 = vpop.f32.mrf.mxu1  ;;  %v1076_v12 = vadd.f32 1.0, %v1012_v60  ;;  %v1564_v42 = vadd.f32 -1.0, %v1012_v60 }
  0xe8   :  { %v1139_v8 = vmul.f32 %v1802_v3, %v1563_v63  ;;  %v886_v9 = vmin.f32 %v2405_v0, 20.0  ;;  %v660_v11 = vadd.f32 %v659_v5, %v570_v2 }
  0xe9   :  { %v751_v15 = vpop.f32.mrf.mxu2 }
  0xea   :  { %v1804_v16 = vpop.eup %1803  ;;  %v1171_v18 = vmul.f32 %v1139_v8, %v2374_v59  ;;  %v926_v19 = vmul.f32 1.442695, %v886_v9  ;;  %v749_v21 = vadd.f32 %v748_v52, %v660_v11 }
  0xeb   :  { %v981_v22 = vadd.f32 1.0, %v1804_v16 }
  0xec   :  { %v1672_v24 = vpack.c.bf16 %v1171_v18, %v1170_v17  ;;  %1805 = vpow2.f32 %v926_v19  ;;  %v819_v13 = vmul.f32 %v2257_v7, %v749_v21 }
  0xed   :  { %1807 = vrcp.f32 %v1076_v12  ;;  %v1013_v25 = vmul.f32 %v981_v22, %v981_v22  ;;  %v699_v26 = vpop.f32.mrf.mxu3 }
  0xee   :  { %1740 = vst [vmem:[%s2639_s4 + $0x10] sm:$0xff] %v1672_v24   ;;  %v2418_v27 = vadd.f32 %v2262_v10, %v819_v13  ;;  %v2421_v35 = vadd.f32 %v699_v26, %v2292_v29  ;;  %v573_v59 = vpop.f32.mrf.mxu0 }
  0xef   :  { %v1077_v28 = vadd.f32 1.0, %v1013_v25  ;;  %v662_v30 = vpop.f32.mrf.mxu1  ;;  %v1565_v6 = vadd.f32 -1.0, %v1013_v25 }
  0xf0   :  { %v887_v33 = vmin.f32 %v2418_v27, 20.0  ;;  %v663_v34 = vadd.f32 %v662_v30, %v573_v59 }
  0xf1   :  { %1809 = vrcp.f32 %v1077_v28  ;;  %v753_v36 = vpop.f32.mrf.mxu2 }
  0xf2   :  { %v1806_v37 = vpop.eup %1805  ;;  %v928_v38 = vmul.f32 1.442695, %v887_v33  ;;  %v752_v39 = vadd.f32 %v751_v15, %v663_v34 }
  0xf3   :  { %v1808_v40 = vpop.eup %1807  ;;  %v982_v41 = vadd.f32 1.0, %v1806_v37 }
  0xf4   :  { %1811 = vpow2.f32 %v928_v38  ;;  %v820_v43 = vmul.f32 %v2257_v7, %v752_v39  ;;  %v1140_v49 = vmul.f32 %v1808_v40, %v1564_v42 }
  0xf5   :  { %v1014_v44 = vmul.f32 %v982_v41, %v982_v41  ;;  %v2425_v29 = vpop.f32.mrf.mxu3 }
  0xf6   :  { %v2428_v47 = vadd.f32 %v2262_v10, %v820_v43  ;;  %v575_v50 = vpop.f32.mrf.mxu0  ;;  %v1172_v58 = vmul.f32 %v1140_v49, %v2387_v23 }
  0xf7   :  { %v1810_v51 = vpop.eup %1809  ;;  %v664_v52 = vpop.f32.mrf.mxu1  ;;  %v1078_v31 = vadd.f32 1.0, %v1014_v44  ;;  %v1566_v24 = vadd.f32 -1.0, %v1014_v44 }
  0xf8   :  { %v1141_v53 = vmul.f32 %v1810_v51, %v1565_v6  ;;  %v888_v54 = vmin.f32 %v2428_v47, 20.0  ;;  %v665_v14 = vadd.f32 %v664_v52, %v575_v50 }
  0xf9   :  { %v756_v55 = vpop.f32.mrf.mxu2 }
  0xfa   :  { %v1812_v56 = vpop.eup %1811  ;;  %v1173_v60 = vmul.f32 %v1141_v53, %v2400_v46  ;;  %v930_v61 = vmul.f32 1.442695, %v888_v54  ;;  %v754_v62 = vadd.f32 %v753_v36, %v665_v14 }
  0xfb   :  { %v983_v63 = vadd.f32 1.0, %v1812_v56 }
  0xfc   :  { %v1677_v2 = vpack.c.bf16 %v1173_v60, %v1172_v58  ;;  %1813 = vpow2.f32 %v930_v61  ;;  %v821_v3 = vmul.f32 %v2257_v7, %v754_v62 }
  0xfd   :  { %1815 = vrcp.f32 %v1078_v31  ;;  %v1015_v5 = vmul.f32 %v983_v63, %v983_v63  ;;  %v2434_v8 = vpop.f32.mrf.mxu3 }
  0xfe   :  { %1741 = vst [vmem:[%s2639_s4 + $0x18] sm:$0xff] %v1677_v2   ;;  %v2440_v9 = vadd.f32 %v2262_v10, %v821_v3  ;;  %v578_v23 = vpop.f32.mrf.mxu0 }
  0xff   :  { %v1079_v46 = vadd.f32 1.0, %v1015_v5  ;;  %v667_v11 = vpop.f32.mrf.mxu1  ;;  %v1567_v28 = vadd.f32 -1.0, %v1015_v5 }
 0x100   :  { %v889_v12 = vmin.f32 %v2440_v9, 20.0  ;;  %v668_v15 = vadd.f32 %v667_v11, %v578_v23 }
 0x101   :  { %1817 = vrcp.f32 %v1079_v46  ;;  %v758_v16 = vpop.f32.mrf.mxu2 }
 0x102   :  { %v1814_v17 = vpop.eup %1813  ;;  %v932_v18 = vmul.f32 1.442695, %v889_v12  ;;  %v757_v19 = vadd.f32 %v756_v55, %v668_v15 }
 0x103   :  { %v1816_v21 = vpop.eup %1815  ;;  %v984_v22 = vadd.f32 1.0, %v1814_v17 }
 0x104   :  { %1819 = vpow2.f32 %v932_v18  ;;  %v822_v13 = vmul.f32 %v2257_v7, %v757_v19  ;;  %v1142_v59 = vmul.f32 %v1816_v21, %v1566_v24 }
 0x105   :  { %v1016_v25 = vmul.f32 %v984_v22, %v984_v22  ;;  %v2444_v26 = vpop.f32.mrf.mxu3 }
 0x106   :  { %v2447_v30 = vadd.f32 %v2262_v10, %v822_v13  ;;  %v580_v33 = vpop.f32.mrf.mxu0  ;;  %v1174_v43 = vmul.f32 %v1142_v59, %v2405_v0 }
 0x107   :  { %v1818_v34 = vpop.eup %1817  ;;  %v669_v36 = vpop.f32.mrf.mxu1  ;;  %v1080_v40 = vadd.f32 1.0, %v1016_v25  ;;  %v1568_v3 = vadd.f32 -1.0, %v1016_v25 }
 0x108   :  { %v1143_v37 = vmul.f32 %v1818_v34, %v1567_v28  ;;  %v890_v38 = vmin.f32 %v2447_v30, 20.0  ;;  %v670_v39 = vadd.f32 %v669_v36, %v580_v33 }
 0x109   :  { %v761_v41 = vpop.f32.mrf.mxu2 }
 0x10a   :  { %v1820_v42 = vpop.eup %1819  ;;  %v1175_v44 = vmul.f32 %v1143_v37, %v2418_v27  ;;  %v934_v49 = vmul.f32 1.442695, %v890_v38  ;;  %v759_v6 = vadd.f32 %v758_v16, %v670_v39 }
 0x10b   :  { %v985_v50 = vadd.f32 1.0, %v1820_v42 }
 0x10c   :  { %v1682_v51 = vpack.c.bf16 %v1175_v44, %v1174_v43  ;;  %1821 = vpow2.f32 %v934_v49  ;;  %v823_v52 = vmul.f32 %v2257_v7, %v759_v6 }
 0x10d   :  { %1823 = vrcp.f32 %v1080_v40  ;;  %v1017_v53 = vmul.f32 %v985_v50, %v985_v50  ;;  %v2453_v54 = vpop.f32.mrf.mxu3 }
 0x10e   :  { %1742 = vst [vmem:[%s2639_s4 + $0x20] sm:$0xff] %v1682_v51   ;;  %v2459_v14 = vadd.f32 %v2262_v10, %v823_v52  ;;  %v583_v0 = vpop.f32.mrf.mxu0 }
 0x10f   :  { %v1081_v27 = vadd.f32 1.0, %v1017_v53  ;;  %v672_v31 = vpop.f32.mrf.mxu1  ;;  %v1569_v12 = vadd.f32 -1.0, %v1017_v53 }
 0x110   :  { %v891_v55 = vmin.f32 %v2459_v14, 20.0  ;;  %v673_v56 = vadd.f32 %v672_v31, %v583_v0 }
 0x111   :  { %1825 = vrcp.f32 %v1081_v27  ;;  %v763_v58 = vpop.f32.mrf.mxu2  ;;  %v703_v27 = vadd.f32 %v2425_v29, %v2306_v48 }
 0x112   :  { %v1822_v60 = vpop.eup %1821  ;;  %v936_v61 = vmul.f32 1.442695, %v891_v55  ;;  %v762_v62 = vadd.f32 %v761_v41, %v673_v56 }
 0x113   :  { %v1824_v63 = vpop.eup %1823  ;;  %v986_v2 = vadd.f32 1.0, %v1822_v60 }
 0x114   :  { %1827 = vpow2.f32 %v936_v61  ;;  %v824_v5 = vmul.f32 %v2257_v7, %v762_v62  ;;  %v1144_v11 = vmul.f32 %v1824_v63, %v1568_v3 }
 0x115   :  { %v1018_v23 = vmul.f32 %v986_v2, %v986_v2  ;;  %v2463_v46 = vpop.f32.mrf.mxu3 }
 0x116   :  { %v2466_v15 = vadd.f32 %v2262_v10, %v824_v5  ;;  %v585_v16 = vpop.f32.mrf.mxu0  ;;  %v1176_v59 = vmul.f32 %v1144_v11, %v2428_v47 }
 0x117   :  { %v1826_v17 = vpop.eup %1825  ;;  %v1082_v18 = vadd.f32 1.0, %v1018_v23  ;;  %v674_v19 = vpop.f32.mrf.mxu1  ;;  %v1570_v53 = vadd.f32 -1.0, %v1018_v23 }
 0x118   :  { %v1145_v21 = vmul.f32 %v1826_v17, %v1569_v12  ;;  %v892_v22 = vmin.f32 %v2466_v15, 20.0  ;;  %v675_v24 = vadd.f32 %v674_v19, %v585_v16 }
 0x119   :  { %v766_v13 = vpop.f32.mrf.mxu2  ;;  %1829 = vrcp.f32 %v1082_v18 }
 0x11a   :  { %v1828_v25 = vpop.eup %1827  ;;  %v1177_v28 = vmul.f32 %v1145_v21, %v2440_v9  ;;  %v938_v33 = vmul.f32 1.442695, %v892_v22  ;;  %v764_v34 = vadd.f32 %v763_v58, %v675_v24  ;;  %v705_v24 = vadd.f32 %v2434_v8, %v2332_v4 }
 0x11b   :  { %v987_v36 = vadd.f32 1.0, %v1828_v25 }
 0x11c   :  { %v1687_v37 = vpack.c.bf16 %v1177_v28, %v1176_v59  ;;  %1831 = vpow2.f32 %v938_v33  ;;  %v825_v38 = vmul.f32 %v2257_v7, %v764_v34 }
 0x11d   :  { %v1019_v39 = vmul.f32 %v987_v36, %v987_v36  ;;  %v2472_v40 = vpop.f32.mrf.mxu3 }
 0x11e   :  { %1743 = vst [vmem:[%s2639_s4 + $0x28] sm:$0xff] %v1687_v37   ;;  %v2478_v41 = vadd.f32 %v2262_v10, %v825_v38  ;;  %v588_v47 = vpop.f32.mrf.mxu0 }
 0x11f   :  { %v1083_v9 = vadd.f32 1.0, %v1019_v39  ;;  %v677_v42 = vpop.f32.mrf.mxu1  ;;  %v1830_v49 = vpop.eup %1829  ;;  %v1571_v60 = vadd.f32 -1.0, %v1019_v39 }
 0x120   :  { %v893_v43 = vmin.f32 %v2478_v41, 20.0  ;;  %v678_v44 = vadd.f32 %v677_v42, %v588_v47  ;;  %v1146_v55 = vmul.f32 %v1830_v49, %v1570_v53 }
 0x121   :  { %1833 = vrcp.f32 %v1083_v9  ;;  %v768_v6 = vpop.f32.mrf.mxu2 }
 0x122   :  { %v1832_v50 = vpop.eup %1831  ;;  %v940_v51 = vmul.f32 1.442695, %v893_v43  ;;  %v767_v52 = vadd.f32 %v766_v13, %v678_v44  ;;  %v1178_v12 = vmul.f32 %v1146_v55, %v2447_v30 }
 0x123   :  { %v988_v0 = vadd.f32 1.0, %v1832_v50 }
 0x124   :  { %1835 = vpow2.f32 %v940_v51  ;;  %v826_v31 = vmul.f32 %v2257_v7, %v767_v52  ;;  %v708_v52 = vadd.f32 %v2444_v26, %v2346_v32 }
 0x125   :  { %v1020_v56 = vmul.f32 %v988_v0, %v988_v0  ;;  %v791_v58 = vpop.f32.mrf.mxu3 }
 0x126   :  { %v2485_v61 = vadd.f32 %v2262_v10, %v826_v31  ;;  %v792_v62 = vadd.f32 %v791_v58, %v703_v27  ;;  %v590_v63 = vpop.f32.mrf.mxu0 }
 0x127   :  { %v1834_v2 = vpop.eup %1833  ;;  %v1084_v3 = vadd.f32 1.0, %v1020_v56  ;;  %v679_v5 = vpop.f32.mrf.mxu1 }
 0x128   :  { %v1147_v23 = vmul.f32 %v1834_v2, %v1571_v60  ;;  %v894_v11 = vmin.f32 %v2485_v61, 20.0  ;;  %v836_v48 = vmul.f32 %v2257_v7, %v792_v62  ;;  %v680_v29 = vadd.f32 %v679_v5, %v590_v63 }
 0x129   :  { %v771_v16 = vpop.f32.mrf.mxu2  ;;  %1837 = vrcp.f32 %v1084_v3 }
 0x12a   :  { %v1836_v17 = vpop.eup %1835  ;;  %v1179_v18 = vmul.f32 %v1147_v23, %v2459_v14  ;;  %v942_v19 = vmul.f32 1.442695, %v894_v11  ;;  %v2492_v21 = vadd.f32 %v2262_v10, %v836_v48  ;;  %v769_v22 = vadd.f32 %v768_v6, %v680_v29 }
 0x12b   :  { %v989_v13 = vadd.f32 1.0, %v1836_v17  ;;  %v1572_v6 = vadd.f32 -1.0, %v1020_v56 }
 0x12c   :  { %v1692_v25 = vpack.c.bf16 %v1179_v18, %v1178_v12  ;;  %1839 = vpow2.f32 %v942_v19  ;;  %v904_v59 = vmin.f32 %v2492_v21, 20.0  ;;  %v827_v30 = vmul.f32 %v2257_v7, %v769_v22 }
 0x12d   :  { %v1021_v28 = vmul.f32 %v989_v13, %v989_v13  ;;  %v793_v33 = vpop.f32.mrf.mxu3 }
 0x12e   :  { %1744 = vst [vmem:[%s2639_s4 + $0x30] sm:$0xff] %v1692_v25   ;;  %v962_v14 = vmul.f32 1.442695, %v904_v59  ;;  %v2502_v34 = vadd.f32 %v2262_v10, %v827_v30  ;;  %v794_v36 = vadd.f32 %v793_v33, %v705_v24  ;;  %v593_v4 = vpop.f32.mrf.mxu0  ;;  %v710_v30 = vadd.f32 %v2453_v54, %v2368_v57 }
 0x12f   :  { %v1085_v8 = vadd.f32 1.0, %v1021_v28  ;;  %v682_v37 = vpop.f32.mrf.mxu1  ;;  %v1838_v47 = vpop.eup %1837  ;;  %v1573_v60 = vadd.f32 -1.0, %v1021_v28 }
 0x130   :  { %1841 = vpow2.f32 %v962_v14  ;;  %v895_v38 = vmin.f32 %v2502_v34, 20.0  ;;  %v837_v39 = vmul.f32 %v2257_v7, %v794_v36  ;;  %v683_v9 = vadd.f32 %v682_v37, %v593_v4 }
 0x131   :  { %1843 = vrcp.f32 %v1085_v8  ;;  %v773_v42 = vpop.f32.mrf.mxu2  ;;  %v1148_v0 = vmul.f32 %v1838_v47, %v1572_v6 }
 0x132   :  { %v1840_v43 = vpop.eup %1839  ;;  %v944_v44 = vmul.f32 1.442695, %v895_v38  ;;  %v2507_v49 = vadd.f32 %v2262_v10, %v837_v39  ;;  %v772_v51 = vadd.f32 %v771_v16, %v683_v9 }
 0x133   :  { %v990_v50 = vadd.f32 1.0, %v1840_v43  ;;  %v1180_v29 = vmul.f32 %v1148_v0, %v2466_v15 }
 0x134   :  { %1845 = vpow2.f32 %v944_v44  ;;  %v905_v53 = vmin.f32 %v2507_v49, 20.0  ;;  %v828_v31 = vmul.f32 %v2257_v7, %v772_v51 }
 0x135   :  { %v1022_v27 = vmul.f32 %v990_v50, %v990_v50  ;;  %v796_v55 = vpop.f32.mrf.mxu3 }
 0x136   :  { %v1842_v58 = vpop.eup %1841  ;;  %v964_v62 = vmul.f32 1.442695, %v905_v53  ;;  %v797_v63 = vadd.f32 %v796_v55, %v708_v52  ;;  %v595_v2 = vpop.f32.mrf.mxu0  ;;  %v2514_v23 = vadd.f32 %v2262_v10, %v828_v31 }
 0x137   :  { %v1844_v3 = vpop.eup %1843  ;;  %v1086_v56 = vadd.f32 1.0, %v1022_v27  ;;  %v1000_v5 = vadd.f32 1.0, %v1842_v58  ;;  %v684_v32 = vpop.f32.mrf.mxu1  ;;  %v1574_v43 = vadd.f32 -1.0, %v1022_v27  ;;  %v713_v58 = vadd.f32 %v2463_v46, %v2384_v20 }
 0x138   :  { %v1149_v26 = vmul.f32 %v1844_v3, %v1573_v60  ;;  %1847 = vpow2.f32 %v964_v62  ;;  %v838_v11 = vmul.f32 %v2257_v7, %v797_v63  ;;  %v685_v48 = vadd.f32 %v684_v32, %v595_v2 }
 0x139   :  { %v1032_v12 = vmul.f32 %v1000_v5, %v1000_v5  ;;  %v896_v16 = vmin.f32 %v2514_v23, 20.0  ;;  %v776_v17 = vpop.f32.mrf.mxu2  ;;  %1849 = vrcp.f32 %v1086_v56 }
 0x13a   :  { %v1846_v18 = vpop.eup %1845  ;;  %v1181_v19 = vmul.f32 %v1149_v26, %v2478_v41  ;;  %v2521_v22 = vadd.f32 %v2262_v10, %v838_v11  ;;  %v774_v24 = vadd.f32 %v773_v42, %v685_v48 }
 0x13b   :  { %v1096_v13 = vadd.f32 1.0, %v1032_v12  ;;  %v991_v25 = vadd.f32 1.0, %v1846_v18  ;;  %v946_v59 = vmul.f32 1.442695, %v896_v16  ;;  %v1584_v56 = vadd.f32 -1.0, %v1032_v12 }
 0x13c   :  { %v1697_v28 = vpack.c.bf16 %v1181_v19, %v1180_v29  ;;  %v906_v15 = vmin.f32 %v2521_v22, 20.0  ;;  %v829_v33 = vmul.f32 %v2257_v7, %v774_v24 }
 0x13d   :  { %v1023_v14 = vmul.f32 %v991_v25, %v991_v25  ;;  %v798_v36 = vpop.f32.mrf.mxu3  ;;  %1851 = vpow2.f32 %v946_v59 }
 0x13e   :  { %v1848_v4 = vpop.eup %1847  ;;  %1745 = vst [vmem:[%s2639_s4 + $0x38] sm:$0xff] %v1697_v28   ;;  %v966_v41 = vmul.f32 1.442695, %v906_v15  ;;  %v2531_v8 = vadd.f32 %v2262_v10, %v829_v33  ;;  %v799_v37 = vadd.f32 %v798_v36, %v710_v30  ;;  %v598_v38 = vpop.f32.mrf.mxu0  ;;  %1853 = vrcp.f32 %v1096_v13 }
 0x13f   :  { %v1087_v57 = vadd.f32 1.0, %v1023_v14  ;;  %v1001_v54 = vadd.f32 1.0, %v1848_v4  ;;  %v687_v39 = vpop.f32.mrf.mxu1  ;;  %v1850_v47 = vpop.eup %1849  ;;  %v1575_v5 = vadd.f32 -1.0, %v1023_v14 }
 0x140   :  { %1855 = vpow2.f32 %v966_v41  ;;  %v897_v9 = vmin.f32 %v2531_v8, 20.0  ;;  %v839_v42 = vmul.f32 %v2257_v7, %v799_v37  ;;  %v688_v6 = vadd.f32 %v687_v39, %v598_v38 }
 0x141   :  { %1857 = vrcp.f32 %v1087_v57  ;;  %v1033_v44 = vmul.f32 %v1001_v54, %v1001_v54  ;;  %v778_v50 = vpop.f32.mrf.mxu2  ;;  %v1150_v53 = vmul.f32 %v1850_v47, %v1574_v43 }
 0x142   :  { %v948_v51 = vmul.f32 1.442695, %v897_v9  ;;  %v2536_v52 = vadd.f32 %v2262_v10, %v839_v42  ;;  %v777_v31 = vadd.f32 %v776_v17, %v688_v6 }
 0x143   :  { %v1097_v0 = vadd.f32 1.0, %v1033_v44  ;;  %v1852_v55 = vpop.eup %1851  ;;  %v1182_v29 = vmul.f32 %v1150_v53, %v2485_v61  ;;  %v1585_v15 = vadd.f32 -1.0, %v1033_v44 }
 0x144   :  { %1859 = vpow2.f32 %v948_v51  ;;  %v907_v60 = vmin.f32 %v2536_v52, 20.0  ;;  %v1854_v62 = vpop.eup %1853  ;;  %v992_v27 = vadd.f32 1.0, %v1852_v55  ;;  %v830_v63 = vmul.f32 %v2257_v7, %v777_v31 }
 0x145   :  { %1861 = vrcp.f32 %v1097_v0  ;;  %v801_v2 = vpop.f32.mrf.mxu3  ;;  %v1160_v13 = vmul.f32 %v1854_v62, %v1584_v56 }
 0x146   :  { %v1856_v3 = vpop.eup %1855  ;;  %v968_v32 = vmul.f32 1.442695, %v907_v60  ;;  %v802_v26 = vadd.f32 %v801_v2, %v713_v58  ;;  %v600_v11 = vpop.f32.mrf.mxu0  ;;  %v1024_v16 = vmul.f32 %v992_v27, %v992_v27  ;;  %v2544_v46 = vadd.f32 %v2262_v10, %v830_v63 }
 0x147   :  { %v1858_v48 = vpop.eup %1857  ;;  %v1002_v20 = vadd.f32 1.0, %v1856_v3  ;;  %v689_v17 = vpop.f32.mrf.mxu1 }
 0x148   :  { %v1151_v18 = vmul.f32 %v1858_v48, %v1575_v5  ;;  %1863 = vpow2.f32 %v968_v32  ;;  %v840_v19 = vmul.f32 %v2257_v7, %v802_v26  ;;  %v690_v24 = vadd.f32 %v689_v17, %v600_v11 }
 0x149   :  { %v1088_v12 = vadd.f32 1.0, %v1024_v16  ;;  %v2547_v25 = vmul.f32 %v1002_v20, %v1002_v20  ;;  %v898_v59 = vmin.f32 %v2544_v46, 20.0  ;;  %v781_v30 = vpop.f32.mrf.mxu2  ;;  %v715_v7 = vadd.f32 %v2472_v40, %v2394_v45 }
 0x14a   :  { %v1860_v28 = vpop.eup %1859  ;;  %v1183_v61 = vmul.f32 %v1151_v18, %v2502_v34  ;;  %v2552_v33 = vadd.f32 %v2262_v10, %v840_v19  ;;  %v779_v14 = vadd.f32 %v778_v50, %v690_v24  ;;  %v1192_v34 = vmul.f32 %v1160_v13, %v2492_v21  ;;  %v2562_v10 = vld [vmem:[%s2637_s2] ss:$0 sm:$0xff] }
 0x14b   :  { %v1862_v36 = vpop.eup %1861  ;;  %1865 = vrcp.f32 %v1088_v12  ;;  %v1098_v4 = vadd.f32 1.0, %v2547_v25  ;;  %v993_v41 = vadd.f32 1.0, %v1860_v28  ;;  %v950_v57 = vmul.f32 1.442695, %v898_v59  ;;  %v2572_v50 = vld [vmem:[%s2638_s3] ss:$0 sm:$0xff] }
 0x14c   :  { %v1702_v37 = vpack.c.bf16 %v1183_v61, %v1182_v29  ;;  %v1161_v38 = vmul.f32 %v1862_v36, %v1585_v15  ;;  %v908_v54 = vmin.f32 %v2552_v33, 20.0  ;;  %v831_v47 = vmul.f32 %v2562_v10, %v779_v14 }
 0x14d   :  { %v1025_v39 = vmul.f32 %v993_v41, %v993_v41  ;;  %v803_v45 = vpop.f32.mrf.mxu3  ;;  %1867 = vpow2.f32 %v950_v57  ;;  %v1576_v2 = vadd.f32 -1.0, %v1024_v16  ;;  %v1586_v13 = vadd.f32 -1.0, %v2547_v25 }
 0x14e   :  { %v1864_v40 = vpop.eup %1863  ;;  %1746 = vst [vmem:[%s2639_s4 + $0x40] sm:$0xff] %v1702_v37   ;;  %v1193_v9 = vmul.f32 %v1161_v38, %v2507_v49  ;;  %v970_v42 = vmul.f32 1.442695, %v908_v54  ;;  %v804_v43 = vadd.f32 %v803_v45, %v715_v7  ;;  %v603_v21 = vpop.f32.mrf.mxu0  ;;  %1869 = vrcp.f32 %v1098_v4 }
 0x14f   :  { %v1089_v44 = vadd.f32 1.0, %v1025_v39  ;;  %v1003_v6 = vadd.f32 1.0, %v1864_v40  ;;  %v2575_v51 = vadd.f32 %v2572_v50, %v831_v47  ;;  %v692_v53 = vpop.f32.mrf.mxu1  ;;  %v1577_v17 = vadd.f32 -1.0, %v1025_v39 }
 0x150   :  { %v1727_v0 = vpack.c.bf16 %v1193_v9, %v1192_v34  ;;  %1871 = vpow2.f32 %v970_v42  ;;  %v841_v49 = vmul.f32 %v2562_v10, %v804_v43  ;;  %v693_v31 = vadd.f32 %v692_v53, %v603_v21 }
 0x151   :  { %v1866_v55 = vpop.eup %1865  ;;  %1873 = vrcp.f32 %v1089_v44  ;;  %v1035_v58 = vmul.f32 %v1003_v6, %v1003_v6  ;;  %v899_v60 = vmin.f32 %v2575_v51, 20.0  ;;  %v783_v62 = vpop.f32.mrf.mxu2 }
 0x152   :  { %1751 = vst [vmem:[%s2639_s4 + $0x68] sm:$0xff] %v1727_v0   ;;  %v2583_v27 = vadd.f32 %v2572_v50, %v841_v49  ;;  %v782_v63 = vadd.f32 %v781_v30, %v693_v31  ;;  %v1152_v48 = vmul.f32 %v1866_v55, %v1576_v2 }
 0x153   :  { %v1099_v3 = vadd.f32 1.0, %v1035_v58  ;;  %v952_v56 = vmul.f32 1.442695, %v899_v60  ;;  %v1868_v5 = vpop.eup %1867  ;;  %v1587_v7 = vadd.f32 -1.0, %v1035_v58 }
 0x154   :  { %v909_v32 = vmin.f32 %v2583_v27, 20.0  ;;  %v832_v26 = vmul.f32 %v2562_v10, %v782_v63  ;;  %v1870_v11 = vpop.eup %1869  ;;  %v994_v29 = vadd.f32 1.0, %v1868_v5  ;;  %v1184_v14 = vmul.f32 %v1152_v48, %v2514_v23 }
 0x155   :  { %1875 = vrcp.f32 %v1099_v3  ;;  %v1162_v36 = vmul.f32 %v1870_v11, %v1586_v13 }
 0x156   :  { %v1872_v20 = vpop.eup %1871  ;;  %1877 = vpow2.f32 %v952_v56  ;;  %v972_v18 = vmul.f32 1.442695, %v909_v32  ;;  %v2588_v19 = vadd.f32 %v2572_v50, %v832_v26  ;;  %v605_v24 = vpop.f32.mrf.mxu0  ;;  %v1026_v12 = vmul.f32 %v994_v29, %v994_v29 }
 0x157   :  { %v1874_v16 = vpop.eup %1873  ;;  %v1004_v59 = vadd.f32 1.0, %v1872_v20  ;;  %v694_v30 = vpop.f32.mrf.mxu1  ;;  %v1194_v21 = vmul.f32 %v1162_v36, %v2521_v22 }
 0x158   :  { %v1153_v28 = vmul.f32 %v1874_v16, %v1577_v17  ;;  %1879 = vpow2.f32 %v972_v18  ;;  %v900_v61 = vmin.f32 %v2588_v19, 20.0  ;;  %v695_v15 = vadd.f32 %v694_v30, %v605_v24 }
 0x159   :  { %v1036_v4 = vmul.f32 %v1004_v59, %v1004_v59  ;;  %v786_v41 = vpop.f32.mrf.mxu2  ;;  %v1090_v34 = vadd.f32 1.0, %v1026_v12  ;;  %v1578_v26 = vadd.f32 -1.0, %v1026_v12 }
 0x15a   :  { %v1185_v37 = vmul.f32 %v1153_v28, %v2531_v8  ;;  %v954_v38 = vmul.f32 1.442695, %v900_v61  ;;  %v784_v57 = vadd.f32 %v783_v62, %v695_v15  ;;  %v787_v25 = vadd.f32 %v786_v41, %v2408_v1 }
 0x15b   :  { %v1876_v54 = vpop.eup %1875  ;;  %v1100_v9 = vadd.f32 1.0, %v1036_v4  ;;  %v1588_v20 = vadd.f32 -1.0, %v1036_v4 }
 0x15c   :  { %v1878_v39 = vpop.eup %1877  ;;  %v1707_v47 = vpack.c.bf16 %v1185_v37, %v1184_v14  ;;  %v1163_v45 = vmul.f32 %v1876_v54, %v1587_v7  ;;  %1881 = vpow2.f32 %v954_v38  ;;  %v833_v40 = vmul.f32 %v2562_v10, %v784_v57 }
 0x15d   :  { %v995_v23 = vadd.f32 1.0, %v1878_v39  ;;  %v834_v42 = vmul.f32 %v2562_v10, %v787_v25  ;;  %1883 = vrcp.f32 %v1090_v34 }
 0x15e   :  { %v1880_v43 = vpop.eup %1879  ;;  %1747 = vst [vmem:[%s2639_s4 + $0x48] sm:$0xff] %v1707_v47   ;;  %v1195_v1 = vmul.f32 %v1163_v45, %v2536_v52  ;;  %v2603_v8 = vadd.f32 %v2572_v50, %v833_v40  ;;  %1885 = vrcp.f32 %v1100_v9 }
 0x15f   :  { %v1027_v44 = vmul.f32 %v995_v23, %v995_v23  ;;  %v1005_v6 = vadd.f32 1.0, %v1880_v43  ;;  %v2606_v53 = vadd.f32 %v2572_v50, %v834_v42 }
 0x160   :  { %v1732_v0 = vpack.c.bf16 %v1195_v1, %v1194_v21  ;;  %v901_v49 = vmin.f32 %v2603_v8, 20.0 }
 0x161   :  { %v1091_v22 = vadd.f32 1.0, %v1027_v44  ;;  %v1037_v31 = vmul.f32 %v1005_v6, %v1005_v6  ;;  %v902_v55 = vmin.f32 %v2606_v53, 20.0  ;;  %v788_v58 = vpop.f32.mrf.mxu2  ;;  %v1579_v17 = vadd.f32 -1.0, %v1027_v44 }
 0x162   :  { %v1882_v60 = vpop.eup %1881  ;;  %1752 = vst [vmem:[%s2639_s4 + $0x70] sm:$0xff] %v1732_v0   ;;  %v956_v52 = vmul.f32 1.442695, %v901_v49  ;;  %v789_v62 = vadd.f32 %v788_v58, %v2421_v35 }
 0x163   :  { %1887 = vrcp.f32 %v1091_v22  ;;  %v1101_v63 = vadd.f32 1.0, %v1037_v31  ;;  %v996_v2 = vadd.f32 1.0, %v1882_v60  ;;  %v958_v3 = vmul.f32 1.442695, %v902_v55  ;;  %v1884_v56 = vpop.eup %1883 }
 0x164   :  { %1889 = vpow2.f32 %v956_v52  ;;  %v835_v32 = vmul.f32 %v2562_v10, %v789_v62  ;;  %v1886_v11 = vpop.eup %1885  ;;  %v1154_v29 = vmul.f32 %v1884_v56, %v1578_v26  ;;  %v1589_v30 = vadd.f32 -1.0, %v1037_v31 }
 0x165   :  { %1891 = vrcp.f32 %v1101_v63  ;;  %v1028_v5 = vmul.f32 %v996_v2, %v996_v2  ;;  %v1164_v13 = vmul.f32 %v1886_v11, %v1588_v20 }
 0x166   :  { %1893 = vpow2.f32 %v958_v3  ;;  %v871_v48 = vadd.f32 %v2572_v50, %v835_v32  ;;  %v1186_v10 = vmul.f32 %v1154_v29, %v2544_v46 }
 0x167   :  { %v1092_v18 = vadd.f32 1.0, %v1028_v5  ;;  %v1196_v4 = vmul.f32 %v1164_v13, %v2552_v33  ;;  %v1580_v34 = vadd.f32 -1.0, %v1028_v5 }
 0x168   :  { %v903_v24 = vmin.f32 %v871_v48, 20.0 }
 0x169   :  { %v1888_v35 = vpop.eup %1887  ;;  %1895 = vrcp.f32 %v1092_v18 }
 0x16a   :  { %v1890_v16 = vpop.eup %1889  ;;  %v1155_v59 = vmul.f32 %v1888_v35, %v1579_v17  ;;  %v960_v15 = vmul.f32 1.442695, %v903_v24 }
 0x16b   :  { %v1892_v28 = vpop.eup %1891  ;;  %v997_v61 = vadd.f32 1.0, %v1890_v16 }
 0x16c   :  { %v1894_v14 = vpop.eup %1893  ;;  %v1187_v12 = vmul.f32 %v1155_v59, %v2575_v51  ;;  %v1165_v36 = vmul.f32 %v1892_v28, %v1589_v30  ;;  %1897 = vpow2.f32 %v960_v15 }
 0x16d   :  { %v1029_v50 = vmul.f32 %v997_v61, %v997_v61  ;;  %v998_v7 = vadd.f32 1.0, %v1894_v14 }
 0x16e   :  { %v1712_v41 = vpack.c.bf16 %v1187_v12, %v1186_v10  ;;  %v1197_v37 = vmul.f32 %v1165_v36, %v2583_v27 }
 0x16f   :  { %v1093_v38 = vadd.f32 1.0, %v1029_v50  ;;  %v1030_v57 = vmul.f32 %v998_v7, %v998_v7  ;;  %v1896_v46 = vpop.eup %1895  ;;  %v1581_v47 = vadd.f32 -1.0, %v1029_v50 }
 0x170   :  { %1748 = vst [vmem:[%s2639_s4 + $0x50] sm:$0xff] %v1712_v41   ;;  %v1737_v25 = vpack.c.bf16 %v1197_v37, %v1196_v4  ;;  %v1156_v39 = vmul.f32 %v1896_v46, %v1580_v34 }
 0x171   :  { %1899 = vrcp.f32 %v1093_v38  ;;  %v1094_v51 = vadd.f32 1.0, %v1030_v57  ;;  %v1582_v1 = vadd.f32 -1.0, %v1030_v57 }
 0x172   :  { %1753 = vst [vmem:[%s2639_s4 + $0x78] sm:$0xff] %v1737_v25   ;;  %v1898_v54 = vpop.eup %1897  ;;  %v1188_v23 = vmul.f32 %v1156_v39, %v2588_v19 }
 0x173   :  { %v999_v33 = vadd.f32 1.0, %v1898_v54  ;;  %1901 = vrcp.f32 %v1094_v51 }
 0x175   :  { %v1031_v27 = vmul.f32 %v999_v33, %v999_v33 }
 0x177   :  { %v1900_v45 = vpop.eup %1899  ;;  %v1095_v9 = vadd.f32 1.0, %v1031_v27  ;;  %v1583_v6 = vadd.f32 -1.0, %v1031_v27 }
 0x178   :  { %v1157_v40 = vmul.f32 %v1900_v45, %v1581_v47 }
 0x179   :  { %1903 = vrcp.f32 %v1095_v9  ;;  %v1902_v43 = vpop.eup %1901 }
 0x17a   :  { %v1189_v42 = vmul.f32 %v1157_v40, %v2603_v8  ;;  %v1158_v44 = vmul.f32 %v1902_v43, %v1582_v1 }
 0x17c   :  { %v1717_v21 = vpack.c.bf16 %v1189_v42, %v1188_v23  ;;  %v1190_v22 = vmul.f32 %v1158_v44, %v2606_v53 }
 0x17e   :  { %1749 = vst [vmem:[%s2639_s4 + $0x58] sm:$0xff] %v1717_v21  }
 0x17f   :  { %v1904_v0 = vpop.eup %1903 }
 0x180   :  { %v1159_v49 = vmul.f32 %v1904_v0, %v1583_v6 }
 0x182   :  { %v1191_v31 = vmul.f32 %v1159_v49, %v871_v48 }
 0x184   :  { %v1722_v55 = vpack.c.bf16 %v1191_v31, %v1190_v22 }
 0x186   :  { %1750 = vst [vmem:[%s2639_s4 + $0x60] sm:$0xff] %v1722_v55  }

// kernel: mbsfc_forward.22
= control target key start
LH: loop header
LB: loop body
LE: loop exit
PB: predicated region body
PF: predicated region fallthrough
CT: control target
= control target key end

     0   :  { %vm158_vm0 = vcmask 1043456   ;;  %vm133_vm1 = vcmask 982016   ;;  %s854_s1 = inlined_call_operand.vmem [shape: bf16[120,128], index: 1, kind: input, shape index: {}]   ;;  %s855_s2 = inlined_call_operand.vmem [shape: f32[1,128], index: 2, kind: input, shape index: {}]   ;;  %s856_s3 = inlined_call_operand.vmem [shape: f32[1,128], index: 3, kind: input, shape index: {}]   ;;  %s857_s0 = inlined_call_operand.vmem [shape: bf16[128,120], index: 0, kind: input, shape index: {}]   ;;  %s858_s4 = inlined_call_operand.vmem [shape: f32[2,128], index: 4, kind: output, shape index: {}]  }
   0x1   :  { %v47_v0 = vld [vmem:[%s854_s1 + $0x38] sm:$0xf]  ;;  %v550_v4 = vld [vmem:[%s854_s1 + $0x30] sm:$0xff]  ;;  %v549_v5 = vld [vmem:[%s854_s1 + $0x28] sm:$0xff] }
   0x2   :  { %v117_v1 = vunpack.c.l.b16 %v47_v0  ;;  %v548_v6 = vld [vmem:[%s854_s1 + $0x20] sm:$0xff]  ;;  %v547_v7 = vld [vmem:[%s854_s1 + $0x18] sm:$0xff]  ;;  %v546_v8 = vld [vmem:[%s854_s1 + $0x10] sm:$0xff] }
   0x3   :  { %v545_v9 = vld [vmem:[%s854_s1 + $0x8] sm:$0xff]  ;;  %v544_v10 = vld [vmem:[%s854_s1] sm:$0xff]  ;;  %v538_v12 = vld [vmem:[%s857_s0 + $0x10] sm:$0xff] }
   0x4   :  { %v125_v2 = vpack.c.b16 %v117_v1, %v117_v1  ;;  %v536_v11 = vld [vmem:[%s857_s0] sm:$0xff]  ;;  %v542_v14 = vld [vmem:[%s857_s0 + $0x30] sm:$0xff]  ;;  %v537_v15 = vld [vmem:[%s857_s0 + $0x8] sm:$0xff] }
   0x5   :  { %v540_v13 = vld [vmem:[%s857_s0 + $0x20] sm:$0xff]  ;;  %v539_v16 = vld [vmem:[%s857_s0 + $0x18] sm:$0xff]  ;;  %v541_v17 = vld [vmem:[%s857_s0 + $0x28] sm:$0xff] }
   0x6   :  { %v160_v3 = vsel %vm158_vm0, %v125_v2, 0  ;;  %v543_v18 = vld [vmem:[%s857_s0 + $0x38] sm:$0xff]  ;;  %v729_v19 = vld [vmem:[%s855_s2] ss:$0 sm:$0xff] }
   0x7   :  { %162 = vmatpush.bf16.msra.mxu0 %v160_v3  ;;  %551 = vmatpush.bf16.msra.mxu1 %v160_v3  ;;  %v734_v20 = vld [vmem:[%s856_s3] ss:$0 sm:$0xff] }
   0x8   :  { %552 = vmatpush.bf16.msra.mxu2 %v160_v3  ;;  %553 = vmatpush.bf16.msra.mxu3 %v160_v3 }
   0xb   :  { %163 = vmatpush.bf16.msra.mxu0 %v550_v4  ;;  %554 = vmatpush.bf16.msra.mxu1 %v550_v4 }
   0xc   :  { %555 = vmatpush.bf16.msra.mxu2 %v550_v4  ;;  %556 = vmatpush.bf16.msra.mxu3 %v550_v4 }
   0xf   :  { %164 = vmatpush.bf16.msra.mxu0 %v549_v5  ;;  %557 = vmatpush.bf16.msra.mxu1 %v549_v5 }
  0x10   :  { %558 = vmatpush.bf16.msra.mxu2 %v549_v5  ;;  %559 = vmatpush.bf16.msra.mxu3 %v549_v5 }
  0x13   :  { %165 = vmatpush.bf16.msra.mxu0 %v548_v6  ;;  %560 = vmatpush.bf16.msra.mxu1 %v548_v6 }
  0x14   :  { %561 = vmatpush.bf16.msra.mxu2 %v548_v6  ;;  %562 = vmatpush.bf16.msra.mxu3 %v548_v6 }
  0x17   :  { %166 = vmatpush.bf16.msra.mxu0 %v547_v7  ;;  %563 = vmatpush.bf16.msra.mxu1 %v547_v7 }
  0x18   :  { %564 = vmatpush.bf16.msra.mxu2 %v547_v7  ;;  %565 = vmatpush.bf16.msra.mxu3 %v547_v7 }
  0x1b   :  { %167 = vmatpush.bf16.msra.mxu0 %v546_v8  ;;  %566 = vmatpush.bf16.msra.mxu1 %v546_v8 }
  0x1c   :  { %567 = vmatpush.bf16.msra.mxu2 %v546_v8  ;;  %568 = vmatpush.bf16.msra.mxu3 %v546_v8 }
  0x1f   :  { %168 = vmatpush.bf16.msra.mxu0 %v545_v9  ;;  %569 = vmatpush.bf16.msra.mxu1 %v545_v9 }
  0x20   :  { %570 = vmatpush.bf16.msra.mxu2 %v545_v9  ;;  %571 = vmatpush.bf16.msra.mxu3 %v545_v9 }
  0x23   :  { %169 = vmatpush.bf16.msra.mxu0 %v544_v10  ;;  %572 = vmatpush.bf16.msra.mxu1 %v544_v10 }
  0x24   :  { %573 = vmatpush.bf16.msra.mxu2 %v544_v10  ;;  %574 = vmatpush.bf16.msra.mxu3 %v544_v10 }
  0x26   :  { %512 = vmatmul.msk.bf16.vlgmr.msra.gmra.mxu0 %vm133_vm1, %v536_v11  ;;  %514 = vmatmul.msk.bf16.vlgmr.msra.gmra.mxu1 %vm133_vm1, %v538_v12 }
  0x27   :  { %516 = vmatmul.msk.bf16.vlgmr.msra.gmra.mxu2 %vm133_vm1, %v540_v13  ;;  %518 = vmatmul.msk.bf16.vlgmr.msra.gmra.mxu3 %vm133_vm1, %v542_v14 }
  0x36   :  { %513 = vmatmul.msk.bf16.gmra.mxu0 %vm133_vm1, %v537_v15  ;;  %515 = vmatmul.msk.bf16.gmra.mxu1 %vm133_vm1, %v539_v16 }
  0x37   :  { %517 = vmatmul.msk.bf16.gmra.mxu2 %vm133_vm1, %v541_v17  ;;  %519 = vmatmul.msk.bf16.gmra.mxu3 %vm133_vm1, %v543_v18 }
  0xa3   :  { %v171_v21 = vpop.f32.mrf.mxu0  ;;  %v181_v22 = vpop.f32.mrf.mxu1 }
  0xa4   :  { %v215_v23 = vmul.f32 %v729_v19, %v171_v21  ;;  %v219_v24 = vmul.f32 %v729_v19, %v181_v22 }
  0xa6   :  { %v739_v25 = vadd.f32 %v734_v20, %v215_v23  ;;  %v743_v27 = vadd.f32 %v734_v20, %v219_v24 }
  0xa8   :  { %v251_v26 = vmin.f32 %v739_v25, 20.0  ;;  %v255_v35 = vmin.f32 %v743_v27, 20.0 }
  0xaa   :  { %v191_v28 = vpop.f32.mrf.mxu2  ;;  %v201_v29 = vpop.f32.mrf.mxu3  ;;  %v267_v34 = vmul.f32 1.442695, %v251_v26  ;;  %v275_v38 = vmul.f32 1.442695, %v255_v35 }
  0xab   :  { %v173_v30 = vpop.f32.mrf.mxu0  ;;  %v183_v31 = vpop.f32.mrf.mxu1  ;;  %v223_v32 = vmul.f32 %v729_v19, %v191_v28  ;;  %v227_v39 = vmul.f32 %v729_v19, %v201_v29 }
  0xac   :  { %v216_v33 = vmul.f32 %v729_v19, %v173_v30  ;;  %578 = vpow2.f32 %v267_v34  ;;  %v220_v43 = vmul.f32 %v729_v19, %v183_v31 }
  0xad   :  { %v752_v37 = vadd.f32 %v734_v20, %v223_v32  ;;  %580 = vpow2.f32 %v275_v38  ;;  %v764_v50 = vadd.f32 %v734_v20, %v227_v39 }
  0xae   :  { %v749_v36 = vadd.f32 %v734_v20, %v216_v33  ;;  %v770_v54 = vadd.f32 %v734_v20, %v220_v43 }
  0xaf   :  { %v259_v46 = vmin.f32 %v752_v37, 20.0  ;;  %v263_v61 = vmin.f32 %v764_v50, 20.0 }
  0xb0   :  { %v252_v40 = vmin.f32 %v749_v36, 20.0  ;;  %v256_v1 = vmin.f32 %v770_v54, 20.0 }
  0xb1   :  { %v283_v55 = vmul.f32 1.442695, %v259_v46  ;;  %v291_v11 = vmul.f32 1.442695, %v263_v61 }
  0xb2   :  { %v193_v41 = vpop.f32.mrf.mxu2  ;;  %v203_v42 = vpop.f32.mrf.mxu3  ;;  %v269_v51 = vmul.f32 1.442695, %v252_v40  ;;  %v277_v12 = vmul.f32 1.442695, %v256_v1 }
  0xb3   :  { %v224_v44 = vmul.f32 %v729_v19, %v193_v41  ;;  %v176_v45 = vpop.f32.mrf.mxu0  ;;  %v186_v49 = vpop.f32.mrf.mxu1  ;;  %v228_v59 = vmul.f32 %v729_v19, %v203_v42 }
  0xb4   :  { %v217_v47 = vmul.f32 %v729_v19, %v176_v45  ;;  %v579_v53 = vpop.eup %578  ;;  %v221_v57 = vmul.f32 %v729_v19, %v186_v49  ;;  %582 = vpow2.f32 %v269_v51 }
  0xb5   :  { %v761_v48 = vadd.f32 %v734_v20, %v224_v44  ;;  %v299_v60 = vadd.f32 1.0, %v579_v53  ;;  %v581_v0 = vpop.eup %580  ;;  %584 = vpow2.f32 %v283_v55  ;;  %v783_v6 = vadd.f32 %v734_v20, %v228_v59 }
  0xb6   :  { %v767_v52 = vadd.f32 %v734_v20, %v217_v47  ;;  %v780_v3 = vadd.f32 %v734_v20, %v221_v57  ;;  %v303_v10 = vadd.f32 1.0, %v581_v0 }
  0xb7   :  { %v260_v58 = vmin.f32 %v761_v48, 20.0  ;;  %v788_v9 = vmul.f32 %v299_v60, %v299_v60  ;;  %v264_v18 = vmin.f32 %v783_v6, 20.0 }
  0xb8   :  { %v253_v56 = vmin.f32 %v767_v52, 20.0  ;;  %v257_v16 = vmin.f32 %v780_v3, 20.0  ;;  %v796_v23 = vmul.f32 %v303_v10, %v303_v10 }
  0xb9   :  { %v285_v5 = vmul.f32 1.442695, %v260_v58  ;;  %v347_v22 = vadd.f32 1.0, %v788_v9  ;;  %v293_v33 = vmul.f32 1.442695, %v264_v18 }
  0xba   :  { %v271_v62 = vmul.f32 1.442695, %v253_v56  ;;  %v196_v63 = vpop.f32.mrf.mxu2  ;;  %v206_v4 = vpop.f32.mrf.mxu3  ;;  %v279_v30 = vmul.f32 1.442695, %v257_v16  ;;  %v351_v35 = vadd.f32 1.0, %v796_v23 }
  0xbb   :  { %v225_v2 = vmul.f32 %v729_v19, %v196_v63  ;;  %v178_v8 = vpop.f32.mrf.mxu0  ;;  %v229_v14 = vmul.f32 %v729_v19, %v206_v4  ;;  %v583_v15 = vpop.eup %582 }
  0xbc   :  { %586 = vpow2.f32 %v271_v62  ;;  %v218_v17 = vmul.f32 %v729_v19, %v178_v8  ;;  %v585_v21 = vpop.eup %584  ;;  %v300_v26 = vadd.f32 1.0, %v583_v15  ;;  %v188_v34 = vpop.f32.mrf.mxu1 }
  0xbd   :  { %v786_v7 = vadd.f32 %v734_v20, %v225_v2  ;;  %588 = vpow2.f32 %v285_v5  ;;  %v799_v28 = vadd.f32 %v734_v20, %v229_v14  ;;  %v307_v32 = vadd.f32 1.0, %v585_v21 }
  0xbe   :  { %590 = vpow2.f32 %v291_v11  ;;  %v802_v31 = vadd.f32 %v734_v20, %v218_v17  ;;  %v316_v39 = vmul.f32 %v300_v26, %v300_v26  ;;  %v222_v44 = vmul.f32 %v729_v19, %v188_v34 }
  0xbf   :  { %v261_v13 = vmin.f32 %v786_v7, 20.0  ;;  %592 = vpow2.f32 %v277_v12  ;;  %v265_v41 = vmin.f32 %v799_v28, 20.0  ;;  %v323_v46 = vmul.f32 %v307_v32, %v307_v32 }
  0xc0   :  { %v254_v42 = vmin.f32 %v802_v31, 20.0  ;;  %v348_v55 = vadd.f32 1.0, %v316_v39  ;;  %v809_v62 = vadd.f32 %v734_v20, %v222_v44 }
  0xc1   :  { %v287_v24 = vmul.f32 1.442695, %v261_v13  ;;  %v295_v57 = vmul.f32 1.442695, %v265_v41  ;;  %v355_v0 = vadd.f32 1.0, %v323_v46 }
  0xc2   :  { %v587_v29 = vpop.eup %586  ;;  %v198_v47 = vpop.f32.mrf.mxu2  ;;  %v273_v58 = vmul.f32 1.442695, %v254_v42  ;;  %v258_v8 = vmin.f32 %v809_v62, 20.0 }
  0xc3   :  { %594 = vpow2.f32 %v287_v24  ;;  %v589_v38 = vpop.eup %588  ;;  %v301_v40 = vadd.f32 1.0, %v587_v29  ;;  %v208_v53 = vpop.f32.mrf.mxu3  ;;  %v226_v63 = vmul.f32 %v729_v19, %v198_v47 }
  0xc4   :  { %596 = vrcp.f32 %v347_v22  ;;  %v591_v43 = vpop.eup %590  ;;  %v308_v51 = vadd.f32 1.0, %v589_v38  ;;  %v230_v2 = vmul.f32 %v729_v19, %v208_v53  ;;  %v281_v16 = vmul.f32 1.442695, %v258_v8 }
  0xc5   :  { %598 = vpow2.f32 %v279_v30  ;;  %v593_v45 = vpop.eup %592  ;;  %v317_v56 = vmul.f32 %v301_v40, %v301_v40  ;;  %v311_v60 = vadd.f32 1.0, %v591_v43  ;;  %v815_v10 = vadd.f32 %v734_v20, %v226_v63 }
  0xc6   :  { %600 = vpow2.f32 %v293_v33  ;;  %v304_v61 = vadd.f32 1.0, %v593_v45  ;;  %v324_v5 = vmul.f32 %v308_v51, %v308_v51  ;;  %v821_v21 = vadd.f32 %v734_v20, %v230_v2 }
  0xc7   :  { %602 = vrcp.f32 %v351_v35  ;;  %v349_v12 = vadd.f32 1.0, %v317_v56  ;;  %v817_v14 = vmul.f32 %v311_v60, %v311_v60  ;;  %v262_v17 = vmin.f32 %v815_v10, 20.0 }
  0xc8   :  { %604 = vpow2.f32 %v295_v57  ;;  %v320_v15 = vmul.f32 %v304_v61, %v304_v61  ;;  %v356_v22 = vadd.f32 1.0, %v324_v5  ;;  %v266_v30 = vmin.f32 %v821_v21, 20.0 }
  0xc9   :  { %v595_v49 = vpop.eup %594  ;;  %606 = vpow2.f32 %v273_v58  ;;  %v289_v26 = vmul.f32 1.442695, %v262_v17  ;;  %v520_v33 = vadd.f32 -1.0, %v788_v9  ;;  %v359_v34 = vadd.f32 1.0, %v817_v14 }
  0xca   :  { %v597_v59 = vpop.eup %596  ;;  %v309_v1 = vadd.f32 1.0, %v595_v49  ;;  %608 = vrcp.f32 %v348_v55  ;;  %v521_v35 = vadd.f32 -1.0, %v316_v39  ;;  %v297_v42 = vmul.f32 1.442695, %v266_v30 }
  0xcb   :  { %v599_v4 = vpop.eup %598  ;;  %610 = vrcp.f32 %v355_v0  ;;  %v352_v43 = vadd.f32 1.0, %v320_v15  ;;  %v524_v49 = vadd.f32 -1.0, %v796_v23  ;;  %v528_v53 = vadd.f32 -1.0, %v323_v46 }
  0xcc   :  { %v601_v11 = vpop.eup %600  ;;  %v305_v19 = vadd.f32 1.0, %v599_v4  ;;  %v325_v18 = vmul.f32 %v309_v1, %v309_v1  ;;  %612 = vpow2.f32 %v281_v16  ;;  %v522_v55 = vadd.f32 -1.0, %v317_v56 }
  0xcd   :  { %v603_v13 = vpop.eup %602  ;;  %v312_v24 = vadd.f32 1.0, %v601_v11  ;;  %614 = vrcp.f32 %v349_v12  ;;  %v379_v0 = vmul.f32 %v597_v59, %v520_v33  ;;  %v525_v12 = vadd.f32 -1.0, %v320_v15 }
  0xce   :  { %v605_v29 = vpop.eup %604  ;;  %616 = vpow2.f32 %v289_v26  ;;  %v321_v40 = vmul.f32 %v305_v19, %v305_v19  ;;  %v357_v41 = vadd.f32 1.0, %v325_v18  ;;  %v383_v4 = vmul.f32 %v603_v13, %v524_v49 }
  0xcf   :  { %v607_v32 = vpop.eup %606  ;;  %618 = vrcp.f32 %v356_v22  ;;  %v826_v44 = vmul.f32 %v312_v24, %v312_v24  ;;  %v313_v45 = vadd.f32 1.0, %v605_v29  ;;  %v529_v56 = vadd.f32 -1.0, %v324_v5 }
  0xd0   :  { %v609_v38 = vpop.eup %608  ;;  %v302_v20 = vadd.f32 1.0, %v607_v32  ;;  %620 = vpow2.f32 %v297_v42  ;;  %v353_v58 = vadd.f32 1.0, %v321_v40  ;;  %v395_v59 = vmul.f32 %v379_v0, %v739_v25 }
  0xd1   :  { %v611_v47 = vpop.eup %610  ;;  %622 = vrcp.f32 %v359_v34  ;;  %v380_v39 = vmul.f32 %v609_v38, %v521_v35  ;;  %v360_v1 = vadd.f32 1.0, %v826_v44  ;;  %v329_v2 = vmul.f32 %v313_v45, %v313_v45 }
  0xd2   :  { %v318_v51 = vmul.f32 %v302_v20, %v302_v20  ;;  %v613_v9 = vpop.eup %612  ;;  %624 = vrcp.f32 %v357_v41  ;;  %v530_v32 = vadd.f32 -1.0, %v325_v18  ;;  %v644_v15 = vmov 64.0  }
  0xd3   :  { %v615_v57 = vpop.eup %614  ;;  %v306_v61 = vadd.f32 1.0, %v613_v9  ;;  %626 = vrcp.f32 %v352_v43  ;;  %v396_v46 = vmul.f32 %v380_v39, %v749_v36  ;;  %v361_v26 = vadd.f32 1.0, %v329_v2 }
  0xd4   :  { %v350_v60 = vadd.f32 1.0, %v318_v51  ;;  %v617_v63 = vpop.eup %616  ;;  %v381_v16 = vmul.f32 %v615_v57, %v522_v55  ;;  %v523_v5 = vadd.f32 -1.0, %v318_v51  ;;  %v387_v41 = vmul.f32 %v611_v47, %v528_v53 }
  0xd5   :  { %v322_v23 = vmul.f32 %v306_v61, %v306_v61  ;;  %v310_v8 = vadd.f32 1.0, %v617_v63  ;;  %v619_v11 = vpop.eup %618  ;;  %v411_v20 = vadd.f32 %v396_v46, %v395_v59  ;;  %v526_v42 = vadd.f32 -1.0, %v321_v40 }
  0xd6   :  { %628 = vrcp.f32 %v350_v60  ;;  %v621_v17 = vpop.eup %620  ;;  %v388_v30 = vmul.f32 %v619_v11, %v529_v56  ;;  %v397_v36 = vmul.f32 %v381_v16, %v767_v52  ;;  %v532_v18 = vadd.f32 -1.0, %v817_v14 }
  0xd7   :  { %630 = vrcp.f32 %v353_v58  ;;  %v354_v19 = vadd.f32 1.0, %v322_v23  ;;  %v326_v22 = vmul.f32 %v310_v8, %v310_v8  ;;  %v623_v24 = vpop.eup %622  ;;  %v314_v29 = vadd.f32 1.0, %v621_v17 }
  0xd8   :  { %632 = vrcp.f32 %v360_v1  ;;  %v625_v13 = vpop.eup %624  ;;  %v404_v52 = vmul.f32 %v388_v30, %v761_v48  ;;  %v412_v51 = vadd.f32 %v411_v20, %v397_v36  ;;  %v527_v57 = vadd.f32 -1.0, %v322_v23 }
  0xd9   :  { %634 = vrcp.f32 %v354_v19  ;;  %v358_v33 = vadd.f32 1.0, %v326_v22  ;;  %v627_v34 = vpop.eup %626  ;;  %v330_v35 = vmul.f32 %v314_v29, %v314_v29  ;;  %v389_v25 = vmul.f32 %v625_v13, %v530_v32 }
  0xda   :  { %636 = vrcp.f32 %v644_v15  ;;  %v384_v9 = vmul.f32 %v627_v34, %v525_v12  ;;  %v399_v47 = vmul.f32 %v383_v4, %v743_v27  ;;  %v403_v40 = vmul.f32 %v387_v41, %v752_v37 }
  0xdb   :  { %638 = vrcp.f32 %v358_v33  ;;  %v362_v45 = vadd.f32 1.0, %v330_v35  ;;  %v405_v61 = vmul.f32 %v389_v25, %v786_v7  ;;  %v531_v14 = vadd.f32 -1.0, %v326_v22 }
  0xdc   :  { %v629_v38 = vpop.eup %628  ;;  %640 = vrcp.f32 %v361_v26  ;;  %v391_v1 = vmul.f32 %v623_v24, %v532_v18  ;;  %v400_v48 = vmul.f32 %v384_v9, %v770_v54  ;;  %v533_v8 = vadd.f32 -1.0, %v826_v44 }
  0xdd   :  { %v382_v43 = vmul.f32 %v629_v38, %v523_v5  ;;  %v631_v49 = vpop.eup %630  ;;  %642 = vrcp.f32 %v362_v45  ;;  %v433_v11 = vadd.f32 %v404_v52, %v403_v40  ;;  %v535_v59 = vadd.f32 -1.0, %v330_v35 }
  0xde   :  { %v633_v39 = vpop.eup %632  ;;  %v385_v60 = vmul.f32 %v631_v49, %v526_v42  ;;  %v407_v22 = vmul.f32 %v391_v1, %v764_v50 }
  0xdf   :  { %v398_v55 = vmul.f32 %v382_v43, %v802_v31  ;;  %v635_v58 = vpop.eup %634  ;;  %v534_v31 = vadd.f32 -1.0, %v329_v2  ;;  %v392_v37 = vmul.f32 %v633_v39, %v533_v8  ;;  %v434_v16 = vadd.f32 %v433_v11, %v405_v61 }
  0xe0   :  { %v637_v53 = vpop.eup %636  ;;  %v386_v27 = vmul.f32 %v635_v58, %v527_v57  ;;  %v401_v56 = vmul.f32 %v385_v60, %v780_v3 }
  0xe1   :  { %v413_v63 = vadd.f32 %v412_v51, %v398_v55  ;;  %v639_v0 = vpop.eup %638  ;;  %v425_v12 = vmul.f32 64.0, %v637_v53  ;;  %v408_v29 = vmul.f32 %v392_v37, %v783_v6  ;;  %vm429_vm2 = vweird.f32 %v637_v53 }
  0xe2   :  { %v641_v23 = vpop.eup %640  ;;  %v390_v4 = vmul.f32 %v639_v0, %v531_v14  ;;  %v402_v44 = vmul.f32 %v386_v27, %v809_v62 }
  0xe3   :  { %v414_v46 = vadd.f32 %v413_v63, %v399_v47  ;;  %v643_v19 = vpop.eup %642  ;;  %v393_v54 = vmul.f32 %v641_v23, %v534_v31  ;;  %v426_v26 = vsub.f32 1.0, %v425_v12 }
  0xe4   :  { %v406_v17 = vmul.f32 %v390_v4, %v815_v10  ;;  %v394_v32 = vmul.f32 %v643_v19, %v535_v59 }
  0xe5   :  { %v415_v7 = vadd.f32 %v414_v46, %v400_v48  ;;  %v409_v3 = vmul.f32 %v393_v54, %v799_v28  ;;  %v427_v10 = vmul.f32 %v637_v53, %v426_v26 }
  0xe6   :  { %v435_v24 = vadd.f32 %v434_v16, %v406_v17  ;;  %v410_v50 = vmul.f32 %v394_v32, %v821_v21 }
  0xe7   :  { %v416_v2 = vadd.f32 %v415_v7, %v401_v56  ;;  %v428_v38 = vadd.f32 %v637_v53, %v427_v10 }
  0xe8   :  { %v436_v30 = vadd.f32 %v435_v24, %v407_v22 }
  0xe9   :  { %v417_v13 = vadd.f32 %v416_v2, %v402_v44  ;;  %v430_v42 = vsel %vm429_vm2, %v637_v53, %v428_v38 }
  0xea   :  { %v437_v34 = vadd.f32 %v436_v30, %v408_v29 }
  0xeb   :  { %v418_v33 = vrot.slane %v417_v13, 4 }
  0xec   :  { %v438_v5 = vadd.f32 %v437_v34, %v409_v3 }
  0xed   :  { %v419_v36 = vadd.f32 %v418_v33, %v417_v13 }
  0xee   :  { %v439_v62 = vadd.f32 %v438_v5, %v410_v50 }
  0xef   :  { %v420_v15 = vrot.slane %v419_v36, 2 }
  0xf0   :  { %v440_v35 = vrot.slane %v439_v62, 4 }
  0xf1   :  { %v421_v41 = vadd.f32 %v420_v15, %v419_v36 }
  0xf2   :  { %v441_v6 = vadd.f32 %v440_v35, %v439_v62 }
  0xf3   :  { %v422_v20 = vrot.slane %v421_v41, 1 }
  0xf4   :  { %v442_v43 = vrot.slane %v441_v6, 2 }
  0xf5   :  { %v423_v25 = vadd.f32 %v422_v20, %v421_v41 }
  0xf6   :  { %v443_v28 = vadd.f32 %v442_v43, %v441_v6 }
  0xf7   :  { %v431_v45 = vmul.f32 %v430_v42, %v423_v25 }
  0xf8   :  { %v444_v49 = vrot.slane %v443_v28, 1 }
  0xf9   :  { %432 = vst [vmem:[%s858_s4] sm:$0x1] %v431_v45 }
  0xfa   :  { %v445_v21 = vadd.f32 %v444_v49, %v443_v28 }
  0xfc   :  { %v446_v18 = vmul.f32 %v445_v21, %v430_v42 }
  0xfe   :  { %447 = vst [vmem:[%s858_s4 + $0x1] sm:$0x1] %v446_v18 }

// kernel: mbsfc_forward.31
= control target key start
LH: loop header
LB: loop body
LE: loop exit
PB: predicated region body
PF: predicated region fallthrough
CT: control target
= control target key end

     0   :  { %vm51_vm0 = vcmask 1043456   ;;  %s241_s0 = inlined_call_operand.vmem [shape: f32[2,180], index: 0, kind: input, shape index: {}]   ;;  %s242_s1 = inlined_call_operand.vmem [shape: f32[180,128], index: 1, kind: input, shape index: {}]   ;;  %s243_s2 = inlined_call_operand.vmem [shape: f32[1,128], index: 2, kind: input, shape index: {}]   ;;  %s244_s3 = inlined_call_operand.hbm [shape: f32[2,128], index: 3, kind: output, shape index: {}]  }
   0x1   :  { %v31_v0 = vld [vmem:[%s242_s1 + $0x78] sm:$0xff]  ;;  %v30_v1 = vld [vmem:[%s242_s1 + $0x70] sm:$0xff]  ;;  %v29_v2 = vld [vmem:[%s242_s1 + $0x68] sm:$0xff] }
   0x2   :  { %55 = vmatpush.msra.mxu0 %v31_v0  ;;  %v38_v3 = vld [vmem:[%s242_s1 + $0xb0] sm:$0xf]  ;;  %v28_v4 = vld [vmem:[%s242_s1 + $0x60] sm:$0xff]  ;;  %v37_v5 = vld [vmem:[%s242_s1 + $0xa8] sm:$0xff] }
   0x3   :  { %112 = vmatpush.msk.msra.mxu1 %vm51_vm0, %v38_v3  ;;  %v36_v6 = vld [vmem:[%s242_s1 + $0xa0] sm:$0xff]  ;;  %v27_v7 = vld [vmem:[%s242_s1 + $0x58] sm:$0xff]  ;;  %v26_v10 = vld [vmem:[%s242_s1 + $0x50] sm:$0xff] }
   0x4   :  { %56 = vmatpush.msra.mxu0 %v30_v1  ;;  %v35_v8 = vld [vmem:[%s242_s1 + $0x98] sm:$0xff]  ;;  %v15_v9 = vld [vmem:[%s241_s0] sm:$0xf]  ;;  %v34_v11 = vld [vmem:[%s242_s1 + $0x90] sm:$0xff] }
   0x5   :  { %85 = vmatpush.msra.mxu1 %v37_v5  ;;  %44 = vst [vmem:[#allocation1] ss:$4 sm:$0xff] %v15_v9 }
   0x6   :  { %57 = vmatpush.msra.mxu0 %v29_v2 }
   0x7   :  { %86 = vmatpush.msra.mxu1 %v36_v6 }
   0x8   :  { %58 = vmatpush.msra.mxu0 %v28_v4 }
   0xa   :  { %59 = vmatpush.msra.mxu0 %v27_v7 }
   0xb   :  { %8 = vsyncpa [#allocation3], 0  ;;  %v25_v12 = vld [vmem:[%s242_s1 + $0x48] sm:$0xff]  ;;  %87 = vmatpush.msra.mxu1 %v35_v8  ;;  %v24_v14 = vld [vmem:[%s242_s1 + $0x40] sm:$0xff]  ;;  %vm48_vm1 = vcmask 424960   ;;  %s142_s7 = smov [#allocation2]  }
   0xc   :  { %60 = vmatpush.msra.mxu0 %v26_v10  ;;  %v33_v13 = vld [vmem:[%s242_s1 + $0x88] sm:$0xff]  ;;  %v32_v15 = vld [vmem:[%s242_s1 + $0x80] sm:$0xff]  ;;  %v23_v16 = vld [vmem:[%s242_s1 + $0x38] sm:$0xff]  ;;  %s101_s8 = sshll.u32 %s142_s7, 4  ;;  %s103_s11 = sshll.u32 %s244_s3, 4  ;;  %s102_s8 = int_to_ptr.vmem [resolvable:$true] %s101_s8  ;;  %s104_s11 = int_to_ptr.hbm [resolvable:$true] %s103_s11 }
   0xd   :  { %88 = vmatpush.msra.mxu1 %v34_v11  ;;  %v46_v17 = vld.sshfl [vmem:[#allocation1 + $0x8] sm:$0xff pattern:$0x73625140]  ;;  %v22_v18 = vld [vmem:[%s242_s1 + $0x30] sm:$0xff]  ;;  %v20_v20 = vld [vmem:[%s242_s1 + $0x20] sm:$0xff] }
   0xe   :  { %61 = vmatpush.msra.mxu0 %v25_v12  ;;  %v21_v19 = vld [vmem:[%s242_s1 + $0x28] sm:$0xff]  ;;  %v19_v21 = vld [vmem:[%s242_s1 + $0x18] sm:$0xff]  ;;  %v18_v22 = vld [vmem:[%s242_s1 + $0x10] sm:$0xff] }
   0xf   :  { %89 = vmatpush.msra.mxu1 %v33_v13  ;;  %v17_v23 = vld [vmem:[%s242_s1 + $0x8] sm:$0xff]  ;;  %v16_v24 = vld [vmem:[%s242_s1] sm:$0xff] }
  0x10   :  { %62 = vmatpush.msra.mxu0 %v24_v14  ;;  %v45_v25 = vld.sshfl [vmem:[#allocation1] sm:$0xff pattern:$0x73625140] }
  0x11   :  { %90 = vmatpush.msra.mxu1 %v32_v15  ;;  %v115_v26 = vld [vmem:[%s243_s2] ss:$0 sm:$0xff] }
  0x12   :  { %63 = vmatpush.msra.mxu0 %v23_v16  ;;  %113 = vmatmul.msk.f32.vlgmr.msra.gmra.mxu1 %vm48_vm1, %v46_v17 }
  0x14   :  { %64 = vmatpush.msra.mxu0 %v22_v18 }
  0x16   :  { %65 = vmatpush.msra.mxu0 %v21_v19 }
  0x18   :  { %66 = vmatpush.msra.mxu0 %v20_v20 }
  0x1a   :  { %67 = vmatpush.msra.mxu0 %v19_v21 }
  0x1c   :  { %68 = vmatpush.msra.mxu0 %v18_v22 }
  0x1e   :  { %69 = vmatpush.msra.mxu0 %v17_v23 }
  0x20   :  { %70 = vmatpush.msra.mxu0 %v16_v24 }
  0x21   :  { %71 = vmatmul.f32.vlgmr.msra.gmra.mxu0 %v45_v25 }
  0x8f   :  { %v92_v28 = vpop.f32.mrf.mxu1 }
  0x9e   :  { %v72_v27 = vpop.f32.mrf.mxu0 }
  0x9f   :  { %v73_v29 = vadd.f32 %v115_v26, %v72_v27 }
  0xa1   :  { %v93_v30 = vadd.f32 %v92_v28, %v73_v29 }
  0xa3   :  { %95 = vst [vmem:[#allocation2] sm:$0x3] %v93_v30 }
  0xa4   :  { %106 = dma.vmem_to_hbm [thread:$0]  %s102_s8, 32, %s104_s11, [#allocation3]  }
  0xa5   :  { %140 = dma.done.wait [#allocation3], 32  }
  0xa6   :  { %141 = vsyncadd [#allocation3], 4294967264 }
  0xa7   :  { %111 = vsyncpa [#allocation3], 1 }

</bundles_post_ra>
